<compile_context>
chip_gen: v7x
topology: tpu7x:2x2x1
jax: 0.10.0
libtpu: 0.0.40
codegen_flags: <defaults>
</compile_context>

<pallas_src>
import jax
import jax.numpy as jnp
from jax import lax
from jax.experimental import pallas as pl
from jax.experimental.pallas import tpu as pltpu

# ---------------------------------------------------------------------------
# Configuration mirroring the PyTorch module:
#   CSN backbone: DenseNet(growth=32, blocks=(6,12,6,6), init=3) -> 408 feats
#                 at crop/32 spatial, classifier = Linear(408, 2)
#   classifier  : DenseNet121 -> 1024 feats, head Linear(1024, NUM_CLASSES)
# ---------------------------------------------------------------------------
CROP_SIZE = 64
PATCH = 32                      # total spatial downsample of the DenseNet trunks
CSN_FEAT = 408
CSN_FEAT_PAD = 512              # padded to a multiple of 128 lanes
D121_FEAT = 1024
NUM_CLASSES = 2
K_IN = 3 * PATCH * PATCH        # im2col contraction size = 3072
TK = 1536                       # K tile; grid = (2 phases, K_IN // TK)
assert K_IN % TK == 0
KT = K_IN // TK


# ============================ Pallas kernel =================================

def _fused_classifier_kernel(patches_ref, pool_ref, expand_ref,
                             csn_w_ref, csn_s_ref, csn_b_ref,
                             csn_fcw_ref, csn_fcb_ref,
                             d121_w_ref, d121_s_ref, d121_b_ref,
                             d121_fcw_ref, d121_fcb_ref,
                             o_ref,
                             acc0_ref, acc1_ref, patches2_ref):
    """Whole Classifier forward in one kernel.

    patches_ref : (M, K)  f32  im2col of x (M = N*Hf*Wf), resident in VMEM
    pool_ref    : (n, M)  f32  per-sample mean-pool matrix (1/s entries)
    expand_ref  : (M, n)  f32  row->sample expand matrix (0/1 entries)
    *_w_ref     : (TK, C) int8 pre-transposed stem weight tile
    *_s_ref     : (1, C)  f32  per-output-channel dequant scale
    *_b_ref     : (1, C)  f32  stem bias
    *_fcw_ref   : (cout,C)f32  head weight (lane-dense), *_fcb_ref (1, cout)
    acc0/acc1   : (M, C1)/(M, C2) f32 resident accumulators
    patches2_ref: (M, K)  bf16 affine+tanh'ed im2col for the D121 phase
    o_ref       : (n, NUM_CLASSES) f32 logits
    """
    p = pl.program_id(0)            # 0 = CSN phase, 1 = DenseNet121 phase
    k = pl.program_id(1)
    nk = pl.num_programs(1)
    koff = pl.multiple_of(k * TK, 128)

    # ------------------------- phase 0: CSN stem ---------------------------
    @pl.when(jnp.logical_and(p == 0, k == 0))
    def _():
        acc0_ref[...] = jnp.zeros_like(acc0_ref)

    @pl.when(p == 0)
    def _():
        a = patches_ref[:, pl.ds(koff, TK)].astype(jnp.bfloat16)
        # int8 -> f32 -> bf16: lossless (|q| <= 127), MXU sees bf16 on all chips
        w = csn_w_ref[...].astype(jnp.float32).astype(jnp.bfloat16)
        acc0_ref[...] += jnp.dot(a, w, preferred_element_type=jnp.float32)

    @pl.when(jnp.logical_and(p == 0, k == nk - 1))
    def _():
        # per-channel dequant scale, bias, relu, global average pool
        f = jnp.maximum(acc0_ref[...] * csn_s_ref[...] + csn_b_ref[...], 0.0)
        pooled = jnp.dot(pool_ref[...], f,
                         preferred_element_type=jnp.float32)          # (n, C1)
        bg = lax.dot_general(pooled, csn_fcw_ref[...],
                             (((1,), (1,)), ((), ())),
                             preferred_element_type=jnp.float32)
        bg = bg + csn_fcb_ref[...]                                     # (n, 2)
        # column 0 = beta, column 1 = gamma (then gamma += 0.5), as in the ref
        bg_rows = jnp.dot(expand_ref[...], bg,
                          preferred_element_type=jnp.float32)          # (M, 2)
        beta = bg_rows[:, 0:1]
        gamma = bg_rows[:, 1:2] + 0.5
        # affine+tanh is elementwise in x -> apply it directly in im2col layout
        patches2_ref[...] = jnp.tanh(
            gamma * patches_ref[...] + beta).astype(jnp.bfloat16)

    # --------------------- phase 1: DenseNet121 stem -----------------------
    @pl.when(jnp.logical_and(p == 1, k == 0))
    def _():
        acc1_ref[...] = jnp.zeros_like(acc1_ref)

    @pl.when(p == 1)
    def _():
        a = patches2_ref[:, pl.ds(koff, TK)]
        w = d121_w_ref[...].astype(jnp.float32).astype(jnp.bfloat16)
        acc1_ref[...] += jnp.dot(a, w, preferred_element_type=jnp.float32)

    @pl.when(jnp.logical_and(p == 1, k == nk - 1))
    def _():
        f = jnp.maximum(acc1_ref[...] * d121_s_ref[...] + d121_b_ref[...], 0.0)
        pooled = jnp.dot(pool_ref[...], f,
                         preferred_element_type=jnp.float32)          # (n, C2)
        o_ref[...] = lax.dot_general(pooled, d121_fcw_ref[...],
                                     (((1,), (1,)), ((), ())),
                                     preferred_element_type=jnp.float32) \
                     + d121_fcb_ref[...]


def fused_forward(patches, pool, expand, params):
    M, K = patches.shape
    n = pool.shape[0]
    c1 = params["csn_w_q"].shape[1]
    c2 = params["d121_w_q"].shape[1]
    cout = params["d121_fc_w"].shape[0]
    kt = K // TK

    ce = pl.CostEstimate(
        flops=2 * M * K * (c1 + c2) + 2 * n * M * (c1 + c2)
              + 2 * n * (2 * c1 + cout * c2) + 4 * M * K,
        transcendentals=M * K,
        bytes_accessed=(K * (c1 + c2)                       # int8 stem weights
                        + patches.size * 4
                        + 4 * (c1 + c2) * 4                 # scales + biases
                        + (2 * c1 + cout * c2 + 2 + cout) * 4
                        + (n * M + M * n) * 4
                        + n * cout * 4),
    )

    const = lambda p_, k_: (0, 0)

    return pl.pallas_call(
        _fused_classifier_kernel,
        out_shape=jax.ShapeDtypeStruct((n, cout), jnp.float32),
        grid=(2, kt),
        in_specs=[
            pl.BlockSpec((M, K), const),                               # patches
            pl.BlockSpec((n, M), const),                               # pool
            pl.BlockSpec((M, n), const),                               # expand
            # CSN weight: walks K during phase 0, pinned at last block in phase 1
            pl.BlockSpec((TK, c1),
                         lambda p_, k_: ((1 - p_) * k_ + p_ * (kt - 1), 0)),
            pl.BlockSpec((1, c1), const),
            pl.BlockSpec((1, c1), const),
            pl.BlockSpec((2, c1), const),                              # csn fc
            pl.BlockSpec((1, 2), const),
            # D121 weight: pinned at block 0 in phase 0 (prefetched under CSN),
            # walks K during phase 1
            pl.BlockSpec((TK, c2), lambda p_, k_: (p_ * k_, 0)),
            pl.BlockSpec((1, c2), const),
            pl.BlockSpec((1, c2), const),
            pl.BlockSpec((cout, c2), const),                           # d121 fc
            pl.BlockSpec((1, cout), const),
        ],
        out_specs=pl.BlockSpec((n, cout), const),
        scratch_shapes=[
            pltpu.VMEM((M, c1), jnp.float32),     # CSN accumulator
            pltpu.VMEM((M, c2), jnp.float32),     # D121 accumulator
            pltpu.VMEM((M, K), jnp.bfloat16),     # affine+tanh'ed im2col
        ],
        compiler_params=pltpu.CompilerParams(
            dimension_semantics=("arbitrary", "arbitrary")),
        cost_estimate=ce,
    )(patches, pool, expand,
      params["csn_w_q"], params["csn_scale"], params["csn_b"],
      params["csn_fc_w"], params["csn_fc_b"],
      params["d121_w_q"], params["d121_scale"], params["d121_b"],
      params["d121_fc_w"], params["d121_fc_b"])


# ================================ glue ======================================

def extract_patches(x, p=PATCH):
    """NCHW -> (N*Hf*Wf, Cin*P*P) im2col rows for a PxP / stride-P conv (f32)."""
    n, cin, h, w = x.shape
    hf, wf = h // p, w // p
    return (x.reshape(n, cin, hf, p, wf, p)
             .transpose(0, 2, 4, 1, 3, 5)
             .reshape(n * hf * wf, cin * p * p))


def _quantize_per_channel(w):
    """f32 (K, C) -> int8 weights + per-output-channel f32 scale (1, C)."""
    absmax = jnp.max(jnp.abs(w), axis=0, keepdims=True)
    scale = jnp.maximum(absmax / 127.0, 1e-8)
    w_q = jnp.clip(jnp.round(w / scale), -127.0, 127.0).astype(jnp.int8)
    return w_q, scale.astype(jnp.float32)


def init_params(key):
    ks = jax.random.split(key, 6)

    def nrm(k, shape, s):
        return s * jax.random.normal(k, shape, dtype=jnp.float32)

    # TODO(synk): the DenseNet dense-block/transition trunks (CSN backbone
    # .features and the torchvision DenseNet121 feature extractor) are external
    # classes not defined in the provided source; each trunk is stood in by one
    # PATCHxPATCH/stride-PATCH conv reproducing the real channel count
    # (408 / 1024) and the /32 spatial reduction.
    csn_w = nrm(ks[0], (K_IN, CSN_FEAT), 0.02)
    csn_w = jnp.pad(csn_w, ((0, 0), (0, CSN_FEAT_PAD - CSN_FEAT)))
    csn_w_q, csn_scale = _quantize_per_channel(csn_w)

    csn_fc = nrm(ks[1], (2, CSN_FEAT), 0.05)                 # (cout=2, C) lane-dense
    csn_fc = jnp.pad(csn_fc, ((0, 0), (0, CSN_FEAT_PAD - CSN_FEAT)))
    csn_fc_b = nrm(ks[2], (1, 2), 0.05)

    d121_w = nrm(ks[3], (K_IN, D121_FEAT), 0.02)
    d121_w_q, d121_scale = _quantize_per_channel(d121_w)

    d121_fc = nrm(ks[4], (NUM_CLASSES, D121_FEAT), 0.05)     # (cout, C) lane-dense
    d121_fc_b = nrm(ks[5], (1, NUM_CLASSES), 0.05)

    return {
        "csn_w_q": csn_w_q,                                   # (K, 512) int8
        "csn_scale": csn_scale,                               # (1, 512) f32
        "csn_b": jnp.zeros((1, CSN_FEAT_PAD), jnp.float32),
        "csn_fc_w": csn_fc,                                   # (2, 512) f32
        "csn_fc_b": csn_fc_b,                                 # (1, 2)
        "d121_w_q": d121_w_q,                                 # (K, 1024) int8
        "d121_scale": d121_scale,                             # (1, 1024) f32
        "d121_b": jnp.zeros((1, D121_FEAT), jnp.float32),
        "d121_fc_w": d121_fc,                                 # (C_out, 1024) f32
        "d121_fc_b": d121_fc_b,                               # (1, C_out)
    }


@jax.jit
def classifier_forward(params, x):
    n, c, h, w = x.shape
    hf, wf = h // PATCH, w // PATCH
    s = hf * wf
    patches = extract_patches(x)                                          # (M, K) f32
    # per-sample global-mean-pool and row-expand matrices (trace-time constants)
    pool = jnp.repeat(jnp.eye(n, dtype=jnp.float32), s, axis=1) / float(s)  # (n, M)
    expand = jnp.repeat(jnp.eye(n, dtype=jnp.float32), s, axis=0)           # (M, n)
    return fused_forward(patches, pool, expand, params)                   # (n, C_out)


if __name__ == "__main__":
    key = jax.random.PRNGKey(0)
    pkey, xkey = jax.random.split(key)
    params = init_params(pkey)
    x = jax.random.normal(xkey, (2, 3, CROP_SIZE, CROP_SIZE), dtype=jnp.float32)
    preds = classifier_forward(params, x)
    jax.block_until_ready(preds)
    assert preds.shape == (2, NUM_CLASSES)
    assert bool(jnp.all(jnp.isfinite(preds)))
    print("KERNEL_OK")
</pallas_src>

<mosaic_0001>
module attributes {stable_mosaic.version = 11 : i64} {
  func.func @_fused_classifier_kernel(%arg0: i32, %arg1: i32, %arg2: memref<8x3072xf32, #tpu.memory_space<vmem>>, %arg3: memref<2x8xf32, #tpu.memory_space<vmem>>, %arg4: memref<8x2xf32, #tpu.memory_space<vmem>>, %arg5: memref<1536x512xi8, #tpu.memory_space<vmem>>, %arg6: memref<1x512xf32, #tpu.memory_space<vmem>>, %arg7: memref<1x512xf32, #tpu.memory_space<vmem>>, %arg8: memref<2x512xf32, #tpu.memory_space<vmem>>, %arg9: memref<1x2xf32, #tpu.memory_space<vmem>>, %arg10: memref<1536x1024xi8, #tpu.memory_space<vmem>>, %arg11: memref<1x1024xf32, #tpu.memory_space<vmem>>, %arg12: memref<1x1024xf32, #tpu.memory_space<vmem>>, %arg13: memref<2x1024xf32, #tpu.memory_space<vmem>>, %arg14: memref<1x2xf32, #tpu.memory_space<vmem>>, %arg15: memref<2x2xf32, #tpu.memory_space<vmem>>, %arg16: memref<8x512xf32, #tpu.memory_space<vmem>>, %arg17: memref<8x1024xf32, #tpu.memory_space<vmem>>, %arg18: memref<8x3072xbf16, #tpu.memory_space<vmem>>) attributes {dimension_semantics = [#tpu.dimension_semantics<arbitrary>, #tpu.dimension_semantics<arbitrary>], iteration_bounds = array<i64: 2, 2>, scalar_prefetch = 0 : i64, scratch_operands = 3 : i64, tpu.core_type = #tpu.core_type<tc>, window_params = [{pipeline_mode = #tpu.pipeline_mode<synchronous>, transform_indices = @transform_0, window_bounds = array<i64: 8, 3072>}, {pipeline_mode = #tpu.pipeline_mode<synchronous>, transform_indices = @transform_1, window_bounds = array<i64: 2, 8>}, {pipeline_mode = #tpu.pipeline_mode<synchronous>, transform_indices = @transform_2, window_bounds = array<i64: 8, 2>}, {transform_indices = @transform_3, window_bounds = array<i64: 1536, 512>}, {pipeline_mode = #tpu.pipeline_mode<synchronous>, transform_indices = @transform_4, window_bounds = array<i64: 1, 512>}, {pipeline_mode = #tpu.pipeline_mode<synchronous>, transform_indices = @transform_5, window_bounds = array<i64: 1, 512>}, {pipeline_mode = #tpu.pipeline_mode<synchronous>, transform_indices = @transform_6, window_bounds = array<i64: 2, 512>}, {pipeline_mode = #tpu.pipeline_mode<synchronous>, transform_indices = @transform_7, window_bounds = array<i64: 1, 2>}, {transform_indices = @transform_8, window_bounds = array<i64: 1536, 1024>}, {pipeline_mode = #tpu.pipeline_mode<synchronous>, transform_indices = @transform_9, window_bounds = array<i64: 1, 1024>}, {pipeline_mode = #tpu.pipeline_mode<synchronous>, transform_indices = @transform_10, window_bounds = array<i64: 1, 1024>}, {pipeline_mode = #tpu.pipeline_mode<synchronous>, transform_indices = @transform_11, window_bounds = array<i64: 2, 1024>}, {pipeline_mode = #tpu.pipeline_mode<synchronous>, transform_indices = @transform_12, window_bounds = array<i64: 1, 2>}, {pipeline_mode = #tpu.pipeline_mode<synchronous>, transform_indices = @transform_13, window_bounds = array<i64: 2, 2>}]} {
    %c1536_i32 = arith.constant 1536 : i32
    %0 = arith.muli %arg1, %c1536_i32 : i32
    %1 = tpu.assume_multiple %0, 128 : i32
    %c0_i32 = arith.constant 0 : i32
    %2 = arith.cmpi eq, %arg0, %c0_i32 : i32
    %c0_i32_0 = arith.constant 0 : i32
    %3 = arith.cmpi eq, %arg1, %c0_i32_0 : i32
    %4 = arith.andi %2, %3 : i1
    %5 = arith.extui %4 : i1 to i32
    %c0_i32_1 = arith.constant 0 : i32
    %6 = arith.cmpi ne, %5, %c0_i32_1 : i32
    scf.if %6 {
      %cst = arith.constant 0.000000e+00 : f32
      %28 = vector.broadcast %cst : f32 to vector<8x512xf32>
      %c0 = arith.constant 0 : index
      %c0_14 = arith.constant 0 : index
      %29 = vector.load %arg16[%c0, %c0_14] : memref<8x512xf32, #tpu.memory_space<vmem>>, vector<8x512xf32>
      tpu.vector_store %arg16[%c0, %c0_14], %28 {strides = array<i32>} : memref<8x512xf32, #tpu.memory_space<vmem>>, vector<8x512xf32>,
    } else {
    }
    %c0_i32_2 = arith.constant 0 : i32
    %7 = arith.cmpi eq, %arg0, %c0_i32_2 : i32
    %8 = arith.extui %7 : i1 to i32
    %c0_i32_3 = arith.constant 0 : i32
    %9 = arith.cmpi ne, %8, %c0_i32_3 : i32
    scf.if %9 {
      %c0 = arith.constant 0 : index
      %28 = arith.index_cast %1 : i32 to index
      %29 = vector.load %arg2[%c0, %28] : memref<8x3072xf32, #tpu.memory_space<vmem>>, vector<8x1536xf32>
      %30 = arith.truncf %29 : vector<8x1536xf32> to vector<8x1536xbf16>
      %c0_14 = arith.constant 0 : index
      %c0_15 = arith.constant 0 : index
      %31 = vector.load %arg5[%c0_14, %c0_15] : memref<1536x512xi8, #tpu.memory_space<vmem>>, vector<1536x512xi8>
      %32 = arith.sitofp %31 : vector<1536x512xi8> to vector<1536x512xf32>
      %33 = arith.truncf %32 : vector<1536x512xf32> to vector<1536x512xbf16>
      %c0_16 = arith.constant 0 : index
      %c0_17 = arith.constant 0 : index
      %34 = vector.load %arg16[%c0_16, %c0_17] : memref<8x512xf32, #tpu.memory_space<vmem>>, vector<8x512xf32>
      %cst = arith.constant dense<0.000000e+00> : vector<8x512xf32>
      %35 = tpu.matmul %30, %33, %cst {dimension_numbers = #tpu.dot_dimension_numbers<[1], [0], [0], [1], [0, 0, 1, 1], [], []>} : vector<8x1536xbf16>, vector<1536x512xbf16>, vector<8x512xf32> -> vector<8x512xf32>
      %36 = arith.addf %34, %35 : vector<8x512xf32>
      %c0_18 = arith.constant 0 : index
      %c0_19 = arith.constant 0 : index
      %37 = vector.load %arg16[%c0_18, %c0_19] : memref<8x512xf32, #tpu.memory_space<vmem>>, vector<8x512xf32>
      tpu.vector_store %arg16[%c0_18, %c0_19], %36 {strides = array<i32>} : memref<8x512xf32, #tpu.memory_space<vmem>>, vector<8x512xf32>,
    } else {
    }
    %c0_i32_4 = arith.constant 0 : i32
    %10 = arith.cmpi eq, %arg0, %c0_i32_4 : i32
    %c1_i32 = arith.constant 1 : i32
    %11 = arith.cmpi eq, %arg1, %c1_i32 : i32
    %12 = arith.andi %10, %11 : i1
    %13 = arith.extui %12 : i1 to i32
    %c0_i32_5 = arith.constant 0 : i32
    %14 = arith.cmpi ne, %13, %c0_i32_5 : i32
    scf.if %14 {
      %c0 = arith.constant 0 : index
      %c0_14 = arith.constant 0 : index
      %28 = vector.load %arg16[%c0, %c0_14] : memref<8x512xf32, #tpu.memory_space<vmem>>, vector<8x512xf32>
      %c0_15 = arith.constant 0 : index
      %c0_16 = arith.constant 0 : index
      %29 = vector.load %arg6[%c0_15, %c0_16] : memref<1x512xf32, #tpu.memory_space<vmem>>, vector<1x512xf32>
      %30 = vector.broadcast %29 : vector<1x512xf32> to vector<8x512xf32>
      %31 = arith.mulf %28, %30 : vector<8x512xf32>
      %c0_17 = arith.constant 0 : index
      %c0_18 = arith.constant 0 : index
      %32 = vector.load %arg7[%c0_17, %c0_18] : memref<1x512xf32, #tpu.memory_space<vmem>>, vector<1x512xf32>
      %33 = vector.broadcast %32 : vector<1x512xf32> to vector<8x512xf32>
      %34 = arith.addf %31, %33 : vector<8x512xf32>
      %cst = arith.constant 0.000000e+00 : f32
      %35 = vector.broadcast %cst : f32 to vector<8x512xf32>
      %36 = arith.maximumf %34, %35 : vector<8x512xf32>
      %c0_19 = arith.constant 0 : index
      %c0_20 = arith.constant 0 : index
      %37 = vector.load %arg3[%c0_19, %c0_20] : memref<2x8xf32, #tpu.memory_space<vmem>>, vector<2x8xf32>
      %cst_21 = arith.constant dense<0.000000e+00> : vector<2x512xf32>
      %38 = tpu.matmul %37, %36, %cst_21 {dimension_numbers = #tpu.dot_dimension_numbers<[1], [0], [0], [1], [0, 0, 1, 1], [], []>} : vector<2x8xf32>, vector<8x512xf32>, vector<2x512xf32> -> vector<2x512xf32>
      %c0_22 = arith.constant 0 : index
      %c0_23 = arith.constant 0 : index
      %39 = vector.load %arg8[%c0_22, %c0_23] : memref<2x512xf32, #tpu.memory_space<vmem>>, vector<2x512xf32>
      %cst_24 = arith.constant dense<0.000000e+00> : vector<2x2xf32>
      %40 = tpu.matmul %38, %39, %cst_24 {dimension_numbers = #tpu.dot_dimension_numbers<[1], [1], [0], [0], [0, 0, 1, 0], [], []>} : vector<2x512xf32>, vector<2x512xf32>, vector<2x2xf32> -> vector<2x2xf32>
      %c0_25 = arith.constant 0 : index
      %c0_26 = arith.constant 0 : index
      %41 = vector.load %arg9[%c0_25, %c0_26] : memref<1x2xf32, #tpu.memory_space<vmem>>, vector<1x2xf32>
      %42 = vector.broadcast %41 : vector<1x2xf32> to vector<2x2xf32>
      %43 = arith.addf %40, %42 : vector<2x2xf32>
      %c0_27 = arith.constant 0 : index
      %c0_28 = arith.constant 0 : index
      %44 = vector.load %arg4[%c0_27, %c0_28] : memref<8x2xf32, #tpu.memory_space<vmem>>, vector<8x2xf32>
      %cst_29 = arith.constant dense<0.000000e+00> : vector<8x2xf32>
      %45 = tpu.matmul %44, %43, %cst_29 {dimension_numbers = #tpu.dot_dimension_numbers<[1], [0], [0], [1], [0, 0, 1, 1], [], []>} : vector<8x2xf32>, vector<2x2xf32>, vector<8x2xf32> -> vector<8x2xf32>
      %46 = vector.extract_strided_slice %45 {offsets = [0, 0], sizes = [8, 1], strides = [1, 1]} : vector<8x2xf32> to vector<8x1xf32>
      %47 = vector.extract_strided_slice %45 {offsets = [0, 1], sizes = [8, 1], strides = [1, 1]} : vector<8x2xf32> to vector<8x1xf32>
      %cst_30 = arith.constant 5.000000e-01 : f32
      %48 = vector.broadcast %cst_30 : f32 to vector<8x1xf32>
      %49 = arith.addf %47, %48 : vector<8x1xf32>
      %c0_31 = arith.constant 0 : index
      %c0_32 = arith.constant 0 : index
      %50 = vector.load %arg2[%c0_31, %c0_32] : memref<8x3072xf32, #tpu.memory_space<vmem>>, vector<8x3072xf32>
      %51 = vector.broadcast %49 : vector<8x1xf32> to vector<8x3072xf32>
      %52 = arith.mulf %51, %50 : vector<8x3072xf32>
      %53 = vector.broadcast %46 : vector<8x1xf32> to vector<8x3072xf32>
      %54 = arith.addf %52, %53 : vector<8x3072xf32>
      %55 = math.tanh %54 : vector<8x3072xf32>
      %56 = arith.truncf %55 : vector<8x3072xf32> to vector<8x3072xbf16>
      %c0_33 = arith.constant 0 : index
      %c0_34 = arith.constant 0 : index
      %57 = vector.load %arg18[%c0_33, %c0_34] : memref<8x3072xbf16, #tpu.memory_space<vmem>>, vector<8x3072xbf16>
      tpu.vector_store %arg18[%c0_33, %c0_34], %56 {strides = array<i32>} : memref<8x3072xbf16, #tpu.memory_space<vmem>>, vector<8x3072xbf16>,
    } else {
    }
    %c1_i32_6 = arith.constant 1 : i32
    %15 = arith.cmpi eq, %arg0, %c1_i32_6 : i32
    %c0_i32_7 = arith.constant 0 : i32
    %16 = arith.cmpi eq, %arg1, %c0_i32_7 : i32
    %17 = arith.andi %15, %16 : i1
    %18 = arith.extui %17 : i1 to i32
    %c0_i32_8 = arith.constant 0 : i32
    %19 = arith.cmpi ne, %18, %c0_i32_8 : i32
    scf.if %19 {
      %cst = arith.constant 0.000000e+00 : f32
      %28 = vector.broadcast %cst : f32 to vector<8x1024xf32>
      %c0 = arith.constant 0 : index
      %c0_14 = arith.constant 0 : index
      %29 = vector.load %arg17[%c0, %c0_14] : memref<8x1024xf32, #tpu.memory_space<vmem>>, vector<8x1024xf32>
      tpu.vector_store %arg17[%c0, %c0_14], %28 {strides = array<i32>} : memref<8x1024xf32, #tpu.memory_space<vmem>>, vector<8x1024xf32>,
    } else {
    }
    %c1_i32_9 = arith.constant 1 : i32
    %20 = arith.cmpi eq, %arg0, %c1_i32_9 : i32
    %21 = arith.extui %20 : i1 to i32
    %c0_i32_10 = arith.constant 0 : i32
    %22 = arith.cmpi ne, %21, %c0_i32_10 : i32
    scf.if %22 {
      %c0 = arith.constant 0 : index
      %28 = arith.index_cast %1 : i32 to index
      %29 = vector.load %arg18[%c0, %28] : memref<8x3072xbf16, #tpu.memory_space<vmem>>, vector<8x1536xbf16>
      %c0_14 = arith.constant 0 : index
      %c0_15 = arith.constant 0 : index
      %30 = vector.load %arg10[%c0_14, %c0_15] : memref<1536x1024xi8, #tpu.memory_space<vmem>>, vector<1536x1024xi8>
      %31 = arith.sitofp %30 : vector<1536x1024xi8> to vector<1536x1024xf32>
      %32 = arith.truncf %31 : vector<1536x1024xf32> to vector<1536x1024xbf16>
      %c0_16 = arith.constant 0 : index
      %c0_17 = arith.constant 0 : index
      %33 = vector.load %arg17[%c0_16, %c0_17] : memref<8x1024xf32, #tpu.memory_space<vmem>>, vector<8x1024xf32>
      %cst = arith.constant dense<0.000000e+00> : vector<8x1024xf32>
      %34 = tpu.matmul %29, %32, %cst {dimension_numbers = #tpu.dot_dimension_numbers<[1], [0], [0], [1], [0, 0, 1, 1], [], []>} : vector<8x1536xbf16>, vector<1536x1024xbf16>, vector<8x1024xf32> -> vector<8x1024xf32>
      %35 = arith.addf %33, %34 : vector<8x1024xf32>
      %c0_18 = arith.constant 0 : index
      %c0_19 = arith.constant 0 : index
      %36 = vector.load %arg17[%c0_18, %c0_19] : memref<8x1024xf32, #tpu.memory_space<vmem>>, vector<8x1024xf32>
      tpu.vector_store %arg17[%c0_18, %c0_19], %35 {strides = array<i32>} : memref<8x1024xf32, #tpu.memory_space<vmem>>, vector<8x1024xf32>,
    } else {
    }
    %c1_i32_11 = arith.constant 1 : i32
    %23 = arith.cmpi eq, %arg0, %c1_i32_11 : i32
    %c1_i32_12 = arith.constant 1 : i32
    %24 = arith.cmpi eq, %arg1, %c1_i32_12 : i32
    %25 = arith.andi %23, %24 : i1
    %26 = arith.extui %25 : i1 to i32
    %c0_i32_13 = arith.constant 0 : i32
    %27 = arith.cmpi ne, %26, %c0_i32_13 : i32
    scf.if %27 {
      %c0 = arith.constant 0 : index
      %c0_14 = arith.constant 0 : index
      %28 = vector.load %arg17[%c0, %c0_14] : memref<8x1024xf32, #tpu.memory_space<vmem>>, vector<8x1024xf32>
      %c0_15 = arith.constant 0 : index
      %c0_16 = arith.constant 0 : index
      %29 = vector.load %arg11[%c0_15, %c0_16] : memref<1x1024xf32, #tpu.memory_space<vmem>>, vector<1x1024xf32>
      %30 = vector.broadcast %29 : vector<1x1024xf32> to vector<8x1024xf32>
      %31 = arith.mulf %28, %30 : vector<8x1024xf32>
      %c0_17 = arith.constant 0 : index
      %c0_18 = arith.constant 0 : index
      %32 = vector.load %arg12[%c0_17, %c0_18] : memref<1x1024xf32, #tpu.memory_space<vmem>>, vector<1x1024xf32>
      %33 = vector.broadcast %32 : vector<1x1024xf32> to vector<8x1024xf32>
      %34 = arith.addf %31, %33 : vector<8x1024xf32>
      %cst = arith.constant 0.000000e+00 : f32
      %35 = vector.broadcast %cst : f32 to vector<8x1024xf32>
      %36 = arith.maximumf %34, %35 : vector<8x1024xf32>
      %c0_19 = arith.constant 0 : index
      %c0_20 = arith.constant 0 : index
      %37 = vector.load %arg3[%c0_19, %c0_20] : memref<2x8xf32, #tpu.memory_space<vmem>>, vector<2x8xf32>
      %cst_21 = arith.constant dense<0.000000e+00> : vector<2x1024xf32>
      %38 = tpu.matmul %37, %36, %cst_21 {dimension_numbers = #tpu.dot_dimension_numbers<[1], [0], [0], [1], [0, 0, 1, 1], [], []>} : vector<2x8xf32>, vector<8x1024xf32>, vector<2x1024xf32> -> vector<2x1024xf32>
      %c0_22 = arith.constant 0 : index
      %c0_23 = arith.constant 0 : index
      %39 = vector.load %arg13[%c0_22, %c0_23] : memref<2x1024xf32, #tpu.memory_space<vmem>>, vector<2x1024xf32>
      %cst_24 = arith.constant dense<0.000000e+00> : vector<2x2xf32>
      %40 = tpu.matmul %38, %39, %cst_24 {dimension_numbers = #tpu.dot_dimension_numbers<[1], [1], [0], [0], [0, 0, 1, 0], [], []>} : vector<2x1024xf32>, vector<2x1024xf32>, vector<2x2xf32> -> vector<2x2xf32>
      %c0_25 = arith.constant 0 : index
      %c0_26 = arith.constant 0 : index
      %41 = vector.load %arg14[%c0_25, %c0_26] : memref<1x2xf32, #tpu.memory_space<vmem>>, vector<1x2xf32>
      %42 = vector.broadcast %41 : vector<1x2xf32> to vector<2x2xf32>
      %43 = arith.addf %40, %42 : vector<2x2xf32>
      %c0_27 = arith.constant 0 : index
      %c0_28 = arith.constant 0 : index
      %44 = vector.load %arg15[%c0_27, %c0_28] : memref<2x2xf32, #tpu.memory_space<vmem>>, vector<2x2xf32>
      tpu.vector_store %arg15[%c0_27, %c0_28], %43 {strides = array<i32>} : memref<2x2xf32, #tpu.memory_space<vmem>>, vector<2x2xf32>,
    } else {
    }
    return
  }
  func.func @transform_0(%arg0: i32, %arg1: i32) -> (i32, i32) {
    %c0_i32 = arith.constant 0 : i32
    %c0_i32_0 = arith.constant 0 : i32
    %c0_i32_1 = arith.constant 0 : i32
    return %c0_i32, %c0_i32_0 : i32, i32
  }
  func.func @transform_1(%arg0: i32, %arg1: i32) -> (i32, i32) {
    %c0_i32 = arith.constant 0 : i32
    %c0_i32_0 = arith.constant 0 : i32
    %c0_i32_1 = arith.constant 0 : i32
    return %c0_i32, %c0_i32_0 : i32, i32
  }
  func.func @transform_2(%arg0: i32, %arg1: i32) -> (i32, i32) {
    %c0_i32 = arith.constant 0 : i32
    %c0_i32_0 = arith.constant 0 : i32
    %c0_i32_1 = arith.constant 0 : i32
    return %c0_i32, %c0_i32_0 : i32, i32
  }
  func.func @transform_3(%arg0: i32, %arg1: i32) -> (i32, i32) {
    %c1_i32 = arith.constant 1 : i32
    %0 = arith.subi %c1_i32, %arg0 : i32
    %1 = arith.muli %0, %arg1 : i32
    %c1_i32_0 = arith.constant 1 : i32
    %2 = arith.muli %arg0, %c1_i32_0 : i32
    %3 = arith.addi %1, %2 : i32
    %c0_i32 = arith.constant 0 : i32
    %c0_i32_1 = arith.constant 0 : i32
    return %3, %c0_i32 : i32, i32
  }
  func.func @transform_4(%arg0: i32, %arg1: i32) -> (i32, i32) {
    %c0_i32 = arith.constant 0 : i32
    %c0_i32_0 = arith.constant 0 : i32
    %c0_i32_1 = arith.constant 0 : i32
    return %c0_i32, %c0_i32_0 : i32, i32
  }
  func.func @transform_5(%arg0: i32, %arg1: i32) -> (i32, i32) {
    %c0_i32 = arith.constant 0 : i32
    %c0_i32_0 = arith.constant 0 : i32
    %c0_i32_1 = arith.constant 0 : i32
    return %c0_i32, %c0_i32_0 : i32, i32
  }
  func.func @transform_6(%arg0: i32, %arg1: i32) -> (i32, i32) {
    %c0_i32 = arith.constant 0 : i32
    %c0_i32_0 = arith.constant 0 : i32
    %c0_i32_1 = arith.constant 0 : i32
    return %c0_i32, %c0_i32_0 : i32, i32
  }
  func.func @transform_7(%arg0: i32, %arg1: i32) -> (i32, i32) {
    %c0_i32 = arith.constant 0 : i32
    %c0_i32_0 = arith.constant 0 : i32
    %c0_i32_1 = arith.constant 0 : i32
    return %c0_i32, %c0_i32_0 : i32, i32
  }
  func.func @transform_8(%arg0: i32, %arg1: i32) -> (i32, i32) {
    %0 = arith.muli %arg0, %arg1 : i32
    %c0_i32 = arith.constant 0 : i32
    %c0_i32_0 = arith.constant 0 : i32
    return %0, %c0_i32 : i32, i32
  }
  func.func @transform_9(%arg0: i32, %arg1: i32) -> (i32, i32) {
    %c0_i32 = arith.constant 0 : i32
    %c0_i32_0 = arith.constant 0 : i32
    %c0_i32_1 = arith.constant 0 : i32
    return %c0_i32, %c0_i32_0 : i32, i32
  }
  func.func @transform_10(%arg0: i32, %arg1: i32) -> (i32, i32) {
    %c0_i32 = arith.constant 0 : i32
    %c0_i32_0 = arith.constant 0 : i32
    %c0_i32_1 = arith.constant 0 : i32
    return %c0_i32, %c0_i32_0 : i32, i32
  }
  func.func @transform_11(%arg0: i32, %arg1: i32) -> (i32, i32) {
    %c0_i32 = arith.constant 0 : i32
    %c0_i32_0 = arith.constant 0 : i32
    %c0_i32_1 = arith.constant 0 : i32
    return %c0_i32, %c0_i32_0 : i32, i32
  }
  func.func @transform_12(%arg0: i32, %arg1: i32) -> (i32, i32) {
    %c0_i32 = arith.constant 0 : i32
    %c0_i32_0 = arith.constant 0 : i32
    %c0_i32_1 = arith.constant 0 : i32
    return %c0_i32, %c0_i32_0 : i32, i32
  }
  func.func @transform_13(%arg0: i32, %arg1: i32) -> (i32, i32) {
    %c0_i32 = arith.constant 0 : i32
    %c0_i32_0 = arith.constant 0 : i32
    %c0_i32_1 = arith.constant 0 : i32
    return %c0_i32, %c0_i32_0 : i32, i32
  }
}

</mosaic_0001>

<bundles_post_ra>
// kernel: classifier_forward.1
= control target key start
LH: loop header
LB: loop body
LE: loop exit
PB: predicated region body
PF: predicated region fallthrough
CT: control target
= control target key end

     0   :  { %s7922_s0 = inlined_call_operand.vmem [shape: f32[8,3072], index: 0, kind: input, shape index: {}]   ;;  %s7923_s1 = inlined_call_operand.vmem [shape: f32[2,8], index: 1, kind: input, shape index: {}]   ;;  %s7924_s2 = inlined_call_operand.vmem [shape: f32[8,2], index: 2, kind: input, shape index: {}]   ;;  %s7925_s3 = inlined_call_operand.hbm [shape: s8[3072,512], index: 3, kind: input, shape index: {}]   ;;  %s7926_s4 = inlined_call_operand.hbm [shape: f32[1,512], index: 4, kind: input, shape index: {}]   ;;  %s7927_s5 = inlined_call_operand.hbm [shape: f32[1,512], index: 5, kind: input, shape index: {}]   ;;  %s7928_s6 = inlined_call_operand.hbm [shape: f32[2,512], index: 6, kind: input, shape index: {}]   ;;  %s7929_s7 = inlined_call_operand.hbm [shape: f32[1,2], index: 7, kind: input, shape index: {}]   ;;  %s7930_s8 = inlined_call_operand.hbm [shape: s8[3072,1024], index: 8, kind: input, shape index: {}]   ;;  %s7931_s9 = inlined_call_operand.hbm [shape: f32[1,1024], index: 9, kind: input, shape index: {}]   ;;  %s7932_s10 = inlined_call_operand.hbm [shape: f32[1,1024], index: 10, kind: input, shape index: {}]   ;;  %s7933_s11 = inlined_call_operand.hbm [shape: f32[2,1024], index: 11, kind: input, shape index: {}]   ;;  %s7934_s12 = inlined_call_operand.hbm [shape: f32[1,2], index: 12, kind: input, shape index: {}]   ;;  %s7935_s13 = inlined_call_operand.hbm [shape: f32[2,2], index: 13, kind: output, shape index: {}]  }
   0x1   :  { %7950 = sst [smem:[#allocation36_spill]] %s7922_s0 }
   0x2   :  { %7951 = sst [smem:[#allocation37_spill]] %s7923_s1 }
   0x3   :  { %7952 = sst [smem:[#allocation38_spill]] %s7924_s2 }
   0x4   :  { %7953 = sst [smem:[#allocation39_spill]] %s7925_s3 }
   0x5   :  { %7954 = sst [smem:[#allocation40_spill]] %s7926_s4 }
   0x6   :  { %7955 = sst [smem:[#allocation41_spill]] %s7927_s5 }
   0x7   :  { %7956 = sst [smem:[#allocation42_spill]] %s7928_s6 }
   0x8   :  { %7957 = sst [smem:[#allocation43_spill]] %s7929_s7 }
   0x9   :  { %7958 = sst [smem:[#allocation44_spill]] %s7930_s8 }
   0xa   :  { %7959 = sst [smem:[#allocation45_spill]] %s7935_s13 }
   0xb   :  { %18 = vsyncpa [#allocation6], 0 }
   0xc   :  { %20 = vsyncpa [#allocation6 + $0x1], 0 }
   0xd   :  { %21 = vsyncpa [#allocation9], 0 }
   0xe   :  { %22 = vsyncpa [#allocation12], 0 }
   0xf   :  { %23 = vsyncpa [#allocation15], 0 }
  0x10   :  { %25 = vsyncpa [#allocation15 + $0x1], 0 }
  0x11   :  { %26 = vsyncpa [#allocation18], 0 }
  0x12   :  { %27 = vsyncpa [#allocation21], 0 }
  0x13   :  { %28 = vsyncpa [#allocation7], 0  ;;  %s6456_s25 = smov 0   ;;  %s6458_s26 = smov 0  }
  0x14   :  { %s6460_s27 = smov 0   ;;  %s6462_s28 = smov 0  }
  0x15   :  { %s6464_s29 = smov 0   ;;  %s6466_s30 = smov 0  }
  0x16   :  { %s6468_s14 = smov 0   ;;  %s6470_s15 = smov 0  }
  0x17   :  { %s6472_s16 = smov 0   ;;  %s6474_s17 = smov 0  }
  0x18   :  { %s6476_s18 = smov 0  }
  0x19 LB: > { %7960 = sst [smem:[#allocation31_spill]] %s6320_s25  ;;  %s6512_s19 = sadd.s32 4294967295, %s6360_s18   ;;  %s6360_s18 = sphi %s6476_s18, %s34_s18   ;;  %s6356_s17 = sphi %s6474_s17, %s8026_s17   ;;  %s6352_s16 = sphi %s6472_s16, %s8025_s16   ;;  %s6348_s15 = sphi %s6470_s15, %s8024_s15   ;;  %s6344_s14 = sphi %s6468_s14, %s8023_s14   ;;  %s6340_s30 = sphi %s6466_s30, %s8022_s30   ;;  %s6336_s29 = sphi %s6464_s29, %s8021_s29   ;;  %s6332_s28 = sphi %s6462_s28, %s8020_s28   ;;  %s6328_s27 = sphi %s6460_s27, %s8019_s27   ;;  %s6324_s26 = sphi %s6458_s26, %s8018_s26   ;;  %s6320_s25 = sphi %s6456_s25, %s8017_s25  }
  0x1a   : > { %7961 = sst [smem:[#allocation32_spill]] %s6324_s26  ;;  %p5563_p0 = scmp.ge.s32.totalorder %s6360_s18, 1 }
  0x1b   : > { %7962 = sst [smem:[#allocation33_spill]] %s6344_s14  ;;  %p7944_p1 = scmp.eq.s32.totalorder %s6512_s19, 0 }
  0x1c   : > { %7963 = sst [smem:[#allocation34_spill]] %s6348_s15  ;;  %p363_p2 = scmp.lt.s32.totalorder %s6360_s18, 5 }
  0x1d   : > { %s6362_s21 = smov [#allocation8]   ;;  %s6363_s23 = smov [#allocation11]  }
  0x1e   : > { %p6517_p3 = pnand %p5563_p0, %p363_p2  ;;  %s385_s22 = sshll.u32 %s6362_s21, 4  ;;  %s386_s22 = int_to_ptr.vmem [resolvable:$true] %s385_s22 }
  0x1f   : > { %s407_s24 = sshll.u32 %s6363_s23, 4  ;;  %s6364_s2 = smov [#allocation16]   ;;  %s6529_s24 = int_to_ptr.vmem [resolvable:$true] %s407_s24 }
  0x20   : > { %s7964_s20 = scalar_select %p6517_p3, 1, 0 }
  0x21   : > { %p5706_p4 = pneg %p6517_p3  ;;  %s429_s1 = sshll.u32 %s6364_s2, 4  ;;  %s6531_s1 = int_to_ptr.vmem [resolvable:$true] %s429_s1 }
  0x22   : > { %7965 = sst [smem:[#allocation35_spill]] %s7964_s20  ;;  %s7967_s4 = sld [smem:[#allocation40_spill]] }
  0x23   : > { %p6525_p5 = pnand %p5706_p4, %p7944_p1 }
  0x25   : > { %p6541_p7 = pneg %p6525_p5 }
  0x28   : > { %s5932_s21 = scalar_lea.hbm %s7967_s4, 64 }
  0x29   : > { %p5933_p6 = scmp.ne.s32.totalorder %s7967_s4, %s5932_s21  ;;  %p5939_p10 = scmp.lt.u32.totalorder %s5932_s21, %s7967_s4 }
  0x2b   : > { %p5935_p8 = pnand %p6541_p7, %p5933_p6 }
  0x2d   : > { %p5936_p9 = pneg %p5935_p8 }
  0x2f   : > { %p5941_p11 = pnand %p5939_p10, %p5936_p9 }
  0x31   : > { %5944 = shalt.err (!%p5941_p11)
}
  0x32   : > { %s5945_s0 = scalar_lea.vmem %s386_s22, 64  ;;  %p5953_p2 = scmp.lt.s32.totalorder %s386_s22, %s386_s22 }
  0x33   : > { %p5946_p12 = scmp.ne.s32.totalorder %s386_s22, %s5945_s0  ;;  %p5954_p4 = scmp.lt.s32.totalorder %s5945_s0, %s5945_s0 }
  0x35   : > { %p5948_p13 = pnand %p5946_p12, %p6541_p7  ;;  %p5955_p1 = por %p5954_p4, %p5953_p2 }
  0x37   : > { %p5949_p0 = pneg %p5948_p13 }
  0x39   : > { %p5956_p3 = pnand %p5955_p1, %p5949_p0 }
  0x3b   : > { %5959 = shalt.err (!%p5956_p3)
}
  0x3c   : > { %5709 = dma.hbm_to_vmem [thread:$0]  (!%p6525_p5), %s7967_s4, 64, %s386_s22, [#allocation9]  }
  0x3d   : > { %s7969_s6 = sld [smem:[#allocation42_spill]] }
  0x43   : > { %s5960_s21 = scalar_lea.hbm %s7969_s6, 128 }
  0x44   : > { %p5961_p6 = scmp.ne.s32.totalorder %s7969_s6, %s5960_s21  ;;  %p5967_p1 = scmp.lt.u32.totalorder %s5960_s21, %s7969_s6 }
  0x46   : > { %p5963_p8 = pnand %p5961_p6, %p6541_p7 }
  0x48   : > { %p5964_p9 = pneg %p5963_p8 }
  0x4a   : > { %p5969_p3 = pnand %p5967_p1, %p5964_p9 }
  0x4c   : > { %5972 = shalt.err (!%p5969_p3)
}
  0x4d   : > { %s5973_s22 = scalar_lea.vmem %s6529_s24, 128  ;;  %p5981_p13 = scmp.lt.s32.totalorder %s6529_s24, %s6529_s24 }
  0x4e   : > { %p5974_p10 = scmp.ne.s32.totalorder %s6529_s24, %s5973_s22  ;;  %p5982_p0 = scmp.lt.s32.totalorder %s5973_s22, %s5973_s22 }
  0x50   : > { %p5976_p11 = pnand %p5974_p10, %p6541_p7  ;;  %p5983_p2 = por %p5982_p0, %p5981_p13 }
  0x52   : > { %p5977_p12 = pneg %p5976_p11 }
  0x54   : > { %p5984_p4 = pnand %p5983_p2, %p5977_p12 }
  0x56   : > { %5987 = shalt.err (!%p5984_p4)
}
  0x57   : > { %5715 = dma.hbm_to_vmem [thread:$0]  (!%p6525_p5), %s7969_s6, 128, %s6529_s24, [#allocation12]  }
  0x58   : > { %s5988_s8 = scalar_lea.hbm %s7931_s9, 128 }
  0x59   : > { %p5989_p6 = scmp.ne.s32.totalorder %s7931_s9, %s5988_s8  ;;  %p5995_p1 = scmp.lt.u32.totalorder %s5988_s8, %s7931_s9 }
  0x5b   : > { %p5991_p8 = pnand %p5989_p6, %p6541_p7 }
  0x5d   : > { %p5992_p9 = pneg %p5991_p8 }
  0x5f   : > { %p5997_p3 = pnand %p5995_p1, %p5992_p9 }
  0x61   : > { %6000 = shalt.err (!%p5997_p3)
}
  0x62   : > { %s6001_s24 = scalar_lea.vmem %s6531_s1, 128  ;;  %p6009_p13 = scmp.lt.s32.totalorder %s6531_s1, %s6531_s1 }
  0x63   : > { %p6002_p10 = scmp.ne.s32.totalorder %s6531_s1, %s6001_s24  ;;  %p6010_p0 = scmp.lt.s32.totalorder %s6001_s24, %s6001_s24 }
  0x65   : > { %p6004_p11 = pnand %p6002_p10, %p6541_p7  ;;  %p6011_p2 = por %p6010_p0, %p6009_p13 }
  0x67   : > { %p6005_p12 = pneg %p6004_p11 }
  0x69   : > { %p6012_p4 = pnand %p6011_p2, %p6005_p12 }
  0x6b   : > { %6015 = shalt.err (!%p6012_p4)
}
  0x6c   : > { %5721 = dma.hbm_to_vmem [thread:$0]  (!%p6525_p5), %s7931_s9, 128, %s6531_s1, [#allocation15]  }
  0x6d   : > { %s6365_s26 = smov [#allocation17]   ;;  %s6366_s15 = smov [#allocation10]  }
  0x6e   : > { %s440_s14 = sshll.u32 %s6365_s26, 4  ;;  %s396_s8 = sshll.u32 %s6366_s15, 4  ;;  %s441_s14 = int_to_ptr.vmem [resolvable:$true] %s440_s14  ;;  %s397_s8 = int_to_ptr.vmem [resolvable:$true] %s396_s8 }
  0x6f   : > { %s6016_s2 = scalar_lea.hbm %s7932_s10, 128 }
  0x70   : > { %p6017_p6 = scmp.ne.s32.totalorder %s7932_s10, %s6016_s2  ;;  %p6023_p1 = scmp.lt.u32.totalorder %s6016_s2, %s7932_s10 }
  0x72   : > { %p6019_p8 = pnand %p6017_p6, %p6541_p7 }
  0x74   : > { %p6020_p9 = pneg %p6019_p8 }
  0x76   : > { %p6025_p3 = pnand %p6023_p1, %p6020_p9 }
  0x78   : > { %6028 = shalt.err (!%p6025_p3)
}
  0x79   : > { %s6029_s1 = scalar_lea.vmem %s441_s14, 128  ;;  %p6037_p13 = scmp.lt.s32.totalorder %s441_s14, %s441_s14 }
  0x7a   : > { %p6030_p10 = scmp.ne.s32.totalorder %s441_s14, %s6029_s1  ;;  %p6038_p0 = scmp.lt.s32.totalorder %s6029_s1, %s6029_s1 }
  0x7c   : > { %p6032_p11 = pnand %p6030_p10, %p6541_p7  ;;  %p6039_p2 = por %p6038_p0, %p6037_p13 }
  0x7e   : > { %p6033_p12 = pneg %p6032_p11 }
  0x80   : > { %p6040_p4 = pnand %p6039_p2, %p6033_p12 }
  0x82   : > { %6043 = shalt.err (!%p6040_p4)
}
  0x83   : > { %5724 = dma.hbm_to_vmem [thread:$0]  (!%p6525_p5), %s7932_s10, 128, %s441_s14, [#allocation18]  }
  0x84   : > { %s7970_s5 = sld [smem:[#allocation41_spill]] }
  0x8a   : > { %s6044_s20 = scalar_lea.hbm %s7970_s5, 64 }
  0x8b   : > { %p6045_p6 = scmp.ne.s32.totalorder %s7970_s5, %s6044_s20  ;;  %p6051_p1 = scmp.lt.u32.totalorder %s6044_s20, %s7970_s5 }
  0x8d   : > { %p6047_p8 = pnand %p6045_p6, %p6541_p7 }
  0x8f   : > { %p6048_p9 = pneg %p6047_p8 }
  0x91   : > { %p6053_p3 = pnand %p6051_p1, %p6048_p9 }
  0x93   : > { %6056 = shalt.err (!%p6053_p3)
}
  0x94   : > { %s6057_s22 = scalar_lea.vmem %s397_s8, 64  ;;  %p6065_p13 = scmp.lt.s32.totalorder %s397_s8, %s397_s8 }
  0x95   : > { %p6058_p10 = scmp.ne.s32.totalorder %s397_s8, %s6057_s22  ;;  %p6066_p0 = scmp.lt.s32.totalorder %s6057_s22, %s6057_s22 }
  0x97   : > { %p6060_p11 = pnand %p6058_p10, %p6541_p7  ;;  %p6067_p2 = por %p6066_p0, %p6065_p13 }
  0x99   : > { %p6061_p12 = pneg %p6060_p11 }
  0x9b   : > { %p6068_p4 = pnand %p6067_p2, %p6061_p12 }
  0x9d   : > { %6071 = shalt.err (!%p6068_p4)
}
  0x9e   : > { %5712 = dma.hbm_to_vmem [thread:$0]  (!%p6525_p5), %s7970_s5, 64, %s397_s8, [#allocation9]  }
  0x9f   : > { %s6367_s25 = smov [#allocation13]   ;;  %s6368_s4 = smov [#allocation19]  }
  0xa0   : > { %s418_s26 = sshll.u32 %s6367_s25, 4  ;;  %s451_s15 = sshll.u32 %s6368_s4, 4  ;;  %s419_s26 = int_to_ptr.vmem [resolvable:$true] %s418_s26  ;;  %s452_s15 = int_to_ptr.vmem [resolvable:$true] %s451_s15 }
  0xa1   : > { %s7971_s7 = sld [smem:[#allocation43_spill]] }
  0xa7   : > { %s6072_s2 = scalar_lea.hbm %s7971_s7, 16 }
  0xa8   : > { %p6073_p6 = scmp.ne.s32.totalorder %s7971_s7, %s6072_s2  ;;  %p6079_p1 = scmp.lt.u32.totalorder %s6072_s2, %s7971_s7 }
  0xaa   : > { %p6075_p8 = pnand %p6073_p6, %p6541_p7 }
  0xac   : > { %p6076_p9 = pneg %p6075_p8 }
  0xae   : > { %p6081_p3 = pnand %p6079_p1, %p6076_p9 }
  0xb0   : > { %6084 = shalt.err (!%p6081_p3)
}
  0xb1   : > { %s6085_s8 = scalar_lea.vmem %s419_s26, 16  ;;  %s6092_s1 = scalar_lea.vmem %s419_s26, 32 }
  0xb2   : > { %p6086_p10 = scmp.ne.s32.totalorder %s419_s26, %s6085_s8  ;;  %p6093_p13 = scmp.lt.s32.totalorder %s419_s26, %s419_s26 }
  0xb3   : > { %p6094_p0 = scmp.lt.s32.totalorder %s6092_s1, %s6085_s8 }
  0xb4   : > { %p6088_p11 = pnand %p6086_p10, %p6541_p7 }
  0xb5   : > { %p6095_p2 = por %p6094_p0, %p6093_p13 }
  0xb6   : > { %p6089_p12 = pneg %p6088_p11 }
  0xb8   : > { %p6096_p4 = pnand %p6095_p2, %p6089_p12 }
  0xba   : > { %6099 = shalt.err (!%p6096_p4)
}
  0xbb   : > { %5718 = dma.hbm_to_vmem [thread:$0]  (!%p6525_p5), %s7971_s7, 16, %s419_s26, [#allocation12]  }
  0xbc   : > { %s6100_s2 = scalar_lea.hbm %s7933_s11, 256 }
  0xbd   : > { %p6101_p6 = scmp.ne.s32.totalorder %s7933_s11, %s6100_s2  ;;  %p6107_p1 = scmp.lt.u32.totalorder %s6100_s2, %s7933_s11 }
  0xbf   : > { %p6103_p8 = pnand %p6101_p6, %p6541_p7 }
  0xc1   : > { %p6104_p9 = pneg %p6103_p8 }
  0xc3   : > { %p6109_p3 = pnand %p6107_p1, %p6104_p9 }
  0xc5   : > { %6112 = shalt.err (!%p6109_p3)
}
  0xc6   : > { %s6113_s8 = scalar_lea.vmem %s452_s15, 256  ;;  %p6121_p13 = scmp.lt.s32.totalorder %s452_s15, %s452_s15 }
  0xc7   : > { %p6114_p10 = scmp.ne.s32.totalorder %s452_s15, %s6113_s8  ;;  %p6122_p0 = scmp.lt.s32.totalorder %s6113_s8, %s6113_s8 }
  0xc9   : > { %p6116_p11 = pnand %p6114_p10, %p6541_p7  ;;  %p6123_p2 = por %p6122_p0, %p6121_p13 }
  0xcb   : > { %p6117_p12 = pneg %p6116_p11 }
  0xcd   : > { %p6124_p4 = pnand %p6123_p2, %p6117_p12 }
  0xcf   : > { %6127 = shalt.err (!%p6124_p4)
}
  0xd0   : > { %5727 = dma.hbm_to_vmem [thread:$0]  (!%p6525_p5), %s7933_s11, 256, %s452_s15, [#allocation18]  }
  0xd1   : > { %s6369_s25 = smov [#allocation20]   ;;  %s6128_s2 = scalar_lea.hbm %s7934_s12, 16 }
  0xd2   : > { %s462_s4 = sshll.u32 %s6369_s25, 4  ;;  %p6129_p6 = scmp.ne.s32.totalorder %s7934_s12, %s6128_s2  ;;  %s463_s4 = int_to_ptr.vmem [resolvable:$true] %s462_s4 }
  0xd3   : > { %p6135_p1 = scmp.lt.u32.totalorder %s6128_s2, %s7934_s12 }
  0xd4   : > { %p6131_p8 = pnand %p6129_p6, %p6541_p7 }
  0xd6   : > { %p6132_p9 = pneg %p6131_p8 }
  0xd8   : > { %p6137_p3 = pnand %p6135_p1, %p6132_p9 }
  0xda   : > { %6140 = shalt.err (!%p6137_p3)
}
  0xdb   : > { %s6141_s15 = scalar_lea.vmem %s463_s4, 16  ;;  %s6148_s8 = scalar_lea.vmem %s463_s4, 32 }
  0xdc   : > { %p6142_p10 = scmp.ne.s32.totalorder %s463_s4, %s6141_s15  ;;  %p6149_p13 = scmp.lt.s32.totalorder %s463_s4, %s463_s4 }
  0xdd   : > { %p6150_p0 = scmp.lt.s32.totalorder %s6148_s8, %s6141_s15 }
  0xde   : > { %p6144_p11 = pnand %p6142_p10, %p6541_p7 }
  0xdf   : > { %p6151_p2 = por %p6150_p0, %p6149_p13 }
  0xe0   : > { %p6145_p12 = pneg %p6144_p11 }
  0xe2   : > { %p6152_p4 = pnand %p6151_p2, %p6145_p12 }
  0xe4   : > { %6155 = shalt.err (!%p6152_p4)
}
  0xe5   : > { %5730 = dma.hbm_to_vmem [thread:$0]  (!%p6525_p5), %s7934_s12, 16, %s463_s4, [#allocation21]  }
  0xe6   : > { %s43_s23 = sadd.s32 1, %s6352_s16  ;;  %s46_s13 = sadd.s32 1, %s6356_s17 }
  0xe7   : > { %p44_p7 = scmp.ge.s32.totalorder %s43_s23, 2  ;;  %s113_s25 = ssub.s32 1, %s6356_s17 }
  0xe8   : > { %s114_s20 = smul.u32 %s6352_s16, %s113_s25  ;;  %s122_s21 = sadd.s32 1, %s6340_s30 }
  0xe9   : > { %s8028_s23 = smov (%p44_p7, %s43_s23), 0  ;;  %s8030_s13 = smov (!%p44_p7, %s46_s13), %s6356_s17 }
  0xea   : > { %s115_s2 = sadd.s32 %s6356_s17, %s114_s20  ;;  %p129_p6 = scmp.ne.s32.totalorder %s6340_s30, %s6336_s29 }
  0xeb   : > { %p48_p8 = scmp.ge.s32.totalorder %s8030_s13, 2  ;;  %p7948_p9 = scmp.eq.s32.totalorder %s6360_s18, 0 }
  0xec   : > { %p135_p1 = scmp.ne.s32.totalorder %s6336_s29, %s6332_s28  ;;  %p7947_p5 = scmp.lt.s32.totalorder %s6360_s18, 4 }
  0xed   : > { %s8032_s13 = smov (%p48_p8, %s8030_s13), 0  ;;  %p6712_p3 = por %p7948_p9, %p129_p6 }
  0xee   : > { %p7973_p10 = scmp.eq.s32.totalorder %s6512_s19, 0  ;;  %s116_s28 = ssub.s32 1, %s8032_s13 }
  0xef   : > { %s230_s24 = smul.u32 %s8032_s13, %s8028_s23  ;;  %s473_s14 = sand.u32 1, %s6340_s30  }
  0xf0   : > { %p6718_p11 = por %p7973_p10, %p135_p1  ;;  %s117_s22 = smul.u32 %s116_s28, %s8028_s23 }
  0xf1   : > { %s5662_s15 = smul.u32 1536, %s473_s14  ;;  %s7975_s3 = sld [smem:[#allocation39_spill]] }
  0xf2   : > { %s118_s8 = sadd.s32 %s117_s22, %s8032_s13  ;;  %s5644_s26 = smul.u32 24576, %s115_s2 }
  0xf3   : > { %s119_s1 = ssub.s32 %s115_s2, %s118_s8  ;;  %s477_s6 = scalar_lea.vmem [#allocation5], %s5662_s15 }
  0xf4   : > { %p120_p12 = scmp.eq.s32.totalorder %s119_s1, 0  ;;  %s488_s7 = sshll.u32 %s477_s6, 4  ;;  %s6744_s7 = int_to_ptr.vmem [resolvable:$true] %s488_s7 }
  0xf5   : > { %p6737_p13 = pnand %p7947_p5, %p6712_p3  ;;  %s6746_s22 = scalar_lea.sflag [#allocation6], %s473_s14 }
  0xf6   : > { %s6742_s2 = scalar_select %p120_p12, %s6340_s30, %s122_s21  }
  0xf7   : > { %s6731_s5 = scalar_lea.hbm %s7975_s3, %s5644_s26  ;;  %p6158_p2 = pneg %p6737_p13 }
  0xf8   : > { %s6156_s8 = scalar_lea.hbm %s6731_s5, 24576  ;;  %s6161_s15 = scalar_lea.hbm %s7975_s3, 49152 }
  0xf9   : > { %p6157_p0 = scmp.ne.s32.totalorder %s6731_s5, %s6156_s8  ;;  %p6162_p6 = scmp.lt.u32.totalorder %s6731_s5, %s7975_s3 }
  0xfa   : > { %p6163_p8 = scmp.lt.u32.totalorder %s6161_s15, %s6156_s8  ;;  %p6165_p3 = scmp.lt.u32.totalorder %s6156_s8, %s6731_s5 }
  0xfb   : > { %p6159_p4 = pnand %p6158_p2, %p6157_p0 }
  0xfc   : > { %p6164_p1 = por %p6163_p8, %p6162_p6 }
  0xfd   : > { %p6160_p7 = pneg %p6159_p4 }
  0xfe   : > { %p6166_p10 = por %p6165_p3, %p6164_p1 }
 0x100   : > { %p6167_p12 = pnand %p6166_p10, %p6160_p7 }
 0x102   : > { %6170 = shalt.err (!%p6167_p12)
}
 0x103   : > { %s6171_s21 = scalar_lea.vmem %s6744_s7, 24576  ;;  %s6370_s14 = smov [#allocation5]  }
 0x104   : > { %p6172_p0 = scmp.ne.s32.totalorder %s6744_s7, %s6171_s21  ;;  %s6176_s25 = sshll.u32 %s6370_s14, 4  ;;  %s6177_s25 = int_to_ptr.vmem [resolvable:$false] %s6176_s25 }
 0x105   : > { %s6178_s20 = scalar_lea.vmem %s6177_s25, 49152  ;;  %p6179_p9 = scmp.lt.s32.totalorder %s6744_s7, %s6177_s25 }
 0x106   : > { %p6174_p4 = pnand %p6172_p0, %p6158_p2  ;;  %p6180_p6 = scmp.lt.s32.totalorder %s6178_s20, %s6171_s21 }
 0x108   : > { %p6175_p5 = pneg %p6174_p4  ;;  %p6181_p8 = por %p6180_p6, %p6179_p9 }
 0x10a   : > { %p6182_p1 = pnand %p6181_p8, %p6175_p5 }
 0x10c   : > { %6185 = shalt.err (!%p6182_p1)
}
 0x10d   : > { %s6371_s8 = smov 512   ;;  %s7977_s6 = sld [smem:[#allocation32_spill]] }
 0x10e   : > { %s7978_s4 = sld [smem:[#allocation31_spill]]  ;;  %s6372_s15 = smov 32  }
 0x10f   : > { %5734 = dma.hbm_to_vmem [thread:$0]  (!%p6737_p13), %s6731_s5, 24576, %s6744_s7, %s6746_s22, %s6371_s8, %s6371_s8, %s6372_s15  }
 0x110   : > { %s229_s26 = smul.u32 %s6352_s16, %s6356_s17  ;;  %s234_s1 = sadd.s32 1, %s6328_s27 }
 0x111   : > { %s498_s14 = sand.u32 1, %s6360_s18   ;;  %p7979_p7 = scmp.eq.s32.totalorder %s6360_s18, 0 }
 0x112   : > { %s231_s21 = ssub.s32 %s229_s26, %s230_s24  ;;  %p7980_p10 = scmp.eq.s32.totalorder %s6512_s19, 0 }
 0x113   : > { %p241_p9 = scmp.ne.s32.totalorder %s6328_s27, %s7977_s6  ;;  %p232_p2 = scmp.eq.s32.totalorder %s231_s21, 0 }
 0x114   : > { %p247_p5 = scmp.ne.s32.totalorder %s7977_s6, %s7978_s4  ;;  %s500_s3 = sand.u32 1, %s6328_s27  }
 0x115   : > { %p243_p3 = por %p241_p9, %p7979_p7  ;;  %s5645_s28 = smul.u32 49152, %s229_s26 }
 0x116   : > { %p6789_p12 = por %p247_p5, %p7980_p10  ;;  %s5663_s5 = smul.u32 3072, %s500_s3 }
 0x117   : > { %s6794_s20 = scalar_select %p232_p2, %s6328_s27, %s234_s1  }
 0x118   : > { %s7981_s25 = scalar_select %p6789_p12, 1, 0 }
 0x119   : > { %p7982_p13 = scmp.lt.s32.totalorder %s6360_s18, 4  ;;  %s7984_s8 = sld [smem:[#allocation44_spill]] }
 0x11a   : > { %s502_s4 = scalar_lea.vmem [#allocation14], %s5663_s5  ;;  %s6810_s3 = scalar_lea.sflag [#allocation15], %s498_s14 }
 0x11b   : > { %p6799_p0 = pnand %p7982_p13, %p243_p3  ;;  %s511_s15 = sshll.u32 %s502_s4, 4  ;;  %s6808_s15 = int_to_ptr.vmem [resolvable:$true] %s511_s15 }
 0x11d   : > { %p6188_p6 = pneg %p6799_p0 }
 0x11f   : > { %s6806_s6 = scalar_lea.hbm %s7984_s8, %s5645_s28  ;;  %s6191_s28 = scalar_lea.hbm %s7984_s8, 98304 }
 0x120   : > { %s6186_s26 = scalar_lea.hbm %s6806_s6, 49152  ;;  %p6192_p9 = scmp.lt.u32.totalorder %s6806_s6, %s7984_s8 }
 0x121   : > { %p6187_p4 = scmp.ne.s32.totalorder %s6806_s6, %s6186_s26  ;;  %p6193_p5 = scmp.lt.u32.totalorder %s6191_s28, %s6186_s26 }
 0x122   : > { %p6195_p7 = scmp.lt.u32.totalorder %s6186_s26, %s6806_s6 }
 0x123   : > { %p6189_p8 = pnand %p6188_p6, %p6187_p4  ;;  %p6194_p2 = por %p6193_p5, %p6192_p9 }
 0x125   : > { %p6190_p1 = pneg %p6189_p8  ;;  %p6196_p3 = por %p6195_p7, %p6194_p2 }
 0x127   : > { %p6197_p10 = pnand %p6196_p3, %p6190_p1 }
 0x129   : > { %6200 = shalt.err (!%p6197_p10)
}
 0x12a   : > { %s6201_s14 = scalar_lea.vmem %s6808_s15, 49152  ;;  %s6373_s5 = smov [#allocation14]  }
 0x12b   : > { %p6202_p13 = scmp.ne.s32.totalorder %s6808_s15, %s6201_s14  ;;  %s6206_s4 = sshll.u32 %s6373_s5, 4  ;;  %s6207_s4 = int_to_ptr.vmem [resolvable:$false] %s6206_s4 }
 0x12c   : > { %s6208_s1 = scalar_lea.vmem %s6207_s4, 98304  ;;  %p6209_p12 = scmp.lt.s32.totalorder %s6808_s15, %s6207_s4 }
 0x12d   : > { %p6204_p4 = pnand %p6202_p13, %p6188_p6  ;;  %p6210_p9 = scmp.lt.s32.totalorder %s6208_s1, %s6201_s14 }
 0x12f   : > { %p6205_p8 = pneg %p6204_p4  ;;  %p6211_p5 = por %p6210_p9, %p6209_p12 }
 0x131   : > { %p6212_p2 = pnand %p6211_p5, %p6205_p8 }
 0x133   : > { %6215 = shalt.err (!%p6212_p2)
}
 0x134   : > { %s6374_s26 = smov 1024   ;;  %s6375_s21 = smov 64  }
 0x135   : > { %5737 = dma.hbm_to_vmem [thread:$0]  (!%p6799_p0), %s6806_s6, 49152, %s6808_s15, %s6810_s3, %s6374_s26, %s6374_s26, %s6375_s21  }
 0x136   : > { %s7985_s28 = sld [smem:[#allocation35_spill]] }
 0x13c   : > { %p7986_p6 = scmp.ne.s32.totalorder %s7985_s28, 0 }
 0x13d   : > { %s525_s24 = sand.u32 (!%p7986_p6), 1, %s6336_s29  }
 0x13e   : > { %523 = sbr.rel (%p7986_p6) target bundleno = 3345 (0xd11), region = 72  ;;  %s526_s5 = scalar_lea.sflag (!%p7986_p6), [#allocation6], %s525_s24 }
 0x13f   : > { %s5664_s22 = smul.u32 (!%p7986_p6), 1536, %s525_s24 }
 0x141   : > { %s6841_s14 = scalar_lea.vmem (!%p7986_p6), [#allocation5], %s5664_s22 }
 0x145   : > { %6287 = dma.done.wait (%p6718_p11), %s526_s5, 24576  }
 0x146   : > { %6289 = vsyncadd (%p6718_p11), %s526_s5, 4294942720  ;;  %p7987_p12 = scmp.eq.s32.totalorder %s6512_s19, 0 }
 0x148   : > { %6291 = dma.done.wait (%p7987_p12), [#allocation9], 128   ;;  %p7988_p0 = pmov %p7987_p12 }
 0x14a   : > { %6293 = vsyncadd (%p7988_p0), [#allocation9], 4294967168  ;;  %p7989_p1 = pmov %p7988_p0 }
 0x14b   : > { %p7990_p7 = pmov %p7988_p0 }
 0x14c   : > { %6295 = dma.done.wait (%p7989_p1), [#allocation12], 144  }
 0x14d   : > { %6297 = vsyncadd (%p7990_p7), [#allocation12], 4294967152  ;;  %s7991_s7 = sld [smem:[#allocation32_spill]]  ;;  %s550_s6 = sand.u32 1, %s6512_s19  }
 0x14e   : > { %s551_s0 = scalar_lea.sflag [#allocation15], %s550_s6  ;;  %p7992_p11 = scmp.ne.s32.totalorder %s7981_s25, 0 }
 0x153   : > { %s552_s15 = sand.u32 1, %s7991_s7  }
 0x154   : > { %s5665_s3 = smul.u32 3072, %s552_s15 }
 0x156   : > { %s6857_s4 = scalar_lea.vmem [#allocation14], %s5665_s3 }
 0x157   : > { %6299 = dma.done.wait (%p7992_p11), %s551_s0, 49152  }
 0x158   : > { %6301 = vsyncadd (%p7992_p11), %s551_s0, 4294918144  ;;  %p7993_p3 = pmov %p7988_p0 }
 0x159   : > { %p7994_p10 = pmov %p7988_p0 }
 0x15a   : > { %6303 = dma.done.wait (%p7993_p3), [#allocation15], 128  }
 0x15b   : > { %6305 = vsyncadd (%p7994_p10), [#allocation15], 4294967168  ;;  %p7995_p13 = pmov %p7988_p0 }
 0x15c   : > { %p7996_p4 = pmov %p7988_p0 }
 0x15d   : > { %6307 = dma.done.wait (%p7995_p13), [#allocation18], 384  }
 0x15e   : > { %6309 = vsyncadd (%p7996_p4), [#allocation18], 4294966912  ;;  %p7997_p8 = pmov %p7988_p0 }
 0x15f   : > { %p7998_p9 = pmov %p7988_p0 }
 0x160   : > { %6311 = dma.done.wait (%p7997_p8), [#allocation21], 16  }
 0x161   : > { %6313 = vsyncadd (%p7998_p9), [#allocation21], 4294967280  ;;  %s7999_s25 = sld [smem:[#allocation33_spill]]  ;;  %s8000_s1 = sld [smem:[#allocation34_spill]] }
 0x167   : > { %s619_s26 = smul.u32 1536, %s7999_s25  ;;  %p620_p5 = scmp.eq.s32.totalorder %s8000_s1, 0 }
 0x168   : > { %p621_p2 = scmp.eq.s32.totalorder %s7999_s25, 0 }
 0x16a   : > { %p622_p6 = pnand %p621_p2, %p620_p5 }
 0x16b   : > { %v6376_v0 = vmov (!%p622_p6), 0.0  }
 0x16c   : > { %625 = sbr.rel (%p622_p6) target bundleno = 371 (0x173), region = 116  ;;  %626 = vst [vmem:[#allocation2] sm:$0xff] (!%p622_p6), %v6376_v0  ;;  %627 = vst [vmem:[#allocation2 + $0x8] sm:$0xff] (!%p622_p6), %v6376_v0 }
 0x16d   : > { %628 = vst [vmem:[#allocation2 + $0x10] sm:$0xff] (!%p622_p6), %v6376_v0  ;;  %629 = vst [vmem:[#allocation2 + $0x18] sm:$0xff] (!%p622_p6), %v6376_v0 }
 0x173 PF: > { %s8001_s21 = sld [smem:[#allocation34_spill]] }
 0x179   : > { %p5586_p12 = scmp.ne.s32.totalorder %s8001_s21, 0 }
 0x17a   : > { %v662_v1 = vld [vmem:[%s6841_s14 + $0x8] sm:$0xff] (!%p5586_p12)  ;;  %v661_v3 = vld [vmem:[%s6841_s14] sm:$0xff] (!%p5586_p12)  ;;  %s633_s24 = sshra.s32 (!%p5586_p12), %s619_s26, 7  ;;  %s8003_s6 = sld [smem:[#allocation36_spill]] (!%p5586_p12) }
 0x17b   : > { %632 = sbr.rel (%p5586_p12) target bundleno = 985 (0x3d9), region = 120  ;;  %v694_v2 = vld [vmem:[%s6841_s14 + $0x108] sm:$0xff] (!%p5586_p12)  ;;  %v854_v4 = vunpack.c.l.s8.bf16 (!%p5586_p12), %v662_v1  ;;  %v858_v5 = vunpack.c.h.s8.bf16 (!%p5586_p12), %v662_v1  ;;  %v693_v8 = vld [vmem:[%s6841_s14 + $0x100] sm:$0xff] (!%p5586_p12)  ;;  %v853_v9 = vunpack.c.l.s8.bf16 (!%p5586_p12), %v661_v3  ;;  %v857_v13 = vunpack.c.h.s8.bf16 (!%p5586_p12), %v661_v3  ;;  %s5587_s22 = sshll.u32 (!%p5586_p12), %s633_s24, 3 }
 0x17c   : > { %v918_v6 = vunpack.c.l.s8.bf16 (!%p5586_p12), %v694_v2  ;;  %v922_v7 = vunpack.c.h.s8.bf16 (!%p5586_p12), %v694_v2  ;;  %v917_v10 = vunpack.c.l.s8.bf16 (!%p5586_p12), %v693_v8  ;;  %v666_v11 = vld [vmem:[%s6841_s14 + $0x28] sm:$0xff] (!%p5586_p12)  ;;  %v921_v14 = vunpack.c.h.s8.bf16 (!%p5586_p12), %v693_v8  ;;  %v665_v17 = vld [vmem:[%s6841_s14 + $0x20] sm:$0xff] (!%p5586_p12) }
 0x17d   : > { %v698_v12 = vld [vmem:[%s6841_s14 + $0x128] sm:$0xff] (!%p5586_p12)  ;;  %1241 = vmatprep.subr.bf16.mxu0 (!%p5586_p12), %v854_v4  ;;  %v862_v15 = vunpack.c.l.s8.bf16 (!%p5586_p12), %v666_v11  ;;  %v697_v18 = vld [vmem:[%s6841_s14 + $0x120] sm:$0xff] (!%p5586_p12)  ;;  %v861_v19 = vunpack.c.l.s8.bf16 (!%p5586_p12), %v665_v17  ;;  %v866_v21 = vunpack.c.h.s8.bf16 (!%p5586_p12), %v666_v11  ;;  %v865_v25 = vunpack.c.h.s8.bf16 (!%p5586_p12), %v665_v17 }
 0x17e   : > { %1282 = vmatprep.subr.bf16.mxu1 (!%p5586_p12), %v918_v6  ;;  %1242 = vmatpush1.bf16.msra.mxu0 (!%p5586_p12), %v853_v9  ;;  %v926_v16 = vunpack.c.l.s8.bf16 (!%p5586_p12), %v698_v12  ;;  %v925_v20 = vunpack.c.l.s8.bf16 (!%p5586_p12), %v697_v18  ;;  %v930_v22 = vunpack.c.h.s8.bf16 (!%p5586_p12), %v698_v12  ;;  %v670_v23 = vld [vmem:[%s6841_s14 + $0x48] sm:$0xff] (!%p5586_p12)  ;;  %v929_v26 = vunpack.c.h.s8.bf16 (!%p5586_p12), %v697_v18  ;;  %v669_v29 = vld [vmem:[%s6841_s14 + $0x40] sm:$0xff] (!%p5586_p12) }
 0x17f   : > { %1283 = vmatpush1.bf16.msra.mxu1 (!%p5586_p12), %v917_v10  ;;  %1243 = vmatprep.subr.bf16.mxu0 (!%p5586_p12), %v858_v5  ;;  %v702_v24 = vld [vmem:[%s6841_s14 + $0x148] sm:$0xff] (!%p5586_p12)  ;;  %v870_v27 = vunpack.c.l.s8.bf16 (!%p5586_p12), %v670_v23  ;;  %v701_v30 = vld [vmem:[%s6841_s14 + $0x140] sm:$0xff] (!%p5586_p12)  ;;  %v869_v33 = vunpack.c.l.s8.bf16 (!%p5586_p12), %v669_v29  ;;  %v874_v35 = vunpack.c.h.s8.bf16 (!%p5586_p12), %v670_v23  ;;  %v873_v41 = vunpack.c.h.s8.bf16 (!%p5586_p12), %v669_v29 }
 0x180   : > { %1284 = vmatprep.subr.bf16.mxu1 (!%p5586_p12), %v922_v7  ;;  %s6898_s15 = scalar_lea.vmem (!%p5586_p12), %s8003_s6, %s5587_s22  ;;  %v934_v28 = vunpack.c.l.s8.bf16 (!%p5586_p12), %v702_v24  ;;  %v933_v34 = vunpack.c.l.s8.bf16 (!%p5586_p12), %v701_v30  ;;  %v938_v36 = vunpack.c.h.s8.bf16 (!%p5586_p12), %v702_v24  ;;  %v674_v39 = vld [vmem:[%s6841_s14 + $0x68] sm:$0xff] (!%p5586_p12)  ;;  %v937_v42 = vunpack.c.h.s8.bf16 (!%p5586_p12), %v701_v30  ;;  %v673_v45 = vld [vmem:[%s6841_s14 + $0x60] sm:$0xff] (!%p5586_p12) }
 0x181   : > { %v638_v31 = vld [vmem:[%s6898_s15 + $0x8] sm:$0xff] (!%p5586_p12)  ;;  %v640_v32 = vld [vmem:[%s6898_s15 + $0x18] sm:$0xff] (!%p5586_p12)  ;;  %v878_v43 = vunpack.c.l.s8.bf16 (!%p5586_p12), %v674_v39  ;;  %v705_v46 = vld [vmem:[%s6841_s14 + $0x160] sm:$0xff] (!%p5586_p12)  ;;  %v877_v47 = vunpack.c.l.s8.bf16 (!%p5586_p12), %v673_v45  ;;  %v882_v49 = vunpack.c.h.s8.bf16 (!%p5586_p12), %v674_v39  ;;  %v881_v53 = vunpack.c.h.s8.bf16 (!%p5586_p12), %v673_v45 }
 0x182   : > { %1244 = vmatpush1.bf16.msra.mxu0 %v857_v13  ;;  %v6904_v37 = vpack.c.bf16 %v638_v31, %v638_v31  ;;  %v6906_v38 = vpack.c.bf16 %v640_v32, %v640_v32  ;;  %v706_v40 = vld [vmem:[%s6841_s14 + $0x168] sm:$0xff]  ;;  %v941_v48 = vunpack.c.l.s8.bf16 %v705_v46  ;;  %v945_v54 = vunpack.c.h.s8.bf16 %v705_v46  ;;  %v677_v57 = vld [vmem:[%s6841_s14 + $0x80] sm:$0xff] }
 0x183   : > { %1285 = vmatpush1.bf16.msra.mxu1 %v921_v14  ;;  %1245 = vmatprep.subr.bf16.mxu0 %v862_v15  ;;  %v942_v44 = vunpack.c.l.s8.bf16 %v706_v40  ;;  %v946_v50 = vunpack.c.h.s8.bf16 %v706_v40  ;;  %v678_v51 = vld [vmem:[%s6841_s14 + $0x88] sm:$0xff]  ;;  %v709_v58 = vld [vmem:[%s6841_s14 + $0x180] sm:$0xff]  ;;  %v885_v59 = vunpack.c.l.s8.bf16 %v677_v57  ;;  %v889_v1 = vunpack.c.h.s8.bf16 %v677_v57 }
 0x184   : > { %1286 = vmatprep.subr.bf16.mxu1 %v926_v16  ;;  %1273 = vmatprep.mubr.bf16.mxu0 %v6904_v37  ;;  %v710_v52 = vld [vmem:[%s6841_s14 + $0x188] sm:$0xff]  ;;  %v886_v55 = vunpack.c.l.s8.bf16 %v678_v51  ;;  %v949_v60 = vunpack.c.l.s8.bf16 %v709_v58  ;;  %v890_v61 = vunpack.c.h.s8.bf16 %v678_v51  ;;  %v953_v2 = vunpack.c.h.s8.bf16 %v709_v58  ;;  %v681_v5 = vld [vmem:[%s6841_s14 + $0xa0] sm:$0xff] }
 0x185   : > { %1314 = vmatprep.mubr.bf16.mxu1 %v6906_v38  ;;  %v950_v56 = vunpack.c.l.s8.bf16 %v710_v52  ;;  %v954_v62 = vunpack.c.h.s8.bf16 %v710_v52  ;;  %v682_v63 = vld [vmem:[%s6841_s14 + $0xa8] sm:$0xff]  ;;  %v713_v6 = vld [vmem:[%s6841_s14 + $0x1a0] sm:$0xff]  ;;  %v893_v7 = vunpack.c.l.s8.bf16 %v681_v5  ;;  %v897_v13 = vunpack.c.h.s8.bf16 %v681_v5 }
 0x186   : > { %1246 = vmatpush1.bf16.msra.mxu0 %v861_v19  ;;  %v714_v0 = vld [vmem:[%s6841_s14 + $0x1a8] sm:$0xff]  ;;  %v894_v3 = vunpack.c.l.s8.bf16 %v682_v63  ;;  %v957_v8 = vunpack.c.l.s8.bf16 %v713_v6  ;;  %v898_v9 = vunpack.c.h.s8.bf16 %v682_v63  ;;  %v961_v14 = vunpack.c.h.s8.bf16 %v713_v6  ;;  %v685_v17 = vld [vmem:[%s6841_s14 + $0xc0] sm:$0xff] }
 0x187   : > { %1287 = vmatpush1.bf16.msra.mxu1 %v925_v20  ;;  %1247 = vmatprep.subr.bf16.mxu0 %v866_v21  ;;  %v958_v4 = vunpack.c.l.s8.bf16 %v714_v0  ;;  %v962_v10 = vunpack.c.h.s8.bf16 %v714_v0  ;;  %v686_v11 = vld [vmem:[%s6841_s14 + $0xc8] sm:$0xff]  ;;  %v717_v18 = vld [vmem:[%s6841_s14 + $0x1c0] sm:$0xff]  ;;  %v901_v19 = vunpack.c.l.s8.bf16 %v685_v17 }
 0x188   : > { %1288 = vmatprep.subr.bf16.mxu1 %v930_v22  ;;  %v718_v12 = vld [vmem:[%s6841_s14 + $0x1c8] sm:$0xff]  ;;  %v902_v15 = vunpack.c.l.s8.bf16 %v686_v11  ;;  %v965_v20 = vunpack.c.l.s8.bf16 %v717_v18  ;;  %v906_v21 = vunpack.c.h.s8.bf16 %v686_v11  ;;  %v689_v29 = vld [vmem:[%s6841_s14 + $0xe0] sm:$0xff] }
 0x189   : > { %v966_v16 = vunpack.c.l.s8.bf16 %v718_v12  ;;  %v970_v22 = vunpack.c.h.s8.bf16 %v718_v12  ;;  %v690_v23 = vld [vmem:[%s6841_s14 + $0xe8] sm:$0xff]  ;;  %v721_v30 = vld [vmem:[%s6841_s14 + $0x1e0] sm:$0xff]  ;;  %v909_v31 = vunpack.c.l.s8.bf16 %v689_v29  ;;  %v913_v39 = vunpack.c.h.s8.bf16 %v689_v29 }
 0x18a   : > { %1248 = vmatpush1.bf16.msra.mxu0 %v865_v25  ;;  %v722_v24 = vld [vmem:[%s6841_s14 + $0x1e8] sm:$0xff]  ;;  %v905_v25 = vunpack.c.h.s8.bf16 %v685_v17  ;;  %v973_v32 = vunpack.c.l.s8.bf16 %v721_v30  ;;  %v977_v40 = vunpack.c.h.s8.bf16 %v721_v30  ;;  %v725_v45 = vld [vmem:[%s6841_s14 + $0x200] sm:$0xff] }
 0x18b   : > { %1289 = vmatpush1.bf16.msra.mxu1 %v929_v26  ;;  %1249 = vmatprep.subr.bf16.mxu0 %v870_v27  ;;  %v969_v26 = vunpack.c.h.s8.bf16 %v717_v18  ;;  %v910_v27 = vunpack.c.l.s8.bf16 %v690_v23  ;;  %v757_v46 = vld [vmem:[%s6841_s14 + $0x300] sm:$0xff]  ;;  %v981_v51 = vunpack.c.l.s8.bf16 %v725_v45  ;;  %v734_v5 = vld [vmem:[%s6841_s14 + $0x248] sm:$0xff] }
 0x18c   : > { %1290 = vmatprep.subr.bf16.mxu1 %v934_v28  ;;  %v974_v28 = vunpack.c.l.s8.bf16 %v722_v24  ;;  %v1045_v52 = vunpack.c.l.s8.bf16 %v757_v46  ;;  %v729_v63 = vld [vmem:[%s6841_s14 + $0x220] sm:$0xff]  ;;  %v766_v6 = vld [vmem:[%s6841_s14 + $0x348] sm:$0xff] }
 0x18d   : > { %v761_v0 = vld [vmem:[%s6841_s14 + $0x320] sm:$0xff]  ;;  %v738_v17 = vld [vmem:[%s6841_s14 + $0x268] sm:$0xff] }
 0x18e   : > { %1250 = vmatpush1.bf16.msra.mxu0 %v869_v33  ;;  %v914_v33 = vunpack.c.h.s8.bf16 %v690_v23  ;;  %v733_v11 = vld [vmem:[%s6841_s14 + $0x240] sm:$0xff]  ;;  %v770_v18 = vld [vmem:[%s6841_s14 + $0x368] sm:$0xff] }
 0x18f   : > { %1291 = vmatpush1.bf16.msra.mxu1 %v933_v34  ;;  %1251 = vmatprep.subr.bf16.mxu0 %v874_v35  ;;  %v978_v34 = vunpack.c.h.s8.bf16 %v722_v24  ;;  %v726_v35 = vld [vmem:[%s6841_s14 + $0x208] sm:$0xff]  ;;  %v765_v12 = vld [vmem:[%s6841_s14 + $0x340] sm:$0xff] }
 0x190   : > { %1292 = vmatprep.subr.bf16.mxu1 %v938_v36  ;;  %v758_v36 = vld [vmem:[%s6841_s14 + $0x308] sm:$0xff]  ;;  %v737_v23 = vld [vmem:[%s6841_s14 + $0x260] sm:$0xff] }
 0x191   : > { %v769_v24 = vld [vmem:[%s6841_s14 + $0x360] sm:$0xff]  ;;  %v742_v29 = vld [vmem:[%s6841_s14 + $0x288] sm:$0xff] }
 0x192   : > { %1252 = vmatpush1.bf16.msra.mxu0 %v873_v41  ;;  %v637_v41 = vld [vmem:[%s6898_s15] sm:$0xff]  ;;  %v774_v30 = vld [vmem:[%s6841_s14 + $0x388] sm:$0xff] }
 0x193   : > { %1293 = vmatpush1.bf16.msra.mxu1 %v937_v42  ;;  %1253 = vmatprep.subr.bf16.mxu0 %v878_v43  ;;  %v639_v42 = vld [vmem:[%s6898_s15 + $0x10] sm:$0xff]  ;;  %v982_v43 = vunpack.c.l.s8.bf16 %v726_v35 }
 0x194   : > { %1294 = vmatprep.subr.bf16.mxu1 %v942_v44  ;;  %v1046_v44 = vunpack.c.l.s8.bf16 %v758_v36 }
 0x196   : > { %1254 = vmatpush1.bf16.msra.mxu0 %v877_v47  ;;  %v6936_v47 = vpack.c.bf16 %v637_v41, %v637_v41  ;;  %v1018_v41 = vunpack.c.h.s8.bf16 %v742_v29 }
 0x197   : > { %1295 = vmatpush1.bf16.msra.mxu1 %v941_v48  ;;  %1255 = vmatprep.subr.bf16.mxu0 %v882_v49  ;;  %v6938_v48 = vpack.c.bf16 %v639_v42, %v639_v42  ;;  %v642_v49 = vld [vmem:[%s6898_s15 + $0x28] sm:$0xff]  ;;  %v1082_v42 = vunpack.c.h.s8.bf16 %v774_v30 }
 0x198   : > { %1296 = vmatprep.subr.bf16.mxu1 %v946_v50  ;;  %v644_v50 = vld [vmem:[%s6898_s15 + $0x38] sm:$0xff]  ;;  %v6944_v57 = vpack.c.bf16 %v642_v49, %v642_v49 }
 0x199   : > { %v6946_v58 = vpack.c.bf16 %v644_v50, %v644_v50 }
 0x19a   : > { %1256 = vmatpush1.bf16.msra.mxu0 %v881_v53  ;;  %v986_v53 = vunpack.c.h.s8.bf16 %v726_v35  ;;  %v741_v35 = vld [vmem:[%s6841_s14 + $0x280] sm:$0xff] }
 0x19b   : > { %1297 = vmatpush1.bf16.msra.mxu1 %v945_v54  ;;  %1257 = vmatprep.subr.bf16.mxu0 %v886_v55  ;;  %v1050_v54 = vunpack.c.h.s8.bf16 %v758_v36  ;;  %v730_v55 = vld [vmem:[%s6841_s14 + $0x228] sm:$0xff]  ;;  %v773_v36 = vld [vmem:[%s6841_s14 + $0x380] sm:$0xff] }
 0x19c   : > { %1298 = vmatprep.subr.bf16.mxu1 %v950_v56  ;;  %v762_v56 = vld [vmem:[%s6841_s14 + $0x328] sm:$0xff] }
 0x19e   : > { %1258 = vmatpush1.bf16.msra.mxu0 %v885_v59  ;;  %v985_v59 = vunpack.c.h.s8.bf16 %v725_v45  ;;  %v1017_v45 = vunpack.c.h.s8.bf16 %v741_v35 }
 0x19f   : > { %1299 = vmatpush1.bf16.msra.mxu1 %v949_v60  ;;  %1259 = vmatprep.subr.bf16.mxu0 %v890_v61  ;;  %v1049_v60 = vunpack.c.h.s8.bf16 %v757_v46  ;;  %v990_v61 = vunpack.c.l.s8.bf16 %v730_v55  ;;  %v1081_v46 = vunpack.c.h.s8.bf16 %v773_v36 }
 0x1a0   : > { %1300 = vmatprep.subr.bf16.mxu1 %v954_v62  ;;  %v1054_v62 = vunpack.c.l.s8.bf16 %v762_v56 }
 0x1a2   : > { %1260 = vmatpush1.bf16.msra.mxu0 %v889_v1  ;;  %v989_v1 = vunpack.c.l.s8.bf16 %v729_v63 }
 0x1a3   : > { %1301 = vmatpush1.bf16.msra.mxu1 %v953_v2  ;;  %1261 = vmatprep.subr.bf16.mxu0 %v894_v3  ;;  %v1053_v2 = vunpack.c.l.s8.bf16 %v761_v0  ;;  %v994_v3 = vunpack.c.h.s8.bf16 %v730_v55 }
 0x1a4   : > { %1302 = vmatprep.subr.bf16.mxu1 %v958_v4  ;;  %v1058_v4 = vunpack.c.h.s8.bf16 %v762_v56 }
 0x1a6   : > { %1262 = vmatpush1.bf16.msra.mxu0 %v893_v7  ;;  %v993_v7 = vunpack.c.h.s8.bf16 %v729_v63 }
 0x1a7   : > { %1303 = vmatpush1.bf16.msra.mxu1 %v957_v8  ;;  %1263 = vmatprep.subr.bf16.mxu0 %v898_v9  ;;  %v1057_v8 = vunpack.c.h.s8.bf16 %v761_v0  ;;  %v998_v9 = vunpack.c.l.s8.bf16 %v734_v5 }
 0x1a8   : > { %1304 = vmatprep.subr.bf16.mxu1 %v962_v10  ;;  %v1062_v10 = vunpack.c.l.s8.bf16 %v766_v6 }
 0x1aa   : > { %1264 = vmatpush1.bf16.msra.mxu0 %v897_v13  ;;  %v997_v13 = vunpack.c.l.s8.bf16 %v733_v11 }
 0x1ab   : > { %1305 = vmatpush1.bf16.msra.mxu1 %v961_v14  ;;  %1265 = vmatprep.subr.bf16.mxu0 %v902_v15  ;;  %v1061_v14 = vunpack.c.l.s8.bf16 %v765_v12  ;;  %v1002_v15 = vunpack.c.h.s8.bf16 %v734_v5 }
 0x1ac   : > { %1306 = vmatprep.subr.bf16.mxu1 %v966_v16  ;;  %v1066_v16 = vunpack.c.h.s8.bf16 %v766_v6 }
 0x1ae   : > { %1266 = vmatpush1.bf16.msra.mxu0 %v901_v19  ;;  %v1001_v19 = vunpack.c.h.s8.bf16 %v733_v11 }
 0x1af   : > { %1307 = vmatpush1.bf16.msra.mxu1 %v965_v20  ;;  %1267 = vmatprep.subr.bf16.mxu0 %v906_v21  ;;  %v1065_v20 = vunpack.c.h.s8.bf16 %v765_v12  ;;  %v1006_v21 = vunpack.c.l.s8.bf16 %v738_v17 }
 0x1b0   : > { %1308 = vmatprep.subr.bf16.mxu1 %v970_v22  ;;  %v1070_v22 = vunpack.c.l.s8.bf16 %v770_v18 }
 0x1b2   : > { %1268 = vmatpush1.bf16.msra.mxu0 %v905_v25  ;;  %v1005_v25 = vunpack.c.l.s8.bf16 %v737_v23 }
 0x1b3   : > { %1309 = vmatpush1.bf16.msra.mxu1 %v969_v26  ;;  %1269 = vmatprep.subr.bf16.mxu0 %v910_v27  ;;  %v1069_v26 = vunpack.c.l.s8.bf16 %v769_v24  ;;  %v1010_v27 = vunpack.c.h.s8.bf16 %v738_v17 }
 0x1b4   : > { %1310 = vmatprep.subr.bf16.mxu1 %v974_v28  ;;  %v1074_v28 = vunpack.c.h.s8.bf16 %v770_v18 }
 0x1b6   : > { %1270 = vmatpush1.bf16.msra.mxu0 %v909_v31  ;;  %v1009_v31 = vunpack.c.h.s8.bf16 %v737_v23  ;;  %v641_v23 = vld [vmem:[%s6898_s15 + $0x20] sm:$0xff] }
 0x1b7   : > { %1311 = vmatpush1.bf16.msra.mxu1 %v973_v32  ;;  %1271 = vmatprep.subr.bf16.mxu0 %v914_v33  ;;  %v1073_v32 = vunpack.c.h.s8.bf16 %v769_v24  ;;  %v1014_v33 = vunpack.c.l.s8.bf16 %v742_v29  ;;  %v643_v24 = vld [vmem:[%s6898_s15 + $0x30] sm:$0xff]  ;;  %v6984_v29 = vpack.c.bf16 %v641_v23, %v641_v23  ;;  %v805_v23 = vld [vmem:[%s6841_s14 + $0x480] sm:$0xff] }
 0x1b8   : > { %1312 = vmatprep.subr.bf16.mxu1 %v978_v34  ;;  %v1078_v34 = vunpack.c.l.s8.bf16 %v774_v30  ;;  %v6986_v30 = vpack.c.bf16 %v643_v24, %v643_v24  ;;  %v837_v24 = vld [vmem:[%s6841_s14 + $0x580] sm:$0xff] }
 0x1ba   : > { %1272 = vmatpush1.bf16.msra.mxu0 %v913_v39  ;;  %v1013_v39 = vunpack.c.l.s8.bf16 %v741_v35 }
 0x1bb   : > { %1313 = vmatpush1.bf16.msra.mxu1 %v977_v40  ;;  %1323 = vmatprep.subr.bf16.mxu0 %v982_v43  ;;  %v1077_v40 = vunpack.c.l.s8.bf16 %v773_v36  ;;  %v746_v43 = vld [vmem:[%s6841_s14 + $0x2a8] sm:$0xff] }
 0x1bc   : > { %1364 = vmatprep.subr.bf16.mxu1 %v1046_v44  ;;  %v778_v44 = vld [vmem:[%s6841_s14 + $0x3a8] sm:$0xff]  ;;  %v1022_v49 = vunpack.c.l.s8.bf16 %v746_v43  ;;  %v1026_v55 = vunpack.c.h.s8.bf16 %v746_v43 }
 0x1bd   : > { %1274 = vmatmul.mubr.bf16.vlgmr.msra.gmra.mrb[0].mxu0 %v6936_v47  ;;  %v1086_v50 = vunpack.c.l.s8.bf16 %v778_v44  ;;  %v1090_v56 = vunpack.c.h.s8.bf16 %v778_v44 }
 0x1be   : > { %1315 = vmatmul.mubr.bf16.vlgmr.msra.gmra.mrb[0].mxu1 %v6938_v48  ;;  %1324 = vmatpush1.bf16.msra.mxu0 %v981_v51  ;;  %v745_v51 = vld [vmem:[%s6841_s14 + $0x2a0] sm:$0xff] }
 0x1bf   : > { %1365 = vmatpush1.bf16.msra.mxu1 %v1045_v52  ;;  %1325 = vmatprep.subr.bf16.mxu0 %v986_v53  ;;  %v777_v52 = vld [vmem:[%s6841_s14 + $0x3a0] sm:$0xff]  ;;  %v1021_v53 = vunpack.c.l.s8.bf16 %v745_v51 }
 0x1c0   : > { %1366 = vmatprep.subr.bf16.mxu1 %v1050_v54  ;;  %1355 = vmatprep.mubr.bf16.mxu0 %v6944_v57  ;;  %v1085_v54 = vunpack.c.l.s8.bf16 %v777_v52 }
 0x1c1   : > { %1396 = vmatprep.mubr.bf16.mxu1 %v6946_v58 }
 0x1c2   : > { %1326 = vmatpush1.bf16.msra.mxu0 %v985_v59  ;;  %v750_v59 = vld [vmem:[%s6841_s14 + $0x2c8] sm:$0xff] }
 0x1c3   : > { %1367 = vmatpush1.bf16.msra.mxu1 %v1049_v60  ;;  %1327 = vmatprep.subr.bf16.mxu0 %v990_v61  ;;  %v782_v60 = vld [vmem:[%s6841_s14 + $0x3c8] sm:$0xff]  ;;  %v1025_v61 = vunpack.c.h.s8.bf16 %v745_v51  ;;  %v1030_v63 = vunpack.c.l.s8.bf16 %v750_v59  ;;  %v1034_v5 = vunpack.c.h.s8.bf16 %v750_v59 }
 0x1c4   : > { %1368 = vmatprep.subr.bf16.mxu1 %v1054_v62  ;;  %v1089_v62 = vunpack.c.h.s8.bf16 %v777_v52  ;;  %v1094_v0 = vunpack.c.l.s8.bf16 %v782_v60  ;;  %v1098_v6 = vunpack.c.h.s8.bf16 %v782_v60 }
 0x1c6   : > { %1328 = vmatpush1.bf16.msra.mxu0 %v989_v1  ;;  %v749_v1 = vld [vmem:[%s6841_s14 + $0x2c0] sm:$0xff] }
 0x1c7   : > { %1369 = vmatpush1.bf16.msra.mxu1 %v1053_v2  ;;  %1329 = vmatprep.subr.bf16.mxu0 %v994_v3  ;;  %v781_v2 = vld [vmem:[%s6841_s14 + $0x3c0] sm:$0xff]  ;;  %v1029_v3 = vunpack.c.l.s8.bf16 %v749_v1 }
 0x1c8   : > { %1370 = vmatprep.subr.bf16.mxu1 %v1058_v4  ;;  %v1093_v4 = vunpack.c.l.s8.bf16 %v781_v2 }
 0x1ca   : > { %1330 = vmatpush1.bf16.msra.mxu0 %v993_v7  ;;  %v754_v7 = vld [vmem:[%s6841_s14 + $0x2e8] sm:$0xff] }
 0x1cb   : > { %1371 = vmatpush1.bf16.msra.mxu1 %v1057_v8  ;;  %1331 = vmatprep.subr.bf16.mxu0 %v998_v9  ;;  %v786_v8 = vld [vmem:[%s6841_s14 + $0x3e8] sm:$0xff]  ;;  %v1033_v9 = vunpack.c.h.s8.bf16 %v749_v1  ;;  %v1038_v11 = vunpack.c.l.s8.bf16 %v754_v7  ;;  %v1042_v17 = vunpack.c.h.s8.bf16 %v754_v7 }
 0x1cc   : > { %1372 = vmatprep.subr.bf16.mxu1 %v1062_v10  ;;  %v1097_v10 = vunpack.c.h.s8.bf16 %v781_v2  ;;  %v1102_v12 = vunpack.c.l.s8.bf16 %v786_v8  ;;  %v1106_v18 = vunpack.c.h.s8.bf16 %v786_v8 }
 0x1ce   : > { %1332 = vmatpush1.bf16.msra.mxu0 %v997_v13  ;;  %v753_v13 = vld [vmem:[%s6841_s14 + $0x2e0] sm:$0xff] }
 0x1cf   : > { %1373 = vmatpush1.bf16.msra.mxu1 %v1061_v14  ;;  %1333 = vmatprep.subr.bf16.mxu0 %v1002_v15  ;;  %v785_v14 = vld [vmem:[%s6841_s14 + $0x3e0] sm:$0xff]  ;;  %v1037_v15 = vunpack.c.l.s8.bf16 %v753_v13 }
 0x1d0   : > { %1374 = vmatprep.subr.bf16.mxu1 %v1066_v16  ;;  %v1101_v16 = vunpack.c.l.s8.bf16 %v785_v14 }
 0x1d2   : > { %1334 = vmatpush1.bf16.msra.mxu0 %v1001_v19  ;;  %v790_v19 = vld [vmem:[%s6841_s14 + $0x408] sm:$0xff] }
 0x1d3   : > { %1375 = vmatpush1.bf16.msra.mxu1 %v1065_v20  ;;  %1335 = vmatprep.subr.bf16.mxu0 %v1006_v21  ;;  %v822_v20 = vld [vmem:[%s6841_s14 + $0x508] sm:$0xff]  ;;  %v1041_v21 = vunpack.c.h.s8.bf16 %v753_v13  ;;  %v1114_v35 = vunpack.c.h.s8.bf16 %v790_v19 }
 0x1d4   : > { %1376 = vmatprep.subr.bf16.mxu1 %v1070_v22  ;;  %v1105_v22 = vunpack.c.h.s8.bf16 %v785_v14  ;;  %v1178_v36 = vunpack.c.h.s8.bf16 %v822_v20 }
 0x1d6   : > { %1336 = vmatpush1.bf16.msra.mxu0 %v1005_v25  ;;  %v1110_v25 = vunpack.c.l.s8.bf16 %v790_v19 }
 0x1d7   : > { %1377 = vmatpush1.bf16.msra.mxu1 %v1069_v26  ;;  %1337 = vmatprep.subr.bf16.mxu0 %v1010_v27  ;;  %v1174_v26 = vunpack.c.l.s8.bf16 %v822_v20  ;;  %v789_v27 = vld [vmem:[%s6841_s14 + $0x400] sm:$0xff] }
 0x1d8   : > { %1378 = vmatprep.subr.bf16.mxu1 %v1074_v28  ;;  %v821_v28 = vld [vmem:[%s6841_s14 + $0x500] sm:$0xff]  ;;  %v1113_v43 = vunpack.c.h.s8.bf16 %v789_v27 }
 0x1d9   : > { %v1177_v44 = vunpack.c.h.s8.bf16 %v821_v28 }
 0x1da   : > { %1338 = vmatpush1.bf16.msra.mxu0 %v1009_v31  ;;  %v646_v31 = vld [vmem:[%s6898_s15 + $0x48] sm:$0xff] }
 0x1db   : > { %1379 = vmatpush1.bf16.msra.mxu1 %v1073_v32  ;;  %1339 = vmatprep.subr.bf16.mxu0 %v1014_v33  ;;  %v648_v32 = vld [vmem:[%s6898_s15 + $0x58] sm:$0xff]  ;;  %v1109_v33 = vunpack.c.l.s8.bf16 %v789_v27 }
 0x1dc   : > { %1380 = vmatprep.subr.bf16.mxu1 %v1078_v34  ;;  %v1173_v34 = vunpack.c.l.s8.bf16 %v821_v28 }
 0x1de   : > { %1340 = vmatpush1.bf16.msra.mxu0 %v1013_v39  ;;  %v794_v39 = vld [vmem:[%s6841_s14 + $0x428] sm:$0xff] }
 0x1df   : > { %1381 = vmatpush1.bf16.msra.mxu1 %v1077_v40  ;;  %1341 = vmatprep.subr.bf16.mxu0 %v1018_v41  ;;  %v826_v40 = vld [vmem:[%s6841_s14 + $0x528] sm:$0xff]  ;;  %v6992_v41 = vpack.c.bf16 %v646_v31, %v646_v31 }
 0x1e0   : > { %1382 = vmatprep.subr.bf16.mxu1 %v1082_v42  ;;  %v6994_v42 = vpack.c.bf16 %v648_v32, %v648_v32  ;;  %v810_v31 = vld [vmem:[%s6841_s14 + $0x4a8] sm:$0xff] }
 0x1e1   : > { %v842_v32 = vld [vmem:[%s6841_s14 + $0x5a8] sm:$0xff] }
 0x1e2   : > { %1342 = vmatpush1.bf16.msra.mxu0 %v1017_v45  ;;  %v1118_v45 = vunpack.c.l.s8.bf16 %v794_v39 }
 0x1e3   : > { %1383 = vmatpush1.bf16.msra.mxu1 %v1081_v46  ;;  %1343 = vmatprep.subr.bf16.mxu0 %v1022_v49  ;;  %v1182_v46 = vunpack.c.l.s8.bf16 %v826_v40  ;;  %v793_v49 = vld [vmem:[%s6841_s14 + $0x420] sm:$0xff] }
 0x1e4   : > { %1384 = vmatprep.subr.bf16.mxu1 %v1086_v50  ;;  %v825_v50 = vld [vmem:[%s6841_s14 + $0x520] sm:$0xff]  ;;  %v1117_v51 = vunpack.c.l.s8.bf16 %v793_v49  ;;  %v1121_v59 = vunpack.c.h.s8.bf16 %v793_v49  ;;  %v814_v49 = vld [vmem:[%s6841_s14 + $0x4c8] sm:$0xff] }
 0x1e5   : > { %v1181_v52 = vunpack.c.l.s8.bf16 %v825_v50  ;;  %v1185_v60 = vunpack.c.h.s8.bf16 %v825_v50  ;;  %v846_v50 = vld [vmem:[%s6841_s14 + $0x5c8] sm:$0xff] }
 0x1e6   : > { %1344 = vmatpush1.bf16.msra.mxu0 %v1021_v53  ;;  %v1122_v53 = vunpack.c.h.s8.bf16 %v794_v39  ;;  %v809_v39 = vld [vmem:[%s6841_s14 + $0x4a0] sm:$0xff] }
 0x1e7   : > { %1385 = vmatpush1.bf16.msra.mxu1 %v1085_v54  ;;  %1345 = vmatprep.subr.bf16.mxu0 %v1026_v55  ;;  %v1186_v54 = vunpack.c.h.s8.bf16 %v826_v40  ;;  %v798_v55 = vld [vmem:[%s6841_s14 + $0x448] sm:$0xff]  ;;  %v841_v40 = vld [vmem:[%s6841_s14 + $0x5a0] sm:$0xff] }
 0x1e8   : > { %1386 = vmatprep.subr.bf16.mxu1 %v1090_v56  ;;  %v830_v56 = vld [vmem:[%s6841_s14 + $0x548] sm:$0xff] }
 0x1ea   : > { %1346 = vmatpush1.bf16.msra.mxu0 %v1025_v61  ;;  %v1126_v61 = vunpack.c.l.s8.bf16 %v798_v55 }
 0x1eb   : > { %1387 = vmatpush1.bf16.msra.mxu1 %v1089_v62  ;;  %1347 = vmatprep.subr.bf16.mxu0 %v1030_v63  ;;  %v1190_v62 = vunpack.c.l.s8.bf16 %v830_v56  ;;  %v797_v63 = vld [vmem:[%s6841_s14 + $0x440] sm:$0xff] }
 0x1ec   : > { %1388 = vmatprep.subr.bf16.mxu1 %v1094_v0  ;;  %v829_v0 = vld [vmem:[%s6841_s14 + $0x540] sm:$0xff]  ;;  %v1125_v1 = vunpack.c.l.s8.bf16 %v797_v63  ;;  %v1129_v7 = vunpack.c.h.s8.bf16 %v797_v63  ;;  %v818_v63 = vld [vmem:[%s6841_s14 + $0x4e8] sm:$0xff] }
 0x1ed   : > { %v1189_v2 = vunpack.c.l.s8.bf16 %v829_v0  ;;  %v1193_v8 = vunpack.c.h.s8.bf16 %v829_v0  ;;  %v850_v0 = vld [vmem:[%s6841_s14 + $0x5e8] sm:$0xff] }
 0x1ee   : > { %1348 = vmatpush1.bf16.msra.mxu0 %v1029_v3  ;;  %v1130_v3 = vunpack.c.h.s8.bf16 %v798_v55  ;;  %v813_v55 = vld [vmem:[%s6841_s14 + $0x4c0] sm:$0xff] }
 0x1ef   : > { %1389 = vmatpush1.bf16.msra.mxu1 %v1093_v4  ;;  %1349 = vmatprep.subr.bf16.mxu0 %v1034_v5  ;;  %v1194_v4 = vunpack.c.h.s8.bf16 %v830_v56  ;;  %v802_v5 = vld [vmem:[%s6841_s14 + $0x468] sm:$0xff]  ;;  %v845_v56 = vld [vmem:[%s6841_s14 + $0x5c0] sm:$0xff] }
 0x1f0   : > { %1390 = vmatprep.subr.bf16.mxu1 %v1098_v6  ;;  %v834_v6 = vld [vmem:[%s6841_s14 + $0x568] sm:$0xff] }
 0x1f2   : > { %1350 = vmatpush1.bf16.msra.mxu0 %v1033_v9  ;;  %v1134_v9 = vunpack.c.l.s8.bf16 %v802_v5 }
 0x1f3   : > { %1391 = vmatpush1.bf16.msra.mxu1 %v1097_v10  ;;  %1351 = vmatprep.subr.bf16.mxu0 %v1038_v11  ;;  %v1198_v10 = vunpack.c.l.s8.bf16 %v834_v6  ;;  %v801_v11 = vld [vmem:[%s6841_s14 + $0x460] sm:$0xff] }
 0x1f4   : > { %1392 = vmatprep.subr.bf16.mxu1 %v1102_v12  ;;  %v833_v12 = vld [vmem:[%s6841_s14 + $0x560] sm:$0xff]  ;;  %v1133_v13 = vunpack.c.l.s8.bf16 %v801_v11  ;;  %v1137_v19 = vunpack.c.h.s8.bf16 %v801_v11  ;;  %v664_v11 = vld [vmem:[%s6841_s14 + $0x18] sm:$0xff] }
 0x1f5   : > { %v1197_v14 = vunpack.c.l.s8.bf16 %v833_v12  ;;  %v1201_v20 = vunpack.c.h.s8.bf16 %v833_v12  ;;  %v696_v12 = vld [vmem:[%s6841_s14 + $0x118] sm:$0xff] }
 0x1f6   : > { %1352 = vmatpush1.bf16.msra.mxu0 %v1037_v15  ;;  %v1138_v15 = vunpack.c.h.s8.bf16 %v802_v5  ;;  %v817_v5 = vld [vmem:[%s6841_s14 + $0x4e0] sm:$0xff] }
 0x1f7   : > { %1393 = vmatpush1.bf16.msra.mxu1 %v1101_v16  ;;  %1353 = vmatprep.subr.bf16.mxu0 %v1042_v17  ;;  %v1202_v16 = vunpack.c.h.s8.bf16 %v834_v6  ;;  %v806_v17 = vld [vmem:[%s6841_s14 + $0x488] sm:$0xff]  ;;  %v849_v6 = vld [vmem:[%s6841_s14 + $0x5e0] sm:$0xff] }
 0x1f8   : > { %1394 = vmatprep.subr.bf16.mxu1 %v1106_v18  ;;  %v838_v18 = vld [vmem:[%s6841_s14 + $0x588] sm:$0xff]  ;;  %v1146_v27 = vunpack.c.h.s8.bf16 %v806_v17 }
 0x1f9   : > { %v1210_v28 = vunpack.c.h.s8.bf16 %v838_v18 }
 0x1fa   : > { %1354 = vmatpush1.bf16.msra.mxu0 %v1041_v21  ;;  %v1142_v21 = vunpack.c.l.s8.bf16 %v806_v17  ;;  %v856_v17 = vunpack.c.l.s8.bf16 %v664_v11 }
 0x1fb   : > { %1395 = vmatpush1.bf16.msra.mxu1 %v1105_v22  ;;  %1405 = vmatprep.subr.bf16.mxu0 %v1110_v25  ;;  %v1206_v22 = vunpack.c.l.s8.bf16 %v838_v18  ;;  %v1141_v25 = vunpack.c.l.s8.bf16 %v805_v23  ;;  %v920_v18 = vunpack.c.l.s8.bf16 %v696_v12 }
 0x1fc   : > { %1446 = vmatprep.subr.bf16.mxu1 %v1174_v26  ;;  %v1205_v26 = vunpack.c.l.s8.bf16 %v837_v24 }
 0x1fd   : > { %1356 = vmatmul.mubr.bf16.vlgmr.msra.gmra.mrb[4].mxu0 %v6984_v29 }
 0x1fe   : > { %1397 = vmatmul.mubr.bf16.vlgmr.msra.gmra.mrb[4].mxu1 %v6986_v30  ;;  %1406 = vmatpush1.bf16.msra.mxu0 %v1109_v33  ;;  %v1145_v33 = vunpack.c.h.s8.bf16 %v805_v23 }
 0x1ff   : > { %1447 = vmatpush1.bf16.msra.mxu1 %v1173_v34  ;;  %1407 = vmatprep.subr.bf16.mxu0 %v1114_v35  ;;  %v1209_v34 = vunpack.c.h.s8.bf16 %v837_v24  ;;  %v1150_v35 = vunpack.c.l.s8.bf16 %v810_v31 }
 0x200   : > { %1448 = vmatprep.subr.bf16.mxu1 %v1178_v36  ;;  %1437 = vmatprep.mubr.bf16.mxu0 %v6992_v41  ;;  %v1214_v36 = vunpack.c.l.s8.bf16 %v842_v32 }
 0x201   : > { %1478 = vmatprep.mubr.bf16.mxu1 %v6994_v42 }
 0x202   : > { %1408 = vmatpush1.bf16.msra.mxu0 %v1113_v43  ;;  %v1149_v43 = vunpack.c.l.s8.bf16 %v809_v39 }
 0x203   : > { %1449 = vmatpush1.bf16.msra.mxu1 %v1177_v44  ;;  %1409 = vmatprep.subr.bf16.mxu0 %v1118_v45  ;;  %v1213_v44 = vunpack.c.l.s8.bf16 %v841_v40  ;;  %v1154_v45 = vunpack.c.h.s8.bf16 %v810_v31 }
 0x204   : > { %1450 = vmatprep.subr.bf16.mxu1 %v1182_v46  ;;  %v1218_v46 = vunpack.c.h.s8.bf16 %v842_v32 }
 0x206   : > { %1410 = vmatpush1.bf16.msra.mxu0 %v1117_v51  ;;  %v1153_v51 = vunpack.c.h.s8.bf16 %v809_v39 }
 0x207   : > { %1451 = vmatpush1.bf16.msra.mxu1 %v1181_v52  ;;  %1411 = vmatprep.subr.bf16.mxu0 %v1122_v53  ;;  %v1217_v52 = vunpack.c.h.s8.bf16 %v841_v40  ;;  %v1158_v53 = vunpack.c.l.s8.bf16 %v814_v49 }
 0x208   : > { %1452 = vmatprep.subr.bf16.mxu1 %v1186_v54  ;;  %v1222_v54 = vunpack.c.l.s8.bf16 %v846_v50 }
 0x20a   : > { %1412 = vmatpush1.bf16.msra.mxu0 %v1121_v59  ;;  %v1157_v59 = vunpack.c.l.s8.bf16 %v813_v55 }
 0x20b   : > { %1453 = vmatpush1.bf16.msra.mxu1 %v1185_v60  ;;  %1413 = vmatprep.subr.bf16.mxu0 %v1126_v61  ;;  %v1221_v60 = vunpack.c.l.s8.bf16 %v845_v56  ;;  %v1162_v61 = vunpack.c.h.s8.bf16 %v814_v49 }
 0x20c   : > { %1454 = vmatprep.subr.bf16.mxu1 %v1190_v62  ;;  %v1226_v62 = vunpack.c.h.s8.bf16 %v846_v50 }
 0x20e   : > { %1414 = vmatpush1.bf16.msra.mxu0 %v1125_v1  ;;  %v1161_v1 = vunpack.c.h.s8.bf16 %v813_v55 }
 0x20f   : > { %1455 = vmatpush1.bf16.msra.mxu1 %v1189_v2  ;;  %1415 = vmatprep.subr.bf16.mxu0 %v1130_v3  ;;  %v1225_v2 = vunpack.c.h.s8.bf16 %v845_v56  ;;  %v1166_v3 = vunpack.c.l.s8.bf16 %v818_v63 }
 0x210   : > { %1456 = vmatprep.subr.bf16.mxu1 %v1194_v4  ;;  %v1230_v4 = vunpack.c.l.s8.bf16 %v850_v0 }
 0x212   : > { %1416 = vmatpush1.bf16.msra.mxu0 %v1129_v7  ;;  %v1165_v7 = vunpack.c.l.s8.bf16 %v817_v5 }
 0x213   : > { %1457 = vmatpush1.bf16.msra.mxu1 %v1193_v8  ;;  %1417 = vmatprep.subr.bf16.mxu0 %v1134_v9  ;;  %v1229_v8 = vunpack.c.l.s8.bf16 %v849_v6  ;;  %v1170_v9 = vunpack.c.h.s8.bf16 %v818_v63 }
 0x214   : > { %1458 = vmatprep.subr.bf16.mxu1 %v1198_v10  ;;  %v1234_v10 = vunpack.c.h.s8.bf16 %v850_v0 }
 0x216   : > { %1418 = vmatpush1.bf16.msra.mxu0 %v1133_v13  ;;  %v1169_v13 = vunpack.c.h.s8.bf16 %v817_v5 }
 0x217   : > { %1459 = vmatpush1.bf16.msra.mxu1 %v1197_v14  ;;  %1419 = vmatprep.subr.bf16.mxu0 %v1138_v15  ;;  %v1233_v14 = vunpack.c.h.s8.bf16 %v849_v6  ;;  %v645_v15 = vld [vmem:[%s6898_s15 + $0x40] sm:$0xff] }
 0x218   : > { %1460 = vmatprep.subr.bf16.mxu1 %v1202_v16  ;;  %v647_v16 = vld [vmem:[%s6898_s15 + $0x50] sm:$0xff] }
 0x21a   : > { %1420 = vmatpush1.bf16.msra.mxu0 %v1137_v19  ;;  %v663_v19 = vld [vmem:[%s6841_s14 + $0x10] sm:$0xff] }
 0x21b   : > { %1461 = vmatpush1.bf16.msra.mxu1 %v1201_v20  ;;  %1421 = vmatprep.subr.bf16.mxu0 %v1142_v21  ;;  %v695_v20 = vld [vmem:[%s6841_s14 + $0x110] sm:$0xff]  ;;  %v7032_v21 = vpack.c.bf16 %v645_v15, %v645_v15  ;;  %v855_v23 = vunpack.c.l.s8.bf16 %v663_v19  ;;  %v859_v31 = vunpack.c.h.s8.bf16 %v663_v19  ;;  %v684_v19 = vld [vmem:[%s6841_s14 + $0xb8] sm:$0xff] }
 0x21c   : > { %1462 = vmatprep.subr.bf16.mxu1 %v1206_v22  ;;  %v7034_v22 = vpack.c.bf16 %v647_v16, %v647_v16  ;;  %v919_v24 = vunpack.c.l.s8.bf16 %v695_v20  ;;  %v923_v32 = vunpack.c.h.s8.bf16 %v695_v20  ;;  %v716_v20 = vld [vmem:[%s6841_s14 + $0x1b8] sm:$0xff] }
 0x21e   : > { %1422 = vmatpush1.bf16.msra.mxu0 %v1141_v25  ;;  %v860_v25 = vunpack.c.h.s8.bf16 %v664_v11 }
 0x21f   : > { %1463 = vmatpush1.bf16.msra.mxu1 %v1205_v26  ;;  %1423 = vmatprep.subr.bf16.mxu0 %v1146_v27  ;;  %v924_v26 = vunpack.c.h.s8.bf16 %v696_v12  ;;  %v668_v27 = vld [vmem:[%s6841_s14 + $0x38] sm:$0xff] }
 0x220   : > { %1464 = vmatprep.subr.bf16.mxu1 %v1210_v28  ;;  %v700_v28 = vld [vmem:[%s6841_s14 + $0x138] sm:$0xff] }
 0x222   : > { %1424 = vmatpush1.bf16.msra.mxu0 %v1145_v33  ;;  %v864_v33 = vunpack.c.l.s8.bf16 %v668_v27 }
 0x223   : > { %1465 = vmatpush1.bf16.msra.mxu1 %v1209_v34  ;;  %1425 = vmatprep.subr.bf16.mxu0 %v1150_v35  ;;  %v928_v34 = vunpack.c.l.s8.bf16 %v700_v28  ;;  %v667_v35 = vld [vmem:[%s6841_s14 + $0x30] sm:$0xff] }
 0x224   : > { %1466 = vmatprep.subr.bf16.mxu1 %v1214_v36  ;;  %v699_v36 = vld [vmem:[%s6841_s14 + $0x130] sm:$0xff]  ;;  %v863_v39 = vunpack.c.l.s8.bf16 %v667_v35  ;;  %v867_v49 = vunpack.c.h.s8.bf16 %v667_v35  ;;  %v688_v35 = vld [vmem:[%s6841_s14 + $0xd8] sm:$0xff] }
 0x225   : > { %v927_v40 = vunpack.c.l.s8.bf16 %v699_v36  ;;  %v931_v50 = vunpack.c.h.s8.bf16 %v699_v36  ;;  %v720_v36 = vld [vmem:[%s6841_s14 + $0x1d8] sm:$0xff] }
 0x226   : > { %1426 = vmatpush1.bf16.msra.mxu0 %v1149_v43  ;;  %v868_v43 = vunpack.c.h.s8.bf16 %v668_v27  ;;  %v683_v27 = vld [vmem:[%s6841_s14 + $0xb0] sm:$0xff] }
 0x227   : > { %1467 = vmatpush1.bf16.msra.mxu1 %v1213_v44  ;;  %1427 = vmatprep.subr.bf16.mxu0 %v1154_v45  ;;  %v932_v44 = vunpack.c.h.s8.bf16 %v700_v28  ;;  %v672_v45 = vld [vmem:[%s6841_s14 + $0x58] sm:$0xff]  ;;  %v715_v28 = vld [vmem:[%s6841_s14 + $0x1b0] sm:$0xff] }
 0x228   : > { %1468 = vmatprep.subr.bf16.mxu1 %v1218_v46  ;;  %v704_v46 = vld [vmem:[%s6841_s14 + $0x158] sm:$0xff]  ;;  %v876_v55 = vunpack.c.h.s8.bf16 %v672_v45 }
 0x229   : > { %v940_v56 = vunpack.c.h.s8.bf16 %v704_v46 }
 0x22a   : > { %1428 = vmatpush1.bf16.msra.mxu0 %v1153_v51  ;;  %v671_v51 = vld [vmem:[%s6841_s14 + $0x50] sm:$0xff] }
 0x22b   : > { %1469 = vmatpush1.bf16.msra.mxu1 %v1217_v52  ;;  %1429 = vmatprep.subr.bf16.mxu0 %v1158_v53  ;;  %v703_v52 = vld [vmem:[%s6841_s14 + $0x150] sm:$0xff]  ;;  %v871_v53 = vunpack.c.l.s8.bf16 %v671_v51 }
 0x22c   : > { %1470 = vmatprep.subr.bf16.mxu1 %v1222_v54  ;;  %v935_v54 = vunpack.c.l.s8.bf16 %v703_v52 }
 0x22e   : > { %1430 = vmatpush1.bf16.msra.mxu0 %v1157_v59  ;;  %v676_v59 = vld [vmem:[%s6841_s14 + $0x78] sm:$0xff] }
 0x22f   : > { %1471 = vmatpush1.bf16.msra.mxu1 %v1221_v60  ;;  %1431 = vmatprep.subr.bf16.mxu0 %v1162_v61  ;;  %v708_v60 = vld [vmem:[%s6841_s14 + $0x178] sm:$0xff]  ;;  %v875_v61 = vunpack.c.h.s8.bf16 %v671_v51  ;;  %v880_v63 = vunpack.c.l.s8.bf16 %v676_v59  ;;  %v884_v5 = vunpack.c.h.s8.bf16 %v676_v59  ;;  %v691_v59 = vld [vmem:[%s6841_s14 + $0xf0] sm:$0xff] }
 0x230   : > { %1472 = vmatprep.subr.bf16.mxu1 %v1226_v62  ;;  %v939_v62 = vunpack.c.h.s8.bf16 %v703_v52  ;;  %v944_v0 = vunpack.c.l.s8.bf16 %v708_v60  ;;  %v948_v6 = vunpack.c.h.s8.bf16 %v708_v60  ;;  %v692_v51 = vld [vmem:[%s6841_s14 + $0xf8] sm:$0xff]  ;;  %v723_v60 = vld [vmem:[%s6841_s14 + $0x1f0] sm:$0xff] }
 0x231   : > { %v724_v52 = vld [vmem:[%s6841_s14 + $0x1f8] sm:$0xff] }
 0x232   : > { %1432 = vmatpush1.bf16.msra.mxu0 %v1161_v1  ;;  %v675_v1 = vld [vmem:[%s6841_s14 + $0x70] sm:$0xff] }
 0x233   : > { %1473 = vmatpush1.bf16.msra.mxu1 %v1225_v2  ;;  %1433 = vmatprep.subr.bf16.mxu0 %v1166_v3  ;;  %v707_v2 = vld [vmem:[%s6841_s14 + $0x170] sm:$0xff]  ;;  %v879_v3 = vunpack.c.l.s8.bf16 %v675_v1 }
 0x234   : > { %1474 = vmatprep.subr.bf16.mxu1 %v1230_v4  ;;  %v943_v4 = vunpack.c.l.s8.bf16 %v707_v2 }
 0x236   : > { %1434 = vmatpush1.bf16.msra.mxu0 %v1165_v7  ;;  %v680_v7 = vld [vmem:[%s6841_s14 + $0x98] sm:$0xff] }
 0x237   : > { %1475 = vmatpush1.bf16.msra.mxu1 %v1229_v8  ;;  %1435 = vmatprep.subr.bf16.mxu0 %v1170_v9  ;;  %v712_v8 = vld [vmem:[%s6841_s14 + $0x198] sm:$0xff]  ;;  %v883_v9 = vunpack.c.h.s8.bf16 %v675_v1  ;;  %v888_v11 = vunpack.c.l.s8.bf16 %v680_v7 }
 0x238   : > { %1476 = vmatprep.subr.bf16.mxu1 %v1234_v10  ;;  %v947_v10 = vunpack.c.h.s8.bf16 %v707_v2  ;;  %v952_v12 = vunpack.c.l.s8.bf16 %v712_v8  ;;  %v728_v1 = vld [vmem:[%s6841_s14 + $0x218] sm:$0xff] }
 0x239   : > { %v760_v2 = vld [vmem:[%s6841_s14 + $0x318] sm:$0xff] }
 0x23a   : > { %1436 = vmatpush1.bf16.msra.mxu0 %v1169_v13  ;;  %v679_v13 = vld [vmem:[%s6841_s14 + $0x90] sm:$0xff] }
 0x23b   : > { %1477 = vmatpush1.bf16.msra.mxu1 %v1233_v14  ;;  %1487 = vmatprep.subr.bf16.mxu0 %v856_v17  ;;  %v711_v14 = vld [vmem:[%s6841_s14 + $0x190] sm:$0xff]  ;;  %v887_v15 = vunpack.c.l.s8.bf16 %v679_v13  ;;  %v892_v17 = vunpack.c.h.s8.bf16 %v680_v7 }
 0x23c   : > { %1528 = vmatprep.subr.bf16.mxu1 %v920_v18  ;;  %v951_v16 = vunpack.c.l.s8.bf16 %v711_v14  ;;  %v956_v18 = vunpack.c.h.s8.bf16 %v712_v8  ;;  %v727_v7 = vld [vmem:[%s6841_s14 + $0x210] sm:$0xff] }
 0x23d   : > { %1438 = vmatmul.mubr.bf16.vlgmr.msra.gmra.mrb[8].mxu0 %v7032_v21  ;;  %v759_v8 = vld [vmem:[%s6841_s14 + $0x310] sm:$0xff] }
 0x23e   : > { %1479 = vmatmul.mubr.bf16.vlgmr.msra.gmra.mrb[8].mxu1 %v7034_v22  ;;  %1488 = vmatpush1.bf16.msra.mxu0 %v855_v23  ;;  %v891_v23 = vunpack.c.h.s8.bf16 %v679_v13  ;;  %v732_v13 = vld [vmem:[%s6841_s14 + $0x238] sm:$0xff] }
 0x23f   : > { %1529 = vmatpush1.bf16.msra.mxu1 %v919_v24  ;;  %1489 = vmatprep.subr.bf16.mxu0 %v860_v25  ;;  %v955_v24 = vunpack.c.h.s8.bf16 %v711_v14  ;;  %v896_v25 = vunpack.c.l.s8.bf16 %v684_v19  ;;  %v764_v14 = vld [vmem:[%s6841_s14 + $0x338] sm:$0xff] }
 0x240   : > { %1530 = vmatprep.subr.bf16.mxu1 %v924_v26  ;;  %1519 = vmatprep.mubr.bf16.mxu0 %v6904_v37  ;;  %v872_v37 = vunpack.c.l.s8.bf16 %v672_v45  ;;  %v960_v26 = vunpack.c.l.s8.bf16 %v716_v20  ;;  %v687_v45 = vld [vmem:[%s6841_s14 + $0xd0] sm:$0xff] }
 0x241   : > { %1560 = vmatprep.mubr.bf16.mxu1 %v6906_v38  ;;  %v936_v38 = vunpack.c.l.s8.bf16 %v704_v46  ;;  %v719_v46 = vld [vmem:[%s6841_s14 + $0x1d0] sm:$0xff] }
 0x242   : > { %1490 = vmatpush1.bf16.msra.mxu0 %v859_v31  ;;  %v895_v31 = vunpack.c.l.s8.bf16 %v683_v27 }
 0x243   : > { %1531 = vmatpush1.bf16.msra.mxu1 %v923_v32  ;;  %1491 = vmatprep.subr.bf16.mxu0 %v864_v33  ;;  %v959_v32 = vunpack.c.l.s8.bf16 %v715_v28  ;;  %v900_v33 = vunpack.c.h.s8.bf16 %v684_v19  ;;  %v731_v19 = vld [vmem:[%s6841_s14 + $0x230] sm:$0xff] }
 0x244   : > { %1532 = vmatprep.subr.bf16.mxu1 %v928_v34  ;;  %v964_v34 = vunpack.c.h.s8.bf16 %v716_v20  ;;  %v763_v20 = vld [vmem:[%s6841_s14 + $0x330] sm:$0xff] }
 0x246   : > { %1492 = vmatpush1.bf16.msra.mxu0 %v863_v39  ;;  %v899_v39 = vunpack.c.h.s8.bf16 %v683_v27  ;;  %v995_v27 = vunpack.c.h.s8.bf16 %v731_v19 }
 0x247   : > { %1533 = vmatpush1.bf16.msra.mxu1 %v927_v40  ;;  %1493 = vmatprep.subr.bf16.mxu0 %v868_v43  ;;  %v963_v40 = vunpack.c.h.s8.bf16 %v715_v28  ;;  %v904_v43 = vunpack.c.l.s8.bf16 %v688_v35  ;;  %v1059_v28 = vunpack.c.h.s8.bf16 %v763_v20 }
 0x248   : > { %1534 = vmatprep.subr.bf16.mxu1 %v932_v44  ;;  %v968_v44 = vunpack.c.l.s8.bf16 %v720_v36 }
 0x24a   : > { %1494 = vmatpush1.bf16.msra.mxu0 %v867_v49  ;;  %v903_v49 = vunpack.c.l.s8.bf16 %v687_v45 }
 0x24b   : > { %1535 = vmatpush1.bf16.msra.mxu1 %v931_v50  ;;  %1495 = vmatprep.subr.bf16.mxu0 %v872_v37  ;;  %v967_v50 = vunpack.c.l.s8.bf16 %v719_v46  ;;  %v908_v37 = vunpack.c.h.s8.bf16 %v688_v35 }
 0x24c   : > { %1536 = vmatprep.subr.bf16.mxu1 %v936_v38  ;;  %v972_v38 = vunpack.c.h.s8.bf16 %v720_v36 }
 0x24e   : > { %1496 = vmatpush1.bf16.msra.mxu0 %v871_v53  ;;  %v907_v53 = vunpack.c.h.s8.bf16 %v687_v45 }
 0x24f   : > { %1537 = vmatpush1.bf16.msra.mxu1 %v935_v54  ;;  %1497 = vmatprep.subr.bf16.mxu0 %v876_v55  ;;  %v971_v54 = vunpack.c.h.s8.bf16 %v719_v46  ;;  %v912_v55 = vunpack.c.l.s8.bf16 %v692_v51 }
 0x250   : > { %1538 = vmatprep.subr.bf16.mxu1 %v940_v56  ;;  %v976_v56 = vunpack.c.l.s8.bf16 %v724_v52 }
 0x252   : > { %1498 = vmatpush1.bf16.msra.mxu0 %v875_v61  ;;  %v911_v61 = vunpack.c.l.s8.bf16 %v691_v59 }
 0x253   : > { %1539 = vmatpush1.bf16.msra.mxu1 %v939_v62  ;;  %1499 = vmatprep.subr.bf16.mxu0 %v880_v63  ;;  %v975_v62 = vunpack.c.l.s8.bf16 %v723_v60  ;;  %v916_v63 = vunpack.c.h.s8.bf16 %v692_v51 }
 0x254   : > { %1540 = vmatprep.subr.bf16.mxu1 %v944_v0  ;;  %v980_v0 = vunpack.c.h.s8.bf16 %v724_v52 }
 0x256   : > { %1500 = vmatpush1.bf16.msra.mxu0 %v879_v3  ;;  %v915_v3 = vunpack.c.h.s8.bf16 %v691_v59 }
 0x257   : > { %1541 = vmatpush1.bf16.msra.mxu1 %v943_v4  ;;  %1501 = vmatprep.subr.bf16.mxu0 %v884_v5  ;;  %v979_v4 = vunpack.c.h.s8.bf16 %v723_v60  ;;  %v984_v5 = vunpack.c.l.s8.bf16 %v728_v1 }
 0x258   : > { %1542 = vmatprep.subr.bf16.mxu1 %v948_v6  ;;  %v1048_v6 = vunpack.c.l.s8.bf16 %v760_v2 }
 0x25a   : > { %1502 = vmatpush1.bf16.msra.mxu0 %v883_v9  ;;  %v983_v9 = vunpack.c.l.s8.bf16 %v727_v7 }
 0x25b   : > { %1543 = vmatpush1.bf16.msra.mxu1 %v947_v10  ;;  %1503 = vmatprep.subr.bf16.mxu0 %v888_v11  ;;  %v1047_v10 = vunpack.c.l.s8.bf16 %v759_v8  ;;  %v988_v11 = vunpack.c.h.s8.bf16 %v728_v1  ;;  %v744_v1 = vld [vmem:[%s6841_s14 + $0x298] sm:$0xff] }
 0x25c   : > { %1544 = vmatprep.subr.bf16.mxu1 %v952_v12  ;;  %v1052_v12 = vunpack.c.h.s8.bf16 %v760_v2  ;;  %v776_v2 = vld [vmem:[%s6841_s14 + $0x398] sm:$0xff] }
 0x25e   : > { %1504 = vmatpush1.bf16.msra.mxu0 %v887_v15  ;;  %v987_v15 = vunpack.c.h.s8.bf16 %v727_v7  ;;  %v743_v7 = vld [vmem:[%s6841_s14 + $0x290] sm:$0xff] }
 0x25f   : > { %1545 = vmatpush1.bf16.msra.mxu1 %v951_v16  ;;  %1505 = vmatprep.subr.bf16.mxu0 %v892_v17  ;;  %v1051_v16 = vunpack.c.h.s8.bf16 %v759_v8  ;;  %v992_v17 = vunpack.c.l.s8.bf16 %v732_v13  ;;  %v775_v8 = vld [vmem:[%s6841_s14 + $0x390] sm:$0xff] }
 0x260   : > { %1546 = vmatprep.subr.bf16.mxu1 %v956_v18  ;;  %v1056_v18 = vunpack.c.l.s8.bf16 %v764_v14 }
 0x262   : > { %1506 = vmatpush1.bf16.msra.mxu0 %v891_v23  ;;  %v996_v23 = vunpack.c.h.s8.bf16 %v732_v13  ;;  %v748_v13 = vld [vmem:[%s6841_s14 + $0x2b8] sm:$0xff] }
 0x263   : > { %1547 = vmatpush1.bf16.msra.mxu1 %v955_v24  ;;  %1507 = vmatprep.subr.bf16.mxu0 %v896_v25  ;;  %v1060_v24 = vunpack.c.h.s8.bf16 %v764_v14  ;;  %v736_v25 = vld [vmem:[%s6841_s14 + $0x258] sm:$0xff] }
 0x264   : > { %1548 = vmatprep.subr.bf16.mxu1 %v960_v26  ;;  %v768_v26 = vld [vmem:[%s6841_s14 + $0x358] sm:$0xff]  ;;  %v1004_v35 = vunpack.c.h.s8.bf16 %v736_v25 }
 0x265   : > { %v1068_v36 = vunpack.c.h.s8.bf16 %v768_v26  ;;  %v780_v14 = vld [vmem:[%s6841_s14 + $0x3b8] sm:$0xff] }
 0x266   : > { %1508 = vmatpush1.bf16.msra.mxu0 %v895_v31  ;;  %v735_v31 = vld [vmem:[%s6841_s14 + $0x250] sm:$0xff] }
 0x267   : > { %1549 = vmatpush1.bf16.msra.mxu1 %v959_v32  ;;  %1509 = vmatprep.subr.bf16.mxu0 %v900_v33  ;;  %v767_v32 = vld [vmem:[%s6841_s14 + $0x350] sm:$0xff]  ;;  %v999_v33 = vunpack.c.l.s8.bf16 %v735_v31 }
 0x268   : > { %1550 = vmatprep.subr.bf16.mxu1 %v964_v34  ;;  %v1063_v34 = vunpack.c.l.s8.bf16 %v767_v32 }
 0x26a   : > { %1510 = vmatpush1.bf16.msra.mxu0 %v899_v39  ;;  %v740_v39 = vld [vmem:[%s6841_s14 + $0x278] sm:$0xff] }
 0x26b   : > { %1551 = vmatpush1.bf16.msra.mxu1 %v963_v40  ;;  %1511 = vmatprep.subr.bf16.mxu0 %v904_v43  ;;  %v772_v40 = vld [vmem:[%s6841_s14 + $0x378] sm:$0xff]  ;;  %v1003_v43 = vunpack.c.h.s8.bf16 %v735_v31  ;;  %v1008_v45 = vunpack.c.l.s8.bf16 %v740_v39  ;;  %v751_v31 = vld [vmem:[%s6841_s14 + $0x2d0] sm:$0xff] }
 0x26c   : > { %1552 = vmatprep.subr.bf16.mxu1 %v968_v44  ;;  %v1067_v44 = vunpack.c.h.s8.bf16 %v767_v32  ;;  %v1072_v46 = vunpack.c.l.s8.bf16 %v772_v40  ;;  %v783_v32 = vld [vmem:[%s6841_s14 + $0x3d0] sm:$0xff] }
 0x26e   : > { %1512 = vmatpush1.bf16.msra.mxu0 %v903_v49  ;;  %v739_v49 = vld [vmem:[%s6841_s14 + $0x270] sm:$0xff] }
 0x26f   : > { %1553 = vmatpush1.bf16.msra.mxu1 %v967_v50  ;;  %1513 = vmatprep.subr.bf16.mxu0 %v908_v37  ;;  %v771_v50 = vld [vmem:[%s6841_s14 + $0x370] sm:$0xff]  ;;  %v1007_v59 = vunpack.c.l.s8.bf16 %v739_v49 }
 0x270   : > { %1554 = vmatprep.subr.bf16.mxu1 %v972_v38  ;;  %v1071_v60 = vunpack.c.l.s8.bf16 %v771_v50 }
 0x272   : > { %1514 = vmatpush1.bf16.msra.mxu0 %v907_v53 }
 0x273   : > { %1555 = vmatpush1.bf16.msra.mxu1 %v971_v54  ;;  %1515 = vmatprep.subr.bf16.mxu0 %v912_v55 }
 0x274   : > { %1556 = vmatprep.subr.bf16.mxu1 %v976_v56 }
 0x276   : > { %1516 = vmatpush1.bf16.msra.mxu0 %v911_v61 }
 0x277   : > { %1557 = vmatpush1.bf16.msra.mxu1 %v975_v62  ;;  %1517 = vmatprep.subr.bf16.mxu0 %v916_v63  ;;  %v1012_v63 = vunpack.c.h.s8.bf16 %v740_v39  ;;  %v756_v39 = vld [vmem:[%s6841_s14 + $0x2f8] sm:$0xff] }
 0x278   : > { %1558 = vmatprep.subr.bf16.mxu1 %v980_v0  ;;  %v1076_v0 = vunpack.c.h.s8.bf16 %v772_v40  ;;  %v788_v40 = vld [vmem:[%s6841_s14 + $0x3f8] sm:$0xff] }
 0x27a   : > { %1518 = vmatpush1.bf16.msra.mxu0 %v915_v3  ;;  %v1011_v3 = vunpack.c.h.s8.bf16 %v739_v49  ;;  %v755_v49 = vld [vmem:[%s6841_s14 + $0x2f0] sm:$0xff] }
 0x27b   : > { %1559 = vmatpush1.bf16.msra.mxu1 %v979_v4  ;;  %1569 = vmatprep.subr.bf16.mxu0 %v984_v5  ;;  %v1075_v4 = vunpack.c.h.s8.bf16 %v771_v50  ;;  %v1016_v5 = vunpack.c.l.s8.bf16 %v744_v1  ;;  %v787_v50 = vld [vmem:[%s6841_s14 + $0x3f0] sm:$0xff] }
 0x27c   : > { %1610 = vmatprep.subr.bf16.mxu1 %v1048_v6  ;;  %v1080_v6 = vunpack.c.l.s8.bf16 %v776_v2 }
 0x27d   : > { %1520 = vmatmul.mubr.bf16.vlgmr.msra.gmra.mrb[12].mxu0 %v6936_v47  ;;  %v991_v47 = vunpack.c.l.s8.bf16 %v731_v19  ;;  %v747_v19 = vld [vmem:[%s6841_s14 + $0x2b0] sm:$0xff] }
 0x27e   : > { %1561 = vmatmul.mubr.bf16.vlgmr.msra.gmra.mrb[12].mxu1 %v6938_v48  ;;  %1570 = vmatpush1.bf16.msra.mxu0 %v983_v9  ;;  %v1055_v48 = vunpack.c.l.s8.bf16 %v763_v20  ;;  %v1015_v9 = vunpack.c.l.s8.bf16 %v743_v7  ;;  %v779_v20 = vld [vmem:[%s6841_s14 + $0x3b0] sm:$0xff] }
 0x27f   : > { %1611 = vmatpush1.bf16.msra.mxu1 %v1047_v10  ;;  %1571 = vmatprep.subr.bf16.mxu0 %v988_v11  ;;  %v1079_v10 = vunpack.c.l.s8.bf16 %v775_v8  ;;  %v1020_v11 = vunpack.c.h.s8.bf16 %v744_v1 }
 0x280   : > { %1612 = vmatprep.subr.bf16.mxu1 %v1052_v12  ;;  %1601 = vmatprep.mubr.bf16.mxu0 %v6944_v57  ;;  %v1000_v57 = vunpack.c.l.s8.bf16 %v736_v25  ;;  %v1084_v12 = vunpack.c.h.s8.bf16 %v776_v2  ;;  %v752_v25 = vld [vmem:[%s6841_s14 + $0x2d8] sm:$0xff] }
 0x281   : > { %1642 = vmatprep.mubr.bf16.mxu1 %v6946_v58  ;;  %v1064_v58 = vunpack.c.l.s8.bf16 %v768_v26  ;;  %v784_v26 = vld [vmem:[%s6841_s14 + $0x3d8] sm:$0xff] }
 0x282   : > { %1572 = vmatpush1.bf16.msra.mxu0 %v987_v15  ;;  %v1019_v15 = vunpack.c.h.s8.bf16 %v743_v7 }
 0x283   : > { %1613 = vmatpush1.bf16.msra.mxu1 %v1051_v16  ;;  %1573 = vmatprep.subr.bf16.mxu0 %v992_v17  ;;  %v1083_v16 = vunpack.c.h.s8.bf16 %v775_v8  ;;  %v1024_v17 = vunpack.c.l.s8.bf16 %v748_v13 }
 0x284   : > { %1614 = vmatprep.subr.bf16.mxu1 %v1056_v18  ;;  %v1088_v18 = vunpack.c.l.s8.bf16 %v780_v14 }
 0x286   : > { %1574 = vmatpush1.bf16.msra.mxu0 %v991_v47  ;;  %v1023_v47 = vunpack.c.l.s8.bf16 %v747_v19 }
 0x287   : > { %1615 = vmatpush1.bf16.msra.mxu1 %v1055_v48  ;;  %1575 = vmatprep.subr.bf16.mxu0 %v996_v23  ;;  %v1087_v48 = vunpack.c.l.s8.bf16 %v779_v20  ;;  %v1028_v23 = vunpack.c.h.s8.bf16 %v748_v13 }
 0x288   : > { %1616 = vmatprep.subr.bf16.mxu1 %v1060_v24  ;;  %v1092_v24 = vunpack.c.h.s8.bf16 %v780_v14 }
 0x28a   : > { %1576 = vmatpush1.bf16.msra.mxu0 %v995_v27  ;;  %v1027_v27 = vunpack.c.h.s8.bf16 %v747_v19  ;;  %v799_v19 = vld [vmem:[%s6841_s14 + $0x450] sm:$0xff] }
 0x28b   : > { %1617 = vmatpush1.bf16.msra.mxu1 %v1059_v28  ;;  %1577 = vmatprep.subr.bf16.mxu0 %v1000_v57  ;;  %v1091_v28 = vunpack.c.h.s8.bf16 %v779_v20  ;;  %v1032_v57 = vunpack.c.l.s8.bf16 %v752_v25  ;;  %v831_v20 = vld [vmem:[%s6841_s14 + $0x550] sm:$0xff] }
 0x28c   : > { %1618 = vmatprep.subr.bf16.mxu1 %v1064_v58  ;;  %v1096_v58 = vunpack.c.l.s8.bf16 %v784_v26 }
 0x28e   : > { %1578 = vmatpush1.bf16.msra.mxu0 %v999_v33  ;;  %v1031_v33 = vunpack.c.l.s8.bf16 %v751_v31 }
 0x28f   : > { %1619 = vmatpush1.bf16.msra.mxu1 %v1063_v34  ;;  %1579 = vmatprep.subr.bf16.mxu0 %v1004_v35  ;;  %v1095_v34 = vunpack.c.l.s8.bf16 %v783_v32  ;;  %v1036_v35 = vunpack.c.h.s8.bf16 %v752_v25  ;;  %v804_v25 = vld [vmem:[%s6841_s14 + $0x478] sm:$0xff] }
 0x290   : > { %1620 = vmatprep.subr.bf16.mxu1 %v1068_v36  ;;  %v1275_v37 = vpop.f32.mrb[0].mxu0  ;;  %v1100_v36 = vunpack.c.h.s8.bf16 %v784_v26  ;;  %v836_v26 = vld [vmem:[%s6841_s14 + $0x578] sm:$0xff] }
 0x291   : > { %v1316_v38 = vpop.f32.mrb[0].mxu1  ;;  %v1277_v52 = vpop.f32.mrb[1].mxu0 }
 0x292   : > { %v7088_v51 = vadd.f32 %v1316_v38, %v1275_v37  ;;  %v1318_v53 = vpop.f32.mrb[1].mxu1  ;;  %v1279_v55 = vpop.f32.mrb[2].mxu0  ;;  %1580 = vmatpush1.bf16.msra.mxu0 %v1003_v43  ;;  %v1035_v43 = vunpack.c.h.s8.bf16 %v751_v31  ;;  %v1039_v37 = vunpack.c.l.s8.bf16 %v755_v49  ;;  %v1103_v38 = vunpack.c.l.s8.bf16 %v787_v50  ;;  %v803_v31 = vld [vmem:[%s6841_s14 + $0x470] sm:$0xff] }
 0x293   : > { %v7090_v54 = vadd.f32 %v1318_v53, %v1277_v52  ;;  %v1320_v56 = vpop.f32.mrb[2].mxu1  ;;  %1621 = vmatpush1.bf16.msra.mxu1 %v1067_v44  ;;  %v1280_v61 = vpop.f32.mrb[3].mxu0  ;;  %1581 = vmatprep.subr.bf16.mxu0 %v1008_v45  ;;  %v1099_v44 = vunpack.c.h.s8.bf16 %v783_v32  ;;  %v1040_v45 = vunpack.c.l.s8.bf16 %v756_v39  ;;  %v1044_v52 = vunpack.c.h.s8.bf16 %v756_v39  ;;  %v792_v55 = vld [vmem:[%s6841_s14 + $0x418] sm:$0xff]  ;;  %v835_v32 = vld [vmem:[%s6841_s14 + $0x570] sm:$0xff] }
 0x294   : > { %v1321_v62 = vpop.f32.mrb[3].mxu1  ;;  %1622 = vmatprep.subr.bf16.mxu1 %v1072_v46  ;;  %v1104_v46 = vunpack.c.l.s8.bf16 %v788_v40  ;;  %v1108_v53 = vunpack.c.h.s8.bf16 %v788_v40  ;;  %v824_v56 = vld [vmem:[%s6841_s14 + $0x518] sm:$0xff]  ;;  %v1112_v61 = vunpack.c.l.s8.bf16 %v792_v55 }
 0x295   : > { %v1176_v62 = vunpack.c.l.s8.bf16 %v824_v56 }
 0x296   : > { %1582 = vmatpush1.bf16.msra.mxu0 %v1007_v59  ;;  %v1043_v59 = vunpack.c.h.s8.bf16 %v755_v49 }
 0x297   : > { %1623 = vmatpush1.bf16.msra.mxu1 %v1071_v60  ;;  %1583 = vmatprep.subr.bf16.mxu0 %v1012_v63  ;;  %v1107_v60 = vunpack.c.h.s8.bf16 %v787_v50  ;;  %v791_v63 = vld [vmem:[%s6841_s14 + $0x410] sm:$0xff] }
 0x298   : > { %1624 = vmatprep.subr.bf16.mxu1 %v1076_v0  ;;  %v823_v0 = vld [vmem:[%s6841_s14 + $0x510] sm:$0xff]  ;;  %v1111_v1 = vunpack.c.l.s8.bf16 %v791_v63  ;;  %v1115_v7 = vunpack.c.h.s8.bf16 %v791_v63 }
 0x299   : > { %v1175_v2 = vunpack.c.l.s8.bf16 %v823_v0  ;;  %v1179_v8 = vunpack.c.h.s8.bf16 %v823_v0 }
 0x29a   : > { %1584 = vmatpush1.bf16.msra.mxu0 %v1011_v3  ;;  %v1116_v3 = vunpack.c.h.s8.bf16 %v792_v55  ;;  %v1139_v55 = vunpack.c.h.s8.bf16 %v803_v31 }
 0x29b   : > { %1625 = vmatpush1.bf16.msra.mxu1 %v1075_v4  ;;  %1585 = vmatprep.subr.bf16.mxu0 %v1016_v5  ;;  %v1180_v4 = vunpack.c.h.s8.bf16 %v824_v56  ;;  %v796_v5 = vld [vmem:[%s6841_s14 + $0x438] sm:$0xff]  ;;  %v1203_v56 = vunpack.c.h.s8.bf16 %v835_v32 }
 0x29c   : > { %1626 = vmatprep.subr.bf16.mxu1 %v1080_v6  ;;  %v828_v6 = vld [vmem:[%s6841_s14 + $0x538] sm:$0xff]  ;;  %v1124_v13 = vunpack.c.h.s8.bf16 %v796_v5 }
 0x29d   : > { %v1188_v14 = vunpack.c.h.s8.bf16 %v828_v6 }
 0x29e   : > { %1586 = vmatpush1.bf16.msra.mxu0 %v1015_v9  ;;  %v1120_v9 = vunpack.c.l.s8.bf16 %v796_v5 }
 0x29f   : > { %1627 = vmatpush1.bf16.msra.mxu1 %v1079_v10  ;;  %1587 = vmatprep.subr.bf16.mxu0 %v1020_v11  ;;  %v1184_v10 = vunpack.c.l.s8.bf16 %v828_v6  ;;  %v795_v11 = vld [vmem:[%s6841_s14 + $0x430] sm:$0xff] }
 0x2a0   : > { %1628 = vmatprep.subr.bf16.mxu1 %v1084_v12  ;;  %v827_v12 = vld [vmem:[%s6841_s14 + $0x530] sm:$0xff] }
 0x2a2   : > { %1588 = vmatpush1.bf16.msra.mxu0 %v1019_v15  ;;  %v800_v15 = vld [vmem:[%s6841_s14 + $0x458] sm:$0xff] }
 0x2a3   : > { %1629 = vmatpush1.bf16.msra.mxu1 %v1083_v16  ;;  %1589 = vmatprep.subr.bf16.mxu0 %v1024_v17  ;;  %v832_v16 = vld [vmem:[%s6841_s14 + $0x558] sm:$0xff]  ;;  %v1123_v17 = vunpack.c.h.s8.bf16 %v795_v11 }
 0x2a4   : > { %1630 = vmatprep.subr.bf16.mxu1 %v1088_v18  ;;  %v1187_v18 = vunpack.c.h.s8.bf16 %v827_v12 }
 0x2a6   : > { %1590 = vmatpush1.bf16.msra.mxu0 %v1023_v47  ;;  %v1127_v47 = vunpack.c.l.s8.bf16 %v799_v19 }
 0x2a7   : > { %1631 = vmatpush1.bf16.msra.mxu1 %v1087_v48  ;;  %1591 = vmatprep.subr.bf16.mxu0 %v1028_v23  ;;  %v1191_v48 = vunpack.c.l.s8.bf16 %v831_v20  ;;  %v1132_v23 = vunpack.c.h.s8.bf16 %v800_v15 }
 0x2a8   : > { %1632 = vmatprep.subr.bf16.mxu1 %v1092_v24  ;;  %v1196_v24 = vunpack.c.h.s8.bf16 %v832_v16 }
 0x2aa   : > { %1592 = vmatpush1.bf16.msra.mxu0 %v1027_v27  ;;  %v1131_v27 = vunpack.c.h.s8.bf16 %v799_v19 }
 0x2ab   : > { %1633 = vmatpush1.bf16.msra.mxu1 %v1091_v28  ;;  %1593 = vmatprep.subr.bf16.mxu0 %v1032_v57  ;;  %v1195_v28 = vunpack.c.h.s8.bf16 %v831_v20  ;;  %v1136_v57 = vunpack.c.l.s8.bf16 %v804_v25 }
 0x2ac   : > { %1634 = vmatprep.subr.bf16.mxu1 %v1096_v58  ;;  %v1200_v58 = vunpack.c.l.s8.bf16 %v836_v26 }
 0x2ae   : > { %1594 = vmatpush1.bf16.msra.mxu0 %v1031_v33 }
 0x2af   : > { %1635 = vmatpush1.bf16.msra.mxu1 %v1095_v34  ;;  %1595 = vmatprep.subr.bf16.mxu0 %v1036_v35 }
 0x2b0   : > { %1636 = vmatprep.subr.bf16.mxu1 %v1100_v36 }
 0x2b2   : > { %1596 = vmatpush1.bf16.msra.mxu0 %v1035_v43 }
 0x2b3   : > { %1637 = vmatpush1.bf16.msra.mxu1 %v1099_v44  ;;  %1597 = vmatprep.subr.bf16.mxu0 %v1040_v45  ;;  %v1135_v45 = vunpack.c.l.s8.bf16 %v803_v31 }
 0x2b4   : > { %1638 = vmatprep.subr.bf16.mxu1 %v1104_v46  ;;  %v1199_v46 = vunpack.c.l.s8.bf16 %v835_v32 }
 0x2b6   : > { %1598 = vmatpush1.bf16.msra.mxu0 %v1039_v37 }
 0x2b7   : > { %1639 = vmatpush1.bf16.msra.mxu1 %v1103_v38  ;;  %1599 = vmatprep.subr.bf16.mxu0 %v1044_v52  ;;  %v1204_v38 = vunpack.c.h.s8.bf16 %v836_v26 }
 0x2b8   : > { %1640 = vmatprep.subr.bf16.mxu1 %v1108_v53  ;;  %v840_v53 = vld [vmem:[%s6841_s14 + $0x598] sm:$0xff] }
 0x2ba   : > { %1600 = vmatpush1.bf16.msra.mxu0 %v1043_v59 }
 0x2bb   : > { %1641 = vmatpush1.bf16.msra.mxu1 %v1107_v60  ;;  %1651 = vmatprep.subr.bf16.mxu0 %v1112_v61  ;;  %v1208_v60 = vunpack.c.l.s8.bf16 %v840_v53  ;;  %v807_v61 = vld [vmem:[%s6841_s14 + $0x490] sm:$0xff] }
 0x2bc   : > { %1692 = vmatprep.subr.bf16.mxu1 %v1176_v62  ;;  %v839_v62 = vld [vmem:[%s6841_s14 + $0x590] sm:$0xff]  ;;  %v1143_v63 = vunpack.c.l.s8.bf16 %v807_v61  ;;  %v1147_v5 = vunpack.c.h.s8.bf16 %v807_v61 }
 0x2bd   : > { %1602 = vmatmul.mubr.bf16.vlgmr.msra.gmra.mrb[16].mxu0 %v6984_v29  ;;  %v1119_v29 = vunpack.c.l.s8.bf16 %v795_v11  ;;  %v1207_v0 = vunpack.c.l.s8.bf16 %v839_v62  ;;  %v1211_v6 = vunpack.c.h.s8.bf16 %v839_v62 }
 0x2be   : > { %1643 = vmatmul.mubr.bf16.vlgmr.msra.gmra.mrb[16].mxu1 %v6986_v30  ;;  %1652 = vmatpush1.bf16.msra.mxu0 %v1111_v1  ;;  %v1183_v30 = vunpack.c.l.s8.bf16 %v827_v12 }
 0x2bf   : > { %1693 = vmatpush1.bf16.msra.mxu1 %v1175_v2  ;;  %1653 = vmatprep.subr.bf16.mxu0 %v1116_v3  ;;  %v1212_v2 = vunpack.c.h.s8.bf16 %v840_v53  ;;  %v812_v3 = vld [vmem:[%s6841_s14 + $0x4b8] sm:$0xff] }
 0x2c0   : > { %1694 = vmatprep.subr.bf16.mxu1 %v1180_v4  ;;  %1683 = vmatprep.mubr.bf16.mxu0 %v6992_v41  ;;  %v1128_v41 = vunpack.c.l.s8.bf16 %v800_v15  ;;  %v844_v4 = vld [vmem:[%s6841_s14 + $0x5b8] sm:$0xff] }
 0x2c1   : > { %1724 = vmatprep.mubr.bf16.mxu1 %v6994_v42  ;;  %v1192_v42 = vunpack.c.l.s8.bf16 %v832_v16 }
 0x2c2   : > { %1654 = vmatpush1.bf16.msra.mxu0 %v1115_v7  ;;  %v1152_v7 = vunpack.c.l.s8.bf16 %v812_v3 }
 0x2c3   : > { %1695 = vmatpush1.bf16.msra.mxu1 %v1179_v8  ;;  %1655 = vmatprep.subr.bf16.mxu0 %v1120_v9  ;;  %v1216_v8 = vunpack.c.l.s8.bf16 %v844_v4  ;;  %v811_v9 = vld [vmem:[%s6841_s14 + $0x4b0] sm:$0xff] }
 0x2c4   : > { %1696 = vmatprep.subr.bf16.mxu1 %v1184_v10  ;;  %v843_v10 = vld [vmem:[%s6841_s14 + $0x5b0] sm:$0xff]  ;;  %v1151_v11 = vunpack.c.l.s8.bf16 %v811_v9  ;;  %v1155_v15 = vunpack.c.h.s8.bf16 %v811_v9 }
 0x2c5   : > { %v1215_v12 = vunpack.c.l.s8.bf16 %v843_v10  ;;  %v1219_v16 = vunpack.c.h.s8.bf16 %v843_v10 }
 0x2c6   : > { %1656 = vmatpush1.bf16.msra.mxu0 %v1119_v29  ;;  %v1156_v29 = vunpack.c.h.s8.bf16 %v812_v3 }
 0x2c7   : > { %1697 = vmatpush1.bf16.msra.mxu1 %v1183_v30  ;;  %1657 = vmatprep.subr.bf16.mxu0 %v1124_v13  ;;  %v1220_v30 = vunpack.c.h.s8.bf16 %v844_v4  ;;  %v816_v13 = vld [vmem:[%s6841_s14 + $0x4d8] sm:$0xff] }
 0x2c8   : > { %1698 = vmatprep.subr.bf16.mxu1 %v1188_v14  ;;  %v848_v14 = vld [vmem:[%s6841_s14 + $0x5d8] sm:$0xff] }
 0x2ca   : > { %1658 = vmatpush1.bf16.msra.mxu0 %v1123_v17  ;;  %v1160_v17 = vunpack.c.l.s8.bf16 %v816_v13 }
 0x2cb   : > { %1699 = vmatpush1.bf16.msra.mxu1 %v1187_v18  ;;  %1659 = vmatprep.subr.bf16.mxu0 %v1128_v41  ;;  %v1224_v18 = vunpack.c.l.s8.bf16 %v848_v14  ;;  %v815_v41 = vld [vmem:[%s6841_s14 + $0x4d0] sm:$0xff] }
 0x2cc   : > { %1700 = vmatprep.subr.bf16.mxu1 %v1192_v42  ;;  %v847_v42 = vld [vmem:[%s6841_s14 + $0x5d0] sm:$0xff]  ;;  %v1159_v19 = vunpack.c.l.s8.bf16 %v815_v41 }
 0x2cd   : > { %v1223_v20 = vunpack.c.l.s8.bf16 %v847_v42  ;;  %v1227_v26 = vunpack.c.h.s8.bf16 %v847_v42 }
 0x2ce   : > { %1660 = vmatpush1.bf16.msra.mxu0 %v1127_v47  ;;  %v1164_v47 = vunpack.c.h.s8.bf16 %v816_v13 }
 0x2cf   : > { %1701 = vmatpush1.bf16.msra.mxu1 %v1191_v48  ;;  %1661 = vmatprep.subr.bf16.mxu0 %v1132_v23  ;;  %v1228_v48 = vunpack.c.h.s8.bf16 %v848_v14  ;;  %v820_v23 = vld [vmem:[%s6841_s14 + $0x4f8] sm:$0xff] }
 0x2d0   : > { %1702 = vmatprep.subr.bf16.mxu1 %v1196_v24  ;;  %v1357_v33 = vpop.f32.mrb[4].mxu0  ;;  %v852_v24 = vld [vmem:[%s6841_s14 + $0x5f8] sm:$0xff] }
 0x2d1   : > { %v1398_v34 = vpop.f32.mrb[4].mxu1  ;;  %v1358_v35 = vadd.f32 %v1357_v33, %v7088_v51  ;;  %v1359_v36 = vpop.f32.mrb[5].mxu0  ;;  %v1140_v51 = vunpack.c.h.s8.bf16 %v804_v25  ;;  %v1163_v25 = vunpack.c.h.s8.bf16 %v815_v41  ;;  %v1172_v33 = vunpack.c.h.s8.bf16 %v820_v23 }
 0x2d2   : > { %v1400_v39 = vpop.f32.mrb[5].mxu1  ;;  %v1360_v40 = vadd.f32 %v1359_v36, %v7090_v54  ;;  %v1361_v43 = vpop.f32.mrb[6].mxu0  ;;  %1662 = vmatpush1.bf16.msra.mxu0 %v1131_v27  ;;  %v808_v54 = vld [vmem:[%s6841_s14 + $0x498] sm:$0xff]  ;;  %v1168_v27 = vunpack.c.l.s8.bf16 %v820_v23 }
 0x2d3   : > { %v1402_v44 = vpop.f32.mrb[6].mxu1  ;;  %1703 = vmatpush1.bf16.msra.mxu1 %v1195_v28  ;;  %v7130_v49 = vadd.f32 %v1398_v34, %v1358_v35  ;;  %v1362_v50 = vpop.f32.mrb[7].mxu0  ;;  %1663 = vmatprep.subr.bf16.mxu0 %v1136_v57  ;;  %v1144_v59 = vunpack.c.l.s8.bf16 %v808_v54  ;;  %v1148_v1 = vunpack.c.h.s8.bf16 %v808_v54  ;;  %v1232_v28 = vunpack.c.l.s8.bf16 %v852_v24  ;;  %v819_v57 = vld [vmem:[%s6841_s14 + $0x4f0] sm:$0xff]  ;;  %v1238_v54 = vld [vmem:[#allocation2 + $0x8] sm:$0xff] }
 0x2d4   : > { %v1403_v37 = vpop.f32.mrb[7].mxu1  ;;  %1704 = vmatprep.subr.bf16.mxu1 %v1200_v58  ;;  %v7132_v52 = vadd.f32 %v1400_v39, %v1360_v40  ;;  %v851_v58 = vld [vmem:[%s6841_s14 + $0x5f0] sm:$0xff]  ;;  %v1167_v31 = vunpack.c.l.s8.bf16 %v819_v57  ;;  %v1236_v34 = vunpack.c.h.s8.bf16 %v852_v24  ;;  %v1171_v35 = vunpack.c.h.s8.bf16 %v819_v57 }
 0x2d5   : > { %v1231_v32 = vunpack.c.l.s8.bf16 %v851_v58  ;;  %v1235_v36 = vunpack.c.h.s8.bf16 %v851_v58 }
 0x2d6   : > { %1664 = vmatpush1.bf16.msra.mxu0 %v1135_v45 }
 0x2d7   : > { %1705 = vmatpush1.bf16.msra.mxu1 %v1199_v46  ;;  %1665 = vmatprep.subr.bf16.mxu0 %v1140_v51  ;;  %v1237_v46 = vld [vmem:[#allocation2] sm:$0xff] }
 0x2d8   : > { %1706 = vmatprep.subr.bf16.mxu1 %v1204_v38 }
 0x2da   : > { %1666 = vmatpush1.bf16.msra.mxu0 %v1139_v55 }
 0x2db   : > { %1707 = vmatpush1.bf16.msra.mxu1 %v1203_v56  ;;  %1667 = vmatprep.subr.bf16.mxu0 %v1144_v59 }
 0x2dc   : > { %1708 = vmatprep.subr.bf16.mxu1 %v1208_v60 }
 0x2de   : > { %1668 = vmatpush1.bf16.msra.mxu0 %v1143_v63 }
 0x2df   : > { %1709 = vmatpush1.bf16.msra.mxu1 %v1207_v0  ;;  %1669 = vmatprep.subr.bf16.mxu0 %v1148_v1 }
 0x2e0   : > { %1710 = vmatprep.subr.bf16.mxu1 %v1212_v2 }
 0x2e2   : > { %1670 = vmatpush1.bf16.msra.mxu0 %v1147_v5 }
 0x2e3   : > { %1711 = vmatpush1.bf16.msra.mxu1 %v1211_v6  ;;  %1671 = vmatprep.subr.bf16.mxu0 %v1152_v7 }
 0x2e4   : > { %1712 = vmatprep.subr.bf16.mxu1 %v1216_v8 }
 0x2e6   : > { %1672 = vmatpush1.bf16.msra.mxu0 %v1151_v11 }
 0x2e7   : > { %1713 = vmatpush1.bf16.msra.mxu1 %v1215_v12  ;;  %1673 = vmatprep.subr.bf16.mxu0 %v1156_v29 }
 0x2e8   : > { %1714 = vmatprep.subr.bf16.mxu1 %v1220_v30 }
 0x2ea   : > { %1674 = vmatpush1.bf16.msra.mxu0 %v1155_v15 }
 0x2eb   : > { %1715 = vmatpush1.bf16.msra.mxu1 %v1219_v16  ;;  %1675 = vmatprep.subr.bf16.mxu0 %v1160_v17 }
 0x2ec   : > { %1716 = vmatprep.subr.bf16.mxu1 %v1224_v18  ;;  %v1239_v18 = vld [vmem:[#allocation2 + $0x10] sm:$0xff] }
 0x2ee   : > { %1676 = vmatpush1.bf16.msra.mxu0 %v1159_v19 }
 0x2ef   : > { %1717 = vmatpush1.bf16.msra.mxu1 %v1223_v20  ;;  %1677 = vmatprep.subr.bf16.mxu0 %v1164_v47  ;;  %v1240_v47 = vld [vmem:[#allocation2 + $0x18] sm:$0xff] }
 0x2f0   : > { %1718 = vmatprep.subr.bf16.mxu1 %v1228_v48 }
 0x2f2   : > { %1678 = vmatpush1.bf16.msra.mxu0 %v1163_v25 }
 0x2f3   : > { %1719 = vmatpush1.bf16.msra.mxu1 %v1227_v26  ;;  %1679 = vmatprep.subr.bf16.mxu0 %v1168_v27 }
 0x2f4   : > { %1720 = vmatprep.subr.bf16.mxu1 %v1232_v28 }
 0x2f6   : > { %1680 = vmatpush1.bf16.msra.mxu0 %v1167_v31 }
 0x2f7   : > { %1721 = vmatpush1.bf16.msra.mxu1 %v1231_v32  ;;  %1681 = vmatprep.subr.bf16.mxu0 %v1172_v33 }
 0x2f8   : > { %1722 = vmatprep.subr.bf16.mxu1 %v1236_v34 }
 0x2fa   : > { %1682 = vmatpush1.bf16.msra.mxu0 %v1171_v35 }
 0x2fb   : > { %1723 = vmatpush1.bf16.msra.mxu1 %v1235_v36 }
 0x2fd   : > { %1684 = vmatmul.mubr.bf16.vlgmr.msra.gmra.mrb[20].mxu0 %v7032_v21 }
 0x2fe   : > { %1725 = vmatmul.mubr.bf16.vlgmr.msra.gmra.mrb[20].mxu1 %v7034_v22 }
 0x310   : > { %v1439_v39 = vpop.f32.mrb[8].mxu0 }
 0x311   : > { %v1480_v40 = vpop.f32.mrb[8].mxu1  ;;  %v1440_v43 = vadd.f32 %v1439_v39, %v7130_v49  ;;  %v1441_v44 = vpop.f32.mrb[9].mxu0 }
 0x312   : > { %v1482_v45 = vpop.f32.mrb[9].mxu1  ;;  %v1442_v50 = vadd.f32 %v1441_v44, %v7132_v52  ;;  %v1443_v37 = vpop.f32.mrb[10].mxu0 }
 0x313   : > { %v1484_v51 = vpop.f32.mrb[10].mxu1  ;;  %v1481_v38 = vadd.f32 %v1480_v40, %v1440_v43  ;;  %v1444_v53 = vpop.f32.mrb[11].mxu0 }
 0x314   : > { %v1485_v55 = vpop.f32.mrb[11].mxu1  ;;  %v1483_v56 = vadd.f32 %v1482_v45, %v1442_v50 }
 0x315   : > { %v1733_v59 = vadd.f32 %v1481_v38, %v1237_v46 }
 0x316   : > { %v1734_v21 = vadd.f32 %v1483_v56, %v1238_v54 }
 0x317   : > { %1737 = vst [vmem:[#allocation2] sm:$0xff] %v1733_v59 }
 0x318   : > { %1738 = vst [vmem:[#allocation2 + $0x8] sm:$0xff] %v1734_v21 }
 0x350   : > { %v1521_v22 = vpop.f32.mrb[12].mxu0 }
 0x351   : > { %v1562_v60 = vpop.f32.mrb[12].mxu1  ;;  %v1523_v49 = vpop.f32.mrb[13].mxu0 }
 0x352   : > { %v1563_v61 = vadd.f32 %v1562_v60, %v1521_v22  ;;  %v1564_v62 = vpop.f32.mrb[13].mxu1  ;;  %v1525_v0 = vpop.f32.mrb[14].mxu0 }
 0x353   : > { %v1565_v63 = vadd.f32 %v1564_v62, %v1523_v49  ;;  %v1566_v1 = vpop.f32.mrb[14].mxu1  ;;  %v1526_v52 = vpop.f32.mrb[15].mxu0 }
 0x354   : > { %v1567_v2 = vpop.f32.mrb[15].mxu1 }
 0x390   : > { %v1603_v3 = vpop.f32.mrb[16].mxu0 }
 0x391   : > { %v1644_v4 = vpop.f32.mrb[16].mxu1  ;;  %v1604_v5 = vadd.f32 %v1603_v3, %v1563_v61  ;;  %v1605_v6 = vpop.f32.mrb[17].mxu0 }
 0x392   : > { %v1646_v7 = vpop.f32.mrb[17].mxu1  ;;  %v1606_v8 = vadd.f32 %v1605_v6, %v1565_v63  ;;  %v1607_v9 = vpop.f32.mrb[18].mxu0 }
 0x393   : > { %v1648_v10 = vpop.f32.mrb[18].mxu1  ;;  %v1645_v11 = vadd.f32 %v1644_v4, %v1604_v5  ;;  %v1608_v12 = vpop.f32.mrb[19].mxu0 }
 0x394   : > { %v1649_v29 = vpop.f32.mrb[19].mxu1  ;;  %v1647_v30 = vadd.f32 %v1646_v7, %v1606_v8 }
 0x3d0   : > { %v1685_v13 = vpop.f32.mrb[20].mxu0 }
 0x3d1   : > { %v1726_v14 = vpop.f32.mrb[20].mxu1  ;;  %v1686_v15 = vadd.f32 %v1685_v13, %v1645_v11  ;;  %v1687_v16 = vpop.f32.mrb[21].mxu0 }
 0x3d2   : > { %v1728_v17 = vpop.f32.mrb[21].mxu1  ;;  %v1688_v41 = vadd.f32 %v1687_v16, %v1647_v30  ;;  %v1689_v42 = vpop.f32.mrb[22].mxu0 }
 0x3d3   : > { %v1730_v19 = vpop.f32.mrb[22].mxu1  ;;  %v1727_v20 = vadd.f32 %v1726_v14, %v1686_v15  ;;  %v1690_v48 = vpop.f32.mrb[23].mxu0 }
 0x3d4   : > { %v1731_v23 = vpop.f32.mrb[23].mxu1  ;;  %v1729_v24 = vadd.f32 %v1728_v17, %v1688_v41 }
 0x3d5   : > { %v1735_v25 = vadd.f32 %v1727_v20, %v1239_v18 }
 0x3d6   : > { %v1736_v26 = vadd.f32 %v1729_v24, %v1240_v47 }
 0x3d7   : > { %1739 = vst [vmem:[#allocation2 + $0x10] sm:$0xff] %v1735_v25 }
 0x3d8   : > { %1740 = vst [vmem:[#allocation2 + $0x18] sm:$0xff] %v1736_v26 }
 0x3d9 PF: > { %s8004_s14 = sld [smem:[#allocation33_spill]] }
 0x3df   : > { %p1741_p0 = scmp.eq.s32.totalorder %s8004_s14, 1 }
 0x3e1   : > { %p1742_p1 = pnand %p1741_p0, %p620_p5 }
 0x3e2   : > { %v1752_v27 = vlaneseq (!%p1742_p1)  ;;  %v6377_v28 = vmov (!%p1742_p1), 0.0   ;;  %v1750_v58 = vld [vmem:[#allocation8] sm:$0xf] (!%p1742_p1)  ;;  %v1776_v31 = vld [vmem:[#allocation10] sm:$0xf] (!%p1742_p1)  ;;  %v1747_v40 = vld [vmem:[#allocation2 + $0x8] sm:$0xff] (!%p1742_p1) }
 0x3e3   : > { %1745 = sbr.rel (%p1742_p1) target bundleno = 1833 (0x729), region = 124  ;;  %1875 = vmatprep.mubr.f32.mxu0 (!%p1742_p1), %v6377_v28  ;;  %1946 = vmatprep.mubr.f32.mxu1 (!%p1742_p1), %v6377_v28  ;;  %v6378_v32 = vmov (!%p1742_p1), 1983009808   ;;  %v1746_v43 = vld [vmem:[#allocation2] sm:$0xff] (!%p1742_p1)  ;;  %v1749_v51 = vld [vmem:[#allocation2 + $0x18] sm:$0xff] (!%p1742_p1)  ;;  %v1748_v38 = vld [vmem:[#allocation2 + $0x10] sm:$0xff] (!%p1742_p1) }
 0x3e4   : > { %v1753_v57 = vshrl.u32 (!%p1742_p1), %v1752_v27, 7  ;;  %v1964_v33 = vunpack.c.l.s4 (!%p1742_p1), %v6378_v32  ;;  %v1953_v59 = vld [vmem:[#allocation11] sm:$0xff] (!%p1742_p1)  ;;  %s8006_s1 = sld [smem:[#allocation37_spill]] (!%p1742_p1)  ;;  %vm1807_vm0 = vcmask (!%p1742_p1), 64512   ;;  %vm6379_vm1 = vmmov (!%p1742_p1), 0   ;;  %s8007_s24 = sld [smem:[#allocation38_spill]] (!%p1742_p1) }
 0x3e5   : > { %v1962_v8 = vcombine.high (!%p1742_p1), %v1953_v59, %v1953_v59  ;;  %v5590_v13 = vld [vmem:[#allocation13] ss:$0 sm:$0xff] (!%p1742_p1)  ;;  %vm2128_vm2 = vcmask (!%p1742_p1), 1041408   ;;  %vm2124_vm3 = vcmask (!%p1742_p1), 15360   ;;  %v6380_v18 = vmov (!%p1742_p1), 1   ;;  %s8008_s7 = sld [smem:[#allocation36_spill]] (!%p1742_p1) }
 0x3e6   : > { %v1758_v34 = vsub.s32 (!%p1742_p1), 1, %v1753_v57  ;;  %v1754_v35 = vsub.s32 (!%p1742_p1), 0, %v1753_v57  ;;  %v1766_v36 = vsub.s32 (!%p1742_p1), 3, %v1753_v57  ;;  %v1762_v39 = vsub.s32 (!%p1742_p1), 2, %v1753_v57  ;;  %5867 = vset.pattern.permute.xlu0 (!%p1742_p1), %v6380_v18 }
 0x3e7   : > { %v1965_v44 = vunpack.c.0.s8 (!%p1742_p1), %v1964_v33  ;;  %v6381_v20 = vmov (!%p1742_p1), 0  }
 0x3e8   : > { %v1759_v45 = vrot.slane (!%p1742_p1), %v1750_v58, %v1758_v34  ;;  %v1785_v46 = vrot.slane (!%p1742_p1), %v1776_v31, %v1758_v34  ;;  %v1755_v50 = vrot.slane (!%p1742_p1), %v1750_v58, %v1754_v35  ;;  %v1781_v37 = vrot.slane (!%p1742_p1), %v1776_v31, %v1754_v35 }
 0x3e9   : > { %v1767_v54 = vrot.slane (!%p1742_p1), %v1750_v58, %v1766_v36  ;;  %v1793_v53 = vrot.slane (!%p1742_p1), %v1776_v31, %v1766_v36  ;;  %v1763_v55 = vrot.slane (!%p1742_p1), %v1750_v58, %v1762_v39  ;;  %v1789_v56 = vrot.slane (!%p1742_p1), %v1776_v31, %v1762_v39 }
 0x3ea   : > { %v1773_v21 = vmul.f32 %v1759_v45, %v1747_v40  ;;  %v1772_v22 = vmul.f32 %v1755_v50, %v1746_v43  ;;  %v1968_v60 = vsub.s32 %v1965_v44, %v1753_v57  ;;  %v1806_v4 = vld [vmem:[%s8006_s1] sm:$0x3] }
 0x3eb   : > { %v1775_v61 = vmul.f32 %v1767_v54, %v1749_v51  ;;  %v1774_v49 = vmul.f32 %v1763_v55, %v1748_v38  ;;  %v2123_v17 = vld [vmem:[%s8007_s24] sm:$0xff]  ;;  %v2204_v23 = vld [vmem:[%s8008_s7 + $0x8] sm:$0xff]  ;;  %v2205_v24 = vld [vmem:[%s8008_s7 + $0x10] sm:$0xff] }
 0x3ec   : > { %v1799_v62 = vadd.f32 %v1785_v46, %v1773_v21  ;;  %v1798_v63 = vadd.f32 %v1781_v37, %v1772_v22  ;;  %v1969_v0 = vrot.slane %v1953_v59, %v1968_v60  ;;  %v1976_v9 = vrot.slane %v1962_v8, %v1968_v60  ;;  %v2203_v48 = vld [vmem:[%s8008_s7] sm:$0xff]  ;;  %v2206_v26 = vld [vmem:[%s8008_s7 + $0x18] sm:$0xff]  ;;  %v2208_v58 = vld [vmem:[%s8008_s7 + $0x28] sm:$0xff] }
 0x3ed   : > { %v1801_v1 = vadd.f32 %v1793_v53, %v1775_v61  ;;  %v1800_v52 = vadd.f32 %v1789_v56, %v1774_v49  ;;  %v2209_v33 = vld [vmem:[%s8008_s7 + $0x30] sm:$0xff]  ;;  %v2210_v36 = vld [vmem:[%s8008_s7 + $0x38] sm:$0xff]  ;;  %v2211_v43 = vld [vmem:[%s8008_s7 + $0x40] sm:$0xff] }
 0x3ee   : > { %v1803_v2 = vmax.f32 %v1799_v62, 0.0  ;;  %v1802_v3 = vmax.f32 %v1798_v63, 0.0  ;;  %v1977_v7 = vcombine.high %v1969_v0, %v1969_v0  ;;  %v1978_v10 = vcombine.high %v1976_v9, %v1976_v9  ;;  %v2212_v46 = vld [vmem:[%s8008_s7 + $0x48] sm:$0xff]  ;;  %v2213_v51 = vld [vmem:[%s8008_s7 + $0x50] sm:$0xff]  ;;  %v2214_v53 = vld [vmem:[%s8008_s7 + $0x58] sm:$0xff] }
 0x3ef   : > { %v1805_v5 = vmax.f32 %v1801_v1, 0.0  ;;  %v1804_v6 = vmax.f32 %v1800_v52, 0.0  ;;  %v2215_v59 = vld [vmem:[%s8008_s7 + $0x60] sm:$0xff]  ;;  %v2216_v60 = vld [vmem:[%s8008_s7 + $0x68] sm:$0xff]  ;;  %v2217_v62 = vld [vmem:[%s8008_s7 + $0x70] sm:$0xff] }
 0x3f0   : > { %1811 = vmatprep.subr.mxu0 %v1803_v2  ;;  %v2218_v1 = vld [vmem:[%s8008_s7 + $0x78] sm:$0xff] }
 0x3f1   : > { %1812 = vmatpush1.msra.mxu0 %v1802_v3  ;;  %1882 = vmatprep.subr.mxu1 %v1805_v5  ;;  %v2219_v3 = vld [vmem:[%s8008_s7 + $0x80] sm:$0xff] }
 0x3f2   : > { %5588 = vmatmul.mubr.msk.f32.vlgmr.msra.gmra.mrb[0].mxu0 %vm1807_vm0, %v1806_v4  ;;  %1883 = vmatpush1.msra.mxu1 %v1804_v6  ;;  %v2220_v6 = vld [vmem:[%s8008_s7 + $0x88] sm:$0xff] }
 0x3f3   : > { %5589 = vmatmul.mubr.msk.f32.vlgmr.msra.gmra.mrb[0].mxu1 %vm1807_vm0, %v1806_v4  ;;  %1983 = vmatprep.subr.mxu0 %v1977_v7 }
 0x3f4   : > { %5648 = vmatprep.subr.mxu1 %v6377_v28  ;;  %5650 = vmatprep.mubr.msk.f32.mxu1 %vm6379_vm1, %v6377_v28  ;;  %v2207_v28 = vld [vmem:[%s8008_s7 + $0x20] sm:$0xff] }
 0x3f8   : > { %1984 = vmatpush1.xpose.msra.mxu0 %v1969_v0 }
 0x3f9   : > { %2053 = vmatprep.subr.mxu0 %v1978_v10 }
 0x4c5   : > { %v1877_v11 = vpop.f32.mrb[0].mxu0 }
 0x4c6   : > { %v1879_v12 = vpop.f32.mrb[1].mxu0  ;;  %v1948_v29 = vpop.f32.mrb[0].mxu1 }
 0x4c7   : > { %2047 = vmatprep.mubr.f32.mxu0 %v1879_v12  ;;  %v1950_v30 = vpop.f32.mrb[1].mxu1 }
 0x4c8   : > { %2048 = vmatmul.mubr.f32.vlgmr.msra.gmra.mrb[2].mxu0 %v1877_v11 }
 0x4c9   : > { %2054 = vmatpush1.xpose.msra.mxu0 %v1976_v9  ;;  %2117 = vmatprep.mubr.f32.mxu0 %v1950_v30  ;;  %v2221_v9 = vld [vmem:[%s8008_s7 + $0x90] sm:$0xff] }
 0x4d0   : > { %2118 = vmatmul.mubr.f32.vlgmr.msra.gmra.mrb[2].mxu0 %v1948_v29  ;;  %v2222_v29 = vld [vmem:[%s8008_s7 + $0x98] sm:$0xff] }
 0x5a3   : > { %v2119_v14 = vpop.f32.mrb[2].mxu0 }
 0x5a4   : > { %v5653_v15 = vadd.f32 %v5590_v13, %v2119_v14  ;;  %v2121_v16 = vpop.f32.mrb[3].mxu0 }
 0x5a6   : > { %5649 = vmatpush3.msk.msra.mxu1 %vm2128_vm2, %v5653_v15  ;;  %v2223_v15 = vld [vmem:[%s8008_s7 + $0xa0] sm:$0xff] }
 0x5a7   : > { %5651 = vmatmul.mubr.msk.f32.vlgmr.msra.gmra.mrb[2].mxu1 %vm2124_vm3, %v2123_v17 }
 0x67a   : > { %v2198_v41 = vpop.f32.mrb[2].mxu1 }
 0x67b   : > { %v2202_v42 = vadd.f32 0.5, %v2198_v41  ;;  %v5652_v19 = vpop.f32.mrb[3].mxu1 }
 0x67d   : > { %2229 = vperm.xlu0 %5867, %v2202_v42  }
 0x681   : > { %5868 = vset.pattern.permute.xlu0 %v6381_v20 }
 0x682   : > { %2258 = vperm.xlu0 %5868, %v2198_v41   ;;  %v2224_v41 = vld [vmem:[%s8008_s7 + $0xa8] sm:$0xff] }
 0x6fc   : > { %v7169_v47 = vpop.permute.xlu0 %2229 }
 0x6fd   : > { %v2232_v27 = vmul.f32 %v7169_v47, %v2203_v48  ;;  %v2233_v57 = vmul.f32 %v7169_v47, %v2204_v23  ;;  %v2234_v31 = vmul.f32 %v7169_v47, %v2205_v24  ;;  %v2235_v34 = vmul.f32 %v7169_v47, %v2206_v26  ;;  %v2225_v23 = vld [vmem:[%s8008_s7 + $0xb0] sm:$0xff] }
 0x6fe   : > { %v2236_v39 = vmul.f32 %v7169_v47, %v2207_v28  ;;  %v2237_v44 = vmul.f32 %v7169_v47, %v2208_v58  ;;  %v2238_v50 = vmul.f32 %v7169_v47, %v2209_v33  ;;  %v2239_v38 = vmul.f32 %v7169_v47, %v2210_v36  ;;  %v2226_v28 = vld [vmem:[%s8008_s7 + $0xb8] sm:$0xff] }
 0x6ff   : > { %v2240_v55 = vmul.f32 %v7169_v47, %v2211_v43  ;;  %v2241_v21 = vmul.f32 %v7169_v47, %v2212_v46  ;;  %v2242_v61 = vmul.f32 %v7169_v47, %v2213_v51  ;;  %v2243_v63 = vmul.f32 %v7169_v47, %v2214_v53 }
 0x700   : > { %v2244_v52 = vmul.f32 %v7169_v47, %v2215_v59  ;;  %v2245_v4 = vmul.f32 %v7169_v47, %v2216_v60  ;;  %v2246_v7 = vmul.f32 %v7169_v47, %v2217_v62  ;;  %v2247_v10 = vmul.f32 %v7169_v47, %v2218_v1 }
 0x701   : > { %v7180_v25 = vpop.permute.xlu0 %2258  ;;  %v2248_v30 = vmul.f32 %v7169_v47, %v2219_v3  ;;  %v2249_v16 = vmul.f32 %v7169_v47, %v2220_v6  ;;  %v2250_v42 = vmul.f32 %v7169_v47, %v2221_v9  ;;  %v2251_v24 = vmul.f32 %v7169_v47, %v2222_v29 }
 0x702   : > { %v2261_v32 = vadd.f32 %v7180_v25, %v2232_v27  ;;  %v2262_v35 = vadd.f32 %v7180_v25, %v2233_v57  ;;  %v2263_v40 = vadd.f32 %v7180_v25, %v2234_v31  ;;  %v2264_v45 = vadd.f32 %v7180_v25, %v2235_v34 }
 0x703   : > { %v2265_v37 = vadd.f32 %v7180_v25, %v2236_v39  ;;  %v2266_v54 = vadd.f32 %v7180_v25, %v2237_v44  ;;  %v2267_v56 = vadd.f32 %v7180_v25, %v2238_v50  ;;  %v2268_v22 = vadd.f32 %v7180_v25, %v2239_v38 }
 0x704   : > { %5870 = vtanh.f32 %v2261_v32  ;;  %v2269_v49 = vadd.f32 %v7180_v25, %v2240_v55  ;;  %v2270_v0 = vadd.f32 %v7180_v25, %v2241_v21  ;;  %v2271_v2 = vadd.f32 %v7180_v25, %v2242_v61 }
 0x705   : > { %5872 = vtanh.f32 %v2262_v35  ;;  %v2272_v5 = vadd.f32 %v7180_v25, %v2243_v63  ;;  %v2273_v8 = vadd.f32 %v7180_v25, %v2244_v52  ;;  %v2274_v11 = vadd.f32 %v7180_v25, %v2245_v4 }
 0x706   : > { %5874 = vtanh.f32 %v2263_v40  ;;  %v2275_v13 = vadd.f32 %v7180_v25, %v2246_v7  ;;  %v2276_v17 = vadd.f32 %v7180_v25, %v2247_v10  ;;  %v2277_v19 = vadd.f32 %v7180_v25, %v2248_v30 }
 0x707   : > { %5876 = vtanh.f32 %v2264_v45  ;;  %v2278_v26 = vadd.f32 %v7180_v25, %v2249_v16  ;;  %v2252_v57 = vmul.f32 %v7169_v47, %v2223_v15  ;;  %v2279_v58 = vadd.f32 %v7180_v25, %v2250_v42 }
 0x708   : > { %5878 = vtanh.f32 %v2265_v37  ;;  %v2253_v33 = vmul.f32 %v7169_v47, %v2224_v41  ;;  %v2280_v34 = vadd.f32 %v7180_v25, %v2251_v24  ;;  %v2254_v36 = vmul.f32 %v7169_v47, %v2225_v23 }
 0x709   : > { %5880 = vtanh.f32 %v2266_v54  ;;  %v2281_v39 = vadd.f32 %v7180_v25, %v2252_v57  ;;  %v2255_v44 = vmul.f32 %v7169_v47, %v2226_v28 }
 0x70a   : > { %5882 = vtanh.f32 %v2267_v56  ;;  %v2282_v45 = vadd.f32 %v7180_v25, %v2253_v33  ;;  %v2283_v50 = vadd.f32 %v7180_v25, %v2254_v36 }
 0x70b   : > { %5884 = vtanh.f32 %v2268_v22  ;;  %v2284_v38 = vadd.f32 %v7180_v25, %v2255_v44 }
 0x70c   : > { %5886 = vtanh.f32 %v2269_v49 }
 0x70d   : > { %5888 = vtanh.f32 %v2270_v0 }
 0x70e   : > { %v5871_v12 = vpop.eup %5870  ;;  %5890 = vtanh.f32 %v2271_v2 }
 0x70f   : > { %v5873_v14 = vpop.eup %5872  ;;  %5892 = vtanh.f32 %v2272_v5 }
 0x710   : > { %v5875_v18 = vpop.eup %5874  ;;  %5894 = vtanh.f32 %v2273_v8  ;;  %v5632_v20 = vpack.c.bf16 %v5873_v14, %v5871_v12 }
 0x711   : > { %v5877_v48 = vpop.eup %5876  ;;  %5896 = vtanh.f32 %v2274_v11 }
 0x712   : > { %v5879_v27 = vpop.eup %5878  ;;  %5898 = vtanh.f32 %v2275_v13  ;;  %v5633_v31 = vpack.c.bf16 %v5877_v48, %v5875_v18  ;;  %2405 = vst [vmem:[#allocation4] sm:$0xff] %v5632_v20 }
 0x713   : > { %v5881_v32 = vpop.eup %5880  ;;  %5900 = vtanh.f32 %v2276_v17 }
 0x714   : > { %v5883_v35 = vpop.eup %5882  ;;  %5902 = vtanh.f32 %v2277_v19  ;;  %v5634_v40 = vpack.c.bf16 %v5881_v32, %v5879_v27  ;;  %2406 = vst [vmem:[#allocation4 + $0x8] sm:$0xff] %v5633_v31 }
 0x715   : > { %v5885_v43 = vpop.eup %5884  ;;  %5904 = vtanh.f32 %v2278_v26 }
 0x716   : > { %v5887_v46 = vpop.eup %5886  ;;  %5906 = vtanh.f32 %v2279_v58  ;;  %v5635_v37 = vpack.c.bf16 %v5885_v43, %v5883_v35  ;;  %2407 = vst [vmem:[#allocation4 + $0x10] sm:$0xff] %v5634_v40 }
 0x717   : > { %v5889_v51 = vpop.eup %5888  ;;  %5908 = vtanh.f32 %v2280_v34 }
 0x718   : > { %v5891_v54 = vpop.eup %5890  ;;  %5910 = vtanh.f32 %v2281_v39  ;;  %v5636_v53 = vpack.c.bf16 %v5889_v51, %v5887_v46  ;;  %2408 = vst [vmem:[#allocation4 + $0x18] sm:$0xff] %v5635_v37 }
 0x719   : > { %v5893_v55 = vpop.eup %5892  ;;  %5912 = vtanh.f32 %v2282_v45 }
 0x71a   : > { %v5895_v47 = vpop.eup %5894  ;;  %5914 = vtanh.f32 %v2283_v50  ;;  %v5637_v56 = vpack.c.bf16 %v5893_v55, %v5891_v54  ;;  %2409 = vst [vmem:[#allocation4 + $0x20] sm:$0xff] %v5636_v53 }
 0x71b   : > { %v5897_v59 = vpop.eup %5896  ;;  %5916 = vtanh.f32 %v2284_v38 }
 0x71c   : > { %v5899_v21 = vpop.eup %5898  ;;  %v5638_v22 = vpack.c.bf16 %v5897_v59, %v5895_v47  ;;  %2410 = vst [vmem:[#allocation4 + $0x28] sm:$0xff] %v5637_v56 }
 0x71d   : > { %v5901_v60 = vpop.eup %5900 }
 0x71e   : > { %v5903_v61 = vpop.eup %5902  ;;  %v5639_v49 = vpack.c.bf16 %v5901_v60, %v5899_v21  ;;  %2411 = vst [vmem:[#allocation4 + $0x30] sm:$0xff] %v5638_v22 }
 0x71f   : > { %v5905_v25 = vpop.eup %5904 }
 0x720   : > { %v5907_v62 = vpop.eup %5906  ;;  %v5640_v63 = vpack.c.bf16 %v5905_v25, %v5903_v61  ;;  %2412 = vst [vmem:[#allocation4 + $0x38] sm:$0xff] %v5639_v49 }
 0x721   : > { %v5909_v0 = vpop.eup %5908 }
 0x722   : > { %v5911_v1 = vpop.eup %5910  ;;  %v5641_v52 = vpack.c.bf16 %v5909_v0, %v5907_v62  ;;  %2413 = vst [vmem:[#allocation4 + $0x40] sm:$0xff] %v5640_v63 }
 0x723   : > { %v5913_v2 = vpop.eup %5912 }
 0x724   : > { %v5915_v3 = vpop.eup %5914  ;;  %v5642_v4 = vpack.c.bf16 %v5913_v2, %v5911_v1  ;;  %2414 = vst [vmem:[#allocation4 + $0x48] sm:$0xff] %v5641_v52 }
 0x725   : > { %v5917_v5 = vpop.eup %5916 }
 0x726   : > { %v5643_v6 = vpack.c.bf16 %v5917_v5, %v5915_v3  ;;  %2415 = vst [vmem:[#allocation4 + $0x50] sm:$0xff] %v5642_v4 }
 0x728   : > { %2416 = vst [vmem:[#allocation4 + $0x58] sm:$0xff] %v5643_v6 }
 0x729 PF: > { %s8009_s7 = sld [smem:[#allocation34_spill]] }
 0x72f   : > { %p2417_p7 = scmp.eq.s32.totalorder %s8009_s7, 1 }
 0x731   : > { %p2418_p11 = pnand %p2417_p7, %p621_p2 }
 0x732   : > { %v6382_v7 = vmov (!%p2418_p11), 0.0  }
 0x733   : > { %2421 = sbr.rel (%p2418_p11) target bundleno = 1850 (0x73a), region = 128  ;;  %2422 = vst [vmem:[#allocation3] sm:$0xff] (!%p2418_p11), %v6382_v7  ;;  %2423 = vst [vmem:[#allocation3 + $0x8] sm:$0xff] (!%p2418_p11), %v6382_v7 }
 0x734   : > { %2424 = vst [vmem:[#allocation3 + $0x10] sm:$0xff] (!%p2418_p11), %v6382_v7  ;;  %2425 = vst [vmem:[#allocation3 + $0x18] sm:$0xff] (!%p2418_p11), %v6382_v7 }
 0x735   : > { %2426 = vst [vmem:[#allocation3 + $0x20] sm:$0xff] (!%p2418_p11), %v6382_v7  ;;  %2427 = vst [vmem:[#allocation3 + $0x28] sm:$0xff] (!%p2418_p11), %v6382_v7 }
 0x736   : > { %2428 = vst [vmem:[#allocation3 + $0x30] sm:$0xff] (!%p2418_p11), %v6382_v7  ;;  %2429 = vst [vmem:[#allocation3 + $0x38] sm:$0xff] (!%p2418_p11), %v6382_v7 }
 0x73a PF: > { %s8011_s5 = sld [smem:[#allocation34_spill]] }
 0x740   : > { %p5605_p3 = scmp.ne.s32.totalorder %s8011_s5, 1 }
 0x741   : > { %v2444_v8 = vld [vmem:[%s6857_s4 + $0x8] sm:$0xff] (!%p5605_p3)  ;;  %v2443_v10 = vld [vmem:[%s6857_s4] sm:$0xff] (!%p5605_p3)  ;;  %s2433_s15 = sshra.s32 (!%p5605_p3), %s619_s26, 7 }
 0x742   : > { %2432 = sbr.rel (%p5605_p3) target bundleno = 2848 (0xb20), region = 132  ;;  %v2508_v9 = vld [vmem:[%s6857_s4 + $0x208] sm:$0xff] (!%p5605_p3)  ;;  %v2828_v11 = vunpack.c.l.s8.bf16 (!%p5605_p3), %v2444_v8  ;;  %v2836_v12 = vunpack.c.h.s8.bf16 (!%p5605_p3), %v2444_v8  ;;  %v2507_v13 = vld [vmem:[%s6857_s4 + $0x200] sm:$0xff] (!%p5605_p3)  ;;  %v2827_v14 = vunpack.c.l.s8.bf16 (!%p5605_p3), %v2443_v10  ;;  %v2835_v18 = vunpack.c.h.s8.bf16 (!%p5605_p3), %v2443_v10  ;;  %s5606_s14 = sshll.u32 (!%p5605_p3), %s2433_s15, 2 }
 0x743   : > { %v2956_v29 = vunpack.c.l.s8.bf16 (!%p5605_p3), %v2508_v9  ;;  %v2964_v30 = vunpack.c.h.s8.bf16 (!%p5605_p3), %v2508_v9  ;;  %v2955_v15 = vunpack.c.l.s8.bf16 (!%p5605_p3), %v2507_v13  ;;  %v2452_v16 = vld [vmem:[%s6857_s4 + $0x48] sm:$0xff] (!%p5605_p3)  ;;  %v2963_v41 = vunpack.c.h.s8.bf16 (!%p5605_p3), %v2507_v13  ;;  %v2451_v20 = vld [vmem:[%s6857_s4 + $0x40] sm:$0xff] (!%p5605_p3)  ;;  %s7313_s26 = scalar_lea.vmem (!%p5605_p3), [#allocation4], %s5606_s14 }
 0x744   : > { %v2516_v17 = vld [vmem:[%s6857_s4 + $0x248] sm:$0xff] (!%p5605_p3)  ;;  %3645 = vmatprep.subr.bf16.mxu0 (!%p5605_p3), %v2828_v11  ;;  %v2844_v42 = vunpack.c.l.s8.bf16 (!%p5605_p3), %v2452_v16  ;;  %v2515_v48 = vld [vmem:[%s6857_s4 + $0x240] sm:$0xff] (!%p5605_p3)  ;;  %v2843_v23 = vunpack.c.l.s8.bf16 (!%p5605_p3), %v2451_v20  ;;  %v2852_v26 = vunpack.c.h.s8.bf16 (!%p5605_p3), %v2452_v16  ;;  %v2851_v58 = vunpack.c.h.s8.bf16 (!%p5605_p3), %v2451_v20  ;;  %v7319_v39 = vld [vmem:[%s7313_s26 + $0x8] sm:$0xff] (!%p5605_p3) }
 0x745   : > { %3686 = vmatprep.subr.bf16.mxu1 (!%p5605_p3), %v2956_v29  ;;  %3646 = vmatpush1.bf16.msra.mxu0 (!%p5605_p3), %v2827_v14  ;;  %v2972_v19 = vunpack.c.l.s8.bf16 (!%p5605_p3), %v2516_v17  ;;  %v2971_v24 = vunpack.c.l.s8.bf16 (!%p5605_p3), %v2515_v48  ;;  %v2980_v27 = vunpack.c.h.s8.bf16 (!%p5605_p3), %v2516_v17  ;;  %v2460_v28 = vld [vmem:[%s6857_s4 + $0x88] sm:$0xff] (!%p5605_p3)  ;;  %v2979_v31 = vunpack.c.h.s8.bf16 (!%p5605_p3), %v2515_v48  ;;  %v2459_v34 = vld [vmem:[%s6857_s4 + $0x80] sm:$0xff] (!%p5605_p3) }
 0x746   : > { %3687 = vmatpush1.bf16.msra.mxu1 (!%p5605_p3), %v2955_v15  ;;  %3647 = vmatprep.subr.bf16.mxu0 (!%p5605_p3), %v2836_v12  ;;  %v2524_v57 = vld [vmem:[%s6857_s4 + $0x288] sm:$0xff] (!%p5605_p3)  ;;  %v2860_v32 = vunpack.c.l.s8.bf16 (!%p5605_p3), %v2460_v28  ;;  %v2523_v35 = vld [vmem:[%s6857_s4 + $0x280] sm:$0xff] (!%p5605_p3)  ;;  %v2859_v40 = vunpack.c.l.s8.bf16 (!%p5605_p3), %v2459_v34  ;;  %v2868_v44 = vunpack.c.h.s8.bf16 (!%p5605_p3), %v2460_v28  ;;  %v7327_v50 = vcombine.high (!%p5605_p3), %v7319_v39, %v7319_v39 }
 0x747   : > { %3688 = vmatprep.subr.bf16.mxu1 (!%p5605_p3), %v2964_v30  ;;  %v2988_v33 = vunpack.c.l.s8.bf16 (!%p5605_p3), %v2524_v57  ;;  %v7316_v36 = vld [vmem:[%s7313_s26] sm:$0xff] (!%p5605_p3)  ;;  %v2987_v43 = vunpack.c.l.s8.bf16 (!%p5605_p3), %v2523_v35  ;;  %v2996_v45 = vunpack.c.h.s8.bf16 (!%p5605_p3), %v2524_v57  ;;  %v2867_v38 = vunpack.c.h.s8.bf16 (!%p5605_p3), %v2459_v34  ;;  %v2467_v47 = vld [vmem:[%s6857_s4 + $0xc0] sm:$0xff] (!%p5605_p3) }
 0x748   : > { %v7323_v46 = vcombine.high (!%p5605_p3), %v7316_v36, %v7316_v36  ;;  %v2468_v37 = vld [vmem:[%s6857_s4 + $0xc8] sm:$0xff] (!%p5605_p3)  ;;  %3718 = vmatprep.mubr.bf16.mxu1 (!%p5605_p3), %v7327_v50  ;;  %v2995_v54 = vunpack.c.h.s8.bf16 (!%p5605_p3), %v2523_v35  ;;  %v2531_v56 = vld [vmem:[%s6857_s4 + $0x2c0] sm:$0xff] (!%p5605_p3)  ;;  %v2875_v59 = vunpack.c.l.s8.bf16 (!%p5605_p3), %v2467_v47  ;;  %v2883_v25 = vunpack.c.h.s8.bf16 (!%p5605_p3), %v2467_v47 }
 0x749   : > { %3648 = vmatpush1.bf16.msra.mxu0 %v2835_v18  ;;  %v2532_v51 = vld [vmem:[%s6857_s4 + $0x2c8] sm:$0xff]  ;;  %v2876_v53 = vunpack.c.l.s8.bf16 %v2468_v37  ;;  %v3003_v21 = vunpack.c.l.s8.bf16 %v2531_v56  ;;  %v2884_v22 = vunpack.c.h.s8.bf16 %v2468_v37  ;;  %v3011_v62 = vunpack.c.h.s8.bf16 %v2531_v56  ;;  %v2475_v1 = vld [vmem:[%s6857_s4 + $0x100] sm:$0xff] }
 0x74a   : > { %3689 = vmatpush1.bf16.msra.mxu1 %v2963_v41  ;;  %3649 = vmatprep.subr.bf16.mxu0 %v2844_v42  ;;  %v3004_v55 = vunpack.c.l.s8.bf16 %v2532_v51  ;;  %v3012_v60 = vunpack.c.h.s8.bf16 %v2532_v51  ;;  %v2476_v61 = vld [vmem:[%s6857_s4 + $0x108] sm:$0xff]  ;;  %v2539_v52 = vld [vmem:[%s6857_s4 + $0x300] sm:$0xff]  ;;  %v2891_v2 = vunpack.c.l.s8.bf16 %v2475_v1  ;;  %v2899_v8 = vunpack.c.h.s8.bf16 %v2475_v1 }
 0x74b   : > { %3690 = vmatprep.subr.bf16.mxu1 %v2972_v19  ;;  %3677 = vmatprep.mubr.bf16.mxu0 %v7323_v46  ;;  %v2540_v49 = vld [vmem:[%s6857_s4 + $0x308] sm:$0xff]  ;;  %v2892_v63 = vunpack.c.l.s8.bf16 %v2476_v61  ;;  %v3019_v3 = vunpack.c.l.s8.bf16 %v2539_v52  ;;  %v2900_v4 = vunpack.c.h.s8.bf16 %v2476_v61  ;;  %v3027_v9 = vunpack.c.h.s8.bf16 %v2539_v52  ;;  %v2483_v12 = vld [vmem:[%s6857_s4 + $0x140] sm:$0xff] }
 0x74c   : > { %v3020_v0 = vunpack.c.l.s8.bf16 %v2540_v49  ;;  %v3028_v5 = vunpack.c.h.s8.bf16 %v2540_v49  ;;  %v2484_v6 = vld [vmem:[%s6857_s4 + $0x148] sm:$0xff]  ;;  %v2547_v29 = vld [vmem:[%s6857_s4 + $0x340] sm:$0xff]  ;;  %v2907_v30 = vunpack.c.l.s8.bf16 %v2483_v12  ;;  %v2915_v18 = vunpack.c.h.s8.bf16 %v2483_v12 }
 0x74d   : > { %3650 = vmatpush1.bf16.msra.mxu0 %v2843_v23  ;;  %v2548_v7 = vld [vmem:[%s6857_s4 + $0x348] sm:$0xff]  ;;  %v2908_v10 = vunpack.c.l.s8.bf16 %v2484_v6  ;;  %v3035_v13 = vunpack.c.l.s8.bf16 %v2547_v29  ;;  %v2916_v14 = vunpack.c.h.s8.bf16 %v2484_v6  ;;  %v3043_v41 = vunpack.c.h.s8.bf16 %v2547_v29  ;;  %v2491_v20 = vld [vmem:[%s6857_s4 + $0x180] sm:$0xff] }
 0x74e   : > { %3691 = vmatpush1.bf16.msra.mxu1 %v2971_v24  ;;  %3651 = vmatprep.subr.bf16.mxu0 %v2852_v26  ;;  %v3036_v11 = vunpack.c.l.s8.bf16 %v2548_v7  ;;  %v3044_v15 = vunpack.c.h.s8.bf16 %v2548_v7  ;;  %v2492_v16 = vld [vmem:[%s6857_s4 + $0x188] sm:$0xff]  ;;  %v2555_v48 = vld [vmem:[%s6857_s4 + $0x380] sm:$0xff]  ;;  %v2923_v23 = vunpack.c.l.s8.bf16 %v2491_v20 }
 0x74f   : > { %3692 = vmatprep.subr.bf16.mxu1 %v2980_v27  ;;  %v2556_v17 = vld [vmem:[%s6857_s4 + $0x388] sm:$0xff]  ;;  %v2924_v42 = vunpack.c.l.s8.bf16 %v2492_v16  ;;  %v3051_v24 = vunpack.c.l.s8.bf16 %v2555_v48  ;;  %v2932_v26 = vunpack.c.h.s8.bf16 %v2492_v16  ;;  %v2499_v34 = vld [vmem:[%s6857_s4 + $0x1c0] sm:$0xff] }
 0x750   : > { %v3052_v19 = vunpack.c.l.s8.bf16 %v2556_v17  ;;  %v3060_v27 = vunpack.c.h.s8.bf16 %v2556_v17  ;;  %v2500_v28 = vld [vmem:[%s6857_s4 + $0x1c8] sm:$0xff]  ;;  %v2563_v35 = vld [vmem:[%s6857_s4 + $0x3c0] sm:$0xff] }
 0x751   : > { %3652 = vmatpush1.bf16.msra.mxu0 %v2851_v58  ;;  %v2564_v57 = vld [vmem:[%s6857_s4 + $0x3c8] sm:$0xff]  ;;  %v2931_v58 = vunpack.c.h.s8.bf16 %v2491_v20  ;;  %v2571_v47 = vld [vmem:[%s6857_s4 + $0x400] sm:$0xff] }
 0x752   : > { %3693 = vmatpush1.bf16.msra.mxu1 %v2979_v31  ;;  %3653 = vmatprep.subr.bf16.mxu0 %v2860_v32  ;;  %v3059_v31 = vunpack.c.h.s8.bf16 %v2555_v48  ;;  %v2940_v32 = vunpack.c.l.s8.bf16 %v2500_v28  ;;  %v2572_v37 = vld [vmem:[%s6857_s4 + $0x408] sm:$0xff]  ;;  %v2635_v56 = vld [vmem:[%s6857_s4 + $0x600] sm:$0xff]  ;;  %v3083_v61 = vunpack.c.l.s8.bf16 %v2571_v47  ;;  %v3091_v1 = vunpack.c.h.s8.bf16 %v2571_v47 }
 0x753   : > { %3694 = vmatprep.subr.bf16.mxu1 %v2988_v33  ;;  %v3068_v33 = vunpack.c.l.s8.bf16 %v2564_v57  ;;  %v2636_v51 = vld [vmem:[%s6857_s4 + $0x608] sm:$0xff]  ;;  %v3211_v49 = vunpack.c.l.s8.bf16 %v2635_v56  ;;  %v3219_v52 = vunpack.c.h.s8.bf16 %v2635_v56 }
 0x755   : > { %3654 = vmatpush1.bf16.msra.mxu0 %v2859_v40  ;;  %v2939_v40 = vunpack.c.l.s8.bf16 %v2499_v34 }
 0x756   : > { %3695 = vmatpush1.bf16.msra.mxu1 %v2987_v43  ;;  %3655 = vmatprep.subr.bf16.mxu0 %v2868_v44  ;;  %v3067_v43 = vunpack.c.l.s8.bf16 %v2563_v35  ;;  %v2948_v44 = vunpack.c.h.s8.bf16 %v2500_v28 }
 0x757   : > { %3696 = vmatprep.subr.bf16.mxu1 %v2996_v45  ;;  %v3076_v45 = vunpack.c.h.s8.bf16 %v2564_v57 }
 0x759   : > { %3656 = vmatpush1.bf16.msra.mxu0 %v2867_v38  ;;  %v2947_v38 = vunpack.c.h.s8.bf16 %v2499_v34 }
 0x75a   : > { %3697 = vmatpush1.bf16.msra.mxu1 %v2995_v54  ;;  %3657 = vmatprep.subr.bf16.mxu0 %v2876_v53  ;;  %v3075_v54 = vunpack.c.h.s8.bf16 %v2563_v35  ;;  %v3084_v53 = vunpack.c.l.s8.bf16 %v2572_v37 }
 0x75b   : > { %3698 = vmatprep.subr.bf16.mxu1 %v3004_v55  ;;  %v3212_v55 = vunpack.c.l.s8.bf16 %v2636_v51 }
 0x75d   : > { %3658 = vmatpush1.bf16.msra.mxu0 %v2875_v59  ;;  %v7357_v59 = vcombine.low %v7316_v36, %v7316_v36  ;;  %v2580_v36 = vld [vmem:[%s6857_s4 + $0x448] sm:$0xff] }
 0x75e   : > { %3699 = vmatpush1.bf16.msra.mxu1 %v3003_v21  ;;  %3659 = vmatprep.subr.bf16.mxu0 %v2884_v22  ;;  %v7361_v21 = vcombine.low %v7319_v39, %v7319_v39  ;;  %v7364_v22 = vld [vmem:[%s7313_s26 + $0x10] sm:$0xff] }
 0x75f   : > { %3700 = vmatprep.subr.bf16.mxu1 %v3012_v60  ;;  %v7367_v60 = vld [vmem:[%s7313_s26 + $0x18] sm:$0xff]  ;;  %v7373_v39 = vcombine.high %v7364_v22, %v7364_v22 }
 0x761   : > { %3660 = vmatpush1.bf16.msra.mxu0 %v2883_v25  ;;  %v3092_v25 = vunpack.c.h.s8.bf16 %v2572_v37 }
 0x762   : > { %3701 = vmatpush1.bf16.msra.mxu1 %v3011_v62  ;;  %3661 = vmatprep.subr.bf16.mxu0 %v2892_v63  ;;  %v3220_v62 = vunpack.c.h.s8.bf16 %v2636_v51  ;;  %v2644_v63 = vld [vmem:[%s6857_s4 + $0x648] sm:$0xff] }
 0x763   : > { %3702 = vmatprep.subr.bf16.mxu1 %v3020_v0  ;;  %v7377_v0 = vcombine.high %v7367_v60, %v7367_v60 }
 0x765   : > { %3662 = vmatpush1.bf16.msra.mxu0 %v2891_v2  ;;  %v3100_v2 = vunpack.c.l.s8.bf16 %v2580_v36 }
 0x766   : > { %3703 = vmatpush1.bf16.msra.mxu1 %v3019_v3  ;;  %3663 = vmatprep.subr.bf16.mxu0 %v2900_v4  ;;  %v3228_v3 = vunpack.c.l.s8.bf16 %v2644_v63  ;;  %v2579_v4 = vld [vmem:[%s6857_s4 + $0x440] sm:$0xff] }
 0x767   : > { %3704 = vmatprep.subr.bf16.mxu1 %v3028_v5  ;;  %v2643_v5 = vld [vmem:[%s6857_s4 + $0x640] sm:$0xff]  ;;  %v3099_v6 = vunpack.c.l.s8.bf16 %v2579_v4  ;;  %v3107_v12 = vunpack.c.h.s8.bf16 %v2579_v4 }
 0x768   : > { %v3227_v7 = vunpack.c.l.s8.bf16 %v2643_v5  ;;  %v3235_v29 = vunpack.c.h.s8.bf16 %v2643_v5 }
 0x769   : > { %3664 = vmatpush1.bf16.msra.mxu0 %v2899_v8  ;;  %v3108_v8 = vunpack.c.h.s8.bf16 %v2580_v36 }
 0x76a   : > { %3705 = vmatpush1.bf16.msra.mxu1 %v3027_v9  ;;  %3665 = vmatprep.subr.bf16.mxu0 %v2908_v10  ;;  %v3236_v9 = vunpack.c.h.s8.bf16 %v2644_v63  ;;  %v2588_v10 = vld [vmem:[%s6857_s4 + $0x488] sm:$0xff] }
 0x76b   : > { %3706 = vmatprep.subr.bf16.mxu1 %v3036_v11  ;;  %v2652_v11 = vld [vmem:[%s6857_s4 + $0x688] sm:$0xff] }
 0x76d   : > { %3666 = vmatpush1.bf16.msra.mxu0 %v2907_v30  ;;  %v3116_v30 = vunpack.c.l.s8.bf16 %v2588_v10 }
 0x76e   : > { %3707 = vmatpush1.bf16.msra.mxu1 %v3035_v13  ;;  %3667 = vmatprep.subr.bf16.mxu0 %v2916_v14  ;;  %v3244_v13 = vunpack.c.l.s8.bf16 %v2652_v11  ;;  %v2587_v14 = vld [vmem:[%s6857_s4 + $0x480] sm:$0xff] }
 0x76f   : > { %3708 = vmatprep.subr.bf16.mxu1 %v3044_v15  ;;  %v2651_v15 = vld [vmem:[%s6857_s4 + $0x680] sm:$0xff]  ;;  %v3115_v16 = vunpack.c.l.s8.bf16 %v2587_v14  ;;  %v3123_v20 = vunpack.c.h.s8.bf16 %v2587_v14 }
 0x770   : > { %v3243_v17 = vunpack.c.l.s8.bf16 %v2651_v15  ;;  %v3251_v48 = vunpack.c.h.s8.bf16 %v2651_v15 }
 0x771   : > { %3668 = vmatpush1.bf16.msra.mxu0 %v2915_v18  ;;  %v3124_v18 = vunpack.c.h.s8.bf16 %v2588_v10 }
 0x772   : > { %3709 = vmatpush1.bf16.msra.mxu1 %v3043_v41  ;;  %3669 = vmatprep.subr.bf16.mxu0 %v2924_v42  ;;  %v3252_v41 = vunpack.c.h.s8.bf16 %v2652_v11  ;;  %v2596_v42 = vld [vmem:[%s6857_s4 + $0x4c8] sm:$0xff] }
 0x773   : > { %3710 = vmatprep.subr.bf16.mxu1 %v3052_v19  ;;  %v2660_v19 = vld [vmem:[%s6857_s4 + $0x6c8] sm:$0xff] }
 0x775   : > { %3670 = vmatpush1.bf16.msra.mxu0 %v2923_v23  ;;  %v3132_v23 = vunpack.c.l.s8.bf16 %v2596_v42 }
 0x776   : > { %3711 = vmatpush1.bf16.msra.mxu1 %v3051_v24  ;;  %3671 = vmatprep.subr.bf16.mxu0 %v2932_v26  ;;  %v3260_v24 = vunpack.c.l.s8.bf16 %v2660_v19  ;;  %v2595_v26 = vld [vmem:[%s6857_s4 + $0x4c0] sm:$0xff] }
 0x777   : > { %3712 = vmatprep.subr.bf16.mxu1 %v3060_v27  ;;  %v2659_v27 = vld [vmem:[%s6857_s4 + $0x6c0] sm:$0xff]  ;;  %v3131_v28 = vunpack.c.l.s8.bf16 %v2595_v26  ;;  %v3139_v34 = vunpack.c.h.s8.bf16 %v2595_v26 }
 0x778   : > { %v3259_v57 = vunpack.c.l.s8.bf16 %v2659_v27  ;;  %v3267_v35 = vunpack.c.h.s8.bf16 %v2659_v27 }
 0x779   : > { %3672 = vmatpush1.bf16.msra.mxu0 %v2931_v58  ;;  %v3140_v58 = vunpack.c.h.s8.bf16 %v2596_v42 }
 0x77a   : > { %3713 = vmatpush1.bf16.msra.mxu1 %v3059_v31  ;;  %3673 = vmatprep.subr.bf16.mxu0 %v2940_v32  ;;  %v3268_v31 = vunpack.c.h.s8.bf16 %v2660_v19  ;;  %v2604_v32 = vld [vmem:[%s6857_s4 + $0x508] sm:$0xff] }
 0x77b   : > { %3714 = vmatprep.subr.bf16.mxu1 %v3068_v33  ;;  %v2668_v33 = vld [vmem:[%s6857_s4 + $0x708] sm:$0xff] }
 0x77d   : > { %3674 = vmatpush1.bf16.msra.mxu0 %v2939_v40  ;;  %v3148_v40 = vunpack.c.l.s8.bf16 %v2604_v32 }
 0x77e   : > { %3715 = vmatpush1.bf16.msra.mxu1 %v3067_v43  ;;  %3675 = vmatprep.subr.bf16.mxu0 %v2948_v44  ;;  %v3276_v43 = vunpack.c.l.s8.bf16 %v2668_v33  ;;  %v2603_v44 = vld [vmem:[%s6857_s4 + $0x500] sm:$0xff] }
 0x77f   : > { %3716 = vmatprep.subr.bf16.mxu1 %v3076_v45  ;;  %v2667_v45 = vld [vmem:[%s6857_s4 + $0x700] sm:$0xff]  ;;  %v3147_v37 = vunpack.c.l.s8.bf16 %v2603_v44  ;;  %v3155_v47 = vunpack.c.h.s8.bf16 %v2603_v44 }
 0x780   : > { %v3275_v51 = vunpack.c.l.s8.bf16 %v2667_v45  ;;  %v3283_v56 = vunpack.c.h.s8.bf16 %v2667_v45 }
 0x781   : > { %3676 = vmatpush1.bf16.msra.mxu0 %v2947_v38  ;;  %v3156_v38 = vunpack.c.h.s8.bf16 %v2604_v32  ;;  %v7415_v32 = vcombine.low %v7364_v22, %v7364_v22  ;;  %v2708_v22 = vld [vmem:[%s6857_s4 + $0x848] sm:$0xff] }
 0x782   : > { %3717 = vmatpush1.bf16.msra.mxu1 %v3075_v54  ;;  %3727 = vmatprep.subr.bf16.mxu0 %v3084_v53  ;;  %v3284_v54 = vunpack.c.h.s8.bf16 %v2668_v33  ;;  %v2612_v53 = vld [vmem:[%s6857_s4 + $0x548] sm:$0xff]  ;;  %v7419_v33 = vcombine.low %v7367_v60, %v7367_v60 }
 0x783   : > { %3768 = vmatprep.subr.bf16.mxu1 %v3212_v55  ;;  %v2676_v55 = vld [vmem:[%s6857_s4 + $0x748] sm:$0xff] }
 0x784   : > { %3678 = vmatmul.mubr.bf16.vlgmr.msra.gmra.mrb[0].mxu0 %v7357_v59 }
 0x785   : > { %3719 = vmatmul.mubr.bf16.vlgmr.msra.gmra.mrb[0].mxu1 %v7361_v21  ;;  %3728 = vmatpush1.bf16.msra.mxu0 %v3083_v61  ;;  %v3164_v61 = vunpack.c.l.s8.bf16 %v2612_v53 }
 0x786   : > { %3769 = vmatpush1.bf16.msra.mxu1 %v3211_v49  ;;  %3729 = vmatprep.subr.bf16.mxu0 %v3092_v25  ;;  %v3292_v49 = vunpack.c.l.s8.bf16 %v2676_v55  ;;  %v2611_v25 = vld [vmem:[%s6857_s4 + $0x540] sm:$0xff] }
 0x787   : > { %3770 = vmatprep.subr.bf16.mxu1 %v3220_v62  ;;  %3759 = vmatprep.mubr.bf16.mxu0 %v7373_v39  ;;  %v2675_v62 = vld [vmem:[%s6857_s4 + $0x740] sm:$0xff]  ;;  %v3163_v36 = vunpack.c.l.s8.bf16 %v2611_v25  ;;  %v3171_v4 = vunpack.c.h.s8.bf16 %v2611_v25  ;;  %v3364_v25 = vunpack.c.h.s8.bf16 %v2708_v22 }
 0x788   : > { %3800 = vmatprep.mubr.bf16.mxu1 %v7377_v0  ;;  %v3291_v63 = vunpack.c.l.s8.bf16 %v2675_v62  ;;  %v3299_v5 = vunpack.c.h.s8.bf16 %v2675_v62 }
 0x789   : > { %3730 = vmatpush1.bf16.msra.mxu0 %v3091_v1  ;;  %v3172_v1 = vunpack.c.h.s8.bf16 %v2612_v53  ;;  %v3356_v53 = vunpack.c.l.s8.bf16 %v2708_v22 }
 0x78a   : > { %3771 = vmatpush1.bf16.msra.mxu1 %v3219_v52  ;;  %3731 = vmatprep.subr.bf16.mxu0 %v3100_v2  ;;  %v3300_v52 = vunpack.c.h.s8.bf16 %v2676_v55  ;;  %v2620_v2 = vld [vmem:[%s6857_s4 + $0x588] sm:$0xff] }
 0x78b   : > { %3772 = vmatprep.subr.bf16.mxu1 %v3228_v3  ;;  %v2684_v3 = vld [vmem:[%s6857_s4 + $0x788] sm:$0xff] }
 0x78d   : > { %3732 = vmatpush1.bf16.msra.mxu0 %v3099_v6  ;;  %v3180_v6 = vunpack.c.l.s8.bf16 %v2620_v2 }
 0x78e   : > { %3773 = vmatpush1.bf16.msra.mxu1 %v3227_v7  ;;  %3733 = vmatprep.subr.bf16.mxu0 %v3108_v8  ;;  %v3308_v7 = vunpack.c.l.s8.bf16 %v2684_v3  ;;  %v2619_v8 = vld [vmem:[%s6857_s4 + $0x580] sm:$0xff] }
 0x78f   : > { %3774 = vmatprep.subr.bf16.mxu1 %v3236_v9  ;;  %v2683_v9 = vld [vmem:[%s6857_s4 + $0x780] sm:$0xff]  ;;  %v3179_v10 = vunpack.c.l.s8.bf16 %v2619_v8  ;;  %v3187_v14 = vunpack.c.h.s8.bf16 %v2619_v8 }
 0x790   : > { %v3307_v11 = vunpack.c.l.s8.bf16 %v2683_v9  ;;  %v3315_v15 = vunpack.c.h.s8.bf16 %v2683_v9 }
 0x791   : > { %3734 = vmatpush1.bf16.msra.mxu0 %v3107_v12  ;;  %v3188_v12 = vunpack.c.h.s8.bf16 %v2620_v2 }
 0x792   : > { %3775 = vmatpush1.bf16.msra.mxu1 %v3235_v29  ;;  %3735 = vmatprep.subr.bf16.mxu0 %v3116_v30  ;;  %v3316_v29 = vunpack.c.h.s8.bf16 %v2684_v3  ;;  %v2628_v30 = vld [vmem:[%s6857_s4 + $0x5c8] sm:$0xff] }
 0x793   : > { %3776 = vmatprep.subr.bf16.mxu1 %v3244_v13  ;;  %v2692_v13 = vld [vmem:[%s6857_s4 + $0x7c8] sm:$0xff] }
 0x795   : > { %3736 = vmatpush1.bf16.msra.mxu0 %v3115_v16  ;;  %v3196_v16 = vunpack.c.l.s8.bf16 %v2628_v30 }
 0x796   : > { %3777 = vmatpush1.bf16.msra.mxu1 %v3243_v17  ;;  %3737 = vmatprep.subr.bf16.mxu0 %v3124_v18  ;;  %v3324_v17 = vunpack.c.l.s8.bf16 %v2692_v13  ;;  %v2627_v18 = vld [vmem:[%s6857_s4 + $0x5c0] sm:$0xff] }
 0x797   : > { %3778 = vmatprep.subr.bf16.mxu1 %v3252_v41  ;;  %v2691_v41 = vld [vmem:[%s6857_s4 + $0x7c0] sm:$0xff]  ;;  %v3195_v42 = vunpack.c.l.s8.bf16 %v2627_v18  ;;  %v3203_v26 = vunpack.c.h.s8.bf16 %v2627_v18 }
 0x798   : > { %v3323_v19 = vunpack.c.l.s8.bf16 %v2691_v41  ;;  %v3331_v27 = vunpack.c.h.s8.bf16 %v2691_v41 }
 0x799   : > { %3738 = vmatpush1.bf16.msra.mxu0 %v3123_v20  ;;  %v3204_v20 = vunpack.c.h.s8.bf16 %v2628_v30 }
 0x79a   : > { %3779 = vmatpush1.bf16.msra.mxu1 %v3251_v48  ;;  %3739 = vmatprep.subr.bf16.mxu0 %v3132_v23  ;;  %v3332_v48 = vunpack.c.h.s8.bf16 %v2692_v13  ;;  %v2700_v23 = vld [vmem:[%s6857_s4 + $0x808] sm:$0xff] }
 0x79b   : > { %3780 = vmatprep.subr.bf16.mxu1 %v3260_v24  ;;  %v2764_v24 = vld [vmem:[%s6857_s4 + $0xa08] sm:$0xff]  ;;  %v3348_v44 = vunpack.c.h.s8.bf16 %v2700_v23 }
 0x79c   : > { %v3476_v45 = vunpack.c.h.s8.bf16 %v2764_v24 }
 0x79d   : > { %3740 = vmatpush1.bf16.msra.mxu0 %v3131_v28  ;;  %v3340_v28 = vunpack.c.l.s8.bf16 %v2700_v23 }
 0x79e   : > { %3781 = vmatpush1.bf16.msra.mxu1 %v3259_v57  ;;  %3741 = vmatprep.subr.bf16.mxu0 %v3140_v58  ;;  %v3468_v57 = vunpack.c.l.s8.bf16 %v2764_v24  ;;  %v2699_v58 = vld [vmem:[%s6857_s4 + $0x800] sm:$0xff] }
 0x79f   : > { %3782 = vmatprep.subr.bf16.mxu1 %v3268_v31  ;;  %v2763_v31 = vld [vmem:[%s6857_s4 + $0xa00] sm:$0xff] }
 0x7a1   : > { %3742 = vmatpush1.bf16.msra.mxu0 %v3139_v34  ;;  %v7422_v34 = vld [vmem:[%s7313_s26 + $0x20] sm:$0xff] }
 0x7a2   : > { %3783 = vmatpush1.bf16.msra.mxu1 %v3267_v35  ;;  %3743 = vmatprep.subr.bf16.mxu0 %v3148_v40  ;;  %v7425_v35 = vld [vmem:[%s7313_s26 + $0x28] sm:$0xff]  ;;  %v3339_v40 = vunpack.c.l.s8.bf16 %v2699_v58  ;;  %v7431_v60 = vcombine.high %v7422_v34, %v7422_v34 }
 0x7a3   : > { %3784 = vmatprep.subr.bf16.mxu1 %v3276_v43  ;;  %v3467_v43 = vunpack.c.l.s8.bf16 %v2763_v31 }
 0x7a5   : > { %3744 = vmatpush1.bf16.msra.mxu0 %v3147_v37  ;;  %v2772_v37 = vld [vmem:[%s6857_s4 + $0xa48] sm:$0xff] }
 0x7a6   : > { %3785 = vmatpush1.bf16.msra.mxu1 %v3275_v51  ;;  %3745 = vmatprep.subr.bf16.mxu0 %v3156_v38  ;;  %v7435_v51 = vcombine.high %v7425_v35, %v7425_v35  ;;  %v3347_v38 = vunpack.c.h.s8.bf16 %v2699_v58  ;;  %v3484_v55 = vunpack.c.l.s8.bf16 %v2772_v37  ;;  %v3492_v62 = vunpack.c.h.s8.bf16 %v2772_v37 }
 0x7a7   : > { %3786 = vmatprep.subr.bf16.mxu1 %v3284_v54  ;;  %v3475_v54 = vunpack.c.h.s8.bf16 %v2763_v31 }
 0x7a9   : > { %3746 = vmatpush1.bf16.msra.mxu0 %v3155_v47  ;;  %v2707_v47 = vld [vmem:[%s6857_s4 + $0x840] sm:$0xff] }
 0x7aa   : > { %3787 = vmatpush1.bf16.msra.mxu1 %v3283_v56  ;;  %3747 = vmatprep.subr.bf16.mxu0 %v3164_v61  ;;  %v2771_v56 = vld [vmem:[%s6857_s4 + $0xa40] sm:$0xff]  ;;  %v3355_v61 = vunpack.c.l.s8.bf16 %v2707_v47 }
 0x7ab   : > { %3788 = vmatprep.subr.bf16.mxu1 %v3292_v49  ;;  %v3483_v49 = vunpack.c.l.s8.bf16 %v2771_v56 }
 0x7ad   : > { %3748 = vmatpush1.bf16.msra.mxu0 %v3163_v36  ;;  %v2716_v36 = vld [vmem:[%s6857_s4 + $0x888] sm:$0xff] }
 0x7ae   : > { %3789 = vmatpush1.bf16.msra.mxu1 %v3291_v63  ;;  %3749 = vmatprep.subr.bf16.mxu0 %v3172_v1  ;;  %v2780_v63 = vld [vmem:[%s6857_s4 + $0xa88] sm:$0xff]  ;;  %v3363_v1 = vunpack.c.h.s8.bf16 %v2707_v47  ;;  %v3372_v2 = vunpack.c.l.s8.bf16 %v2716_v36  ;;  %v3380_v8 = vunpack.c.h.s8.bf16 %v2716_v36 }
 0x7af   : > { %3790 = vmatprep.subr.bf16.mxu1 %v3300_v52  ;;  %v3491_v52 = vunpack.c.h.s8.bf16 %v2771_v56  ;;  %v3500_v3 = vunpack.c.l.s8.bf16 %v2780_v63  ;;  %v3508_v9 = vunpack.c.h.s8.bf16 %v2780_v63 }
 0x7b1   : > { %3750 = vmatpush1.bf16.msra.mxu0 %v3171_v4  ;;  %v2715_v4 = vld [vmem:[%s6857_s4 + $0x880] sm:$0xff] }
 0x7b2   : > { %3791 = vmatpush1.bf16.msra.mxu1 %v3299_v5  ;;  %3751 = vmatprep.subr.bf16.mxu0 %v3180_v6  ;;  %v2779_v5 = vld [vmem:[%s6857_s4 + $0xa80] sm:$0xff]  ;;  %v3371_v6 = vunpack.c.l.s8.bf16 %v2715_v4 }
 0x7b3   : > { %3792 = vmatprep.subr.bf16.mxu1 %v3308_v7  ;;  %v3499_v7 = vunpack.c.l.s8.bf16 %v2779_v5 }
 0x7b5   : > { %3752 = vmatpush1.bf16.msra.mxu0 %v3179_v10  ;;  %v2724_v10 = vld [vmem:[%s6857_s4 + $0x8c8] sm:$0xff] }
 0x7b6   : > { %3793 = vmatpush1.bf16.msra.mxu1 %v3307_v11  ;;  %3753 = vmatprep.subr.bf16.mxu0 %v3188_v12  ;;  %v2788_v11 = vld [vmem:[%s6857_s4 + $0xac8] sm:$0xff]  ;;  %v3379_v12 = vunpack.c.h.s8.bf16 %v2715_v4  ;;  %v3388_v30 = vunpack.c.l.s8.bf16 %v2724_v10  ;;  %v3396_v18 = vunpack.c.h.s8.bf16 %v2724_v10 }
 0x7b7   : > { %3794 = vmatprep.subr.bf16.mxu1 %v3316_v29  ;;  %v3507_v29 = vunpack.c.h.s8.bf16 %v2779_v5  ;;  %v3516_v13 = vunpack.c.l.s8.bf16 %v2788_v11  ;;  %v3524_v41 = vunpack.c.h.s8.bf16 %v2788_v11 }
 0x7b9   : > { %3754 = vmatpush1.bf16.msra.mxu0 %v3187_v14  ;;  %v2723_v14 = vld [vmem:[%s6857_s4 + $0x8c0] sm:$0xff] }
 0x7ba   : > { %3795 = vmatpush1.bf16.msra.mxu1 %v3315_v15  ;;  %3755 = vmatprep.subr.bf16.mxu0 %v3196_v16  ;;  %v2787_v15 = vld [vmem:[%s6857_s4 + $0xac0] sm:$0xff]  ;;  %v3387_v16 = vunpack.c.l.s8.bf16 %v2723_v14 }
 0x7bb   : > { %3796 = vmatprep.subr.bf16.mxu1 %v3324_v17  ;;  %v3515_v17 = vunpack.c.l.s8.bf16 %v2787_v15 }
 0x7bd   : > { %3756 = vmatpush1.bf16.msra.mxu0 %v3195_v42  ;;  %v2732_v42 = vld [vmem:[%s6857_s4 + $0x908] sm:$0xff] }
 0x7be   : > { %3797 = vmatpush1.bf16.msra.mxu1 %v3323_v19  ;;  %3757 = vmatprep.subr.bf16.mxu0 %v3204_v20  ;;  %v2796_v19 = vld [vmem:[%s6857_s4 + $0xb08] sm:$0xff]  ;;  %v3395_v20 = vunpack.c.h.s8.bf16 %v2723_v14  ;;  %v3404_v23 = vunpack.c.l.s8.bf16 %v2732_v42  ;;  %v3412_v58 = vunpack.c.h.s8.bf16 %v2732_v42 }
 0x7bf   : > { %3798 = vmatprep.subr.bf16.mxu1 %v3332_v48  ;;  %v3523_v48 = vunpack.c.h.s8.bf16 %v2787_v15  ;;  %v3532_v24 = vunpack.c.l.s8.bf16 %v2796_v19  ;;  %v3540_v31 = vunpack.c.h.s8.bf16 %v2796_v19 }
 0x7c1   : > { %3758 = vmatpush1.bf16.msra.mxu0 %v3203_v26  ;;  %v2731_v26 = vld [vmem:[%s6857_s4 + $0x900] sm:$0xff] }
 0x7c2   : > { %3799 = vmatpush1.bf16.msra.mxu1 %v3331_v27  ;;  %3809 = vmatprep.subr.bf16.mxu0 %v3340_v28  ;;  %v2795_v27 = vld [vmem:[%s6857_s4 + $0xb00] sm:$0xff]  ;;  %v3403_v28 = vunpack.c.l.s8.bf16 %v2731_v26 }
 0x7c3   : > { %3850 = vmatprep.subr.bf16.mxu1 %v3468_v57  ;;  %v3531_v57 = vunpack.c.l.s8.bf16 %v2795_v27 }
 0x7c4   : > { %3760 = vmatmul.mubr.bf16.vlgmr.msra.gmra.mrb[4].mxu0 %v7415_v32 }
 0x7c5   : > { %3801 = vmatmul.mubr.bf16.vlgmr.msra.gmra.mrb[4].mxu1 %v7419_v33  ;;  %3810 = vmatpush1.bf16.msra.mxu0 %v3339_v40  ;;  %v2740_v40 = vld [vmem:[%s6857_s4 + $0x948] sm:$0xff] }
 0x7c6   : > { %3851 = vmatpush1.bf16.msra.mxu1 %v3467_v43  ;;  %3811 = vmatprep.subr.bf16.mxu0 %v3348_v44  ;;  %v2804_v43 = vld [vmem:[%s6857_s4 + $0xb48] sm:$0xff]  ;;  %v3411_v44 = vunpack.c.h.s8.bf16 %v2731_v26  ;;  %v3420_v22 = vunpack.c.l.s8.bf16 %v2740_v40  ;;  %v3428_v47 = vunpack.c.h.s8.bf16 %v2740_v40 }
 0x7c7   : > { %3852 = vmatprep.subr.bf16.mxu1 %v3476_v45  ;;  %3841 = vmatprep.mubr.bf16.mxu0 %v7431_v60  ;;  %v3539_v45 = vunpack.c.h.s8.bf16 %v2795_v27  ;;  %v3548_v37 = vunpack.c.l.s8.bf16 %v2804_v43  ;;  %v3556_v56 = vunpack.c.h.s8.bf16 %v2804_v43 }
 0x7c8   : > { %3882 = vmatprep.mubr.bf16.mxu1 %v7435_v51 }
 0x7c9   : > { %3812 = vmatpush1.bf16.msra.mxu0 %v3347_v38  ;;  %v2739_v38 = vld [vmem:[%s6857_s4 + $0x940] sm:$0xff] }
 0x7ca   : > { %3853 = vmatpush1.bf16.msra.mxu1 %v3475_v54  ;;  %3813 = vmatprep.subr.bf16.mxu0 %v3356_v53  ;;  %v2803_v54 = vld [vmem:[%s6857_s4 + $0xb40] sm:$0xff]  ;;  %v3419_v53 = vunpack.c.l.s8.bf16 %v2739_v38 }
 0x7cb   : > { %3854 = vmatprep.subr.bf16.mxu1 %v3484_v55  ;;  %v3547_v55 = vunpack.c.l.s8.bf16 %v2803_v54 }
 0x7cd   : > { %3814 = vmatpush1.bf16.msra.mxu0 %v3355_v61  ;;  %v2748_v61 = vld [vmem:[%s6857_s4 + $0x988] sm:$0xff] }
 0x7ce   : > { %3855 = vmatpush1.bf16.msra.mxu1 %v3483_v49  ;;  %3815 = vmatprep.subr.bf16.mxu0 %v3364_v25  ;;  %v2812_v49 = vld [vmem:[%s6857_s4 + $0xb88] sm:$0xff]  ;;  %v3427_v25 = vunpack.c.h.s8.bf16 %v2739_v38  ;;  %v3436_v36 = vunpack.c.l.s8.bf16 %v2748_v61  ;;  %v3444_v4 = vunpack.c.h.s8.bf16 %v2748_v61 }
 0x7cf   : > { %3856 = vmatprep.subr.bf16.mxu1 %v3492_v62  ;;  %v3555_v62 = vunpack.c.h.s8.bf16 %v2803_v54  ;;  %v3564_v63 = vunpack.c.l.s8.bf16 %v2812_v49  ;;  %v3572_v5 = vunpack.c.h.s8.bf16 %v2812_v49 }
 0x7d1   : > { %3816 = vmatpush1.bf16.msra.mxu0 %v3363_v1  ;;  %v2747_v1 = vld [vmem:[%s6857_s4 + $0x980] sm:$0xff] }
 0x7d2   : > { %3857 = vmatpush1.bf16.msra.mxu1 %v3491_v52  ;;  %3817 = vmatprep.subr.bf16.mxu0 %v3372_v2  ;;  %v2811_v52 = vld [vmem:[%s6857_s4 + $0xb80] sm:$0xff]  ;;  %v3435_v2 = vunpack.c.l.s8.bf16 %v2747_v1 }
 0x7d3   : > { %3858 = vmatprep.subr.bf16.mxu1 %v3500_v3  ;;  %v3563_v3 = vunpack.c.l.s8.bf16 %v2811_v52 }
 0x7d5   : > { %3818 = vmatpush1.bf16.msra.mxu0 %v3371_v6  ;;  %v2756_v6 = vld [vmem:[%s6857_s4 + $0x9c8] sm:$0xff] }
 0x7d6   : > { %3859 = vmatpush1.bf16.msra.mxu1 %v3499_v7  ;;  %3819 = vmatprep.subr.bf16.mxu0 %v3380_v8  ;;  %v2820_v7 = vld [vmem:[%s6857_s4 + $0xbc8] sm:$0xff]  ;;  %v3443_v8 = vunpack.c.h.s8.bf16 %v2747_v1  ;;  %v3452_v10 = vunpack.c.l.s8.bf16 %v2756_v6  ;;  %v3460_v14 = vunpack.c.h.s8.bf16 %v2756_v6 }
 0x7d7   : > { %3860 = vmatprep.subr.bf16.mxu1 %v3508_v9  ;;  %v3571_v9 = vunpack.c.h.s8.bf16 %v2811_v52  ;;  %v3580_v11 = vunpack.c.l.s8.bf16 %v2820_v7  ;;  %v3588_v15 = vunpack.c.h.s8.bf16 %v2820_v7 }
 0x7d9   : > { %3820 = vmatpush1.bf16.msra.mxu0 %v3379_v12  ;;  %v2755_v12 = vld [vmem:[%s6857_s4 + $0x9c0] sm:$0xff] }
 0x7da   : > { %3861 = vmatpush1.bf16.msra.mxu1 %v3507_v29  ;;  %3821 = vmatprep.subr.bf16.mxu0 %v3388_v30  ;;  %v2819_v29 = vld [vmem:[%s6857_s4 + $0xbc0] sm:$0xff]  ;;  %v3451_v30 = vunpack.c.l.s8.bf16 %v2755_v12 }
 0x7db   : > { %3862 = vmatprep.subr.bf16.mxu1 %v3516_v13  ;;  %v3579_v13 = vunpack.c.l.s8.bf16 %v2819_v29 }
 0x7dd   : > { %3822 = vmatpush1.bf16.msra.mxu0 %v3387_v16  ;;  %v2446_v16 = vld [vmem:[%s6857_s4 + $0x18] sm:$0xff] }
 0x7de   : > { %3863 = vmatpush1.bf16.msra.mxu1 %v3515_v17  ;;  %3823 = vmatprep.subr.bf16.mxu0 %v3396_v18  ;;  %v2510_v17 = vld [vmem:[%s6857_s4 + $0x218] sm:$0xff]  ;;  %v3459_v18 = vunpack.c.h.s8.bf16 %v2755_v12  ;;  %v2830_v42 = vunpack.c.l.s8.bf16 %v2446_v16 }
 0x7df   : > { %3864 = vmatprep.subr.bf16.mxu1 %v3524_v41  ;;  %v3587_v41 = vunpack.c.h.s8.bf16 %v2819_v29  ;;  %v2958_v19 = vunpack.c.l.s8.bf16 %v2510_v17 }
 0x7e1   : > { %3824 = vmatpush1.bf16.msra.mxu0 %v3395_v20  ;;  %v2445_v20 = vld [vmem:[%s6857_s4 + $0x10] sm:$0xff] }
 0x7e2   : > { %3865 = vmatpush1.bf16.msra.mxu1 %v3523_v48  ;;  %3825 = vmatprep.subr.bf16.mxu0 %v3404_v23  ;;  %v2509_v48 = vld [vmem:[%s6857_s4 + $0x210] sm:$0xff]  ;;  %v7473_v23 = vcombine.low %v7422_v34, %v7422_v34  ;;  %v2829_v26 = vunpack.c.l.s8.bf16 %v2445_v20  ;;  %v2837_v34 = vunpack.c.h.s8.bf16 %v2445_v20 }
 0x7e3   : > { %3866 = vmatprep.subr.bf16.mxu1 %v3532_v24  ;;  %v7477_v24 = vcombine.low %v7425_v35, %v7425_v35  ;;  %v2957_v27 = vunpack.c.l.s8.bf16 %v2509_v48  ;;  %v2965_v35 = vunpack.c.h.s8.bf16 %v2509_v48 }
 0x7e5   : > { %3826 = vmatpush1.bf16.msra.mxu0 %v3403_v28  ;;  %v2838_v28 = vunpack.c.h.s8.bf16 %v2446_v16 }
 0x7e6   : > { %3867 = vmatpush1.bf16.msra.mxu1 %v3531_v57  ;;  %3827 = vmatprep.subr.bf16.mxu0 %v3412_v58  ;;  %v2966_v57 = vunpack.c.h.s8.bf16 %v2510_v17  ;;  %v2454_v58 = vld [vmem:[%s6857_s4 + $0x58] sm:$0xff] }
 0x7e7   : > { %3868 = vmatprep.subr.bf16.mxu1 %v3540_v31  ;;  %v2518_v31 = vld [vmem:[%s6857_s4 + $0x258] sm:$0xff]  ;;  %v2846_v40 = vunpack.c.l.s8.bf16 %v2454_v58  ;;  %v2854_v38 = vunpack.c.h.s8.bf16 %v2454_v58 }
 0x7e8   : > { %v2974_v43 = vunpack.c.l.s8.bf16 %v2518_v31  ;;  %v2982_v54 = vunpack.c.h.s8.bf16 %v2518_v31 }
 0x7e9   : > { %3828 = vmatpush1.bf16.msra.mxu0 %v3411_v44  ;;  %v2453_v44 = vld [vmem:[%s6857_s4 + $0x50] sm:$0xff] }
 0x7ea   : > { %3869 = vmatpush1.bf16.msra.mxu1 %v3539_v45  ;;  %3829 = vmatprep.subr.bf16.mxu0 %v3420_v22  ;;  %v2517_v45 = vld [vmem:[%s6857_s4 + $0x250] sm:$0xff]  ;;  %v2845_v22 = vunpack.c.l.s8.bf16 %v2453_v44 }
 0x7eb   : > { %3870 = vmatprep.subr.bf16.mxu1 %v3548_v37  ;;  %v2973_v37 = vunpack.c.l.s8.bf16 %v2517_v45 }
 0x7ed   : > { %3830 = vmatpush1.bf16.msra.mxu0 %v3419_v53  ;;  %v2462_v53 = vld [vmem:[%s6857_s4 + $0x98] sm:$0xff] }
 0x7ee   : > { %3871 = vmatpush1.bf16.msra.mxu1 %v3547_v55  ;;  %3831 = vmatprep.subr.bf16.mxu0 %v3428_v47  ;;  %v2526_v55 = vld [vmem:[%s6857_s4 + $0x298] sm:$0xff]  ;;  %v2853_v47 = vunpack.c.h.s8.bf16 %v2453_v44  ;;  %v2862_v61 = vunpack.c.l.s8.bf16 %v2462_v53  ;;  %v2870_v1 = vunpack.c.h.s8.bf16 %v2462_v53 }
 0x7ef   : > { %3872 = vmatprep.subr.bf16.mxu1 %v3556_v56  ;;  %v2981_v56 = vunpack.c.h.s8.bf16 %v2517_v45  ;;  %v2990_v49 = vunpack.c.l.s8.bf16 %v2526_v55  ;;  %v2998_v52 = vunpack.c.h.s8.bf16 %v2526_v55 }
 0x7f1   : > { %3832 = vmatpush1.bf16.msra.mxu0 %v3427_v25  ;;  %v2461_v25 = vld [vmem:[%s6857_s4 + $0x90] sm:$0xff] }
 0x7f2   : > { %3873 = vmatpush1.bf16.msra.mxu1 %v3555_v62  ;;  %3833 = vmatprep.subr.bf16.mxu0 %v3436_v36  ;;  %v2525_v62 = vld [vmem:[%s6857_s4 + $0x290] sm:$0xff]  ;;  %v2861_v36 = vunpack.c.l.s8.bf16 %v2461_v25 }
 0x7f3   : > { %3874 = vmatprep.subr.bf16.mxu1 %v3564_v63  ;;  %v2989_v63 = vunpack.c.l.s8.bf16 %v2525_v62 }
 0x7f5   : > { %3834 = vmatpush1.bf16.msra.mxu0 %v3435_v2  ;;  %v2470_v2 = vld [vmem:[%s6857_s4 + $0xd8] sm:$0xff] }
 0x7f6   : > { %3875 = vmatpush1.bf16.msra.mxu1 %v3563_v3  ;;  %3835 = vmatprep.subr.bf16.mxu0 %v3444_v4  ;;  %v2534_v3 = vld [vmem:[%s6857_s4 + $0x2d8] sm:$0xff]  ;;  %v2869_v4 = vunpack.c.h.s8.bf16 %v2461_v25  ;;  %v2878_v6 = vunpack.c.l.s8.bf16 %v2470_v2  ;;  %v2886_v12 = vunpack.c.h.s8.bf16 %v2470_v2 }
 0x7f7   : > { %3876 = vmatprep.subr.bf16.mxu1 %v3572_v5  ;;  %v2997_v5 = vunpack.c.h.s8.bf16 %v2525_v62  ;;  %v3006_v7 = vunpack.c.l.s8.bf16 %v2534_v3  ;;  %v3014_v29 = vunpack.c.h.s8.bf16 %v2534_v3 }
 0x7f9   : > { %3836 = vmatpush1.bf16.msra.mxu0 %v3443_v8  ;;  %v2469_v8 = vld [vmem:[%s6857_s4 + $0xd0] sm:$0xff] }
 0x7fa   : > { %3877 = vmatpush1.bf16.msra.mxu1 %v3571_v9  ;;  %3837 = vmatprep.subr.bf16.mxu0 %v3452_v10  ;;  %v2533_v9 = vld [vmem:[%s6857_s4 + $0x2d0] sm:$0xff]  ;;  %v2877_v10 = vunpack.c.l.s8.bf16 %v2469_v8 }
 0x7fb   : > { %3878 = vmatprep.subr.bf16.mxu1 %v3580_v11  ;;  %v3005_v11 = vunpack.c.l.s8.bf16 %v2533_v9 }
 0x7fd   : > { %3838 = vmatpush1.bf16.msra.mxu0 %v3451_v30  ;;  %v2478_v30 = vld [vmem:[%s6857_s4 + $0x118] sm:$0xff] }
 0x7fe   : > { %3879 = vmatpush1.bf16.msra.mxu1 %v3579_v13  ;;  %3839 = vmatprep.subr.bf16.mxu0 %v3460_v14  ;;  %v2542_v13 = vld [vmem:[%s6857_s4 + $0x318] sm:$0xff]  ;;  %v2885_v14 = vunpack.c.h.s8.bf16 %v2469_v8  ;;  %v2894_v16 = vunpack.c.l.s8.bf16 %v2478_v30  ;;  %v2902_v20 = vunpack.c.h.s8.bf16 %v2478_v30 }
 0x7ff   : > { %3880 = vmatprep.subr.bf16.mxu1 %v3588_v15  ;;  %v3013_v15 = vunpack.c.h.s8.bf16 %v2533_v9  ;;  %v3022_v17 = vunpack.c.l.s8.bf16 %v2542_v13  ;;  %v3030_v48 = vunpack.c.h.s8.bf16 %v2542_v13 }
 0x801   : > { %3840 = vmatpush1.bf16.msra.mxu0 %v3459_v18  ;;  %v2477_v18 = vld [vmem:[%s6857_s4 + $0x110] sm:$0xff] }
 0x802   : > { %3881 = vmatpush1.bf16.msra.mxu1 %v3587_v41  ;;  %3891 = vmatprep.subr.bf16.mxu0 %v2830_v42  ;;  %v2541_v41 = vld [vmem:[%s6857_s4 + $0x310] sm:$0xff]  ;;  %v2893_v42 = vunpack.c.l.s8.bf16 %v2477_v18 }
 0x803   : > { %3932 = vmatprep.subr.bf16.mxu1 %v2958_v19  ;;  %v3021_v19 = vunpack.c.l.s8.bf16 %v2541_v41 }
 0x804   : > { %3842 = vmatmul.mubr.bf16.vlgmr.msra.gmra.mrb[8].mxu0 %v7473_v23 }
 0x805   : > { %3883 = vmatmul.mubr.bf16.vlgmr.msra.gmra.mrb[8].mxu1 %v7477_v24  ;;  %3892 = vmatpush1.bf16.msra.mxu0 %v2829_v26  ;;  %v2486_v26 = vld [vmem:[%s6857_s4 + $0x158] sm:$0xff] }
 0x806   : > { %3933 = vmatpush1.bf16.msra.mxu1 %v2957_v27  ;;  %3893 = vmatprep.subr.bf16.mxu0 %v2838_v28  ;;  %v2550_v27 = vld [vmem:[%s6857_s4 + $0x358] sm:$0xff]  ;;  %v2901_v28 = vunpack.c.h.s8.bf16 %v2477_v18  ;;  %v2910_v58 = vunpack.c.l.s8.bf16 %v2486_v26  ;;  %v2918_v44 = vunpack.c.h.s8.bf16 %v2486_v26 }
 0x807   : > { %3934 = vmatprep.subr.bf16.mxu1 %v2966_v57  ;;  %3923 = vmatprep.mubr.bf16.mxu0 %v7323_v46  ;;  %v3029_v57 = vunpack.c.h.s8.bf16 %v2541_v41  ;;  %v3038_v31 = vunpack.c.l.s8.bf16 %v2550_v27  ;;  %v3046_v45 = vunpack.c.h.s8.bf16 %v2550_v27 }
 0x808   : > { %3964 = vmatprep.mubr.bf16.mxu1 %v7327_v50 }
 0x809   : > { %3894 = vmatpush1.bf16.msra.mxu0 %v2837_v34  ;;  %v2485_v34 = vld [vmem:[%s6857_s4 + $0x150] sm:$0xff] }
 0x80a   : > { %3935 = vmatpush1.bf16.msra.mxu1 %v2965_v35  ;;  %3895 = vmatprep.subr.bf16.mxu0 %v2846_v40  ;;  %v2549_v35 = vld [vmem:[%s6857_s4 + $0x350] sm:$0xff]  ;;  %v2909_v40 = vunpack.c.l.s8.bf16 %v2485_v34 }
 0x80b   : > { %3936 = vmatprep.subr.bf16.mxu1 %v2974_v43  ;;  %v3037_v43 = vunpack.c.l.s8.bf16 %v2549_v35 }
 0x80d   : > { %3896 = vmatpush1.bf16.msra.mxu0 %v2845_v22  ;;  %v2494_v22 = vld [vmem:[%s6857_s4 + $0x198] sm:$0xff] }
 0x80e   : > { %3937 = vmatpush1.bf16.msra.mxu1 %v2973_v37  ;;  %3897 = vmatprep.subr.bf16.mxu0 %v2854_v38  ;;  %v2558_v37 = vld [vmem:[%s6857_s4 + $0x398] sm:$0xff]  ;;  %v2917_v38 = vunpack.c.h.s8.bf16 %v2485_v34  ;;  %v2926_v53 = vunpack.c.l.s8.bf16 %v2494_v22  ;;  %v2934_v25 = vunpack.c.h.s8.bf16 %v2494_v22 }
 0x80f   : > { %3938 = vmatprep.subr.bf16.mxu1 %v2982_v54  ;;  %v3045_v54 = vunpack.c.h.s8.bf16 %v2549_v35  ;;  %v3054_v55 = vunpack.c.l.s8.bf16 %v2558_v37  ;;  %v3062_v62 = vunpack.c.h.s8.bf16 %v2558_v37 }
 0x811   : > { %3898 = vmatpush1.bf16.msra.mxu0 %v2853_v47  ;;  %v2493_v47 = vld [vmem:[%s6857_s4 + $0x190] sm:$0xff] }
 0x812   : > { %3939 = vmatpush1.bf16.msra.mxu1 %v2981_v56  ;;  %3899 = vmatprep.subr.bf16.mxu0 %v2862_v61  ;;  %v2557_v56 = vld [vmem:[%s6857_s4 + $0x390] sm:$0xff]  ;;  %v2925_v61 = vunpack.c.l.s8.bf16 %v2493_v47 }
 0x813   : > { %3940 = vmatprep.subr.bf16.mxu1 %v2990_v49  ;;  %v3053_v49 = vunpack.c.l.s8.bf16 %v2557_v56 }
 0x815   : > { %3900 = vmatpush1.bf16.msra.mxu0 %v2861_v36  ;;  %v2502_v36 = vld [vmem:[%s6857_s4 + $0x1d8] sm:$0xff] }
 0x816   : > { %3941 = vmatpush1.bf16.msra.mxu1 %v2989_v63  ;;  %3901 = vmatprep.subr.bf16.mxu0 %v2870_v1  ;;  %v2566_v63 = vld [vmem:[%s6857_s4 + $0x3d8] sm:$0xff]  ;;  %v2933_v1 = vunpack.c.h.s8.bf16 %v2493_v47  ;;  %v2942_v2 = vunpack.c.l.s8.bf16 %v2502_v36  ;;  %v2950_v8 = vunpack.c.h.s8.bf16 %v2502_v36 }
 0x817   : > { %3942 = vmatprep.subr.bf16.mxu1 %v2998_v52  ;;  %v3061_v52 = vunpack.c.h.s8.bf16 %v2557_v56  ;;  %v3070_v3 = vunpack.c.l.s8.bf16 %v2566_v63  ;;  %v3078_v9 = vunpack.c.h.s8.bf16 %v2566_v63 }
 0x819   : > { %3902 = vmatpush1.bf16.msra.mxu0 %v2869_v4  ;;  %v2501_v4 = vld [vmem:[%s6857_s4 + $0x1d0] sm:$0xff] }
 0x81a   : > { %3943 = vmatpush1.bf16.msra.mxu1 %v2997_v5  ;;  %3903 = vmatprep.subr.bf16.mxu0 %v2878_v6  ;;  %v2565_v5 = vld [vmem:[%s6857_s4 + $0x3d0] sm:$0xff]  ;;  %v2941_v6 = vunpack.c.l.s8.bf16 %v2501_v4 }
 0x81b   : > { %3944 = vmatprep.subr.bf16.mxu1 %v3006_v7  ;;  %v3069_v7 = vunpack.c.l.s8.bf16 %v2565_v5 }
 0x81d   : > { %3904 = vmatpush1.bf16.msra.mxu0 %v2877_v10  ;;  %v2574_v10 = vld [vmem:[%s6857_s4 + $0x418] sm:$0xff] }
 0x81e   : > { %3945 = vmatpush1.bf16.msra.mxu1 %v3005_v11  ;;  %3905 = vmatprep.subr.bf16.mxu0 %v2886_v12  ;;  %v2638_v11 = vld [vmem:[%s6857_s4 + $0x618] sm:$0xff]  ;;  %v2949_v12 = vunpack.c.h.s8.bf16 %v2501_v4  ;;  %v3086_v30 = vunpack.c.l.s8.bf16 %v2574_v10  ;;  %v3094_v18 = vunpack.c.h.s8.bf16 %v2574_v10 }
 0x81f   : > { %3946 = vmatprep.subr.bf16.mxu1 %v3014_v29  ;;  %v3077_v29 = vunpack.c.h.s8.bf16 %v2565_v5  ;;  %v3214_v13 = vunpack.c.l.s8.bf16 %v2638_v11  ;;  %v3222_v41 = vunpack.c.h.s8.bf16 %v2638_v11 }
 0x821   : > { %3906 = vmatpush1.bf16.msra.mxu0 %v2885_v14  ;;  %v2573_v14 = vld [vmem:[%s6857_s4 + $0x410] sm:$0xff] }
 0x822   : > { %3947 = vmatpush1.bf16.msra.mxu1 %v3013_v15  ;;  %3907 = vmatprep.subr.bf16.mxu0 %v2894_v16  ;;  %v2637_v15 = vld [vmem:[%s6857_s4 + $0x610] sm:$0xff]  ;;  %v3085_v16 = vunpack.c.l.s8.bf16 %v2573_v14 }
 0x823   : > { %3948 = vmatprep.subr.bf16.mxu1 %v3022_v17  ;;  %v3213_v17 = vunpack.c.l.s8.bf16 %v2637_v15 }
 0x825   : > { %3908 = vmatpush1.bf16.msra.mxu0 %v2893_v42  ;;  %v2582_v42 = vld [vmem:[%s6857_s4 + $0x458] sm:$0xff] }
 0x826   : > { %3949 = vmatpush1.bf16.msra.mxu1 %v3021_v19  ;;  %3909 = vmatprep.subr.bf16.mxu0 %v2902_v20  ;;  %v2646_v19 = vld [vmem:[%s6857_s4 + $0x658] sm:$0xff]  ;;  %v3093_v20 = vunpack.c.h.s8.bf16 %v2573_v14  ;;  %v3102_v26 = vunpack.c.l.s8.bf16 %v2582_v42  ;;  %v3110_v34 = vunpack.c.h.s8.bf16 %v2582_v42  ;;  %v2605_v42 = vld [vmem:[%s6857_s4 + $0x510] sm:$0xff] }
 0x827   : > { %3950 = vmatprep.subr.bf16.mxu1 %v3030_v48  ;;  %v3221_v48 = vunpack.c.h.s8.bf16 %v2637_v15  ;;  %v3230_v27 = vunpack.c.l.s8.bf16 %v2646_v19  ;;  %v3238_v35 = vunpack.c.h.s8.bf16 %v2646_v19  ;;  %v2606_v14 = vld [vmem:[%s6857_s4 + $0x518] sm:$0xff]  ;;  %v2669_v19 = vld [vmem:[%s6857_s4 + $0x710] sm:$0xff] }
 0x828   : > { %v2670_v15 = vld [vmem:[%s6857_s4 + $0x718] sm:$0xff] }
 0x829   : > { %3910 = vmatpush1.bf16.msra.mxu0 %v2901_v28  ;;  %v2581_v28 = vld [vmem:[%s6857_s4 + $0x450] sm:$0xff] }
 0x82a   : > { %3951 = vmatpush1.bf16.msra.mxu1 %v3029_v57  ;;  %3911 = vmatprep.subr.bf16.mxu0 %v2910_v58  ;;  %v2645_v57 = vld [vmem:[%s6857_s4 + $0x650] sm:$0xff]  ;;  %v3101_v58 = vunpack.c.l.s8.bf16 %v2581_v28 }
 0x82b   : > { %3952 = vmatprep.subr.bf16.mxu1 %v3038_v31  ;;  %v3229_v31 = vunpack.c.l.s8.bf16 %v2645_v57 }
 0x82d   : > { %3912 = vmatpush1.bf16.msra.mxu0 %v2909_v40  ;;  %v2590_v40 = vld [vmem:[%s6857_s4 + $0x498] sm:$0xff] }
 0x82e   : > { %3953 = vmatpush1.bf16.msra.mxu1 %v3037_v43  ;;  %3913 = vmatprep.subr.bf16.mxu0 %v2918_v44  ;;  %v2654_v43 = vld [vmem:[%s6857_s4 + $0x698] sm:$0xff]  ;;  %v3109_v44 = vunpack.c.h.s8.bf16 %v2581_v28  ;;  %v3118_v22 = vunpack.c.l.s8.bf16 %v2590_v40  ;;  %v3126_v47 = vunpack.c.h.s8.bf16 %v2590_v40  ;;  %v2613_v40 = vld [vmem:[%s6857_s4 + $0x550] sm:$0xff] }
 0x82f   : > { %3954 = vmatprep.subr.bf16.mxu1 %v3046_v45  ;;  %v3237_v45 = vunpack.c.h.s8.bf16 %v2645_v57  ;;  %v3246_v37 = vunpack.c.l.s8.bf16 %v2654_v43  ;;  %v3254_v56 = vunpack.c.h.s8.bf16 %v2654_v43  ;;  %v2614_v28 = vld [vmem:[%s6857_s4 + $0x558] sm:$0xff]  ;;  %v2677_v43 = vld [vmem:[%s6857_s4 + $0x750] sm:$0xff] }
 0x830   : > { %v2678_v57 = vld [vmem:[%s6857_s4 + $0x758] sm:$0xff] }
 0x831   : > { %3914 = vmatpush1.bf16.msra.mxu0 %v2917_v38  ;;  %v2589_v38 = vld [vmem:[%s6857_s4 + $0x490] sm:$0xff] }
 0x832   : > { %3955 = vmatpush1.bf16.msra.mxu1 %v3045_v54  ;;  %3915 = vmatprep.subr.bf16.mxu0 %v2926_v53  ;;  %v2653_v54 = vld [vmem:[%s6857_s4 + $0x690] sm:$0xff]  ;;  %v3117_v53 = vunpack.c.l.s8.bf16 %v2589_v38 }
 0x833   : > { %3956 = vmatprep.subr.bf16.mxu1 %v3054_v55  ;;  %v3245_v55 = vunpack.c.l.s8.bf16 %v2653_v54 }
 0x835   : > { %3916 = vmatpush1.bf16.msra.mxu0 %v2925_v61  ;;  %v2598_v61 = vld [vmem:[%s6857_s4 + $0x4d8] sm:$0xff] }
 0x836   : > { %3957 = vmatpush1.bf16.msra.mxu1 %v3053_v49  ;;  %3917 = vmatprep.subr.bf16.mxu0 %v2934_v25  ;;  %v2662_v49 = vld [vmem:[%s6857_s4 + $0x6d8] sm:$0xff]  ;;  %v3125_v25 = vunpack.c.h.s8.bf16 %v2589_v38  ;;  %v3134_v36 = vunpack.c.l.s8.bf16 %v2598_v61 }
 0x837   : > { %3958 = vmatprep.subr.bf16.mxu1 %v3062_v62  ;;  %v3253_v62 = vunpack.c.h.s8.bf16 %v2653_v54  ;;  %v3262_v63 = vunpack.c.l.s8.bf16 %v2662_v49  ;;  %v2622_v38 = vld [vmem:[%s6857_s4 + $0x598] sm:$0xff] }
 0x838   : > { %v2686_v54 = vld [vmem:[%s6857_s4 + $0x798] sm:$0xff] }
 0x839   : > { %3918 = vmatpush1.bf16.msra.mxu0 %v2933_v1  ;;  %v2597_v1 = vld [vmem:[%s6857_s4 + $0x4d0] sm:$0xff] }
 0x83a   : > { %3959 = vmatpush1.bf16.msra.mxu1 %v3061_v52  ;;  %3919 = vmatprep.subr.bf16.mxu0 %v2942_v2  ;;  %v2661_v52 = vld [vmem:[%s6857_s4 + $0x6d0] sm:$0xff]  ;;  %v3133_v10 = vunpack.c.l.s8.bf16 %v2597_v1 }
 0x83b   : > { %3960 = vmatprep.subr.bf16.mxu1 %v3070_v3  ;;  %v3261_v11 = vunpack.c.l.s8.bf16 %v2661_v52 }
 0x83d   : > { %3920 = vmatpush1.bf16.msra.mxu0 %v2941_v6 }
 0x83e   : > { %3961 = vmatpush1.bf16.msra.mxu1 %v3069_v7  ;;  %3921 = vmatprep.subr.bf16.mxu0 %v2950_v8 }
 0x83f   : > { %3962 = vmatprep.subr.bf16.mxu1 %v3078_v9 }
 0x841   : > { %3922 = vmatpush1.bf16.msra.mxu0 %v2949_v12 }
 0x842   : > { %3963 = vmatpush1.bf16.msra.mxu1 %v3077_v29  ;;  %3973 = vmatprep.subr.bf16.mxu0 %v3086_v30  ;;  %v3142_v30 = vunpack.c.h.s8.bf16 %v2598_v61  ;;  %v2621_v61 = vld [vmem:[%s6857_s4 + $0x590] sm:$0xff] }
 0x843   : > { %4014 = vmatprep.subr.bf16.mxu1 %v3214_v13  ;;  %v3270_v13 = vunpack.c.h.s8.bf16 %v2662_v49  ;;  %v2685_v49 = vld [vmem:[%s6857_s4 + $0x790] sm:$0xff] }
 0x844   : > { %3924 = vmatmul.mubr.bf16.vlgmr.msra.gmra.mrb[12].mxu0 %v7357_v59 }
 0x845   : > { %3965 = vmatmul.mubr.bf16.vlgmr.msra.gmra.mrb[12].mxu1 %v7361_v21  ;;  %3974 = vmatpush1.bf16.msra.mxu0 %v3085_v16  ;;  %v3141_v16 = vunpack.c.h.s8.bf16 %v2597_v1  ;;  %v2630_v1 = vld [vmem:[%s6857_s4 + $0x5d8] sm:$0xff] }
 0x846   : > { %4015 = vmatpush1.bf16.msra.mxu1 %v3213_v17  ;;  %3975 = vmatprep.subr.bf16.mxu0 %v3094_v18  ;;  %v3269_v17 = vunpack.c.h.s8.bf16 %v2661_v52  ;;  %v3150_v18 = vunpack.c.l.s8.bf16 %v2606_v14  ;;  %v2694_v52 = vld [vmem:[%s6857_s4 + $0x7d8] sm:$0xff] }
 0x847   : > { %4016 = vmatprep.subr.bf16.mxu1 %v3222_v41  ;;  %4005 = vmatprep.mubr.bf16.mxu0 %v7373_v39  ;;  %v3278_v41 = vunpack.c.l.s8.bf16 %v2670_v15 }
 0x848   : > { %4046 = vmatprep.mubr.bf16.mxu1 %v7377_v0 }
 0x849   : > { %3976 = vmatpush1.bf16.msra.mxu0 %v3093_v20  ;;  %v3149_v20 = vunpack.c.l.s8.bf16 %v2605_v42 }
 0x84a   : > { %4017 = vmatpush1.bf16.msra.mxu1 %v3221_v48  ;;  %3977 = vmatprep.subr.bf16.mxu0 %v3102_v26  ;;  %v3277_v48 = vunpack.c.l.s8.bf16 %v2669_v19  ;;  %v3158_v26 = vunpack.c.h.s8.bf16 %v2606_v14 }
 0x84b   : > { %4018 = vmatprep.subr.bf16.mxu1 %v3230_v27  ;;  %v3286_v27 = vunpack.c.h.s8.bf16 %v2670_v15 }
 0x84d   : > { %3978 = vmatpush1.bf16.msra.mxu0 %v3101_v58  ;;  %v3157_v58 = vunpack.c.h.s8.bf16 %v2605_v42 }
 0x84e   : > { %4019 = vmatpush1.bf16.msra.mxu1 %v3229_v31  ;;  %3979 = vmatprep.subr.bf16.mxu0 %v3110_v34  ;;  %v3285_v31 = vunpack.c.h.s8.bf16 %v2669_v19  ;;  %v3166_v34 = vunpack.c.l.s8.bf16 %v2614_v28 }
 0x84f   : > { %4020 = vmatprep.subr.bf16.mxu1 %v3238_v35  ;;  %v3294_v35 = vunpack.c.l.s8.bf16 %v2678_v57 }
 0x851   : > { %3980 = vmatpush1.bf16.msra.mxu0 %v3109_v44  ;;  %v3165_v44 = vunpack.c.l.s8.bf16 %v2613_v40 }
 0x852   : > { %4021 = vmatpush1.bf16.msra.mxu1 %v3237_v45  ;;  %3981 = vmatprep.subr.bf16.mxu0 %v3118_v22  ;;  %v3293_v45 = vunpack.c.l.s8.bf16 %v2677_v43  ;;  %v3174_v22 = vunpack.c.h.s8.bf16 %v2614_v28 }
 0x853   : > { %4022 = vmatprep.subr.bf16.mxu1 %v3246_v37  ;;  %v3302_v37 = vunpack.c.h.s8.bf16 %v2678_v57 }
 0x855   : > { %3982 = vmatpush1.bf16.msra.mxu0 %v3117_v53  ;;  %v3173_v53 = vunpack.c.h.s8.bf16 %v2613_v40 }
 0x856   : > { %4023 = vmatpush1.bf16.msra.mxu1 %v3245_v55  ;;  %3983 = vmatprep.subr.bf16.mxu0 %v3126_v47  ;;  %v3301_v55 = vunpack.c.h.s8.bf16 %v2677_v43  ;;  %v3182_v47 = vunpack.c.l.s8.bf16 %v2622_v38 }
 0x857   : > { %4024 = vmatprep.subr.bf16.mxu1 %v3254_v56  ;;  %v3679_v2 = vpop.f32.mrb[0].mxu0  ;;  %v3310_v56 = vunpack.c.l.s8.bf16 %v2686_v54 }
 0x858   : > { %v3720_v3 = vpop.f32.mrb[0].mxu1  ;;  %v3681_v5 = vpop.f32.mrb[1].mxu0 }
 0x859   : > { %v7531_v4 = vadd.f32 %v3720_v3, %v3679_v2  ;;  %v3722_v6 = vpop.f32.mrb[1].mxu1  ;;  %v3683_v8 = vpop.f32.mrb[2].mxu0  ;;  %3984 = vmatpush1.bf16.msra.mxu0 %v3125_v25  ;;  %v3181_v25 = vunpack.c.l.s8.bf16 %v2621_v61  ;;  %v3189_v2 = vunpack.c.h.s8.bf16 %v2621_v61  ;;  %v3317_v3 = vunpack.c.h.s8.bf16 %v2685_v49 }
 0x85a   : > { %v7533_v7 = vadd.f32 %v3722_v6, %v3681_v5  ;;  %v3724_v9 = vpop.f32.mrb[2].mxu1  ;;  %4025 = vmatpush1.bf16.msra.mxu1 %v3253_v62  ;;  %v3684_v12 = vpop.f32.mrb[3].mxu0  ;;  %3985 = vmatprep.subr.bf16.mxu0 %v3134_v36  ;;  %v3309_v62 = vunpack.c.l.s8.bf16 %v2685_v49  ;;  %v3190_v36 = vunpack.c.h.s8.bf16 %v2622_v38  ;;  %v3198_v5 = vunpack.c.l.s8.bf16 %v2630_v1  ;;  %v2629_v8 = vld [vmem:[%s6857_s4 + $0x5d0] sm:$0xff] }
 0x85b   : > { %v3725_v29 = vpop.f32.mrb[3].mxu1  ;;  %4026 = vmatprep.subr.bf16.mxu1 %v3262_v63  ;;  %v3318_v63 = vunpack.c.h.s8.bf16 %v2686_v54  ;;  %v3326_v6 = vunpack.c.l.s8.bf16 %v2694_v52  ;;  %v2693_v9 = vld [vmem:[%s6857_s4 + $0x7d0] sm:$0xff]  ;;  %v3206_v12 = vunpack.c.h.s8.bf16 %v2630_v1  ;;  %v3205_v14 = vunpack.c.h.s8.bf16 %v2629_v8 }
 0x85c   : > { %v3334_v29 = vunpack.c.h.s8.bf16 %v2694_v52  ;;  %v3333_v15 = vunpack.c.h.s8.bf16 %v2693_v9 }
 0x85d   : > { %3986 = vmatpush1.bf16.msra.mxu0 %v3133_v10  ;;  %v3197_v10 = vunpack.c.l.s8.bf16 %v2629_v8 }
 0x85e   : > { %4027 = vmatpush1.bf16.msra.mxu1 %v3261_v11  ;;  %3987 = vmatprep.subr.bf16.mxu0 %v3142_v30  ;;  %v3325_v11 = vunpack.c.l.s8.bf16 %v2693_v9  ;;  %v2702_v30 = vld [vmem:[%s6857_s4 + $0x818] sm:$0xff] }
 0x85f   : > { %4028 = vmatprep.subr.bf16.mxu1 %v3270_v13  ;;  %v2766_v13 = vld [vmem:[%s6857_s4 + $0xa18] sm:$0xff] }
 0x861   : > { %3988 = vmatpush1.bf16.msra.mxu0 %v3141_v16  ;;  %v3342_v16 = vunpack.c.l.s8.bf16 %v2702_v30 }
 0x862   : > { %4029 = vmatpush1.bf16.msra.mxu1 %v3269_v17  ;;  %3989 = vmatprep.subr.bf16.mxu0 %v3150_v18  ;;  %v3470_v17 = vunpack.c.l.s8.bf16 %v2766_v13  ;;  %v2701_v18 = vld [vmem:[%s6857_s4 + $0x810] sm:$0xff] }
 0x863   : > { %4030 = vmatprep.subr.bf16.mxu1 %v3278_v41  ;;  %v2765_v41 = vld [vmem:[%s6857_s4 + $0xa10] sm:$0xff]  ;;  %v3341_v42 = vunpack.c.l.s8.bf16 %v2701_v18  ;;  %v3349_v28 = vunpack.c.h.s8.bf16 %v2701_v18 }
 0x864   : > { %v3469_v19 = vunpack.c.l.s8.bf16 %v2765_v41  ;;  %v3477_v57 = vunpack.c.h.s8.bf16 %v2765_v41 }
 0x865   : > { %3990 = vmatpush1.bf16.msra.mxu0 %v3149_v20  ;;  %v3350_v20 = vunpack.c.h.s8.bf16 %v2702_v30 }
 0x866   : > { %4031 = vmatpush1.bf16.msra.mxu1 %v3277_v48  ;;  %3991 = vmatprep.subr.bf16.mxu0 %v3158_v26  ;;  %v3478_v48 = vunpack.c.h.s8.bf16 %v2766_v13  ;;  %v2710_v26 = vld [vmem:[%s6857_s4 + $0x858] sm:$0xff] }
 0x867   : > { %4032 = vmatprep.subr.bf16.mxu1 %v3286_v27  ;;  %v2774_v27 = vld [vmem:[%s6857_s4 + $0xa58] sm:$0xff] }
 0x869   : > { %3992 = vmatpush1.bf16.msra.mxu0 %v3157_v58  ;;  %v3358_v58 = vunpack.c.l.s8.bf16 %v2710_v26 }
 0x86a   : > { %4033 = vmatpush1.bf16.msra.mxu1 %v3285_v31  ;;  %3993 = vmatprep.subr.bf16.mxu0 %v3166_v34  ;;  %v3486_v31 = vunpack.c.l.s8.bf16 %v2774_v27  ;;  %v2709_v34 = vld [vmem:[%s6857_s4 + $0x850] sm:$0xff] }
 0x86b   : > { %4034 = vmatprep.subr.bf16.mxu1 %v3294_v35  ;;  %v2773_v35 = vld [vmem:[%s6857_s4 + $0xa50] sm:$0xff]  ;;  %v3357_v40 = vunpack.c.l.s8.bf16 %v2709_v34  ;;  %v3365_v38 = vunpack.c.h.s8.bf16 %v2709_v34 }
 0x86c   : > { %v3485_v43 = vunpack.c.l.s8.bf16 %v2773_v35  ;;  %v3493_v54 = vunpack.c.h.s8.bf16 %v2773_v35 }
 0x86d   : > { %3994 = vmatpush1.bf16.msra.mxu0 %v3165_v44  ;;  %v3366_v44 = vunpack.c.h.s8.bf16 %v2710_v26 }
 0x86e   : > { %4035 = vmatpush1.bf16.msra.mxu1 %v3293_v45  ;;  %3995 = vmatprep.subr.bf16.mxu0 %v3174_v22  ;;  %v3494_v45 = vunpack.c.h.s8.bf16 %v2774_v27  ;;  %v2718_v22 = vld [vmem:[%s6857_s4 + $0x898] sm:$0xff] }
 0x86f   : > { %4036 = vmatprep.subr.bf16.mxu1 %v3302_v37  ;;  %v2782_v37 = vld [vmem:[%s6857_s4 + $0xa98] sm:$0xff] }
 0x871   : > { %3996 = vmatpush1.bf16.msra.mxu0 %v3173_v53  ;;  %v3374_v53 = vunpack.c.l.s8.bf16 %v2718_v22 }
 0x872   : > { %4037 = vmatpush1.bf16.msra.mxu1 %v3301_v55  ;;  %3997 = vmatprep.subr.bf16.mxu0 %v3182_v47  ;;  %v3502_v55 = vunpack.c.l.s8.bf16 %v2782_v37  ;;  %v2717_v47 = vld [vmem:[%s6857_s4 + $0x890] sm:$0xff] }
 0x873   : > { %4038 = vmatprep.subr.bf16.mxu1 %v3310_v56  ;;  %v2781_v56 = vld [vmem:[%s6857_s4 + $0xa90] sm:$0xff]  ;;  %v3373_v61 = vunpack.c.l.s8.bf16 %v2717_v47  ;;  %v3381_v1 = vunpack.c.h.s8.bf16 %v2717_v47 }
 0x874   : > { %v3501_v49 = vunpack.c.l.s8.bf16 %v2781_v56  ;;  %v3509_v52 = vunpack.c.h.s8.bf16 %v2781_v56 }
 0x875   : > { %3998 = vmatpush1.bf16.msra.mxu0 %v3181_v25  ;;  %v3382_v25 = vunpack.c.h.s8.bf16 %v2718_v22 }
 0x876   : > { %4039 = vmatpush1.bf16.msra.mxu1 %v3309_v62  ;;  %3999 = vmatprep.subr.bf16.mxu0 %v3190_v36  ;;  %v3510_v62 = vunpack.c.h.s8.bf16 %v2782_v37  ;;  %v2726_v36 = vld [vmem:[%s6857_s4 + $0x8d8] sm:$0xff] }
 0x877   : > { %4040 = vmatprep.subr.bf16.mxu1 %v3318_v63  ;;  %v2790_v63 = vld [vmem:[%s6857_s4 + $0xad8] sm:$0xff] }
 0x878   : > { %v3526_v41 = vunpack.c.h.s8.bf16 %v2790_v63 }
 0x879   : > { %4000 = vmatpush1.bf16.msra.mxu0 %v3189_v2  ;;  %v3390_v2 = vunpack.c.l.s8.bf16 %v2726_v36 }
 0x87a   : > { %4041 = vmatpush1.bf16.msra.mxu1 %v3317_v3  ;;  %4001 = vmatprep.subr.bf16.mxu0 %v3198_v5  ;;  %v3518_v3 = vunpack.c.l.s8.bf16 %v2790_v63  ;;  %v2725_v5 = vld [vmem:[%s6857_s4 + $0x8d0] sm:$0xff] }
 0x87b   : > { %4042 = vmatprep.subr.bf16.mxu1 %v3326_v6  ;;  %v2789_v6 = vld [vmem:[%s6857_s4 + $0xad0] sm:$0xff] }
 0x87d   : > { %4002 = vmatpush1.bf16.msra.mxu0 %v3197_v10 }
 0x87e   : > { %4043 = vmatpush1.bf16.msra.mxu1 %v3325_v11  ;;  %4003 = vmatprep.subr.bf16.mxu0 %v3206_v12 }
 0x87f   : > { %4044 = vmatprep.subr.bf16.mxu1 %v3334_v29 }
 0x881   : > { %4004 = vmatpush1.bf16.msra.mxu0 %v3205_v14  ;;  %v3389_v14 = vunpack.c.l.s8.bf16 %v2725_v5 }
 0x882   : > { %4045 = vmatpush1.bf16.msra.mxu1 %v3333_v15  ;;  %4055 = vmatprep.subr.bf16.mxu0 %v3342_v16  ;;  %v3517_v15 = vunpack.c.l.s8.bf16 %v2789_v6 }
 0x883   : > { %4096 = vmatprep.subr.bf16.mxu1 %v3470_v17 }
 0x884   : > { %4006 = vmatmul.mubr.bf16.vlgmr.msra.gmra.mrb[16].mxu0 %v7415_v32 }
 0x885   : > { %4047 = vmatmul.mubr.bf16.vlgmr.msra.gmra.mrb[16].mxu1 %v7419_v33  ;;  %4056 = vmatpush1.bf16.msra.mxu0 %v3341_v42 }
 0x886   : > { %4097 = vmatpush1.bf16.msra.mxu1 %v3469_v19  ;;  %4057 = vmatprep.subr.bf16.mxu0 %v3350_v20  ;;  %v2798_v19 = vld [vmem:[%s6857_s4 + $0xb18] sm:$0xff]  ;;  %v3397_v20 = vunpack.c.h.s8.bf16 %v2725_v5 }
 0x887   : > { %4098 = vmatprep.subr.bf16.mxu1 %v3478_v48  ;;  %4087 = vmatprep.mubr.bf16.mxu0 %v7431_v60  ;;  %v3525_v48 = vunpack.c.h.s8.bf16 %v2789_v6  ;;  %v3534_v27 = vunpack.c.l.s8.bf16 %v2798_v19  ;;  %v3542_v35 = vunpack.c.h.s8.bf16 %v2798_v19 }
 0x888   : > { %4128 = vmatprep.mubr.bf16.mxu1 %v7435_v51 }
 0x889   : > { %4058 = vmatpush1.bf16.msra.mxu0 %v3349_v28  ;;  %v2733_v28 = vld [vmem:[%s6857_s4 + $0x910] sm:$0xff] }
 0x88a   : > { %4099 = vmatpush1.bf16.msra.mxu1 %v3477_v57  ;;  %4059 = vmatprep.subr.bf16.mxu0 %v3358_v58  ;;  %v2797_v57 = vld [vmem:[%s6857_s4 + $0xb10] sm:$0xff]  ;;  %v3405_v58 = vunpack.c.l.s8.bf16 %v2733_v28 }
 0x88b   : > { %4100 = vmatprep.subr.bf16.mxu1 %v3486_v31  ;;  %v3533_v31 = vunpack.c.l.s8.bf16 %v2797_v57 }
 0x88d   : > { %4060 = vmatpush1.bf16.msra.mxu0 %v3357_v40  ;;  %v2742_v40 = vld [vmem:[%s6857_s4 + $0x958] sm:$0xff] }
 0x88e   : > { %4101 = vmatpush1.bf16.msra.mxu1 %v3485_v43  ;;  %4061 = vmatprep.subr.bf16.mxu0 %v3366_v44  ;;  %v2806_v43 = vld [vmem:[%s6857_s4 + $0xb58] sm:$0xff]  ;;  %v3413_v44 = vunpack.c.h.s8.bf16 %v2733_v28  ;;  %v3422_v22 = vunpack.c.l.s8.bf16 %v2742_v40  ;;  %v3430_v47 = vunpack.c.h.s8.bf16 %v2742_v40 }
 0x88f   : > { %4102 = vmatprep.subr.bf16.mxu1 %v3494_v45  ;;  %v3541_v45 = vunpack.c.h.s8.bf16 %v2797_v57  ;;  %v3550_v37 = vunpack.c.l.s8.bf16 %v2806_v43  ;;  %v3558_v56 = vunpack.c.h.s8.bf16 %v2806_v43 }
 0x891   : > { %4062 = vmatpush1.bf16.msra.mxu0 %v3365_v38  ;;  %v2741_v38 = vld [vmem:[%s6857_s4 + $0x950] sm:$0xff] }
 0x892   : > { %4103 = vmatpush1.bf16.msra.mxu1 %v3493_v54  ;;  %4063 = vmatprep.subr.bf16.mxu0 %v3374_v53  ;;  %v2805_v54 = vld [vmem:[%s6857_s4 + $0xb50] sm:$0xff]  ;;  %v3421_v53 = vunpack.c.l.s8.bf16 %v2741_v38 }
 0x893   : > { %4104 = vmatprep.subr.bf16.mxu1 %v3502_v55  ;;  %v3549_v55 = vunpack.c.l.s8.bf16 %v2805_v54 }
 0x895   : > { %4064 = vmatpush1.bf16.msra.mxu0 %v3373_v61  ;;  %v2750_v61 = vld [vmem:[%s6857_s4 + $0x998] sm:$0xff] }
 0x896   : > { %4105 = vmatpush1.bf16.msra.mxu1 %v3501_v49  ;;  %4065 = vmatprep.subr.bf16.mxu0 %v3382_v25  ;;  %v2814_v49 = vld [vmem:[%s6857_s4 + $0xb98] sm:$0xff]  ;;  %v3429_v25 = vunpack.c.h.s8.bf16 %v2741_v38  ;;  %v3446_v5 = vunpack.c.h.s8.bf16 %v2750_v61 }
 0x897   : > { %4106 = vmatprep.subr.bf16.mxu1 %v3510_v62  ;;  %v3761_v8 = vpop.f32.mrb[4].mxu0  ;;  %v3557_v62 = vunpack.c.h.s8.bf16 %v2805_v54  ;;  %v3566_v63 = vunpack.c.l.s8.bf16 %v2814_v49  ;;  %v3574_v6 = vunpack.c.h.s8.bf16 %v2814_v49 }
 0x898   : > { %v3802_v9 = vpop.f32.mrb[4].mxu1  ;;  %v3762_v10 = vadd.f32 %v3761_v8, %v7531_v4  ;;  %v3763_v11 = vpop.f32.mrb[5].mxu0  ;;  %v3398_v4 = vunpack.c.h.s8.bf16 %v2726_v36  ;;  %v3438_v36 = vunpack.c.l.s8.bf16 %v2750_v61  ;;  %v2758_v8 = vld [vmem:[%s6857_s4 + $0x9d8] sm:$0xff] }
 0x899   : > { %v3804_v12 = vpop.f32.mrb[5].mxu1  ;;  %v3764_v29 = vadd.f32 %v3763_v11, %v7533_v7  ;;  %v3765_v30 = vpop.f32.mrb[6].mxu0  ;;  %4066 = vmatpush1.bf16.msra.mxu0 %v3381_v1  ;;  %v2734_v7 = vld [vmem:[%s6857_s4 + $0x918] sm:$0xff]  ;;  %v2749_v1 = vld [vmem:[%s6857_s4 + $0x990] sm:$0xff] }
 0x89a   : > { %v3806_v13 = vpop.f32.mrb[6].mxu1  ;;  %4107 = vmatpush1.bf16.msra.mxu1 %v3509_v52  ;;  %v7573_v16 = vadd.f32 %v3802_v9, %v3762_v10  ;;  %v3766_v17 = vpop.f32.mrb[7].mxu0  ;;  %4067 = vmatprep.subr.bf16.mxu0 %v3390_v2  ;;  %v3406_v26 = vunpack.c.l.s8.bf16 %v2734_v7  ;;  %v3414_v34 = vunpack.c.h.s8.bf16 %v2734_v7  ;;  %v2813_v52 = vld [vmem:[%s6857_s4 + $0xb90] sm:$0xff]  ;;  %v3437_v2 = vunpack.c.l.s8.bf16 %v2749_v1  ;;  %v2822_v9 = vld [vmem:[%s6857_s4 + $0xbd8] sm:$0xff] }
 0x89b   : > { %v3807_v18 = vpop.f32.mrb[7].mxu1  ;;  %4108 = vmatprep.subr.bf16.mxu1 %v3518_v3  ;;  %v7575_v42 = vadd.f32 %v3804_v12, %v3764_v29  ;;  %v3565_v3 = vunpack.c.l.s8.bf16 %v2813_v52  ;;  %v3445_v10 = vunpack.c.h.s8.bf16 %v2749_v1  ;;  %v3573_v11 = vunpack.c.h.s8.bf16 %v2813_v52  ;;  %v2757_v30 = vld [vmem:[%s6857_s4 + $0x9d0] sm:$0xff] }
 0x89c   : > { %v3454_v12 = vunpack.c.l.s8.bf16 %v2758_v8  ;;  %v3582_v29 = vunpack.c.l.s8.bf16 %v2822_v9  ;;  %v2821_v13 = vld [vmem:[%s6857_s4 + $0xbd0] sm:$0xff]  ;;  %v3462_v17 = vunpack.c.h.s8.bf16 %v2758_v8  ;;  %v3590_v18 = vunpack.c.h.s8.bf16 %v2822_v9 }
 0x89d   : > { %4068 = vmatpush1.bf16.msra.mxu0 %v3389_v14  ;;  %v3453_v14 = vunpack.c.l.s8.bf16 %v2757_v30  ;;  %v3461_v7 = vunpack.c.h.s8.bf16 %v2757_v30  ;;  %v3589_v19 = vunpack.c.h.s8.bf16 %v2821_v13 }
 0x89e   : > { %4109 = vmatpush1.bf16.msra.mxu1 %v3517_v15  ;;  %4069 = vmatprep.subr.bf16.mxu0 %v3398_v4  ;;  %v3581_v15 = vunpack.c.l.s8.bf16 %v2821_v13  ;;  %v2448_v4 = vld [vmem:[%s6857_s4 + $0x28] sm:$0xff] }
 0x89f   : > { %4110 = vmatprep.subr.bf16.mxu1 %v3526_v41  ;;  %v2512_v41 = vld [vmem:[%s6857_s4 + $0x228] sm:$0xff] }
 0x8a1   : > { %4070 = vmatpush1.bf16.msra.mxu0 %v3397_v20  ;;  %v2832_v20 = vunpack.c.l.s8.bf16 %v2448_v4 }
 0x8a2   : > { %4111 = vmatpush1.bf16.msra.mxu1 %v3525_v48  ;;  %4071 = vmatprep.subr.bf16.mxu0 %v3406_v26  ;;  %v2960_v48 = vunpack.c.l.s8.bf16 %v2512_v41  ;;  %v2447_v26 = vld [vmem:[%s6857_s4 + $0x20] sm:$0xff] }
 0x8a3   : > { %4112 = vmatprep.subr.bf16.mxu1 %v3534_v27  ;;  %v2511_v27 = vld [vmem:[%s6857_s4 + $0x220] sm:$0xff]  ;;  %v2831_v28 = vunpack.c.l.s8.bf16 %v2447_v26  ;;  %v2839_v40 = vunpack.c.h.s8.bf16 %v2447_v26  ;;  %v3596_v26 = vld [vmem:[#allocation3 + $0x8] sm:$0xff] }
 0x8a4   : > { %v2959_v57 = vunpack.c.l.s8.bf16 %v2511_v27  ;;  %v2967_v43 = vunpack.c.h.s8.bf16 %v2511_v27 }
 0x8a5   : > { %4072 = vmatpush1.bf16.msra.mxu0 %v3405_v58  ;;  %v2840_v58 = vunpack.c.h.s8.bf16 %v2448_v4 }
 0x8a6   : > { %4113 = vmatpush1.bf16.msra.mxu1 %v3533_v31  ;;  %4073 = vmatprep.subr.bf16.mxu0 %v3414_v34  ;;  %v2968_v31 = vunpack.c.h.s8.bf16 %v2512_v41  ;;  %v2456_v34 = vld [vmem:[%s6857_s4 + $0x68] sm:$0xff] }
 0x8a7   : > { %4114 = vmatprep.subr.bf16.mxu1 %v3542_v35  ;;  %v2520_v35 = vld [vmem:[%s6857_s4 + $0x268] sm:$0xff] }
 0x8a9   : > { %4074 = vmatpush1.bf16.msra.mxu0 %v3413_v44  ;;  %v2848_v44 = vunpack.c.l.s8.bf16 %v2456_v34 }
 0x8aa   : > { %4115 = vmatpush1.bf16.msra.mxu1 %v3541_v45  ;;  %4075 = vmatprep.subr.bf16.mxu0 %v3422_v22  ;;  %v2976_v45 = vunpack.c.l.s8.bf16 %v2520_v35  ;;  %v2455_v22 = vld [vmem:[%s6857_s4 + $0x60] sm:$0xff] }
 0x8ab   : > { %4116 = vmatprep.subr.bf16.mxu1 %v3550_v37  ;;  %v2519_v37 = vld [vmem:[%s6857_s4 + $0x260] sm:$0xff]  ;;  %v2847_v38 = vunpack.c.l.s8.bf16 %v2455_v22  ;;  %v2855_v61 = vunpack.c.h.s8.bf16 %v2455_v22 }
 0x8ac   : > { %v2975_v54 = vunpack.c.l.s8.bf16 %v2519_v37  ;;  %v2983_v49 = vunpack.c.h.s8.bf16 %v2519_v37  ;;  %v2479_v22 = vld [vmem:[%s6857_s4 + $0x120] sm:$0xff] }
 0x8ad   : > { %4076 = vmatpush1.bf16.msra.mxu0 %v3421_v53  ;;  %v2856_v53 = vunpack.c.h.s8.bf16 %v2456_v34  ;;  %v2543_v37 = vld [vmem:[%s6857_s4 + $0x320] sm:$0xff] }
 0x8ae   : > { %4117 = vmatpush1.bf16.msra.mxu1 %v3549_v55  ;;  %4077 = vmatprep.subr.bf16.mxu0 %v3430_v47  ;;  %v2984_v55 = vunpack.c.h.s8.bf16 %v2520_v35  ;;  %v2464_v47 = vld [vmem:[%s6857_s4 + $0xa8] sm:$0xff] }
 0x8af   : > { %4118 = vmatprep.subr.bf16.mxu1 %v3558_v56  ;;  %v2528_v56 = vld [vmem:[%s6857_s4 + $0x2a8] sm:$0xff] }
 0x8b1   : > { %4078 = vmatpush1.bf16.msra.mxu0 %v3429_v25  ;;  %v2864_v25 = vunpack.c.l.s8.bf16 %v2464_v47 }
 0x8b2   : > { %4119 = vmatpush1.bf16.msra.mxu1 %v3557_v62  ;;  %4079 = vmatprep.subr.bf16.mxu0 %v3438_v36  ;;  %v2992_v62 = vunpack.c.l.s8.bf16 %v2528_v56  ;;  %v2463_v36 = vld [vmem:[%s6857_s4 + $0xa0] sm:$0xff] }
 0x8b3   : > { %4120 = vmatprep.subr.bf16.mxu1 %v3566_v63  ;;  %v2527_v63 = vld [vmem:[%s6857_s4 + $0x2a0] sm:$0xff]  ;;  %v2863_v1 = vunpack.c.l.s8.bf16 %v2463_v36  ;;  %v2871_v8 = vunpack.c.h.s8.bf16 %v2463_v36 }
 0x8b4   : > { %v2991_v52 = vunpack.c.l.s8.bf16 %v2527_v63  ;;  %v2999_v9 = vunpack.c.h.s8.bf16 %v2527_v63  ;;  %v2487_v36 = vld [vmem:[%s6857_s4 + $0x160] sm:$0xff] }
 0x8b5   : > { %4080 = vmatpush1.bf16.msra.mxu0 %v3437_v2  ;;  %v2872_v2 = vunpack.c.h.s8.bf16 %v2464_v47  ;;  %v2488_v47 = vld [vmem:[%s6857_s4 + $0x168] sm:$0xff]  ;;  %v2551_v63 = vld [vmem:[%s6857_s4 + $0x360] sm:$0xff] }
 0x8b6   : > { %4121 = vmatpush1.bf16.msra.mxu1 %v3565_v3  ;;  %4081 = vmatprep.subr.bf16.mxu0 %v3446_v5  ;;  %v3000_v3 = vunpack.c.h.s8.bf16 %v2528_v56  ;;  %v2472_v5 = vld [vmem:[%s6857_s4 + $0xe8] sm:$0xff] }
 0x8b7   : > { %4122 = vmatprep.subr.bf16.mxu1 %v3574_v6  ;;  %v2536_v6 = vld [vmem:[%s6857_s4 + $0x2e8] sm:$0xff] }
 0x8b8   : > { %v2552_v56 = vld [vmem:[%s6857_s4 + $0x368] sm:$0xff] }
 0x8b9   : > { %4082 = vmatpush1.bf16.msra.mxu0 %v3445_v10  ;;  %v2880_v10 = vunpack.c.l.s8.bf16 %v2472_v5 }
 0x8ba   : > { %4123 = vmatpush1.bf16.msra.mxu1 %v3573_v11  ;;  %4083 = vmatprep.subr.bf16.mxu0 %v3454_v12  ;;  %v3008_v11 = vunpack.c.l.s8.bf16 %v2536_v6  ;;  %v2471_v12 = vld [vmem:[%s6857_s4 + $0xe0] sm:$0xff] }
 0x8bb   : > { %4124 = vmatprep.subr.bf16.mxu1 %v3582_v29  ;;  %v2535_v29 = vld [vmem:[%s6857_s4 + $0x2e0] sm:$0xff] }
 0x8bd   : > { %4084 = vmatpush1.bf16.msra.mxu0 %v3453_v14 }
 0x8be   : > { %4125 = vmatpush1.bf16.msra.mxu1 %v3581_v15  ;;  %4085 = vmatprep.subr.bf16.mxu0 %v3462_v17 }
 0x8bf   : > { %4126 = vmatprep.subr.bf16.mxu1 %v3590_v18  ;;  %v3595_v18 = vld [vmem:[#allocation3] sm:$0xff] }
 0x8c1   : > { %4086 = vmatpush1.bf16.msra.mxu0 %v3461_v7 }
 0x8c2   : > { %4127 = vmatpush1.bf16.msra.mxu1 %v3589_v19  ;;  %4137 = vmatprep.subr.bf16.mxu0 %v2832_v20  ;;  %v2879_v19 = vunpack.c.l.s8.bf16 %v2471_v12  ;;  %v3007_v20 = vunpack.c.l.s8.bf16 %v2535_v29 }
 0x8c3   : > { %4178 = vmatprep.subr.bf16.mxu1 %v2960_v48 }
 0x8c4   : > { %4088 = vmatmul.mubr.bf16.vlgmr.msra.gmra.mrb[20].mxu0 %v7473_v23 }
 0x8c5   : > { %4129 = vmatmul.mubr.bf16.vlgmr.msra.gmra.mrb[20].mxu1 %v7477_v24  ;;  %4138 = vmatpush1.bf16.msra.mxu0 %v2831_v28 }
 0x8c6   : > { %4179 = vmatpush1.bf16.msra.mxu1 %v2959_v57  ;;  %4139 = vmatprep.subr.bf16.mxu0 %v2840_v58  ;;  %v3016_v57 = vunpack.c.h.s8.bf16 %v2536_v6  ;;  %v2560_v6 = vld [vmem:[%s6857_s4 + $0x3a8] sm:$0xff] }
 0x8c7   : > { %4180 = vmatprep.subr.bf16.mxu1 %v2968_v31  ;;  %4169 = vmatprep.mubr.bf16.mxu0 %v7323_v46  ;;  %v2544_v31 = vld [vmem:[%s6857_s4 + $0x328] sm:$0xff] }
 0x8c8   : > { %4210 = vmatprep.mubr.bf16.mxu1 %v7327_v50 }
 0x8c9   : > { %4140 = vmatpush1.bf16.msra.mxu0 %v2839_v40  ;;  %v2887_v40 = vunpack.c.h.s8.bf16 %v2471_v12  ;;  %v2495_v12 = vld [vmem:[%s6857_s4 + $0x1a0] sm:$0xff] }
 0x8ca   : > { %4181 = vmatpush1.bf16.msra.mxu1 %v2967_v43  ;;  %4141 = vmatprep.subr.bf16.mxu0 %v2848_v44  ;;  %v3015_v43 = vunpack.c.h.s8.bf16 %v2535_v29  ;;  %v2559_v29 = vld [vmem:[%s6857_s4 + $0x3a0] sm:$0xff] }
 0x8cb   : > { %4182 = vmatprep.subr.bf16.mxu1 %v2976_v45  ;;  %v3024_v45 = vunpack.c.l.s8.bf16 %v2544_v31 }
 0x8cd   : > { %4142 = vmatpush1.bf16.msra.mxu0 %v2847_v38  ;;  %v2895_v38 = vunpack.c.l.s8.bf16 %v2479_v22 }
 0x8ce   : > { %4183 = vmatpush1.bf16.msra.mxu1 %v2975_v54  ;;  %4143 = vmatprep.subr.bf16.mxu0 %v2856_v53  ;;  %v3023_v54 = vunpack.c.l.s8.bf16 %v2543_v37 }
 0x8cf   : > { %4184 = vmatprep.subr.bf16.mxu1 %v2984_v55  ;;  %v3032_v55 = vunpack.c.h.s8.bf16 %v2544_v31 }
 0x8d1   : > { %4144 = vmatpush1.bf16.msra.mxu0 %v2855_v61  ;;  %v2903_v61 = vunpack.c.h.s8.bf16 %v2479_v22 }
 0x8d2   : > { %4185 = vmatpush1.bf16.msra.mxu1 %v2983_v49  ;;  %4145 = vmatprep.subr.bf16.mxu0 %v2864_v25  ;;  %v3031_v49 = vunpack.c.h.s8.bf16 %v2543_v37  ;;  %v2912_v25 = vunpack.c.l.s8.bf16 %v2488_v47 }
 0x8d3   : > { %4186 = vmatprep.subr.bf16.mxu1 %v2992_v62  ;;  %v3040_v62 = vunpack.c.l.s8.bf16 %v2552_v56 }
 0x8d5   : > { %4146 = vmatpush1.bf16.msra.mxu0 %v2863_v1  ;;  %v2911_v1 = vunpack.c.l.s8.bf16 %v2487_v36 }
 0x8d6   : > { %4187 = vmatpush1.bf16.msra.mxu1 %v2991_v52  ;;  %4147 = vmatprep.subr.bf16.mxu0 %v2872_v2  ;;  %v3039_v52 = vunpack.c.l.s8.bf16 %v2551_v63  ;;  %v2920_v2 = vunpack.c.h.s8.bf16 %v2488_v47 }
 0x8d7   : > { %4188 = vmatprep.subr.bf16.mxu1 %v3000_v3  ;;  %v3843_v30 = vpop.f32.mrb[8].mxu0  ;;  %v3048_v3 = vunpack.c.h.s8.bf16 %v2552_v56 }
 0x8d8   : > { %v3884_v13 = vpop.f32.mrb[8].mxu1  ;;  %v3844_v14 = vadd.f32 %v3843_v30, %v7573_v16  ;;  %v3845_v15 = vpop.f32.mrb[9].mxu0  ;;  %v2888_v16 = vunpack.c.h.s8.bf16 %v2472_v5  ;;  %v2496_v5 = vld [vmem:[%s6857_s4 + $0x1a8] sm:$0xff]  ;;  %v2927_v30 = vunpack.c.l.s8.bf16 %v2495_v12 }
 0x8d9   : > { %v3886_v17 = vpop.f32.mrb[9].mxu1  ;;  %v3846_v4 = vadd.f32 %v3845_v15, %v7575_v42  ;;  %v3847_v41 = vpop.f32.mrb[10].mxu0  ;;  %4148 = vmatpush1.bf16.msra.mxu0 %v2871_v8  ;;  %v2480_v42 = vld [vmem:[%s6857_s4 + $0x128] sm:$0xff]  ;;  %v2919_v8 = vunpack.c.h.s8.bf16 %v2487_v36  ;;  %v3064_v15 = vunpack.c.h.s8.bf16 %v2560_v6 }
 0x8da   : > { %v3888_v7 = vpop.f32.mrb[10].mxu1  ;;  %4189 = vmatpush1.bf16.msra.mxu1 %v2999_v9  ;;  %v3885_v48 = vadd.f32 %v3884_v13, %v3844_v14  ;;  %v3848_v27 = vpop.f32.mrb[11].mxu0  ;;  %4149 = vmatprep.subr.bf16.mxu0 %v2880_v10  ;;  %v2896_v44 = vunpack.c.l.s8.bf16 %v2480_v42  ;;  %v2904_v53 = vunpack.c.h.s8.bf16 %v2480_v42  ;;  %v3047_v9 = vunpack.c.h.s8.bf16 %v2551_v63 }
 0x8db   : > { %v3889_v28 = vpop.f32.mrb[11].mxu1  ;;  %4190 = vmatprep.subr.bf16.mxu1 %v3008_v11  ;;  %v3887_v58 = vadd.f32 %v3886_v17, %v3846_v4  ;;  %v2928_v10 = vunpack.c.l.s8.bf16 %v2496_v5  ;;  %v3056_v11 = vunpack.c.l.s8.bf16 %v2560_v6  ;;  %v3055_v13 = vunpack.c.l.s8.bf16 %v2559_v29  ;;  %v2504_v17 = vld [vmem:[%s6857_s4 + $0x1e8] sm:$0xff] }
 0x8dc   : > { %v4629_v34 = vadd.f32 %v3885_v48, %v3595_v18  ;;  %v2936_v14 = vunpack.c.h.s8.bf16 %v2496_v5  ;;  %v2568_v18 = vld [vmem:[%s6857_s4 + $0x3e8] sm:$0xff]  ;;  %v2935_v4 = vunpack.c.h.s8.bf16 %v2495_v12  ;;  %v3063_v41 = vunpack.c.h.s8.bf16 %v2559_v29  ;;  %v2567_v48 = vld [vmem:[%s6857_s4 + $0x3e0] sm:$0xff] }
 0x8dd   : > { %v4630_v35 = vadd.f32 %v3887_v58, %v3596_v26  ;;  %4150 = vmatpush1.bf16.msra.mxu0 %v2879_v19  ;;  %v2944_v7 = vunpack.c.l.s8.bf16 %v2504_v17  ;;  %v3072_v19 = vunpack.c.l.s8.bf16 %v2568_v18  ;;  %v3071_v27 = vunpack.c.l.s8.bf16 %v2567_v48  ;;  %v2640_v58 = vld [vmem:[%s6857_s4 + $0x628] sm:$0xff] }
 0x8de   : > { %4191 = vmatpush1.bf16.msra.mxu1 %v3007_v20  ;;  %4637 = vst [vmem:[#allocation3] sm:$0xff] %v4629_v34  ;;  %4151 = vmatprep.subr.bf16.mxu0 %v2888_v16  ;;  %v2503_v20 = vld [vmem:[%s6857_s4 + $0x1e0] sm:$0xff]  ;;  %v2952_v28 = vunpack.c.h.s8.bf16 %v2504_v17  ;;  %v3080_v16 = vunpack.c.h.s8.bf16 %v2568_v18  ;;  %v3079_v31 = vunpack.c.h.s8.bf16 %v2567_v48  ;;  %v3224_v37 = vunpack.c.h.s8.bf16 %v2640_v58 }
 0x8df   : > { %4192 = vmatprep.subr.bf16.mxu1 %v3016_v57  ;;  %4638 = vst [vmem:[#allocation3 + $0x8] sm:$0xff] %v4630_v35  ;;  %v2943_v26 = vunpack.c.l.s8.bf16 %v2503_v20  ;;  %v2576_v57 = vld [vmem:[%s6857_s4 + $0x428] sm:$0xff]  ;;  %v2951_v42 = vunpack.c.h.s8.bf16 %v2503_v20  ;;  %v3216_v35 = vunpack.c.l.s8.bf16 %v2640_v58 }
 0x8e0   : > { %v3088_v34 = vunpack.c.l.s8.bf16 %v2576_v57  ;;  %v3096_v22 = vunpack.c.h.s8.bf16 %v2576_v57 }
 0x8e1   : > { %4152 = vmatpush1.bf16.msra.mxu0 %v2887_v40  ;;  %v2575_v40 = vld [vmem:[%s6857_s4 + $0x420] sm:$0xff] }
 0x8e2   : > { %4193 = vmatpush1.bf16.msra.mxu1 %v3015_v43  ;;  %4153 = vmatprep.subr.bf16.mxu0 %v2896_v44  ;;  %v2639_v43 = vld [vmem:[%s6857_s4 + $0x620] sm:$0xff]  ;;  %v3087_v44 = vunpack.c.l.s8.bf16 %v2575_v40 }
 0x8e3   : > { %4194 = vmatprep.subr.bf16.mxu1 %v3024_v45  ;;  %v3215_v45 = vunpack.c.l.s8.bf16 %v2639_v43 }
 0x8e5   : > { %4154 = vmatpush1.bf16.msra.mxu0 %v2895_v38  ;;  %v2584_v38 = vld [vmem:[%s6857_s4 + $0x468] sm:$0xff] }
 0x8e6   : > { %4195 = vmatpush1.bf16.msra.mxu1 %v3023_v54  ;;  %4155 = vmatprep.subr.bf16.mxu0 %v2904_v53  ;;  %v2648_v54 = vld [vmem:[%s6857_s4 + $0x668] sm:$0xff]  ;;  %v3095_v53 = vunpack.c.h.s8.bf16 %v2575_v40  ;;  %v3104_v47 = vunpack.c.l.s8.bf16 %v2584_v38  ;;  %v3112_v36 = vunpack.c.h.s8.bf16 %v2584_v38  ;;  %v2607_v38 = vld [vmem:[%s6857_s4 + $0x520] sm:$0xff] }
 0x8e7   : > { %4196 = vmatprep.subr.bf16.mxu1 %v3032_v55  ;;  %v3223_v55 = vunpack.c.h.s8.bf16 %v2639_v43  ;;  %v3232_v56 = vunpack.c.l.s8.bf16 %v2648_v54  ;;  %v3240_v63 = vunpack.c.h.s8.bf16 %v2648_v54  ;;  %v2608_v40 = vld [vmem:[%s6857_s4 + $0x528] sm:$0xff]  ;;  %v2671_v54 = vld [vmem:[%s6857_s4 + $0x720] sm:$0xff] }
 0x8e8   : > { %v2672_v43 = vld [vmem:[%s6857_s4 + $0x728] sm:$0xff] }
 0x8e9   : > { %4156 = vmatpush1.bf16.msra.mxu0 %v2903_v61  ;;  %v2583_v61 = vld [vmem:[%s6857_s4 + $0x460] sm:$0xff] }
 0x8ea   : > { %4197 = vmatpush1.bf16.msra.mxu1 %v3031_v49  ;;  %4157 = vmatprep.subr.bf16.mxu0 %v2912_v25  ;;  %v2647_v49 = vld [vmem:[%s6857_s4 + $0x660] sm:$0xff]  ;;  %v3103_v25 = vunpack.c.l.s8.bf16 %v2583_v61 }
 0x8eb   : > { %4198 = vmatprep.subr.bf16.mxu1 %v3040_v62  ;;  %v3231_v62 = vunpack.c.l.s8.bf16 %v2647_v49 }
 0x8ed   : > { %4158 = vmatpush1.bf16.msra.mxu0 %v2911_v1  ;;  %v2592_v1 = vld [vmem:[%s6857_s4 + $0x4a8] sm:$0xff] }
 0x8ee   : > { %4199 = vmatpush1.bf16.msra.mxu1 %v3039_v52  ;;  %4159 = vmatprep.subr.bf16.mxu0 %v2920_v2  ;;  %v2656_v52 = vld [vmem:[%s6857_s4 + $0x6a8] sm:$0xff]  ;;  %v3111_v2 = vunpack.c.h.s8.bf16 %v2583_v61  ;;  %v3120_v5 = vunpack.c.l.s8.bf16 %v2592_v1  ;;  %v3128_v12 = vunpack.c.h.s8.bf16 %v2592_v1  ;;  %v2615_v1 = vld [vmem:[%s6857_s4 + $0x560] sm:$0xff] }
 0x8ef   : > { %4200 = vmatprep.subr.bf16.mxu1 %v3048_v3  ;;  %v3239_v3 = vunpack.c.h.s8.bf16 %v2647_v49  ;;  %v3248_v6 = vunpack.c.l.s8.bf16 %v2656_v52  ;;  %v3256_v29 = vunpack.c.h.s8.bf16 %v2656_v52  ;;  %v2616_v61 = vld [vmem:[%s6857_s4 + $0x568] sm:$0xff]  ;;  %v2679_v52 = vld [vmem:[%s6857_s4 + $0x760] sm:$0xff] }
 0x8f0   : > { %v2680_v49 = vld [vmem:[%s6857_s4 + $0x768] sm:$0xff] }
 0x8f1   : > { %4160 = vmatpush1.bf16.msra.mxu0 %v2919_v8  ;;  %v2591_v8 = vld [vmem:[%s6857_s4 + $0x4a0] sm:$0xff] }
 0x8f2   : > { %4201 = vmatpush1.bf16.msra.mxu1 %v3047_v9  ;;  %4161 = vmatprep.subr.bf16.mxu0 %v2928_v10  ;;  %v2655_v9 = vld [vmem:[%s6857_s4 + $0x6a0] sm:$0xff]  ;;  %v3119_v10 = vunpack.c.l.s8.bf16 %v2591_v8 }
 0x8f3   : > { %4202 = vmatprep.subr.bf16.mxu1 %v3056_v11  ;;  %v3247_v11 = vunpack.c.l.s8.bf16 %v2655_v9 }
 0x8f5   : > { %4162 = vmatpush1.bf16.msra.mxu0 %v2927_v30  ;;  %v2600_v30 = vld [vmem:[%s6857_s4 + $0x4e8] sm:$0xff] }
 0x8f6   : > { %4203 = vmatpush1.bf16.msra.mxu1 %v3055_v13  ;;  %4163 = vmatprep.subr.bf16.mxu0 %v2936_v14  ;;  %v2664_v13 = vld [vmem:[%s6857_s4 + $0x6e8] sm:$0xff]  ;;  %v3127_v14 = vunpack.c.h.s8.bf16 %v2591_v8  ;;  %v3136_v17 = vunpack.c.l.s8.bf16 %v2600_v30 }
 0x8f7   : > { %4204 = vmatprep.subr.bf16.mxu1 %v3064_v15  ;;  %v3255_v15 = vunpack.c.h.s8.bf16 %v2655_v9  ;;  %v3264_v18 = vunpack.c.l.s8.bf16 %v2664_v13  ;;  %v2624_v8 = vld [vmem:[%s6857_s4 + $0x5a8] sm:$0xff] }
 0x8f8   : > { %v2688_v9 = vld [vmem:[%s6857_s4 + $0x7a8] sm:$0xff] }
 0x8f9   : > { %4164 = vmatpush1.bf16.msra.mxu0 %v2935_v4  ;;  %v2599_v4 = vld [vmem:[%s6857_s4 + $0x4e0] sm:$0xff] }
 0x8fa   : > { %4205 = vmatpush1.bf16.msra.mxu1 %v3063_v41  ;;  %4165 = vmatprep.subr.bf16.mxu0 %v2944_v7  ;;  %v2663_v41 = vld [vmem:[%s6857_s4 + $0x6e0] sm:$0xff]  ;;  %v3135_v57 = vunpack.c.l.s8.bf16 %v2599_v4 }
 0x8fb   : > { %4206 = vmatprep.subr.bf16.mxu1 %v3072_v19  ;;  %v3263_v58 = vunpack.c.l.s8.bf16 %v2663_v41 }
 0x8fd   : > { %4166 = vmatpush1.bf16.msra.mxu0 %v2943_v26 }
 0x8fe   : > { %4207 = vmatpush1.bf16.msra.mxu1 %v3071_v27  ;;  %4167 = vmatprep.subr.bf16.mxu0 %v2952_v28 }
 0x8ff   : > { %4208 = vmatprep.subr.bf16.mxu1 %v3080_v16 }
 0x901   : > { %4168 = vmatpush1.bf16.msra.mxu0 %v2951_v42 }
 0x902   : > { %4209 = vmatpush1.bf16.msra.mxu1 %v3079_v31  ;;  %4219 = vmatprep.subr.bf16.mxu0 %v3088_v34  ;;  %v3144_v34 = vunpack.c.h.s8.bf16 %v2600_v30  ;;  %v2623_v30 = vld [vmem:[%s6857_s4 + $0x5a0] sm:$0xff] }
 0x903   : > { %4260 = vmatprep.subr.bf16.mxu1 %v3216_v35  ;;  %v3272_v35 = vunpack.c.h.s8.bf16 %v2664_v13  ;;  %v2687_v13 = vld [vmem:[%s6857_s4 + $0x7a0] sm:$0xff] }
 0x904   : > { %4170 = vmatmul.mubr.bf16.vlgmr.msra.gmra.mrb[24].mxu0 %v7357_v59 }
 0x905   : > { %4211 = vmatmul.mubr.bf16.vlgmr.msra.gmra.mrb[24].mxu1 %v7361_v21  ;;  %4220 = vmatpush1.bf16.msra.mxu0 %v3087_v44  ;;  %v3143_v44 = vunpack.c.h.s8.bf16 %v2599_v4  ;;  %v2632_v4 = vld [vmem:[%s6857_s4 + $0x5e8] sm:$0xff] }
 0x906   : > { %4261 = vmatpush1.bf16.msra.mxu1 %v3215_v45  ;;  %4221 = vmatprep.subr.bf16.mxu0 %v3096_v22  ;;  %v3271_v45 = vunpack.c.h.s8.bf16 %v2663_v41  ;;  %v3152_v22 = vunpack.c.l.s8.bf16 %v2608_v40  ;;  %v2696_v41 = vld [vmem:[%s6857_s4 + $0x7e8] sm:$0xff] }
 0x907   : > { %4262 = vmatprep.subr.bf16.mxu1 %v3224_v37  ;;  %4251 = vmatprep.mubr.bf16.mxu0 %v7373_v39  ;;  %v3280_v37 = vunpack.c.l.s8.bf16 %v2672_v43 }
 0x908   : > { %4292 = vmatprep.mubr.bf16.mxu1 %v7377_v0 }
 0x909   : > { %4222 = vmatpush1.bf16.msra.mxu0 %v3095_v53  ;;  %v3151_v53 = vunpack.c.l.s8.bf16 %v2607_v38 }
 0x90a   : > { %4263 = vmatpush1.bf16.msra.mxu1 %v3223_v55  ;;  %4223 = vmatprep.subr.bf16.mxu0 %v3104_v47  ;;  %v3279_v55 = vunpack.c.l.s8.bf16 %v2671_v54  ;;  %v3160_v47 = vunpack.c.h.s8.bf16 %v2608_v40 }
 0x90b   : > { %4264 = vmatprep.subr.bf16.mxu1 %v3232_v56  ;;  %v3288_v56 = vunpack.c.h.s8.bf16 %v2672_v43 }
 0x90d   : > { %4224 = vmatpush1.bf16.msra.mxu0 %v3103_v25  ;;  %v3159_v25 = vunpack.c.h.s8.bf16 %v2607_v38 }
 0x90e   : > { %4265 = vmatpush1.bf16.msra.mxu1 %v3231_v62  ;;  %4225 = vmatprep.subr.bf16.mxu0 %v3112_v36  ;;  %v3287_v62 = vunpack.c.h.s8.bf16 %v2671_v54  ;;  %v3168_v36 = vunpack.c.l.s8.bf16 %v2616_v61 }
 0x90f   : > { %4266 = vmatprep.subr.bf16.mxu1 %v3240_v63  ;;  %v3296_v63 = vunpack.c.l.s8.bf16 %v2680_v49 }
 0x911   : > { %4226 = vmatpush1.bf16.msra.mxu0 %v3111_v2  ;;  %v3167_v2 = vunpack.c.l.s8.bf16 %v2615_v1 }
 0x912   : > { %4267 = vmatpush1.bf16.msra.mxu1 %v3239_v3  ;;  %4227 = vmatprep.subr.bf16.mxu0 %v3120_v5  ;;  %v3295_v3 = vunpack.c.l.s8.bf16 %v2679_v52  ;;  %v3176_v5 = vunpack.c.h.s8.bf16 %v2616_v61 }
 0x913   : > { %4268 = vmatprep.subr.bf16.mxu1 %v3248_v6  ;;  %v3304_v6 = vunpack.c.h.s8.bf16 %v2680_v49 }
 0x915   : > { %4228 = vmatpush1.bf16.msra.mxu0 %v3119_v10  ;;  %v3175_v10 = vunpack.c.h.s8.bf16 %v2615_v1 }
 0x916   : > { %4269 = vmatpush1.bf16.msra.mxu1 %v3247_v11  ;;  %4229 = vmatprep.subr.bf16.mxu0 %v3128_v12  ;;  %v3303_v11 = vunpack.c.h.s8.bf16 %v2679_v52  ;;  %v3184_v12 = vunpack.c.l.s8.bf16 %v2624_v8 }
 0x917   : > { %4270 = vmatprep.subr.bf16.mxu1 %v3256_v29  ;;  %v3925_v7 = vpop.f32.mrb[12].mxu0  ;;  %v3312_v29 = vunpack.c.l.s8.bf16 %v2688_v9 }
 0x918   : > { %v3966_v19 = vpop.f32.mrb[12].mxu1  ;;  %v3927_v48 = vpop.f32.mrb[13].mxu0 }
 0x919   : > { %v7651_v20 = vadd.f32 %v3966_v19, %v3925_v7  ;;  %v3968_v26 = vpop.f32.mrb[13].mxu1  ;;  %v3929_v28 = vpop.f32.mrb[14].mxu0  ;;  %4230 = vmatpush1.bf16.msra.mxu0 %v3127_v14  ;;  %v3183_v14 = vunpack.c.l.s8.bf16 %v2623_v30  ;;  %v3191_v7 = vunpack.c.h.s8.bf16 %v2623_v30  ;;  %v3319_v19 = vunpack.c.h.s8.bf16 %v2687_v13 }
 0x91a   : > { %v7653_v27 = vadd.f32 %v3968_v26, %v3927_v48  ;;  %v3970_v16 = vpop.f32.mrb[14].mxu1  ;;  %4271 = vmatpush1.bf16.msra.mxu1 %v3255_v15  ;;  %v3930_v42 = vpop.f32.mrb[15].mxu0  ;;  %4231 = vmatprep.subr.bf16.mxu0 %v3136_v17  ;;  %v3311_v15 = vunpack.c.l.s8.bf16 %v2687_v13  ;;  %v3192_v17 = vunpack.c.h.s8.bf16 %v2624_v8  ;;  %v3200_v48 = vunpack.c.l.s8.bf16 %v2632_v4  ;;  %v2631_v28 = vld [vmem:[%s6857_s4 + $0x5e0] sm:$0xff] }
 0x91b   : > { %v3971_v31 = vpop.f32.mrb[15].mxu1  ;;  %4272 = vmatprep.subr.bf16.mxu1 %v3264_v18  ;;  %v3320_v18 = vunpack.c.h.s8.bf16 %v2688_v9  ;;  %v3328_v26 = vunpack.c.l.s8.bf16 %v2696_v41  ;;  %v2695_v16 = vld [vmem:[%s6857_s4 + $0x7e0] sm:$0xff]  ;;  %v3208_v42 = vunpack.c.h.s8.bf16 %v2632_v4  ;;  %v3207_v40 = vunpack.c.h.s8.bf16 %v2631_v28 }
 0x91c   : > { %v3336_v31 = vunpack.c.h.s8.bf16 %v2696_v41  ;;  %v3335_v43 = vunpack.c.h.s8.bf16 %v2695_v16 }
 0x91d   : > { %4232 = vmatpush1.bf16.msra.mxu0 %v3135_v57  ;;  %v3199_v57 = vunpack.c.l.s8.bf16 %v2631_v28 }
 0x91e   : > { %4273 = vmatpush1.bf16.msra.mxu1 %v3263_v58  ;;  %4233 = vmatprep.subr.bf16.mxu0 %v3144_v34  ;;  %v3327_v58 = vunpack.c.l.s8.bf16 %v2695_v16  ;;  %v2704_v34 = vld [vmem:[%s6857_s4 + $0x828] sm:$0xff] }
 0x91f   : > { %4274 = vmatprep.subr.bf16.mxu1 %v3272_v35  ;;  %v2768_v35 = vld [vmem:[%s6857_s4 + $0xa28] sm:$0xff] }
 0x921   : > { %4234 = vmatpush1.bf16.msra.mxu0 %v3143_v44  ;;  %v3344_v44 = vunpack.c.l.s8.bf16 %v2704_v34 }
 0x922   : > { %4275 = vmatpush1.bf16.msra.mxu1 %v3271_v45  ;;  %4235 = vmatprep.subr.bf16.mxu0 %v3152_v22  ;;  %v3472_v45 = vunpack.c.l.s8.bf16 %v2768_v35  ;;  %v2703_v22 = vld [vmem:[%s6857_s4 + $0x820] sm:$0xff] }
 0x923   : > { %4276 = vmatprep.subr.bf16.mxu1 %v3280_v37  ;;  %v2767_v37 = vld [vmem:[%s6857_s4 + $0xa20] sm:$0xff]  ;;  %v3343_v38 = vunpack.c.l.s8.bf16 %v2703_v22  ;;  %v3351_v61 = vunpack.c.h.s8.bf16 %v2703_v22 }
 0x924   : > { %v3471_v54 = vunpack.c.l.s8.bf16 %v2767_v37  ;;  %v3479_v49 = vunpack.c.h.s8.bf16 %v2767_v37 }
 0x925   : > { %4236 = vmatpush1.bf16.msra.mxu0 %v3151_v53  ;;  %v3352_v53 = vunpack.c.h.s8.bf16 %v2704_v34 }
 0x926   : > { %4277 = vmatpush1.bf16.msra.mxu1 %v3279_v55  ;;  %4237 = vmatprep.subr.bf16.mxu0 %v3160_v47  ;;  %v3480_v55 = vunpack.c.h.s8.bf16 %v2768_v35  ;;  %v2712_v47 = vld [vmem:[%s6857_s4 + $0x868] sm:$0xff] }
 0x927   : > { %4278 = vmatprep.subr.bf16.mxu1 %v3288_v56  ;;  %v2776_v56 = vld [vmem:[%s6857_s4 + $0xa68] sm:$0xff] }
 0x929   : > { %4238 = vmatpush1.bf16.msra.mxu0 %v3159_v25  ;;  %v3360_v25 = vunpack.c.l.s8.bf16 %v2712_v47 }
 0x92a   : > { %4279 = vmatpush1.bf16.msra.mxu1 %v3287_v62  ;;  %4239 = vmatprep.subr.bf16.mxu0 %v3168_v36  ;;  %v3488_v62 = vunpack.c.l.s8.bf16 %v2776_v56  ;;  %v2711_v36 = vld [vmem:[%s6857_s4 + $0x860] sm:$0xff] }
 0x92b   : > { %4280 = vmatprep.subr.bf16.mxu1 %v3296_v63  ;;  %v2775_v63 = vld [vmem:[%s6857_s4 + $0xa60] sm:$0xff]  ;;  %v3359_v1 = vunpack.c.l.s8.bf16 %v2711_v36  ;;  %v3367_v8 = vunpack.c.h.s8.bf16 %v2711_v36 }
 0x92c   : > { %v3487_v52 = vunpack.c.l.s8.bf16 %v2775_v63  ;;  %v3495_v9 = vunpack.c.h.s8.bf16 %v2775_v63 }
 0x92d   : > { %4240 = vmatpush1.bf16.msra.mxu0 %v3167_v2  ;;  %v3368_v2 = vunpack.c.h.s8.bf16 %v2712_v47 }
 0x92e   : > { %4281 = vmatpush1.bf16.msra.mxu1 %v3295_v3  ;;  %4241 = vmatprep.subr.bf16.mxu0 %v3176_v5  ;;  %v3496_v3 = vunpack.c.h.s8.bf16 %v2776_v56  ;;  %v2720_v5 = vld [vmem:[%s6857_s4 + $0x8a8] sm:$0xff] }
 0x92f   : > { %4282 = vmatprep.subr.bf16.mxu1 %v3304_v6  ;;  %v2784_v6 = vld [vmem:[%s6857_s4 + $0xaa8] sm:$0xff] }
 0x931   : > { %4242 = vmatpush1.bf16.msra.mxu0 %v3175_v10  ;;  %v3376_v10 = vunpack.c.l.s8.bf16 %v2720_v5 }
 0x932   : > { %4283 = vmatpush1.bf16.msra.mxu1 %v3303_v11  ;;  %4243 = vmatprep.subr.bf16.mxu0 %v3184_v12  ;;  %v3504_v11 = vunpack.c.l.s8.bf16 %v2784_v6  ;;  %v2719_v12 = vld [vmem:[%s6857_s4 + $0x8a0] sm:$0xff] }
 0x933   : > { %4284 = vmatprep.subr.bf16.mxu1 %v3312_v29  ;;  %v2783_v29 = vld [vmem:[%s6857_s4 + $0xaa0] sm:$0xff]  ;;  %v3375_v30 = vunpack.c.l.s8.bf16 %v2719_v12  ;;  %v3383_v4 = vunpack.c.h.s8.bf16 %v2719_v12 }
 0x934   : > { %v3503_v13 = vunpack.c.l.s8.bf16 %v2783_v29  ;;  %v3511_v41 = vunpack.c.h.s8.bf16 %v2783_v29 }
 0x935   : > { %4244 = vmatpush1.bf16.msra.mxu0 %v3183_v14  ;;  %v3384_v14 = vunpack.c.h.s8.bf16 %v2720_v5 }
 0x936   : > { %4285 = vmatpush1.bf16.msra.mxu1 %v3311_v15  ;;  %4245 = vmatprep.subr.bf16.mxu0 %v3192_v17  ;;  %v3512_v15 = vunpack.c.h.s8.bf16 %v2784_v6  ;;  %v2728_v17 = vld [vmem:[%s6857_s4 + $0x8e8] sm:$0xff] }
 0x937   : > { %4286 = vmatprep.subr.bf16.mxu1 %v3320_v18  ;;  %v2792_v18 = vld [vmem:[%s6857_s4 + $0xae8] sm:$0xff] }
 0x938   : > { %v3528_v37 = vunpack.c.h.s8.bf16 %v2792_v18 }
 0x939   : > { %4246 = vmatpush1.bf16.msra.mxu0 %v3191_v7  ;;  %v3392_v7 = vunpack.c.l.s8.bf16 %v2728_v17 }
 0x93a   : > { %4287 = vmatpush1.bf16.msra.mxu1 %v3319_v19  ;;  %4247 = vmatprep.subr.bf16.mxu0 %v3200_v48  ;;  %v3520_v19 = vunpack.c.l.s8.bf16 %v2792_v18  ;;  %v2727_v48 = vld [vmem:[%s6857_s4 + $0x8e0] sm:$0xff] }
 0x93b   : > { %4288 = vmatprep.subr.bf16.mxu1 %v3328_v26  ;;  %v2791_v26 = vld [vmem:[%s6857_s4 + $0xae0] sm:$0xff] }
 0x93d   : > { %4248 = vmatpush1.bf16.msra.mxu0 %v3199_v57 }
 0x93e   : > { %4289 = vmatpush1.bf16.msra.mxu1 %v3327_v58  ;;  %4249 = vmatprep.subr.bf16.mxu0 %v3208_v42 }
 0x93f   : > { %4290 = vmatprep.subr.bf16.mxu1 %v3336_v31 }
 0x941   : > { %4250 = vmatpush1.bf16.msra.mxu0 %v3207_v40  ;;  %v3391_v40 = vunpack.c.l.s8.bf16 %v2727_v48 }
 0x942   : > { %4291 = vmatpush1.bf16.msra.mxu1 %v3335_v43  ;;  %4301 = vmatprep.subr.bf16.mxu0 %v3344_v44  ;;  %v3519_v43 = vunpack.c.l.s8.bf16 %v2791_v26 }
 0x943   : > { %4342 = vmatprep.subr.bf16.mxu1 %v3472_v45 }
 0x944   : > { %4252 = vmatmul.mubr.bf16.vlgmr.msra.gmra.mrb[28].mxu0 %v7415_v32 }
 0x945   : > { %4293 = vmatmul.mubr.bf16.vlgmr.msra.gmra.mrb[28].mxu1 %v7419_v33  ;;  %4302 = vmatpush1.bf16.msra.mxu0 %v3343_v38 }
 0x946   : > { %4343 = vmatpush1.bf16.msra.mxu1 %v3471_v54  ;;  %4303 = vmatprep.subr.bf16.mxu0 %v3352_v53  ;;  %v2800_v54 = vld [vmem:[%s6857_s4 + $0xb28] sm:$0xff]  ;;  %v3399_v53 = vunpack.c.h.s8.bf16 %v2727_v48 }
 0x947   : > { %4344 = vmatprep.subr.bf16.mxu1 %v3480_v55  ;;  %4333 = vmatprep.mubr.bf16.mxu0 %v7431_v60  ;;  %v3527_v55 = vunpack.c.h.s8.bf16 %v2791_v26  ;;  %v3536_v56 = vunpack.c.l.s8.bf16 %v2800_v54  ;;  %v3544_v63 = vunpack.c.h.s8.bf16 %v2800_v54 }
 0x948   : > { %4374 = vmatprep.mubr.bf16.mxu1 %v7435_v51 }
 0x949   : > { %4304 = vmatpush1.bf16.msra.mxu0 %v3351_v61  ;;  %v2735_v61 = vld [vmem:[%s6857_s4 + $0x920] sm:$0xff] }
 0x94a   : > { %4345 = vmatpush1.bf16.msra.mxu1 %v3479_v49  ;;  %4305 = vmatprep.subr.bf16.mxu0 %v3360_v25  ;;  %v2799_v49 = vld [vmem:[%s6857_s4 + $0xb20] sm:$0xff]  ;;  %v3407_v25 = vunpack.c.l.s8.bf16 %v2735_v61 }
 0x94b   : > { %4346 = vmatprep.subr.bf16.mxu1 %v3488_v62  ;;  %v3535_v62 = vunpack.c.l.s8.bf16 %v2799_v49 }
 0x94d   : > { %4306 = vmatpush1.bf16.msra.mxu0 %v3359_v1  ;;  %v2744_v1 = vld [vmem:[%s6857_s4 + $0x968] sm:$0xff] }
 0x94e   : > { %4347 = vmatpush1.bf16.msra.mxu1 %v3487_v52  ;;  %4307 = vmatprep.subr.bf16.mxu0 %v3368_v2  ;;  %v2808_v52 = vld [vmem:[%s6857_s4 + $0xb68] sm:$0xff]  ;;  %v3415_v2 = vunpack.c.h.s8.bf16 %v2735_v61  ;;  %v3424_v5 = vunpack.c.l.s8.bf16 %v2744_v1  ;;  %v3432_v12 = vunpack.c.h.s8.bf16 %v2744_v1 }
 0x94f   : > { %4348 = vmatprep.subr.bf16.mxu1 %v3496_v3  ;;  %v3543_v3 = vunpack.c.h.s8.bf16 %v2799_v49  ;;  %v3552_v6 = vunpack.c.l.s8.bf16 %v2808_v52  ;;  %v3560_v29 = vunpack.c.h.s8.bf16 %v2808_v52 }
 0x951   : > { %4308 = vmatpush1.bf16.msra.mxu0 %v3367_v8  ;;  %v2743_v8 = vld [vmem:[%s6857_s4 + $0x960] sm:$0xff] }
 0x952   : > { %4349 = vmatpush1.bf16.msra.mxu1 %v3495_v9  ;;  %4309 = vmatprep.subr.bf16.mxu0 %v3376_v10  ;;  %v2807_v9 = vld [vmem:[%s6857_s4 + $0xb60] sm:$0xff]  ;;  %v3423_v10 = vunpack.c.l.s8.bf16 %v2743_v8 }
 0x953   : > { %4350 = vmatprep.subr.bf16.mxu1 %v3504_v11  ;;  %v3551_v11 = vunpack.c.l.s8.bf16 %v2807_v9 }
 0x955   : > { %4310 = vmatpush1.bf16.msra.mxu0 %v3375_v30  ;;  %v2752_v30 = vld [vmem:[%s6857_s4 + $0x9a8] sm:$0xff] }
 0x956   : > { %4351 = vmatpush1.bf16.msra.mxu1 %v3503_v13  ;;  %4311 = vmatprep.subr.bf16.mxu0 %v3384_v14  ;;  %v2816_v13 = vld [vmem:[%s6857_s4 + $0xba8] sm:$0xff]  ;;  %v3431_v14 = vunpack.c.h.s8.bf16 %v2743_v8  ;;  %v3448_v48 = vunpack.c.h.s8.bf16 %v2752_v30 }
 0x957   : > { %4352 = vmatprep.subr.bf16.mxu1 %v3512_v15  ;;  %v4007_v28 = vpop.f32.mrb[16].mxu0  ;;  %v3559_v15 = vunpack.c.h.s8.bf16 %v2807_v9  ;;  %v3568_v18 = vunpack.c.l.s8.bf16 %v2816_v13  ;;  %v3576_v26 = vunpack.c.h.s8.bf16 %v2816_v13 }
 0x958   : > { %v4048_v16 = vpop.f32.mrb[16].mxu1  ;;  %v4008_v57 = vadd.f32 %v4007_v28, %v7651_v20  ;;  %v4009_v58 = vpop.f32.mrb[17].mxu0  ;;  %v3400_v20 = vunpack.c.h.s8.bf16 %v2728_v17  ;;  %v3440_v17 = vunpack.c.l.s8.bf16 %v2752_v30  ;;  %v2760_v28 = vld [vmem:[%s6857_s4 + $0x9e8] sm:$0xff] }
 0x959   : > { %v4050_v42 = vpop.f32.mrb[17].mxu1  ;;  %v4010_v31 = vadd.f32 %v4009_v58, %v7653_v27  ;;  %v4011_v34 = vpop.f32.mrb[18].mxu0  ;;  %4312 = vmatpush1.bf16.msra.mxu0 %v3383_v4  ;;  %v2736_v27 = vld [vmem:[%s6857_s4 + $0x928] sm:$0xff]  ;;  %v2751_v4 = vld [vmem:[%s6857_s4 + $0x9a0] sm:$0xff] }
 0x95a   : > { %v4052_v35 = vpop.f32.mrb[18].mxu1  ;;  %4353 = vmatpush1.bf16.msra.mxu1 %v3511_v41  ;;  %v7693_v44 = vadd.f32 %v4048_v16, %v4008_v57  ;;  %v4012_v45 = vpop.f32.mrb[19].mxu0  ;;  %4313 = vmatprep.subr.bf16.mxu0 %v3392_v7  ;;  %v3408_v47 = vunpack.c.l.s8.bf16 %v2736_v27  ;;  %v3416_v36 = vunpack.c.h.s8.bf16 %v2736_v27  ;;  %v2815_v41 = vld [vmem:[%s6857_s4 + $0xba0] sm:$0xff]  ;;  %v3439_v7 = vunpack.c.l.s8.bf16 %v2751_v4  ;;  %v2824_v16 = vld [vmem:[%s6857_s4 + $0xbe8] sm:$0xff] }
 0x95b   : > { %v4053_v22 = vpop.f32.mrb[19].mxu1  ;;  %4354 = vmatprep.subr.bf16.mxu1 %v3520_v19  ;;  %v7695_v38 = vadd.f32 %v4050_v42, %v4010_v31  ;;  %v3567_v19 = vunpack.c.l.s8.bf16 %v2815_v41  ;;  %v3447_v57 = vunpack.c.h.s8.bf16 %v2751_v4  ;;  %v3575_v58 = vunpack.c.h.s8.bf16 %v2815_v41  ;;  %v2759_v34 = vld [vmem:[%s6857_s4 + $0x9e0] sm:$0xff] }
 0x95c   : > { %v3456_v42 = vunpack.c.l.s8.bf16 %v2760_v28  ;;  %v3584_v31 = vunpack.c.l.s8.bf16 %v2824_v16  ;;  %v2823_v35 = vld [vmem:[%s6857_s4 + $0xbe0] sm:$0xff]  ;;  %v3464_v45 = vunpack.c.h.s8.bf16 %v2760_v28  ;;  %v3592_v22 = vunpack.c.h.s8.bf16 %v2824_v16 }
 0x95d   : > { %4314 = vmatpush1.bf16.msra.mxu0 %v3391_v40  ;;  %v3455_v40 = vunpack.c.l.s8.bf16 %v2759_v34  ;;  %v3463_v27 = vunpack.c.h.s8.bf16 %v2759_v34  ;;  %v3591_v54 = vunpack.c.h.s8.bf16 %v2823_v35 }
 0x95e   : > { %4355 = vmatpush1.bf16.msra.mxu1 %v3519_v43  ;;  %4315 = vmatprep.subr.bf16.mxu0 %v3400_v20  ;;  %v3583_v43 = vunpack.c.l.s8.bf16 %v2823_v35  ;;  %v2450_v20 = vld [vmem:[%s6857_s4 + $0x38] sm:$0xff] }
 0x95f   : > { %4356 = vmatprep.subr.bf16.mxu1 %v3528_v37  ;;  %v2514_v37 = vld [vmem:[%s6857_s4 + $0x238] sm:$0xff] }
 0x961   : > { %4316 = vmatpush1.bf16.msra.mxu0 %v3399_v53  ;;  %v2834_v53 = vunpack.c.l.s8.bf16 %v2450_v20 }
 0x962   : > { %4357 = vmatpush1.bf16.msra.mxu1 %v3527_v55  ;;  %4317 = vmatprep.subr.bf16.mxu0 %v3408_v47  ;;  %v2962_v55 = vunpack.c.l.s8.bf16 %v2514_v37  ;;  %v2449_v47 = vld [vmem:[%s6857_s4 + $0x30] sm:$0xff] }
 0x963   : > { %4358 = vmatprep.subr.bf16.mxu1 %v3536_v56  ;;  %v2513_v56 = vld [vmem:[%s6857_s4 + $0x230] sm:$0xff]  ;;  %v2833_v61 = vunpack.c.l.s8.bf16 %v2449_v47  ;;  %v2841_v1 = vunpack.c.h.s8.bf16 %v2449_v47 }
 0x964   : > { %v2961_v49 = vunpack.c.l.s8.bf16 %v2513_v56  ;;  %v2969_v52 = vunpack.c.h.s8.bf16 %v2513_v56 }
 0x965   : > { %4318 = vmatpush1.bf16.msra.mxu0 %v3407_v25  ;;  %v2842_v25 = vunpack.c.h.s8.bf16 %v2450_v20 }
 0x966   : > { %4359 = vmatpush1.bf16.msra.mxu1 %v3535_v62  ;;  %4319 = vmatprep.subr.bf16.mxu0 %v3416_v36  ;;  %v2970_v62 = vunpack.c.h.s8.bf16 %v2514_v37  ;;  %v2458_v36 = vld [vmem:[%s6857_s4 + $0x78] sm:$0xff] }
 0x967   : > { %4360 = vmatprep.subr.bf16.mxu1 %v3544_v63  ;;  %v2522_v63 = vld [vmem:[%s6857_s4 + $0x278] sm:$0xff] }
 0x969   : > { %4320 = vmatpush1.bf16.msra.mxu0 %v3415_v2  ;;  %v2850_v2 = vunpack.c.l.s8.bf16 %v2458_v36 }
 0x96a   : > { %4361 = vmatpush1.bf16.msra.mxu1 %v3543_v3  ;;  %4321 = vmatprep.subr.bf16.mxu0 %v3424_v5  ;;  %v2978_v3 = vunpack.c.l.s8.bf16 %v2522_v63  ;;  %v2457_v5 = vld [vmem:[%s6857_s4 + $0x70] sm:$0xff] }
 0x96b   : > { %4362 = vmatprep.subr.bf16.mxu1 %v3552_v6  ;;  %v2521_v6 = vld [vmem:[%s6857_s4 + $0x270] sm:$0xff]  ;;  %v2849_v8 = vunpack.c.l.s8.bf16 %v2457_v5  ;;  %v2857_v30 = vunpack.c.h.s8.bf16 %v2457_v5 }
 0x96c   : > { %v2977_v9 = vunpack.c.l.s8.bf16 %v2521_v6  ;;  %v2985_v13 = vunpack.c.h.s8.bf16 %v2521_v6 }
 0x96d   : > { %4322 = vmatpush1.bf16.msra.mxu0 %v3423_v10  ;;  %v2858_v10 = vunpack.c.h.s8.bf16 %v2458_v36 }
 0x96e   : > { %4363 = vmatpush1.bf16.msra.mxu1 %v3551_v11  ;;  %4323 = vmatprep.subr.bf16.mxu0 %v3432_v12  ;;  %v2986_v11 = vunpack.c.h.s8.bf16 %v2522_v63  ;;  %v2466_v12 = vld [vmem:[%s6857_s4 + $0xb8] sm:$0xff] }
 0x96f   : > { %4364 = vmatprep.subr.bf16.mxu1 %v3560_v29  ;;  %v2530_v29 = vld [vmem:[%s6857_s4 + $0x2b8] sm:$0xff]  ;;  %v2874_v4 = vunpack.c.h.s8.bf16 %v2466_v12 }
 0x970   : > { %v3002_v41 = vunpack.c.h.s8.bf16 %v2530_v29 }
 0x971   : > { %4324 = vmatpush1.bf16.msra.mxu0 %v3431_v14  ;;  %v2465_v14 = vld [vmem:[%s6857_s4 + $0xb0] sm:$0xff] }
 0x972   : > { %4365 = vmatpush1.bf16.msra.mxu1 %v3559_v15  ;;  %4325 = vmatprep.subr.bf16.mxu0 %v3440_v17  ;;  %v2529_v15 = vld [vmem:[%s6857_s4 + $0x2b0] sm:$0xff]  ;;  %v2865_v17 = vunpack.c.l.s8.bf16 %v2465_v14 }
 0x973   : > { %4366 = vmatprep.subr.bf16.mxu1 %v3568_v18  ;;  %v2993_v18 = vunpack.c.l.s8.bf16 %v2529_v15 }
 0x975   : > { %4326 = vmatpush1.bf16.msra.mxu0 %v3439_v7  ;;  %v2474_v7 = vld [vmem:[%s6857_s4 + $0xf8] sm:$0xff] }
 0x976   : > { %4367 = vmatpush1.bf16.msra.mxu1 %v3567_v19  ;;  %4327 = vmatprep.subr.bf16.mxu0 %v3448_v48  ;;  %v2538_v19 = vld [vmem:[%s6857_s4 + $0x2f8] sm:$0xff]  ;;  %v2873_v48 = vunpack.c.h.s8.bf16 %v2465_v14  ;;  %v2882_v28 = vunpack.c.l.s8.bf16 %v2474_v7 }
 0x977   : > { %4368 = vmatprep.subr.bf16.mxu1 %v3576_v26  ;;  %v3001_v26 = vunpack.c.h.s8.bf16 %v2529_v15  ;;  %v3010_v16 = vunpack.c.l.s8.bf16 %v2538_v19  ;;  %v3018_v56 = vunpack.c.h.s8.bf16 %v2538_v19 }
 0x979   : > { %4328 = vmatpush1.bf16.msra.mxu0 %v3447_v57  ;;  %v2473_v57 = vld [vmem:[%s6857_s4 + $0xf0] sm:$0xff] }
 0x97a   : > { %4369 = vmatpush1.bf16.msra.mxu1 %v3575_v58  ;;  %4329 = vmatprep.subr.bf16.mxu0 %v3456_v42  ;;  %v2537_v58 = vld [vmem:[%s6857_s4 + $0x2f0] sm:$0xff]  ;;  %v2881_v37 = vunpack.c.l.s8.bf16 %v2473_v57  ;;  %v2889_v36 = vunpack.c.h.s8.bf16 %v2473_v57 }
 0x97b   : > { %4370 = vmatprep.subr.bf16.mxu1 %v3584_v31  ;;  %v3017_v63 = vunpack.c.h.s8.bf16 %v2537_v58 }
 0x97d   : > { %4330 = vmatpush1.bf16.msra.mxu0 %v3455_v40 }
 0x97e   : > { %4371 = vmatpush1.bf16.msra.mxu1 %v3583_v43  ;;  %4331 = vmatprep.subr.bf16.mxu0 %v3464_v45  ;;  %v3597_v43 = vld [vmem:[#allocation3 + $0x10] sm:$0xff] }
 0x97f   : > { %4372 = vmatprep.subr.bf16.mxu1 %v3592_v22 }
 0x981   : > { %4332 = vmatpush1.bf16.msra.mxu0 %v3463_v27  ;;  %v3009_v27 = vunpack.c.l.s8.bf16 %v2537_v58 }
 0x982   : > { %4373 = vmatpush1.bf16.msra.mxu1 %v3591_v54  ;;  %4383 = vmatprep.subr.bf16.mxu0 %v2834_v53  ;;  %v3598_v53 = vld [vmem:[#allocation3 + $0x18] sm:$0xff] }
 0x983   : > { %4424 = vmatprep.subr.bf16.mxu1 %v2962_v55 }
 0x984   : > { %4334 = vmatmul.mubr.bf16.vlgmr.msra.gmra.mrb[32].mxu0 %v7473_v23 }
 0x985   : > { %4375 = vmatmul.mubr.bf16.vlgmr.msra.gmra.mrb[32].mxu1 %v7477_v24  ;;  %4384 = vmatpush1.bf16.msra.mxu0 %v2833_v61 }
 0x986   : > { %4425 = vmatpush1.bf16.msra.mxu1 %v2961_v49  ;;  %4385 = vmatprep.subr.bf16.mxu0 %v2842_v25  ;;  %v2546_v49 = vld [vmem:[%s6857_s4 + $0x338] sm:$0xff] }
 0x987   : > { %4426 = vmatprep.subr.bf16.mxu1 %v2970_v62  ;;  %4415 = vmatprep.mubr.bf16.mxu0 %v7323_v46  ;;  %v2866_v46 = vunpack.c.l.s8.bf16 %v2466_v12 }
 0x988   : > { %4456 = vmatprep.mubr.bf16.mxu1 %v7327_v50  ;;  %v2994_v50 = vunpack.c.l.s8.bf16 %v2530_v29 }
 0x989   : > { %4386 = vmatpush1.bf16.msra.mxu0 %v2841_v1 }
 0x98a   : > { %4427 = vmatpush1.bf16.msra.mxu1 %v2969_v52  ;;  %4387 = vmatprep.subr.bf16.mxu0 %v2850_v2  ;;  %v3026_v52 = vunpack.c.l.s8.bf16 %v2546_v49  ;;  %v2481_v2 = vld [vmem:[%s6857_s4 + $0x130] sm:$0xff] }
 0x98b   : > { %4428 = vmatprep.subr.bf16.mxu1 %v2978_v3  ;;  %v2545_v3 = vld [vmem:[%s6857_s4 + $0x330] sm:$0xff]  ;;  %v2897_v5 = vunpack.c.l.s8.bf16 %v2481_v2  ;;  %v2905_v12 = vunpack.c.h.s8.bf16 %v2481_v2  ;;  %v2586_v2 = vld [vmem:[%s6857_s4 + $0x478] sm:$0xff] }
 0x98c   : > { %v3025_v6 = vunpack.c.l.s8.bf16 %v2545_v3  ;;  %v3033_v29 = vunpack.c.h.s8.bf16 %v2545_v3  ;;  %v2650_v3 = vld [vmem:[%s6857_s4 + $0x678] sm:$0xff] }
 0x98d   : > { %4388 = vmatpush1.bf16.msra.mxu0 %v2849_v8 }
 0x98e   : > { %4429 = vmatpush1.bf16.msra.mxu1 %v2977_v9  ;;  %4389 = vmatprep.subr.bf16.mxu0 %v2858_v10  ;;  %v3034_v9 = vunpack.c.h.s8.bf16 %v2546_v49  ;;  %v2490_v10 = vld [vmem:[%s6857_s4 + $0x178] sm:$0xff] }
 0x98f   : > { %4430 = vmatprep.subr.bf16.mxu1 %v2986_v11  ;;  %v2554_v11 = vld [vmem:[%s6857_s4 + $0x378] sm:$0xff] }
 0x991   : > { %4390 = vmatpush1.bf16.msra.mxu0 %v2857_v30  ;;  %v2914_v30 = vunpack.c.l.s8.bf16 %v2490_v10 }
 0x992   : > { %4431 = vmatpush1.bf16.msra.mxu1 %v2985_v13  ;;  %4391 = vmatprep.subr.bf16.mxu0 %v2866_v46  ;;  %v3042_v13 = vunpack.c.l.s8.bf16 %v2554_v11  ;;  %v2489_v46 = vld [vmem:[%s6857_s4 + $0x170] sm:$0xff] }
 0x993   : > { %4432 = vmatprep.subr.bf16.mxu1 %v2994_v50  ;;  %v2553_v50 = vld [vmem:[%s6857_s4 + $0x370] sm:$0xff]  ;;  %v2913_v14 = vunpack.c.l.s8.bf16 %v2489_v46 }
 0x994   : > { %v3041_v15 = vunpack.c.l.s8.bf16 %v2553_v50  ;;  %v3049_v19 = vunpack.c.h.s8.bf16 %v2553_v50 }
 0x995   : > { %4392 = vmatpush1.bf16.msra.mxu0 %v2865_v17  ;;  %v2922_v17 = vunpack.c.h.s8.bf16 %v2490_v10  ;;  %v2585_v10 = vld [vmem:[%s6857_s4 + $0x470] sm:$0xff] }
 0x996   : > { %4433 = vmatpush1.bf16.msra.mxu1 %v2993_v18  ;;  %4393 = vmatprep.subr.bf16.mxu0 %v2874_v4  ;;  %v3050_v18 = vunpack.c.h.s8.bf16 %v2554_v11  ;;  %v2498_v4 = vld [vmem:[%s6857_s4 + $0x1b8] sm:$0xff]  ;;  %v2649_v11 = vld [vmem:[%s6857_s4 + $0x670] sm:$0xff] }
 0x997   : > { %4434 = vmatprep.subr.bf16.mxu1 %v3002_v41  ;;  %v4089_v42 = vpop.f32.mrb[20].mxu0  ;;  %v2562_v41 = vld [vmem:[%s6857_s4 + $0x3b8] sm:$0xff]  ;;  %v3241_v50 = vunpack.c.h.s8.bf16 %v2649_v11 }
 0x998   : > { %v4130_v31 = vpop.f32.mrb[20].mxu1  ;;  %v4090_v34 = vadd.f32 %v4089_v42, %v7693_v44  ;;  %v4091_v35 = vpop.f32.mrb[21].mxu0  ;;  %v2890_v44 = vunpack.c.h.s8.bf16 %v2474_v7  ;;  %v2921_v7 = vunpack.c.h.s8.bf16 %v2489_v46  ;;  %v2938_v42 = vunpack.c.h.s8.bf16 %v2498_v4 }
 0x999   : > { %v4132_v40 = vpop.f32.mrb[21].mxu1  ;;  %v4092_v45 = vadd.f32 %v4091_v35, %v7695_v38  ;;  %v4093_v22 = vpop.f32.mrb[22].mxu0  ;;  %4394 = vmatpush1.bf16.msra.mxu0 %v2873_v48  ;;  %v2482_v38 = vld [vmem:[%s6857_s4 + $0x138] sm:$0xff]  ;;  %v2930_v48 = vunpack.c.l.s8.bf16 %v2498_v4  ;;  %v3113_v46 = vunpack.c.h.s8.bf16 %v2585_v10 }
 0x99a   : > { %v4134_v20 = vpop.f32.mrb[22].mxu1  ;;  %4435 = vmatpush1.bf16.msra.mxu1 %v3001_v26  ;;  %v4131_v54 = vadd.f32 %v4130_v31, %v4090_v34  ;;  %v4094_v55 = vpop.f32.mrb[23].mxu0  ;;  %4395 = vmatprep.subr.bf16.mxu0 %v2882_v28  ;;  %v2898_v1 = vunpack.c.l.s8.bf16 %v2482_v38  ;;  %v2906_v8 = vunpack.c.h.s8.bf16 %v2482_v38  ;;  %v3058_v26 = vunpack.c.l.s8.bf16 %v2562_v41  ;;  %v2497_v28 = vld [vmem:[%s6857_s4 + $0x1b0] sm:$0xff]  ;;  %v2506_v34 = vld [vmem:[%s6857_s4 + $0x1f8] sm:$0xff] }
 0x99b   : > { %v4135_v47 = vpop.f32.mrb[23].mxu1  ;;  %4436 = vmatprep.subr.bf16.mxu1 %v3010_v16  ;;  %v4133_v61 = vadd.f32 %v4132_v40, %v4092_v45  ;;  %v2561_v16 = vld [vmem:[%s6857_s4 + $0x3b0] sm:$0xff]  ;;  %v2929_v57 = vunpack.c.l.s8.bf16 %v2497_v28  ;;  %v3066_v31 = vunpack.c.h.s8.bf16 %v2562_v41  ;;  %v2570_v35 = vld [vmem:[%s6857_s4 + $0x3f8] sm:$0xff]  ;;  %v2937_v40 = vunpack.c.h.s8.bf16 %v2497_v28 }
 0x99c   : > { %v4631_v25 = vadd.f32 %v4131_v54, %v3597_v43  ;;  %v3057_v58 = vunpack.c.l.s8.bf16 %v2561_v16  ;;  %v3065_v43 = vunpack.c.h.s8.bf16 %v2561_v16  ;;  %v2946_v45 = vunpack.c.l.s8.bf16 %v2506_v34  ;;  %v2505_v20 = vld [vmem:[%s6857_s4 + $0x1f0] sm:$0xff]  ;;  %v2578_v47 = vld [vmem:[%s6857_s4 + $0x438] sm:$0xff] }
 0x99d   : > { %v4632_v62 = vadd.f32 %v4133_v61, %v3598_v53  ;;  %4396 = vmatpush1.bf16.msra.mxu0 %v2881_v37  ;;  %v3074_v22 = vunpack.c.l.s8.bf16 %v2570_v35  ;;  %v2569_v37 = vld [vmem:[%s6857_s4 + $0x3f0] sm:$0xff]  ;;  %v2954_v53 = vunpack.c.h.s8.bf16 %v2506_v34  ;;  %v3082_v55 = vunpack.c.h.s8.bf16 %v2570_v35 }
 0x99e   : > { %4437 = vmatpush1.bf16.msra.mxu1 %v3009_v27  ;;  %4639 = vst [vmem:[#allocation3 + $0x10] sm:$0xff] %v4631_v25  ;;  %4397 = vmatprep.subr.bf16.mxu0 %v2890_v44  ;;  %v2945_v27 = vunpack.c.l.s8.bf16 %v2505_v20  ;;  %v3073_v54 = vunpack.c.l.s8.bf16 %v2569_v37  ;;  %v2642_v44 = vld [vmem:[%s6857_s4 + $0x638] sm:$0xff]  ;;  %v3081_v61 = vunpack.c.h.s8.bf16 %v2569_v37  ;;  %v3090_v38 = vunpack.c.l.s8.bf16 %v2578_v47  ;;  %v2577_v25 = vld [vmem:[%s6857_s4 + $0x430] sm:$0xff] }
 0x99f   : > { %4438 = vmatprep.subr.bf16.mxu1 %v3018_v56  ;;  %4640 = vst [vmem:[#allocation3 + $0x18] sm:$0xff] %v4632_v62  ;;  %v2953_v56 = vunpack.c.h.s8.bf16 %v2505_v20  ;;  %v3218_v49 = vunpack.c.l.s8.bf16 %v2642_v44  ;;  %v2641_v62 = vld [vmem:[%s6857_s4 + $0x630] sm:$0xff] }
 0x9a1   : > { %4398 = vmatpush1.bf16.msra.mxu0 %v2889_v36  ;;  %v3089_v36 = vunpack.c.l.s8.bf16 %v2577_v25 }
 0x9a2   : > { %4439 = vmatpush1.bf16.msra.mxu1 %v3017_v63  ;;  %4399 = vmatprep.subr.bf16.mxu0 %v2898_v1  ;;  %v3217_v63 = vunpack.c.l.s8.bf16 %v2641_v62  ;;  %v3098_v1 = vunpack.c.h.s8.bf16 %v2578_v47  ;;  %v2610_v47 = vld [vmem:[%s6857_s4 + $0x538] sm:$0xff] }
 0x9a3   : > { %4440 = vmatprep.subr.bf16.mxu1 %v3026_v52  ;;  %v3226_v52 = vunpack.c.h.s8.bf16 %v2642_v44  ;;  %v2674_v44 = vld [vmem:[%s6857_s4 + $0x738] sm:$0xff] }
 0x9a5   : > { %4400 = vmatpush1.bf16.msra.mxu0 %v2897_v5  ;;  %v3097_v5 = vunpack.c.h.s8.bf16 %v2577_v25  ;;  %v2609_v25 = vld [vmem:[%s6857_s4 + $0x530] sm:$0xff] }
 0x9a6   : > { %4441 = vmatpush1.bf16.msra.mxu1 %v3025_v6  ;;  %4401 = vmatprep.subr.bf16.mxu0 %v2906_v8  ;;  %v3225_v6 = vunpack.c.h.s8.bf16 %v2641_v62  ;;  %v3106_v8 = vunpack.c.l.s8.bf16 %v2586_v2  ;;  %v2673_v62 = vld [vmem:[%s6857_s4 + $0x730] sm:$0xff] }
 0x9a7   : > { %4442 = vmatprep.subr.bf16.mxu1 %v3034_v9  ;;  %v3234_v9 = vunpack.c.l.s8.bf16 %v2650_v3 }
 0x9a9   : > { %4402 = vmatpush1.bf16.msra.mxu0 %v2905_v12  ;;  %v3114_v12 = vunpack.c.h.s8.bf16 %v2586_v2  ;;  %v2618_v2 = vld [vmem:[%s6857_s4 + $0x578] sm:$0xff] }
 0x9aa   : > { %4443 = vmatpush1.bf16.msra.mxu1 %v3033_v29  ;;  %4403 = vmatprep.subr.bf16.mxu0 %v2914_v30  ;;  %v3242_v29 = vunpack.c.h.s8.bf16 %v2650_v3  ;;  %v2594_v30 = vld [vmem:[%s6857_s4 + $0x4b8] sm:$0xff] }
 0x9ab   : > { %4444 = vmatprep.subr.bf16.mxu1 %v3042_v13  ;;  %v2658_v13 = vld [vmem:[%s6857_s4 + $0x6b8] sm:$0xff]  ;;  %v3130_v4 = vunpack.c.h.s8.bf16 %v2594_v30 }
 0x9ac   : > { %v3258_v41 = vunpack.c.h.s8.bf16 %v2658_v13  ;;  %v2682_v3 = vld [vmem:[%s6857_s4 + $0x778] sm:$0xff] }
 0x9ad   : > { %4404 = vmatpush1.bf16.msra.mxu0 %v2913_v14  ;;  %v2593_v14 = vld [vmem:[%s6857_s4 + $0x4b0] sm:$0xff] }
 0x9ae   : > { %4445 = vmatpush1.bf16.msra.mxu1 %v3041_v15  ;;  %4405 = vmatprep.subr.bf16.mxu0 %v2922_v17  ;;  %v2657_v15 = vld [vmem:[%s6857_s4 + $0x6b0] sm:$0xff]  ;;  %v3121_v17 = vunpack.c.l.s8.bf16 %v2593_v14 }
 0x9af   : > { %4446 = vmatprep.subr.bf16.mxu1 %v3050_v18  ;;  %v3249_v18 = vunpack.c.l.s8.bf16 %v2657_v15 }
 0x9b1   : > { %4406 = vmatpush1.bf16.msra.mxu0 %v2921_v7  ;;  %v2602_v7 = vld [vmem:[%s6857_s4 + $0x4f8] sm:$0xff] }
 0x9b2   : > { %4447 = vmatpush1.bf16.msra.mxu1 %v3049_v19  ;;  %4407 = vmatprep.subr.bf16.mxu0 %v2930_v48  ;;  %v2666_v19 = vld [vmem:[%s6857_s4 + $0x6f8] sm:$0xff]  ;;  %v3129_v48 = vunpack.c.h.s8.bf16 %v2593_v14  ;;  %v3138_v28 = vunpack.c.l.s8.bf16 %v2602_v7  ;;  %v2625_v14 = vld [vmem:[%s6857_s4 + $0x5b0] sm:$0xff] }
 0x9b3   : > { %4448 = vmatprep.subr.bf16.mxu1 %v3058_v26  ;;  %v3257_v26 = vunpack.c.h.s8.bf16 %v2657_v15  ;;  %v3266_v16 = vunpack.c.l.s8.bf16 %v2666_v19  ;;  %v2689_v15 = vld [vmem:[%s6857_s4 + $0x7b0] sm:$0xff] }
 0x9b5   : > { %4408 = vmatpush1.bf16.msra.mxu0 %v2929_v57  ;;  %v2601_v57 = vld [vmem:[%s6857_s4 + $0x4f0] sm:$0xff] }
 0x9b6   : > { %4449 = vmatpush1.bf16.msra.mxu1 %v3057_v58  ;;  %4409 = vmatprep.subr.bf16.mxu0 %v2938_v42  ;;  %v2665_v58 = vld [vmem:[%s6857_s4 + $0x6f0] sm:$0xff]  ;;  %v3137_v20 = vunpack.c.l.s8.bf16 %v2601_v57 }
 0x9b7   : > { %4450 = vmatprep.subr.bf16.mxu1 %v3066_v31  ;;  %v3265_v37 = vunpack.c.l.s8.bf16 %v2665_v58 }
 0x9b9   : > { %4410 = vmatpush1.bf16.msra.mxu0 %v2937_v40 }
 0x9ba   : > { %4451 = vmatpush1.bf16.msra.mxu1 %v3065_v43  ;;  %4411 = vmatprep.subr.bf16.mxu0 %v2946_v45 }
 0x9bb   : > { %4452 = vmatprep.subr.bf16.mxu1 %v3074_v22 }
 0x9bd   : > { %4412 = vmatpush1.bf16.msra.mxu0 %v2945_v27 }
 0x9be   : > { %4453 = vmatpush1.bf16.msra.mxu1 %v3073_v54  ;;  %4413 = vmatprep.subr.bf16.mxu0 %v2954_v53  ;;  %v3146_v53 = vunpack.c.h.s8.bf16 %v2602_v7  ;;  %v2634_v7 = vld [vmem:[%s6857_s4 + $0x5f8] sm:$0xff] }
 0x9bf   : > { %4454 = vmatprep.subr.bf16.mxu1 %v3082_v55  ;;  %v3274_v55 = vunpack.c.h.s8.bf16 %v2666_v19  ;;  %v2698_v19 = vld [vmem:[%s6857_s4 + $0x7f8] sm:$0xff] }
 0x9c1   : > { %4414 = vmatpush1.bf16.msra.mxu0 %v2953_v56  ;;  %v3145_v56 = vunpack.c.h.s8.bf16 %v2601_v57  ;;  %v2633_v57 = vld [vmem:[%s6857_s4 + $0x5f0] sm:$0xff] }
 0x9c2   : > { %4455 = vmatpush1.bf16.msra.mxu1 %v3081_v61  ;;  %4465 = vmatprep.subr.bf16.mxu0 %v3090_v38  ;;  %v3273_v61 = vunpack.c.h.s8.bf16 %v2665_v58  ;;  %v3154_v38 = vunpack.c.l.s8.bf16 %v2610_v47  ;;  %v2697_v58 = vld [vmem:[%s6857_s4 + $0x7f0] sm:$0xff] }
 0x9c3   : > { %4506 = vmatprep.subr.bf16.mxu1 %v3218_v49  ;;  %v3282_v49 = vunpack.c.l.s8.bf16 %v2674_v44 }
 0x9c4   : > { %4416 = vmatmul.mubr.bf16.vlgmr.msra.gmra.mrb[36].mxu0 %v7357_v59  ;;  %v3105_v59 = vunpack.c.l.s8.bf16 %v2585_v10  ;;  %v2617_v10 = vld [vmem:[%s6857_s4 + $0x570] sm:$0xff] }
 0x9c5   : > { %4457 = vmatmul.mubr.bf16.vlgmr.msra.gmra.mrb[36].mxu1 %v7361_v21  ;;  %4466 = vmatpush1.bf16.msra.mxu0 %v3089_v36  ;;  %v3233_v21 = vunpack.c.l.s8.bf16 %v2649_v11  ;;  %v3153_v36 = vunpack.c.l.s8.bf16 %v2609_v25  ;;  %v2681_v11 = vld [vmem:[%s6857_s4 + $0x770] sm:$0xff] }
 0x9c6   : > { %4507 = vmatpush1.bf16.msra.mxu1 %v3217_v63  ;;  %4467 = vmatprep.subr.bf16.mxu0 %v3098_v1  ;;  %v3281_v63 = vunpack.c.l.s8.bf16 %v2673_v62  ;;  %v3162_v1 = vunpack.c.h.s8.bf16 %v2610_v47 }
 0x9c7   : > { %4508 = vmatprep.subr.bf16.mxu1 %v3226_v52  ;;  %4497 = vmatprep.mubr.bf16.mxu0 %v7373_v39  ;;  %v3122_v39 = vunpack.c.l.s8.bf16 %v2594_v30  ;;  %v3290_v52 = vunpack.c.h.s8.bf16 %v2674_v44  ;;  %v2626_v30 = vld [vmem:[%s6857_s4 + $0x5b8] sm:$0xff] }
 0x9c8   : > { %4538 = vmatprep.mubr.bf16.mxu1 %v7377_v0  ;;  %v3250_v0 = vunpack.c.l.s8.bf16 %v2658_v13  ;;  %v2690_v13 = vld [vmem:[%s6857_s4 + $0x7b8] sm:$0xff] }
 0x9c9   : > { %4468 = vmatpush1.bf16.msra.mxu0 %v3097_v5  ;;  %v3161_v5 = vunpack.c.h.s8.bf16 %v2609_v25 }
 0x9ca   : > { %4509 = vmatpush1.bf16.msra.mxu1 %v3225_v6  ;;  %4469 = vmatprep.subr.bf16.mxu0 %v3106_v8  ;;  %v3289_v6 = vunpack.c.h.s8.bf16 %v2673_v62  ;;  %v3170_v8 = vunpack.c.l.s8.bf16 %v2618_v2 }
 0x9cb   : > { %4510 = vmatprep.subr.bf16.mxu1 %v3234_v9  ;;  %v3298_v9 = vunpack.c.l.s8.bf16 %v2682_v3 }
 0x9cd   : > { %4470 = vmatpush1.bf16.msra.mxu0 %v3105_v59  ;;  %v3169_v59 = vunpack.c.l.s8.bf16 %v2617_v10 }
 0x9ce   : > { %4511 = vmatpush1.bf16.msra.mxu1 %v3233_v21  ;;  %4471 = vmatprep.subr.bf16.mxu0 %v3114_v12  ;;  %v3297_v21 = vunpack.c.l.s8.bf16 %v2681_v11  ;;  %v3178_v12 = vunpack.c.h.s8.bf16 %v2618_v2 }
 0x9cf   : > { %4512 = vmatprep.subr.bf16.mxu1 %v3242_v29  ;;  %v3306_v29 = vunpack.c.h.s8.bf16 %v2682_v3 }
 0x9d1   : > { %4472 = vmatpush1.bf16.msra.mxu0 %v3113_v46  ;;  %v3177_v46 = vunpack.c.h.s8.bf16 %v2617_v10  ;;  %v2721_v10 = vld [vmem:[%s6857_s4 + $0x8b0] sm:$0xff] }
 0x9d2   : > { %4513 = vmatpush1.bf16.msra.mxu1 %v3241_v50  ;;  %4473 = vmatprep.subr.bf16.mxu0 %v3122_v39  ;;  %v3305_v50 = vunpack.c.h.s8.bf16 %v2681_v11  ;;  %v3186_v39 = vunpack.c.l.s8.bf16 %v2626_v30  ;;  %v2785_v11 = vld [vmem:[%s6857_s4 + $0xab0] sm:$0xff] }
 0x9d3   : > { %4514 = vmatprep.subr.bf16.mxu1 %v3250_v0  ;;  %v3314_v0 = vunpack.c.l.s8.bf16 %v2690_v13 }
 0x9d5   : > { %4474 = vmatpush1.bf16.msra.mxu0 %v3121_v17  ;;  %v3185_v17 = vunpack.c.l.s8.bf16 %v2625_v14 }
 0x9d6   : > { %4515 = vmatpush1.bf16.msra.mxu1 %v3249_v18  ;;  %4475 = vmatprep.subr.bf16.mxu0 %v3130_v4  ;;  %v3313_v18 = vunpack.c.l.s8.bf16 %v2689_v15  ;;  %v3194_v4 = vunpack.c.h.s8.bf16 %v2626_v30  ;;  %v2730_v30 = vld [vmem:[%s6857_s4 + $0x8f8] sm:$0xff] }
 0x9d7   : > { %4516 = vmatprep.subr.bf16.mxu1 %v3258_v41  ;;  %v4171_v42 = vpop.f32.mrb[24].mxu0  ;;  %v3322_v41 = vunpack.c.h.s8.bf16 %v2690_v13  ;;  %v2794_v13 = vld [vmem:[%s6857_s4 + $0xaf8] sm:$0xff] }
 0x9d8   : > { %v4212_v31 = vpop.f32.mrb[24].mxu1  ;;  %v4173_v35 = vpop.f32.mrb[25].mxu0 }
 0x9d9   : > { %v7771_v34 = vadd.f32 %v4212_v31, %v4171_v42  ;;  %v4214_v40 = vpop.f32.mrb[25].mxu1  ;;  %v4175_v45 = vpop.f32.mrb[26].mxu0  ;;  %4476 = vmatpush1.bf16.msra.mxu0 %v3129_v48  ;;  %v3193_v48 = vunpack.c.h.s8.bf16 %v2625_v14  ;;  %v3201_v42 = vunpack.c.l.s8.bf16 %v2633_v57  ;;  %v3329_v31 = vunpack.c.l.s8.bf16 %v2697_v58  ;;  %v2729_v14 = vld [vmem:[%s6857_s4 + $0x8f0] sm:$0xff] }
 0x9da   : > { %v7773_v43 = vadd.f32 %v4214_v40, %v4173_v35  ;;  %v4216_v22 = vpop.f32.mrb[26].mxu1  ;;  %4517 = vmatpush1.bf16.msra.mxu1 %v3257_v26  ;;  %v4176_v27 = vpop.f32.mrb[27].mxu0  ;;  %4477 = vmatprep.subr.bf16.mxu0 %v3138_v28  ;;  %v3321_v26 = vunpack.c.h.s8.bf16 %v2689_v15  ;;  %v3202_v28 = vunpack.c.l.s8.bf16 %v2634_v7  ;;  %v3210_v35 = vunpack.c.h.s8.bf16 %v2634_v7  ;;  %v2706_v45 = vld [vmem:[%s6857_s4 + $0x838] sm:$0xff]  ;;  %v2793_v15 = vld [vmem:[%s6857_s4 + $0xaf0] sm:$0xff] }
 0x9db   : > { %v4217_v54 = vpop.f32.mrb[27].mxu1  ;;  %4518 = vmatprep.subr.bf16.mxu1 %v3266_v16  ;;  %v3330_v16 = vunpack.c.l.s8.bf16 %v2698_v19  ;;  %v3338_v40 = vunpack.c.h.s8.bf16 %v2698_v19  ;;  %v2770_v22 = vld [vmem:[%s6857_s4 + $0xa38] sm:$0xff]  ;;  %v3346_v27 = vunpack.c.l.s8.bf16 %v2706_v45 }
 0x9dc   : > { %v3474_v54 = vunpack.c.l.s8.bf16 %v2770_v22 }
 0x9dd   : > { %4478 = vmatpush1.bf16.msra.mxu0 %v3137_v20  ;;  %v3209_v20 = vunpack.c.h.s8.bf16 %v2633_v57 }
 0x9de   : > { %4519 = vmatpush1.bf16.msra.mxu1 %v3265_v37  ;;  %4479 = vmatprep.subr.bf16.mxu0 %v3146_v53  ;;  %v3337_v37 = vunpack.c.h.s8.bf16 %v2697_v58  ;;  %v2705_v53 = vld [vmem:[%s6857_s4 + $0x830] sm:$0xff] }
 0x9df   : > { %4520 = vmatprep.subr.bf16.mxu1 %v3274_v55  ;;  %v2769_v55 = vld [vmem:[%s6857_s4 + $0xa30] sm:$0xff]  ;;  %v3345_v47 = vunpack.c.l.s8.bf16 %v2705_v53  ;;  %v3353_v25 = vunpack.c.h.s8.bf16 %v2705_v53 }
 0x9e0   : > { %v3473_v44 = vunpack.c.l.s8.bf16 %v2769_v55  ;;  %v3481_v62 = vunpack.c.h.s8.bf16 %v2769_v55 }
 0x9e1   : > { %4480 = vmatpush1.bf16.msra.mxu0 %v3145_v56  ;;  %v3354_v56 = vunpack.c.h.s8.bf16 %v2706_v45  ;;  %v3401_v45 = vunpack.c.h.s8.bf16 %v2729_v14 }
 0x9e2   : > { %4521 = vmatpush1.bf16.msra.mxu1 %v3273_v61  ;;  %4481 = vmatprep.subr.bf16.mxu0 %v3154_v38  ;;  %v3482_v61 = vunpack.c.h.s8.bf16 %v2770_v22  ;;  %v2714_v38 = vld [vmem:[%s6857_s4 + $0x878] sm:$0xff]  ;;  %v3529_v22 = vunpack.c.h.s8.bf16 %v2793_v15 }
 0x9e3   : > { %4522 = vmatprep.subr.bf16.mxu1 %v3282_v49  ;;  %v2778_v49 = vld [vmem:[%s6857_s4 + $0xa78] sm:$0xff]  ;;  %v3370_v2 = vunpack.c.h.s8.bf16 %v2714_v38 }
 0x9e4   : > { %v3498_v3 = vunpack.c.h.s8.bf16 %v2778_v49 }
 0x9e5   : > { %4482 = vmatpush1.bf16.msra.mxu0 %v3153_v36  ;;  %v3362_v36 = vunpack.c.l.s8.bf16 %v2714_v38 }
 0x9e6   : > { %4523 = vmatpush1.bf16.msra.mxu1 %v3281_v63  ;;  %4483 = vmatprep.subr.bf16.mxu0 %v3162_v1  ;;  %v3490_v63 = vunpack.c.l.s8.bf16 %v2778_v49  ;;  %v2713_v1 = vld [vmem:[%s6857_s4 + $0x870] sm:$0xff] }
 0x9e7   : > { %4524 = vmatprep.subr.bf16.mxu1 %v3290_v52  ;;  %v2777_v52 = vld [vmem:[%s6857_s4 + $0xa70] sm:$0xff] }
 0x9e9   : > { %4484 = vmatpush1.bf16.msra.mxu0 %v3161_v5  ;;  %v2722_v5 = vld [vmem:[%s6857_s4 + $0x8b8] sm:$0xff] }
 0x9ea   : > { %4525 = vmatpush1.bf16.msra.mxu1 %v3289_v6  ;;  %4485 = vmatprep.subr.bf16.mxu0 %v3170_v8  ;;  %v2786_v6 = vld [vmem:[%s6857_s4 + $0xab8] sm:$0xff]  ;;  %v3369_v8 = vunpack.c.h.s8.bf16 %v2713_v1 }
 0x9eb   : > { %4526 = vmatprep.subr.bf16.mxu1 %v3298_v9  ;;  %v3497_v9 = vunpack.c.h.s8.bf16 %v2777_v52 }
 0x9ed   : > { %4486 = vmatpush1.bf16.msra.mxu0 %v3169_v59  ;;  %v3377_v59 = vunpack.c.l.s8.bf16 %v2721_v10 }
 0x9ee   : > { %4527 = vmatpush1.bf16.msra.mxu1 %v3297_v21  ;;  %4487 = vmatprep.subr.bf16.mxu0 %v3178_v12  ;;  %v3505_v21 = vunpack.c.l.s8.bf16 %v2785_v11  ;;  %v3386_v12 = vunpack.c.h.s8.bf16 %v2722_v5 }
 0x9ef   : > { %4528 = vmatprep.subr.bf16.mxu1 %v3306_v29  ;;  %v3514_v29 = vunpack.c.h.s8.bf16 %v2786_v6 }
 0x9f1   : > { %4488 = vmatpush1.bf16.msra.mxu0 %v3177_v46  ;;  %v3385_v46 = vunpack.c.h.s8.bf16 %v2721_v10 }
 0x9f2   : > { %4529 = vmatpush1.bf16.msra.mxu1 %v3305_v50  ;;  %4489 = vmatprep.subr.bf16.mxu0 %v3186_v39  ;;  %v3513_v50 = vunpack.c.h.s8.bf16 %v2785_v11  ;;  %v3394_v39 = vunpack.c.l.s8.bf16 %v2730_v30 }
 0x9f3   : > { %4530 = vmatprep.subr.bf16.mxu1 %v3314_v0  ;;  %v3522_v0 = vunpack.c.l.s8.bf16 %v2794_v13 }
 0x9f5   : > { %4490 = vmatpush1.bf16.msra.mxu0 %v3185_v17 }
 0x9f6   : > { %4531 = vmatpush1.bf16.msra.mxu1 %v3313_v18  ;;  %4491 = vmatprep.subr.bf16.mxu0 %v3194_v4 }
 0x9f7   : > { %4532 = vmatprep.subr.bf16.mxu1 %v3322_v41 }
 0x9f9   : > { %4492 = vmatpush1.bf16.msra.mxu0 %v3193_v48 }
 0x9fa   : > { %4533 = vmatpush1.bf16.msra.mxu1 %v3321_v26  ;;  %4493 = vmatprep.subr.bf16.mxu0 %v3202_v28  ;;  %v3393_v28 = vunpack.c.l.s8.bf16 %v2729_v14 }
 0x9fb   : > { %4534 = vmatprep.subr.bf16.mxu1 %v3330_v16  ;;  %v3521_v16 = vunpack.c.l.s8.bf16 %v2793_v15 }
 0x9fd   : > { %4494 = vmatpush1.bf16.msra.mxu0 %v3201_v42 }
 0x9fe   : > { %4535 = vmatpush1.bf16.msra.mxu1 %v3329_v31  ;;  %4495 = vmatprep.subr.bf16.mxu0 %v3210_v35  ;;  %v3530_v31 = vunpack.c.h.s8.bf16 %v2794_v13 }
 0x9ff   : > { %4536 = vmatprep.subr.bf16.mxu1 %v3338_v40  ;;  %v2802_v40 = vld [vmem:[%s6857_s4 + $0xb38] sm:$0xff] }
 0xa01   : > { %4496 = vmatpush1.bf16.msra.mxu0 %v3209_v20 }
 0xa02   : > { %4537 = vmatpush1.bf16.msra.mxu1 %v3337_v37  ;;  %4547 = vmatprep.subr.bf16.mxu0 %v3346_v27  ;;  %v3538_v37 = vunpack.c.l.s8.bf16 %v2802_v40  ;;  %v2737_v27 = vld [vmem:[%s6857_s4 + $0x930] sm:$0xff] }
 0xa03   : > { %4588 = vmatprep.subr.bf16.mxu1 %v3474_v54  ;;  %v2801_v54 = vld [vmem:[%s6857_s4 + $0xb30] sm:$0xff]  ;;  %v3409_v53 = vunpack.c.l.s8.bf16 %v2737_v27  ;;  %v3417_v38 = vunpack.c.h.s8.bf16 %v2737_v27 }
 0xa04   : > { %4498 = vmatmul.mubr.bf16.vlgmr.msra.gmra.mrb[40].mxu0 %v7415_v32  ;;  %v3361_v32 = vunpack.c.l.s8.bf16 %v2713_v1  ;;  %v3537_v55 = vunpack.c.l.s8.bf16 %v2801_v54  ;;  %v3545_v49 = vunpack.c.h.s8.bf16 %v2801_v54 }
 0xa05   : > { %4539 = vmatmul.mubr.bf16.vlgmr.msra.gmra.mrb[40].mxu1 %v7419_v33  ;;  %4548 = vmatpush1.bf16.msra.mxu0 %v3345_v47  ;;  %v3489_v33 = vunpack.c.l.s8.bf16 %v2777_v52 }
 0xa06   : > { %4589 = vmatpush1.bf16.msra.mxu1 %v3473_v44  ;;  %4549 = vmatprep.subr.bf16.mxu0 %v3354_v56  ;;  %v3546_v44 = vunpack.c.h.s8.bf16 %v2802_v40  ;;  %v2746_v56 = vld [vmem:[%s6857_s4 + $0x978] sm:$0xff] }
 0xa07   : > { %4590 = vmatprep.subr.bf16.mxu1 %v3482_v61  ;;  %4579 = vmatprep.mubr.bf16.mxu0 %v7431_v60  ;;  %v3378_v60 = vunpack.c.l.s8.bf16 %v2722_v5  ;;  %v2810_v61 = vld [vmem:[%s6857_s4 + $0xb78] sm:$0xff] }
 0xa08   : > { %4620 = vmatprep.mubr.bf16.mxu1 %v7435_v51  ;;  %v3506_v51 = vunpack.c.l.s8.bf16 %v2786_v6 }
 0xa09   : > { %4550 = vmatpush1.bf16.msra.mxu0 %v3353_v25  ;;  %v3426_v25 = vunpack.c.l.s8.bf16 %v2746_v56 }
 0xa0a   : > { %4591 = vmatpush1.bf16.msra.mxu1 %v3481_v62  ;;  %4551 = vmatprep.subr.bf16.mxu0 %v3362_v36  ;;  %v3554_v62 = vunpack.c.l.s8.bf16 %v2810_v61  ;;  %v2745_v36 = vld [vmem:[%s6857_s4 + $0x970] sm:$0xff] }
 0xa0b   : > { %4592 = vmatprep.subr.bf16.mxu1 %v3490_v63  ;;  %v2809_v63 = vld [vmem:[%s6857_s4 + $0xb70] sm:$0xff]  ;;  %v3425_v1 = vunpack.c.l.s8.bf16 %v2745_v36  ;;  %v3433_v5 = vunpack.c.h.s8.bf16 %v2745_v36 }
 0xa0c   : > { %v3553_v52 = vunpack.c.l.s8.bf16 %v2809_v63  ;;  %v3561_v6 = vunpack.c.h.s8.bf16 %v2809_v63 }
 0xa0d   : > { %4552 = vmatpush1.bf16.msra.mxu0 %v3361_v32  ;;  %v3434_v32 = vunpack.c.h.s8.bf16 %v2746_v56 }
 0xa0e   : > { %4593 = vmatpush1.bf16.msra.mxu1 %v3489_v33  ;;  %4553 = vmatprep.subr.bf16.mxu0 %v3370_v2  ;;  %v3562_v33 = vunpack.c.h.s8.bf16 %v2810_v61  ;;  %v2754_v2 = vld [vmem:[%s6857_s4 + $0x9b8] sm:$0xff] }
 0xa0f   : > { %4594 = vmatprep.subr.bf16.mxu1 %v3498_v3  ;;  %v2818_v3 = vld [vmem:[%s6857_s4 + $0xbb8] sm:$0xff] }
 0xa11   : > { %4554 = vmatpush1.bf16.msra.mxu0 %v3369_v8  ;;  %v3442_v8 = vunpack.c.l.s8.bf16 %v2754_v2 }
 0xa12   : > { %4595 = vmatpush1.bf16.msra.mxu1 %v3497_v9  ;;  %4555 = vmatprep.subr.bf16.mxu0 %v3378_v60  ;;  %v3570_v9 = vunpack.c.l.s8.bf16 %v2818_v3  ;;  %v2753_v60 = vld [vmem:[%s6857_s4 + $0x9b0] sm:$0xff] }
 0xa13   : > { %4596 = vmatprep.subr.bf16.mxu1 %v3506_v51  ;;  %v2817_v51 = vld [vmem:[%s6857_s4 + $0xbb0] sm:$0xff]  ;;  %v3441_v10 = vunpack.c.l.s8.bf16 %v2753_v60 }
 0xa14   : > { %v3569_v11 = vunpack.c.l.s8.bf16 %v2817_v51  ;;  %v3577_v13 = vunpack.c.h.s8.bf16 %v2817_v51 }
 0xa15   : > { %4556 = vmatpush1.bf16.msra.mxu0 %v3377_v59  ;;  %v3450_v59 = vunpack.c.h.s8.bf16 %v2754_v2 }
 0xa16   : > { %4597 = vmatpush1.bf16.msra.mxu1 %v3505_v21  ;;  %4557 = vmatprep.subr.bf16.mxu0 %v3386_v12  ;;  %v3578_v21 = vunpack.c.h.s8.bf16 %v2818_v3  ;;  %v2762_v12 = vld [vmem:[%s6857_s4 + $0x9f8] sm:$0xff] }
 0xa17   : > { %4598 = vmatprep.subr.bf16.mxu1 %v3514_v29  ;;  %v4253_v17 = vpop.f32.mrb[28].mxu0  ;;  %v2826_v29 = vld [vmem:[%s6857_s4 + $0xbf8] sm:$0xff] }
 0xa18   : > { %v4294_v18 = vpop.f32.mrb[28].mxu1  ;;  %v4254_v4 = vadd.f32 %v4253_v17, %v7771_v34  ;;  %v4255_v41 = vpop.f32.mrb[29].mxu0  ;;  %v3402_v34 = vunpack.c.h.s8.bf16 %v2730_v30  ;;  %v3449_v30 = vunpack.c.h.s8.bf16 %v2753_v60  ;;  %v3466_v17 = vunpack.c.h.s8.bf16 %v2762_v12 }
 0xa19   : > { %v4296_v7 = vpop.f32.mrb[29].mxu1  ;;  %v4256_v19 = vadd.f32 %v4255_v41, %v7773_v43  ;;  %v4257_v48 = vpop.f32.mrb[30].mxu0  ;;  %4558 = vmatpush1.bf16.msra.mxu0 %v3385_v46  ;;  %v2738_v43 = vld [vmem:[%s6857_s4 + $0x938] sm:$0xff]  ;;  %v3458_v46 = vunpack.c.l.s8.bf16 %v2762_v12 }
 0xa1a   : > { %v4298_v26 = vpop.f32.mrb[30].mxu1  ;;  %4599 = vmatpush1.bf16.msra.mxu1 %v3513_v50  ;;  %v7813_v57 = vadd.f32 %v4294_v18, %v4254_v4  ;;  %v4258_v58 = vpop.f32.mrb[31].mxu0  ;;  %4559 = vmatprep.subr.bf16.mxu0 %v3394_v39  ;;  %v3410_v20 = vunpack.c.l.s8.bf16 %v2738_v43  ;;  %v3418_v47 = vunpack.c.h.s8.bf16 %v2738_v43  ;;  %v3586_v50 = vunpack.c.l.s8.bf16 %v2826_v29  ;;  %v2761_v39 = vld [vmem:[%s6857_s4 + $0x9f0] sm:$0xff] }
 0xa1b   : > { %v4299_v42 = vpop.f32.mrb[31].mxu1  ;;  %4600 = vmatprep.subr.bf16.mxu1 %v3522_v0  ;;  %v7815_v35 = vadd.f32 %v4296_v7, %v4256_v19  ;;  %v2825_v0 = vld [vmem:[%s6857_s4 + $0xbf0] sm:$0xff]  ;;  %v3457_v14 = vunpack.c.l.s8.bf16 %v2761_v39  ;;  %v3594_v18 = vunpack.c.h.s8.bf16 %v2826_v29  ;;  %v3465_v4 = vunpack.c.h.s8.bf16 %v2761_v39 }
 0xa1c   : > { %v3585_v15 = vunpack.c.l.s8.bf16 %v2825_v0  ;;  %v3593_v41 = vunpack.c.h.s8.bf16 %v2825_v0  ;;  %v3600_v43 = vld [vmem:[#allocation3 + $0x28] sm:$0xff] }
 0xa1d   : > { %4560 = vmatpush1.bf16.msra.mxu0 %v3393_v28 }
 0xa1e   : > { %4601 = vmatpush1.bf16.msra.mxu1 %v3521_v16  ;;  %4561 = vmatprep.subr.bf16.mxu0 %v3402_v34  ;;  %v3599_v16 = vld [vmem:[#allocation3 + $0x20] sm:$0xff] }
 0xa1f   : > { %4602 = vmatprep.subr.bf16.mxu1 %v3530_v31 }
 0xa21   : > { %4562 = vmatpush1.bf16.msra.mxu0 %v3401_v45 }
 0xa22   : > { %4603 = vmatpush1.bf16.msra.mxu1 %v3529_v22  ;;  %4563 = vmatprep.subr.bf16.mxu0 %v3410_v20 }
 0xa23   : > { %4604 = vmatprep.subr.bf16.mxu1 %v3538_v37 }
 0xa25   : > { %4564 = vmatpush1.bf16.msra.mxu0 %v3409_v53 }
 0xa26   : > { %4605 = vmatpush1.bf16.msra.mxu1 %v3537_v55  ;;  %4565 = vmatprep.subr.bf16.mxu0 %v3418_v47 }
 0xa27   : > { %4606 = vmatprep.subr.bf16.mxu1 %v3546_v44 }
 0xa29   : > { %4566 = vmatpush1.bf16.msra.mxu0 %v3417_v38 }
 0xa2a   : > { %4607 = vmatpush1.bf16.msra.mxu1 %v3545_v49  ;;  %4567 = vmatprep.subr.bf16.mxu0 %v3426_v25 }
 0xa2b   : > { %4608 = vmatprep.subr.bf16.mxu1 %v3554_v62 }
 0xa2d   : > { %4568 = vmatpush1.bf16.msra.mxu0 %v3425_v1 }
 0xa2e   : > { %4609 = vmatpush1.bf16.msra.mxu1 %v3553_v52  ;;  %4569 = vmatprep.subr.bf16.mxu0 %v3434_v32 }
 0xa2f   : > { %4610 = vmatprep.subr.bf16.mxu1 %v3562_v33 }
 0xa31   : > { %4570 = vmatpush1.bf16.msra.mxu0 %v3433_v5 }
 0xa32   : > { %4611 = vmatpush1.bf16.msra.mxu1 %v3561_v6  ;;  %4571 = vmatprep.subr.bf16.mxu0 %v3442_v8 }
 0xa33   : > { %4612 = vmatprep.subr.bf16.mxu1 %v3570_v9  ;;  %v3601_v9 = vld [vmem:[#allocation3 + $0x30] sm:$0xff] }
 0xa35   : > { %4572 = vmatpush1.bf16.msra.mxu0 %v3441_v10 }
 0xa36   : > { %4613 = vmatpush1.bf16.msra.mxu1 %v3569_v11  ;;  %4573 = vmatprep.subr.bf16.mxu0 %v3450_v59  ;;  %v3602_v59 = vld [vmem:[#allocation3 + $0x38] sm:$0xff] }
 0xa37   : > { %4614 = vmatprep.subr.bf16.mxu1 %v3578_v21 }
 0xa39   : > { %4574 = vmatpush1.bf16.msra.mxu0 %v3449_v30 }
 0xa3a   : > { %4615 = vmatpush1.bf16.msra.mxu1 %v3577_v13  ;;  %4575 = vmatprep.subr.bf16.mxu0 %v3458_v46 }
 0xa3b   : > { %4616 = vmatprep.subr.bf16.mxu1 %v3586_v50 }
 0xa3d   : > { %4576 = vmatpush1.bf16.msra.mxu0 %v3457_v14 }
 0xa3e   : > { %4617 = vmatpush1.bf16.msra.mxu1 %v3585_v15  ;;  %4577 = vmatprep.subr.bf16.mxu0 %v3466_v17 }
 0xa3f   : > { %4618 = vmatprep.subr.bf16.mxu1 %v3594_v18 }
 0xa41   : > { %4578 = vmatpush1.bf16.msra.mxu0 %v3465_v4 }
 0xa42   : > { %4619 = vmatpush1.bf16.msra.mxu1 %v3593_v41 }
 0xa44   : > { %4580 = vmatmul.mubr.bf16.vlgmr.msra.gmra.mrb[44].mxu0 %v7473_v23 }
 0xa45   : > { %4621 = vmatmul.mubr.bf16.vlgmr.msra.gmra.mrb[44].mxu1 %v7477_v24 }
 0xa57   : > { %v4335_v7 = vpop.f32.mrb[32].mxu0 }
 0xa58   : > { %v4376_v19 = vpop.f32.mrb[32].mxu1  ;;  %v4336_v48 = vadd.f32 %v4335_v7, %v7813_v57  ;;  %v4337_v26 = vpop.f32.mrb[33].mxu0 }
 0xa59   : > { %v4378_v28 = vpop.f32.mrb[33].mxu1  ;;  %v4338_v58 = vadd.f32 %v4337_v26, %v7815_v35  ;;  %v4339_v42 = vpop.f32.mrb[34].mxu0 }
 0xa5a   : > { %v4380_v34 = vpop.f32.mrb[34].mxu1  ;;  %v4377_v31 = vadd.f32 %v4376_v19, %v4336_v48  ;;  %v4340_v40 = vpop.f32.mrb[35].mxu0 }
 0xa5b   : > { %v4381_v45 = vpop.f32.mrb[35].mxu1  ;;  %v4379_v22 = vadd.f32 %v4378_v28, %v4338_v58 }
 0xa5c   : > { %v4633_v20 = vadd.f32 %v4377_v31, %v3599_v16 }
 0xa5d   : > { %v4634_v23 = vadd.f32 %v4379_v22, %v3600_v43 }
 0xa5e   : > { %4641 = vst [vmem:[#allocation3 + $0x20] sm:$0xff] %v4633_v20 }
 0xa5f   : > { %4642 = vst [vmem:[#allocation3 + $0x28] sm:$0xff] %v4634_v23 }
 0xa97   : > { %v4417_v24 = vpop.f32.mrb[36].mxu0 }
 0xa98   : > { %v4458_v37 = vpop.f32.mrb[36].mxu1  ;;  %v4419_v57 = vpop.f32.mrb[37].mxu0 }
 0xa99   : > { %v4459_v27 = vadd.f32 %v4458_v37, %v4417_v24  ;;  %v4460_v54 = vpop.f32.mrb[37].mxu1  ;;  %v4421_v55 = vpop.f32.mrb[38].mxu0 }
 0xa9a   : > { %v4461_v53 = vadd.f32 %v4460_v54, %v4419_v57  ;;  %v4462_v47 = vpop.f32.mrb[38].mxu1  ;;  %v4422_v35 = vpop.f32.mrb[39].mxu0 }
 0xa9b   : > { %v4463_v44 = vpop.f32.mrb[39].mxu1 }
 0xad7   : > { %v4499_v56 = vpop.f32.mrb[40].mxu0 }
 0xad8   : > { %v4540_v61 = vpop.f32.mrb[40].mxu1  ;;  %v4500_v38 = vadd.f32 %v4499_v56, %v4459_v27  ;;  %v4501_v49 = vpop.f32.mrb[41].mxu0 }
 0xad9   : > { %v4542_v25 = vpop.f32.mrb[41].mxu1  ;;  %v4502_v62 = vadd.f32 %v4501_v49, %v4461_v53  ;;  %v4503_v36 = vpop.f32.mrb[42].mxu0 }
 0xada   : > { %v4544_v63 = vpop.f32.mrb[42].mxu1  ;;  %v4541_v1 = vadd.f32 %v4540_v61, %v4500_v38  ;;  %v4504_v52 = vpop.f32.mrb[43].mxu0 }
 0xadb   : > { %v4545_v32 = vpop.f32.mrb[43].mxu1  ;;  %v4543_v33 = vadd.f32 %v4542_v25, %v4502_v62 }
 0xb17   : > { %v4581_v2 = vpop.f32.mrb[44].mxu0 }
 0xb18   : > { %v4622_v3 = vpop.f32.mrb[44].mxu1  ;;  %v4582_v5 = vadd.f32 %v4581_v2, %v4541_v1  ;;  %v4583_v6 = vpop.f32.mrb[45].mxu0 }
 0xb19   : > { %v4624_v8 = vpop.f32.mrb[45].mxu1  ;;  %v4584_v60 = vadd.f32 %v4583_v6, %v4543_v33  ;;  %v4585_v51 = vpop.f32.mrb[46].mxu0 }
 0xb1a   : > { %v4626_v10 = vpop.f32.mrb[46].mxu1  ;;  %v4623_v11 = vadd.f32 %v4622_v3, %v4582_v5  ;;  %v4586_v21 = vpop.f32.mrb[47].mxu0 }
 0xb1b   : > { %v4627_v12 = vpop.f32.mrb[47].mxu1  ;;  %v4625_v29 = vadd.f32 %v4624_v8, %v4584_v60 }
 0xb1c   : > { %v4635_v30 = vadd.f32 %v4623_v11, %v3601_v9 }
 0xb1d   : > { %v4636_v13 = vadd.f32 %v4625_v29, %v3602_v59 }
 0xb1e   : > { %4643 = vst [vmem:[#allocation3 + $0x30] sm:$0xff] %v4635_v30 }
 0xb1f   : > { %4644 = vst [vmem:[#allocation3 + $0x38] sm:$0xff] %v4636_v13 }
 0xb20 PF: > { %p4645_p10 = pnand %p2417_p7, %p1741_p0 }
 0xb21   : > { %v4659_v46 = vlaneseq (!%p4645_p10)  ;;  %v6383_v50 = vmov (!%p4645_p10), 0.0   ;;  %v4657_v0 = vld [vmem:[#allocation16] sm:$0xff] (!%p4645_p10)  ;;  %v4707_v14 = vld [vmem:[#allocation17] sm:$0xff] (!%p4645_p10)  ;;  %v6384_v15 = vmov (!%p4645_p10), 1983009808   ;;  %v4650_v19 = vld [vmem:[#allocation3 + $0x8] sm:$0xff] (!%p4645_p10) }
 0xb22   : > { %4648 = sbr.rel (%p4645_p10) target bundleno = 3314 (0xcf2), region = 136  ;;  %4834 = vmatprep.mubr.f32.mxu1 (!%p4645_p10), %v6383_v50  ;;  %4976 = vmatprep.mubr.f32.mxu0 (!%p4645_p10), %v6383_v50  ;;  %v7845_v17 = vunpack.c.l.s4 (!%p4645_p10), %v6384_v15  ;;  %v4649_v48 = vld [vmem:[#allocation3] sm:$0xff] (!%p4645_p10)  ;;  %vm4766_vm4 = vcmask (!%p4645_p10), 64512   ;;  %v4652_v40 = vld [vmem:[#allocation3 + $0x18] sm:$0xff] (!%p4645_p10)  ;;  %v4651_v45 = vld [vmem:[#allocation3 + $0x10] sm:$0xff] (!%p4645_p10)  ;;  %s8015_s1 = sld [smem:[#allocation37_spill]] (!%p4645_p10) }
 0xb23   : > { %v7843_v39 = vshrl.u32 (!%p4645_p10), %v4659_v46, 7  ;;  %v4654_v37 = vld [vmem:[#allocation3 + $0x28] sm:$0xff] (!%p4645_p10)  ;;  %v4653_v55 = vld [vmem:[#allocation3 + $0x20] sm:$0xff] (!%p4645_p10)  ;;  %vm5387_vm5 = vcmask (!%p4645_p10), 9216  }
 0xb24   : > { %v5068_v21 = vunpack.c.0.s8 (!%p4645_p10), %v7845_v17  ;;  %v5054_v30 = vld [vmem:[#allocation19] sm:$0xff] (!%p4645_p10) }
 0xb25   : > { %v4665_v18 = vsub.s32 (!%p4645_p10), 1, %v7843_v39  ;;  %v4661_v4 = vsub.s32 (!%p4645_p10), 0, %v7843_v39  ;;  %v4673_v41 = vsub.s32 (!%p4645_p10), 3, %v7843_v39  ;;  %v4669_v7 = vsub.s32 (!%p4645_p10), 2, %v7843_v39  ;;  %v4655_v5 = vld [vmem:[#allocation3 + $0x30] sm:$0xff] (!%p4645_p10) }
 0xb26   : > { %v4681_v26 = vsub.s32 (!%p4645_p10), 5, %v7843_v39  ;;  %v4677_v28 = vsub.s32 (!%p4645_p10), 4, %v7843_v39  ;;  %v4689_v16 = vsub.s32 (!%p4645_p10), 7, %v7843_v39  ;;  %v4685_v58 = vsub.s32 (!%p4645_p10), 6, %v7843_v39  ;;  %v4656_v61 = vld [vmem:[#allocation3 + $0x38] sm:$0xff] (!%p4645_p10) }
 0xb27   : > { %v4666_v42 = vrot.slane (!%p4645_p10), %v4657_v0, %v4665_v18  ;;  %v4716_v34 = vrot.slane (!%p4645_p10), %v4707_v14, %v4665_v18  ;;  %v4662_v31 = vrot.slane (!%p4645_p10), %v4657_v0, %v4661_v4  ;;  %v4712_v43 = vrot.slane (!%p4645_p10), %v4707_v14, %v4661_v4 }
 0xb28   : > { %v4674_v22 = vrot.slane (!%p4645_p10), %v4657_v0, %v4673_v41  ;;  %v4724_v20 = vrot.slane (!%p4645_p10), %v4707_v14, %v4673_v41  ;;  %v4670_v23 = vrot.slane (!%p4645_p10), %v4657_v0, %v4669_v7  ;;  %v4720_v24 = vrot.slane (!%p4645_p10), %v4707_v14, %v4669_v7  ;;  %v4765_v6 = vld [vmem:[%s8015_s1] sm:$0x3] (!%p4645_p10)  ;;  %v5055_v41 = vld [vmem:[#allocation19 + $0x8] sm:$0xff] (!%p4645_p10) }
 0xb29   : > { %v4700_v27 = vmul.f32 %v4666_v42, %v4650_v19  ;;  %v4699_v57 = vmul.f32 %v4662_v31, %v4649_v48  ;;  %v4682_v54 = vrot.slane %v4657_v0, %v4681_v26  ;;  %v4732_v53 = vrot.slane %v4707_v14, %v4681_v26 }
 0xb2a   : > { %v4702_v47 = vmul.f32 %v4674_v22, %v4652_v40  ;;  %v4701_v35 = vmul.f32 %v4670_v23, %v4651_v45  ;;  %v4678_v44 = vrot.slane %v4657_v0, %v4677_v28  ;;  %v4728_v56 = vrot.slane %v4707_v14, %v4677_v28 }
 0xb2b   : > { %v4750_v38 = vadd.f32 %v4716_v34, %v4700_v27  ;;  %v4749_v49 = vadd.f32 %v4712_v43, %v4699_v57  ;;  %v4704_v25 = vmul.f32 %v4682_v54, %v4654_v37  ;;  %v4690_v62 = vrot.slane %v4657_v0, %v4689_v16 }
 0xb2c   : > { %v4752_v36 = vadd.f32 %v4724_v20, %v4702_v47  ;;  %v4751_v63 = vadd.f32 %v4720_v24, %v4701_v35  ;;  %v4703_v1 = vmul.f32 %v4678_v44, %v4653_v55  ;;  %v4740_v52 = vrot.slane %v4707_v14, %v4689_v16  ;;  %v5623_v20 = vld [vmem:[#allocation20] ss:$0 sm:$0xff] }
 0xb2d   : > { %v4758_v32 = vmax.f32 %v4750_v38, 0.0  ;;  %v4757_v33 = vmax.f32 %v4749_v49, 0.0  ;;  %v4754_v2 = vadd.f32 %v4732_v53, %v4704_v25  ;;  %v4706_v3 = vmul.f32 %v4690_v62, %v4656_v61 }
 0xb2e   : > { %v4760_v8 = vmax.f32 %v4752_v36, 0.0  ;;  %v4759_v9 = vmax.f32 %v4751_v63, 0.0  ;;  %v4753_v60 = vadd.f32 %v4728_v56, %v4703_v1  ;;  %v4686_v51 = vrot.slane %v4657_v0, %v4685_v58 }
 0xb2f   : > { %4770 = vmatprep.subr.mxu1 %v4758_v32  ;;  %v4762_v10 = vmax.f32 %v4754_v2, 0.0  ;;  %v4756_v11 = vadd.f32 %v4740_v52, %v4706_v3  ;;  %v4736_v59 = vrot.slane %v4707_v14, %v4685_v58  ;;  %v5071_v46 = vsub.s32 %v5068_v21, %v7843_v39 }
 0xb30   : > { %4771 = vmatpush1.msra.mxu1 %v4757_v33  ;;  %v4761_v12 = vmax.f32 %v4753_v60, 0.0  ;;  %v4705_v29 = vmul.f32 %v4686_v51, %v4655_v5  ;;  %v5065_v39 = vcombine.high %v5054_v30, %v5054_v30  ;;  %v5082_v48 = vcombine.high %v5055_v41, %v5055_v41 }
 0xb31   : > { %5619 = vmatmul.mubr.msk.f32.vlgmr.msra.gmra.mrb[0].mxu1 %vm4766_vm4, %v4765_v6  ;;  %4841 = vmatprep.subr.mxu1 %v4760_v8  ;;  %v4764_v13 = vmax.f32 %v4756_v11, 0.0  ;;  %v5072_v15 = vrot.slane %v5054_v30, %v5071_v46  ;;  %v5089_v7 = vrot.slane %v5055_v41, %v5071_v46 }
 0xb32   : > { %4842 = vmatpush1.msra.mxu1 %v4759_v9  ;;  %4905 = vmatprep.mubr.f32.mxu1 %v6383_v50  ;;  %v4755_v0 = vadd.f32 %v4736_v59, %v4705_v29  ;;  %v5079_v18 = vrot.slane %v5065_v39, %v5071_v46  ;;  %v5096_v16 = vrot.slane %v5082_v48, %v5071_v46 }
 0xb33   : > { %4912 = vmatprep.subr.mxu0 %v4762_v10  ;;  %4983 = vmatprep.subr.mxu1 %v4764_v13  ;;  %v5080_v17 = vcombine.high %v5072_v15, %v5072_v15  ;;  %v5097_v19 = vcombine.high %v5089_v7, %v5089_v7 }
 0xb34   : > { %4913 = vmatpush1.msra.mxu0 %v4761_v12  ;;  %v4763_v14 = vmax.f32 %v4755_v0, 0.0  ;;  %v5081_v4 = vcombine.high %v5079_v18, %v5079_v18  ;;  %v5098_v31 = vcombine.high %v5096_v16, %v5096_v16 }
 0xb35   : > { %5620 = vmatmul.mubr.msk.f32.vlgmr.msra.gmra.mrb[2].mxu1 %vm4766_vm4, %v4765_v6  ;;  %5621 = vmatmul.mubr.msk.f32.vlgmr.msra.gmra.mrb[0].mxu0 %vm4766_vm4, %v4765_v6 }
 0xb36   : > { %4984 = vmatpush1.msra.mxu1 %v4763_v14  ;;  %5047 = vmatprep.mubr.f32.mxu1 %v6383_v50 }
 0xb37   : > { %5107 = vmatprep.subr.mxu1 %v5080_v17  ;;  %5177 = vmatprep.subr.mxu0 %v5081_v4 }
 0xb39   : > { %5622 = vmatmul.mubr.msk.f32.vlgmr.msra.gmra.mrb[4].mxu1 %vm4766_vm4, %v4765_v6 }
 0xb3b   : > { %5178 = vmatpush1.xpose.msra.mxu0 %v5079_v18 }
 0xb3c   : > { %5247 = vmatprep.subr.mxu0 %v5097_v19 }
 0xb3d   : > { %5108 = vmatpush1.xpose.msra.mxu1 %v5072_v15 }
 0xc04   : > { %v4836_v26 = vpop.f32.mrb[0].mxu1 }
 0xc05   : > { %v4838_v28 = vpop.f32.mrb[1].mxu1 }
 0xc06   : > { %5171 = vmatprep.mubr.f32.mxu1 %v4838_v28 }
 0xc07   : > { %5172 = vmatmul.mubr.f32.vlgmr.msra.gmra.mrb[6].mxu1 %v4836_v26 }
 0xc08   : > { %v4907_v50 = vpop.f32.mrb[2].mxu1  ;;  %v4978_v58 = vpop.f32.mrb[0].mxu0 }
 0xc09   : > { %v4909_v42 = vpop.f32.mrb[3].mxu1  ;;  %v4980_v34 = vpop.f32.mrb[1].mxu0 }
 0xc0a   : > { %5241 = vmatprep.mubr.f32.mxu0 %v4909_v42 }
 0xc0b   : > { %5242 = vmatmul.mubr.f32.vlgmr.msra.gmra.mrb[2].mxu0 %v4907_v50 }
 0xc0c   : > { %5248 = vmatpush1.xpose.msra.mxu0 %v5089_v7  ;;  %5311 = vmatprep.mubr.f32.mxu0 %v4980_v34  ;;  %v5049_v43 = vpop.f32.mrb[4].mxu1 }
 0xc0d   : > { %5317 = vmatprep.subr.mxu0 %v5098_v31  ;;  %v5051_v40 = vpop.f32.mrb[5].mxu1 }
 0xc13   : > { %5312 = vmatmul.mubr.f32.vlgmr.msra.gmra.mrb[2].mxu0 %v4978_v58 }
 0xc14   : > { %5318 = vmatpush1.xpose.msra.mxu0 %v5096_v16  ;;  %5381 = vmatprep.mubr.f32.mxu0 %v5051_v40 }
 0xc1b   : > { %5382 = vmatmul.mubr.f32.vlgmr.msra.gmra.mrb[2].mxu0 %v5049_v43 }
 0xcda   : > { %v5173_v45 = vpop.f32.mrb[6].mxu1 }
 0xcdb   : > { %v5175_v22 = vpop.f32.mrb[7].mxu1  ;;  %v5174_v23 = vadd.f32 %v5623_v20, %v5173_v45 }
 0xcee   : > { %v5383_v24 = vpop.f32.mrb[2].mxu0 }
 0xcef   : > { %v5657_v37 = vadd.f32 %v5383_v24, %v5174_v23  ;;  %v5385_v27 = vpop.f32.mrb[3].mxu0 }
 0xcf1   : > { %5388 = vst.msk [vmem:[#allocation22] sm:$0x3] %vm5387_vm5, %v5657_v37 }
 0xcf2 PF: > { %p5755_p13 = scmp.eq.s32.totalorder %s6512_s19, 3  ;;  %s6385_s21 = smov [#allocation22]  }
 0xcf3   : > { %s5396_s28 = sshll.u32 %s6385_s21, 4  ;;  %s5397_s28 = int_to_ptr.vmem [resolvable:$true] %s5396_s28 }
 0xcf4   : > { %s6216_s24 = scalar_lea.vmem %s5397_s28, 32  ;;  %p6223_p5 = scmp.lt.s32.totalorder %s5397_s28, %s5397_s28 }
 0xcf5   : > { %p6217_p4 = scmp.ne.s32.totalorder %s5397_s28, %s6216_s24  ;;  %p6224_p2 = scmp.lt.s32.totalorder %s6216_s24, %s6216_s24 }
 0xcf7   : > { %p6218_p8 = pnand %p6217_p4, %p5755_p13  ;;  %p6225_p6 = por %p6224_p2, %p6223_p5 }
 0xcf9   : > { %p6219_p9 = pneg %p6218_p8 }
 0xcfb   : > { %p6226_p12 = pnand %p6225_p6, %p6219_p9 }
 0xcfd   : > { %6229 = shalt.err (!%p6226_p12)
}
 0xcfe   : > { %s8016_s5 = sld [smem:[#allocation45_spill]] }
 0xd04   : > { %s6230_s6 = scalar_lea.hbm %s8016_s5, 32 }
 0xd05   : > { %p6231_p0 = scmp.ne.s32.totalorder %s8016_s5, %s6230_s6  ;;  %p6236_p11 = scmp.lt.u32.totalorder %s6230_s6, %s8016_s5 }
 0xd07   : > { %p6232_p1 = pnand %p6231_p0, %p5755_p13 }
 0xd09   : > { %p6233_p7 = pneg %p6232_p1 }
 0xd0b   : > { %p6238_p3 = pnand %p6236_p11, %p6233_p7 }
 0xd0d   : > { %6241 = shalt.err (!%p6238_p3)
}
 0xd0e   : > { %5703 = dma.vmem_to_hbm [thread:$0]  (%p5755_p13), %s5397_s28, 32, %s8016_s5, [#allocation7]  }
 0xd0f   : > { %6315 = dma.done.wait (%p5755_p13), [#allocation7], 32  }
 0xd10   : > { %6317 = vsyncadd (%p5755_p13), [#allocation7], 4294967264 }
 0xd11 PF: > { %s34_s18 = sadd.s32 1, %s6360_s18   ;;  %s8017_s25 = sld [smem:[#allocation32_spill]] }
 0xd12   : > { %p31_p10 = scmp.ge.s32.totalorder %s34_s18, 6   ;;  %s8018_s26 = smov %s6328_s27 }
 0xd13   : > { %s8019_s27 = smov %s6794_s20  ;;  %s8020_s28 = smov %s6336_s29 }
 0xd14   : > { %s8021_s29 = smov %s6340_s30  ;;  %s8022_s30 = smov %s6742_s2 }
 0xd15   : > { %s8023_s14 = smov %s6352_s16  ;;  %s8024_s15 = smov %s6356_s17 }
 0xd16   : > { %s8025_s16 = smov %s8028_s23  ;;  %s8026_s17 = smov %s8032_s13 }
 0xd17   :  { %33 = sbr.rel (!%p31_p10) target bundleno = 25 (0x19), region = 180 }
 0xd1e   :  { %5409 = vsyncpa [#allocation6], 1 }
 0xd1f   :  { %5411 = vsyncpa [#allocation6 + $0x1], 1 }
 0xd20   :  { %5412 = vsyncpa [#allocation9], 1 }
 0xd21   :  { %5413 = vsyncpa [#allocation12], 1 }
 0xd22   :  { %5414 = vsyncpa [#allocation15], 1 }
 0xd23   :  { %5416 = vsyncpa [#allocation15 + $0x1], 1 }
 0xd24   :  { %5417 = vsyncpa [#allocation18], 1 }
 0xd25   :  { %5418 = vsyncpa [#allocation21], 1 }
 0xd26   :  { %5419 = vsyncpa [#allocation7], 1 }
 0xd27   :  { %5421 = vsyncpa [#allocation7 + $0x1], 1 }

</bundles_post_ra>
